<compile_context>
chip_gen: v6e
topology: v6e:2x2x1
jax: 0.10.0
libtpu: 0.0.40
codegen_flags: <defaults>
</compile_context>

<pallas_src>
import numpy as np
import jax
import jax.numpy as jnp
from jax.experimental import pallas as pl
from jax.experimental.pallas import tpu as pltpu

C = 128  # lane-dense padded channel width


# ----------------------------------------------------------------------------
# Fused Pallas kernel: conv1+relu -> pool -> conv2+relu -> pool -> conv3
# ----------------------------------------------------------------------------
def _intermediate_cnn_kernel(x_ref, w1_ref, b1_ref, w2_ref, b2_ref,
                             w3_ref, b3_ref, out_ref, pad_ref, pool_ref):
    # x_ref   : (16, 16, C)  NHWC input image, channels zero-padded to C
    # w*_ref  : (9, C, C)    3x3 conv weights, tap t = dy*3 + dx, zero-padded
    # b*_ref  : (1, C)       conv biases, zero-padded
    # out_ref : (16, C)      final 4x4 output, rows ordered h*4 + w
    # pad_ref : (18, 18, C)  VMEM scratch for zero-padded activations
    # pool_ref: (8, 8, C)    VMEM scratch for pooled activations

    def conv3x3(act, H, W, w_ref, b_ref, relu):
        # act: (H, W, C) value  ->  (H*W, C) value
        pad_ref[...] = jnp.zeros_like(pad_ref)
        pad_ref[1:H + 1, 1:W + 1, :] = act
        acc = jnp.zeros((H * W, C), jnp.float32)
        t = 0
        for dy in range(3):
            for dx in range(3):
                tap = pad_ref[dy:dy + H, dx:dx + W, :].reshape(H * W, C)
                acc = acc + jnp.dot(tap, w_ref[t],
                                    preferred_element_type=jnp.float32)
                t += 1
        y = acc + b_ref[...]
        if relu:
            y = jnp.maximum(y, 0.0)
        return y

    def maxpool2x2(act_flat, H, W):
        # act_flat: (H*W, C), rows ordered h*W + w  ->  (H//2, W//2, C) value
        Ho, Wo = H // 2, W // 2
        a2 = act_flat.reshape(Ho, 2 * W, C)               # tile-aligned reshape
        a = jnp.maximum(a2[:, :W, :], a2[:, W:, :])       # H-direction max
        for w in range(Wo):                               # W-direction max
            pool_ref[0:Ho, w:w + 1, :] = jnp.maximum(
                a[:, 2 * w:2 * w + 1, :], a[:, 2 * w + 1:2 * w + 2, :])
        return pool_ref[0:Ho, 0:Wo, :]

    # conv1 (3->16) + relu on 16x16, then 2x2 pool -> 8x8
    y1 = conv3x3(x_ref[...], 16, 16, w1_ref, b1_ref, relu=True)   # (256, C)
    p1 = maxpool2x2(y1, 16, 16)                                   # (8, 8, C)
    # conv2 (16->32) + relu on 8x8, then 2x2 pool -> 4x4
    y2 = conv3x3(p1, 8, 8, w2_ref, b2_ref, relu=True)             # (64, C)
    p2 = maxpool2x2(y2, 8, 8)                                     # (4, 4, C)
    # conv3 (32->3) on 4x4, no relu: done per output row (M=4 matmuls) so no
    # sub-(8,128) reshape is needed; rows stored lane-dense into out_ref.
    pad_ref[...] = jnp.zeros_like(pad_ref)
    pad_ref[1:5, 1:5, :] = p2
    for h in range(4):
        acc = jnp.zeros((4, C), jnp.float32)
        t = 0
        for dy in range(3):
            for dx in range(3):
                tap = pad_ref[h + dy, dx:dx + 4, :]               # (4, C)
                acc = acc + jnp.dot(tap, w3_ref[t],
                                    preferred_element_type=jnp.float32)
                t += 1
        out_ref[4 * h:4 * h + 4, :] = acc + b3_ref[...]


# ----------------------------------------------------------------------------
# Wrapper: NCHW in / NCHW out, channel padding to 128 lanes
# ----------------------------------------------------------------------------
def _pad_weight(w, cin, cout):
    # (3,3,cin,cout) HWIO -> (9, C, C) with tap ordering t = dy*3 + dx
    wp = jnp.zeros((3, 3, C, C), jnp.float32).at[:, :, :cin, :cout].set(w)
    return wp.reshape(9, C, C)


def _pad_bias(b, cout):
    return jnp.zeros((1, C), jnp.float32).at[0, :cout].set(b)


@jax.jit
def intermediate_cnn_forward(params, x_nchw):
    N = x_nchw.shape[0]
    x = jnp.transpose(x_nchw, (0, 2, 3, 1)).astype(jnp.float32)   # (N,16,16,3)
    x = jnp.pad(x, ((0, 0), (0, 0), (0, 0), (0, C - x.shape[-1])))

    w1 = _pad_weight(params["w1"], 3, 16)
    b1 = _pad_bias(params["b1"], 16)
    w2 = _pad_weight(params["w2"], 16, 32)
    b2 = _pad_bias(params["b2"], 32)
    w3 = _pad_weight(params["w3"], 32, 3)
    b3 = _pad_bias(params["b3"], 3)

    flops = 2 * 9 * C * C * (16 * 16 + 8 * 8 + 4 * 4) * N
    bytes_accessed = 4 * (x.size + w1.size + w2.size + w3.size
                          + b1.size + b2.size + b3.size + N * 16 * C)

    out = pl.pallas_call(
        _intermediate_cnn_kernel,
        out_shape=jax.ShapeDtypeStruct((N, 16, C), jnp.float32),
        grid_spec=pltpu.PrefetchScalarGridSpec(
            num_scalar_prefetch=0,
            grid=(N,),
            in_specs=[
                pl.BlockSpec((None, 16, 16, C), lambda n: (n, 0, 0, 0)),
                pl.BlockSpec((9, C, C), lambda n: (0, 0, 0)),
                pl.BlockSpec((1, C), lambda n: (0, 0)),
                pl.BlockSpec((9, C, C), lambda n: (0, 0, 0)),
                pl.BlockSpec((1, C), lambda n: (0, 0)),
                pl.BlockSpec((9, C, C), lambda n: (0, 0, 0)),
                pl.BlockSpec((1, C), lambda n: (0, 0)),
            ],
            out_specs=pl.BlockSpec((None, 16, C), lambda n: (n, 0, 0)),
            scratch_shapes=[
                pltpu.VMEM((18, 18, C), jnp.float32),   # padded activations
                pltpu.VMEM((8, 8, C), jnp.float32),     # pooled activations
            ],
        ),
        compiler_params=pltpu.CompilerParams(
            dimension_semantics=("parallel",)),
        cost_estimate=pl.CostEstimate(flops=int(flops), transcendentals=0,
                                      bytes_accessed=int(bytes_accessed)),
    )(x, w1, b1, w2, b2, w3, b3)

    out = out[:, :, :3].reshape(N, 4, 4, 3)            # drop channel padding
    return jnp.transpose(out, (0, 3, 1, 2))            # NHWC -> NCHW (N,3,4,4)


# ----------------------------------------------------------------------------
# Parameters (deterministic, PyTorch-like init) and pure-JAX reference
# ----------------------------------------------------------------------------
def init_params(key):
    def conv_init(k, cin, cout):
        kw, kb = jax.random.split(k)
        bound = 1.0 / np.sqrt(cin * 9)
        w = jax.random.uniform(kw, (3, 3, cin, cout), jnp.float32, -bound, bound)
        b = jax.random.uniform(kb, (cout,), jnp.float32, -bound, bound)
        return w, b

    k1, k2, k3 = jax.random.split(key, 3)
    p = {}
    p["w1"], p["b1"] = conv_init(k1, 3, 16)
    p["w2"], p["b2"] = conv_init(k2, 16, 32)
    p["w3"], p["b3"] = conv_init(k3, 32, 3)
    return p


@jax.jit
def reference_forward(params, x_nchw):
    x = jnp.transpose(x_nchw, (0, 2, 3, 1))

    def conv(x, w, b):
        y = jax.lax.conv_general_dilated(
            x, w, window_strides=(1, 1), padding="SAME",
            dimension_numbers=("NHWC", "HWIO", "NHWC"),
            precision=jax.lax.Precision.HIGHEST)
        return y + b

    def pool(x):
        return jax.lax.reduce_window(x, -jnp.inf, jax.lax.max,
                                     (1, 2, 2, 1), (1, 2, 2, 1), "VALID")

    x = jnp.maximum(conv(x, params["w1"], params["b1"]), 0.0)
    x = pool(x)
    x = jnp.maximum(conv(x, params["w2"], params["b2"]), 0.0)
    x = pool(x)
    x = conv(x, params["w3"], params["b3"])
    return jnp.transpose(x, (0, 3, 1, 2))


if __name__ == "__main__":
    key = jax.random.PRNGKey(0)
    k_params, k_x = jax.random.split(key)

    params = init_params(k_params)
    x = jax.random.normal(k_x, (2, 3, 16, 16), jnp.float32)   # NCHW like PyTorch

    out = jax.block_until_ready(intermediate_cnn_forward(params, x))
    assert out.shape == (2, 3, 4, 4), out.shape

    ref = jax.block_until_ready(reference_forward(params, x))
    np.testing.assert_allclose(np.asarray(out), np.asarray(ref),
                               rtol=1e-2, atol=1e-2)

    print("KERNEL_OK")
</pallas_src>

<mosaic_0001>
module attributes {stable_mosaic.version = 11 : i64} {
  func.func @_intermediate_cnn_kernel(%arg0: i32, %arg1: memref<1x16x16x128xf32, #tpu.memory_space<vmem>>, %arg2: memref<9x128x128xf32, #tpu.memory_space<vmem>>, %arg3: memref<1x128xf32, #tpu.memory_space<vmem>>, %arg4: memref<9x128x128xf32, #tpu.memory_space<vmem>>, %arg5: memref<1x128xf32, #tpu.memory_space<vmem>>, %arg6: memref<9x128x128xf32, #tpu.memory_space<vmem>>, %arg7: memref<1x128xf32, #tpu.memory_space<vmem>>, %arg8: memref<1x16x128xf32, #tpu.memory_space<vmem>>, %arg9: memref<18x18x128xf32, #tpu.memory_space<vmem>>, %arg10: memref<8x8x128xf32, #tpu.memory_space<vmem>>) attributes {dimension_semantics = [#tpu.dimension_semantics<parallel>], iteration_bounds = array<i64: 2>, scalar_prefetch = 0 : i64, scratch_operands = 2 : i64, tpu.core_type = #tpu.core_type<tc>, window_params = [{transform_indices = @transform_0, window_bounds = array<i64: 1, 16, 16, 128>}, {pipeline_mode = #tpu.pipeline_mode<synchronous>, transform_indices = @transform_1, window_bounds = array<i64: 9, 128, 128>}, {pipeline_mode = #tpu.pipeline_mode<synchronous>, transform_indices = @transform_2, window_bounds = array<i64: 1, 128>}, {pipeline_mode = #tpu.pipeline_mode<synchronous>, transform_indices = @transform_3, window_bounds = array<i64: 9, 128, 128>}, {pipeline_mode = #tpu.pipeline_mode<synchronous>, transform_indices = @transform_4, window_bounds = array<i64: 1, 128>}, {pipeline_mode = #tpu.pipeline_mode<synchronous>, transform_indices = @transform_5, window_bounds = array<i64: 9, 128, 128>}, {pipeline_mode = #tpu.pipeline_mode<synchronous>, transform_indices = @transform_6, window_bounds = array<i64: 1, 128>}, {transform_indices = @transform_7, window_bounds = array<i64: 1, 16, 128>}]} {
    %c0 = arith.constant 0 : index
    %c0_0 = arith.constant 0 : index
    %c0_1 = arith.constant 0 : index
    %c0_2 = arith.constant 0 : index
    %0 = vector.load %arg1[%c0, %c0_0, %c0_1, %c0_2] : memref<1x16x16x128xf32, #tpu.memory_space<vmem>>, vector<1x16x16x128xf32>
    %1 = vector.shape_cast %0 : vector<1x16x16x128xf32> to vector<16x16x128xf32>
    %cst = arith.constant 0.000000e+00 : f32
    %2 = vector.broadcast %cst : f32 to vector<18x18x128xf32>
    %c0_3 = arith.constant 0 : index
    %c0_4 = arith.constant 0 : index
    %c0_5 = arith.constant 0 : index
    %3 = vector.load %arg9[%c0_3, %c0_4, %c0_5] : memref<18x18x128xf32, #tpu.memory_space<vmem>>, vector<18x18x128xf32>
    tpu.vector_store %arg9[%c0_3, %c0_4, %c0_5], %2 {strides = array<i32>} : memref<18x18x128xf32, #tpu.memory_space<vmem>>, vector<18x18x128xf32>,
    %c1 = arith.constant 1 : index
    %c1_6 = arith.constant 1 : index
    %c0_7 = arith.constant 0 : index
    %4 = vector.load %arg9[%c1, %c1_6, %c0_7] : memref<18x18x128xf32, #tpu.memory_space<vmem>>, vector<16x16x128xf32>
    tpu.vector_store %arg9[%c1, %c1_6, %c0_7], %1 {strides = array<i32>} : memref<18x18x128xf32, #tpu.memory_space<vmem>>, vector<16x16x128xf32>,
    %cst_8 = arith.constant 0.000000e+00 : f32
    %5 = vector.broadcast %cst_8 : f32 to vector<256x128xf32>
    %c0_9 = arith.constant 0 : index
    %c0_10 = arith.constant 0 : index
    %c0_11 = arith.constant 0 : index
    %6 = vector.load %arg9[%c0_9, %c0_10, %c0_11] : memref<18x18x128xf32, #tpu.memory_space<vmem>>, vector<16x16x128xf32>
    %7 = vector.shape_cast %6 : vector<16x16x128xf32> to vector<256x128xf32>
    %c0_12 = arith.constant 0 : index
    %c0_13 = arith.constant 0 : index
    %c0_14 = arith.constant 0 : index
    %8 = vector.load %arg2[%c0_12, %c0_13, %c0_14] : memref<9x128x128xf32, #tpu.memory_space<vmem>>, vector<1x128x128xf32>
    %9 = vector.shape_cast %8 : vector<1x128x128xf32> to vector<128x128xf32>
    %cst_15 = arith.constant dense<0.000000e+00> : vector<256x128xf32>
    %10 = tpu.matmul %7, %9, %cst_15 {dimension_numbers = #tpu.dot_dimension_numbers<[1], [0], [0], [1], [0, 0, 1, 1], [], []>} : vector<256x128xf32>, vector<128x128xf32>, vector<256x128xf32> -> vector<256x128xf32>
    %11 = arith.addf %5, %10 : vector<256x128xf32>
    %c0_16 = arith.constant 0 : index
    %c1_17 = arith.constant 1 : index
    %c0_18 = arith.constant 0 : index
    %12 = vector.load %arg9[%c0_16, %c1_17, %c0_18] : memref<18x18x128xf32, #tpu.memory_space<vmem>>, vector<16x16x128xf32>
    %13 = vector.shape_cast %12 : vector<16x16x128xf32> to vector<256x128xf32>
    %c1_19 = arith.constant 1 : index
    %c0_20 = arith.constant 0 : index
    %c0_21 = arith.constant 0 : index
    %14 = vector.load %arg2[%c1_19, %c0_20, %c0_21] : memref<9x128x128xf32, #tpu.memory_space<vmem>>, vector<1x128x128xf32>
    %15 = vector.shape_cast %14 : vector<1x128x128xf32> to vector<128x128xf32>
    %cst_22 = arith.constant dense<0.000000e+00> : vector<256x128xf32>
    %16 = tpu.matmul %13, %15, %cst_22 {dimension_numbers = #tpu.dot_dimension_numbers<[1], [0], [0], [1], [0, 0, 1, 1], [], []>} : vector<256x128xf32>, vector<128x128xf32>, vector<256x128xf32> -> vector<256x128xf32>
    %17 = arith.addf %11, %16 : vector<256x128xf32>
    %c0_23 = arith.constant 0 : index
    %c2 = arith.constant 2 : index
    %c0_24 = arith.constant 0 : index
    %18 = vector.load %arg9[%c0_23, %c2, %c0_24] : memref<18x18x128xf32, #tpu.memory_space<vmem>>, vector<16x16x128xf32>
    %19 = vector.shape_cast %18 : vector<16x16x128xf32> to vector<256x128xf32>
    %c2_25 = arith.constant 2 : index
    %c0_26 = arith.constant 0 : index
    %c0_27 = arith.constant 0 : index
    %20 = vector.load %arg2[%c2_25, %c0_26, %c0_27] : memref<9x128x128xf32, #tpu.memory_space<vmem>>, vector<1x128x128xf32>
    %21 = vector.shape_cast %20 : vector<1x128x128xf32> to vector<128x128xf32>
    %cst_28 = arith.constant dense<0.000000e+00> : vector<256x128xf32>
    %22 = tpu.matmul %19, %21, %cst_28 {dimension_numbers = #tpu.dot_dimension_numbers<[1], [0], [0], [1], [0, 0, 1, 1], [], []>} : vector<256x128xf32>, vector<128x128xf32>, vector<256x128xf32> -> vector<256x128xf32>
    %23 = arith.addf %17, %22 : vector<256x128xf32>
    %c1_29 = arith.constant 1 : index
    %c0_30 = arith.constant 0 : index
    %c0_31 = arith.constant 0 : index
    %24 = vector.load %arg9[%c1_29, %c0_30, %c0_31] : memref<18x18x128xf32, #tpu.memory_space<vmem>>, vector<16x16x128xf32>
    %25 = vector.shape_cast %24 : vector<16x16x128xf32> to vector<256x128xf32>
    %c3 = arith.constant 3 : index
    %c0_32 = arith.constant 0 : index
    %c0_33 = arith.constant 0 : index
    %26 = vector.load %arg2[%c3, %c0_32, %c0_33] : memref<9x128x128xf32, #tpu.memory_space<vmem>>, vector<1x128x128xf32>
    %27 = vector.shape_cast %26 : vector<1x128x128xf32> to vector<128x128xf32>
    %cst_34 = arith.constant dense<0.000000e+00> : vector<256x128xf32>
    %28 = tpu.matmul %25, %27, %cst_34 {dimension_numbers = #tpu.dot_dimension_numbers<[1], [0], [0], [1], [0, 0, 1, 1], [], []>} : vector<256x128xf32>, vector<128x128xf32>, vector<256x128xf32> -> vector<256x128xf32>
    %29 = arith.addf %23, %28 : vector<256x128xf32>
    %c1_35 = arith.constant 1 : index
    %c1_36 = arith.constant 1 : index
    %c0_37 = arith.constant 0 : index
    %30 = vector.load %arg9[%c1_35, %c1_36, %c0_37] : memref<18x18x128xf32, #tpu.memory_space<vmem>>, vector<16x16x128xf32>
    %31 = vector.shape_cast %30 : vector<16x16x128xf32> to vector<256x128xf32>
    %c4 = arith.constant 4 : index
    %c0_38 = arith.constant 0 : index
    %c0_39 = arith.constant 0 : index
    %32 = vector.load %arg2[%c4, %c0_38, %c0_39] : memref<9x128x128xf32, #tpu.memory_space<vmem>>, vector<1x128x128xf32>
    %33 = vector.shape_cast %32 : vector<1x128x128xf32> to vector<128x128xf32>
    %cst_40 = arith.constant dense<0.000000e+00> : vector<256x128xf32>
    %34 = tpu.matmul %31, %33, %cst_40 {dimension_numbers = #tpu.dot_dimension_numbers<[1], [0], [0], [1], [0, 0, 1, 1], [], []>} : vector<256x128xf32>, vector<128x128xf32>, vector<256x128xf32> -> vector<256x128xf32>
    %35 = arith.addf %29, %34 : vector<256x128xf32>
    %c1_41 = arith.constant 1 : index
    %c2_42 = arith.constant 2 : index
    %c0_43 = arith.constant 0 : index
    %36 = vector.load %arg9[%c1_41, %c2_42, %c0_43] : memref<18x18x128xf32, #tpu.memory_space<vmem>>, vector<16x16x128xf32>
    %37 = vector.shape_cast %36 : vector<16x16x128xf32> to vector<256x128xf32>
    %c5 = arith.constant 5 : index
    %c0_44 = arith.constant 0 : index
    %c0_45 = arith.constant 0 : index
    %38 = vector.load %arg2[%c5, %c0_44, %c0_45] : memref<9x128x128xf32, #tpu.memory_space<vmem>>, vector<1x128x128xf32>
    %39 = vector.shape_cast %38 : vector<1x128x128xf32> to vector<128x128xf32>
    %cst_46 = arith.constant dense<0.000000e+00> : vector<256x128xf32>
    %40 = tpu.matmul %37, %39, %cst_46 {dimension_numbers = #tpu.dot_dimension_numbers<[1], [0], [0], [1], [0, 0, 1, 1], [], []>} : vector<256x128xf32>, vector<128x128xf32>, vector<256x128xf32> -> vector<256x128xf32>
    %41 = arith.addf %35, %40 : vector<256x128xf32>
    %c2_47 = arith.constant 2 : index
    %c0_48 = arith.constant 0 : index
    %c0_49 = arith.constant 0 : index
    %42 = vector.load %arg9[%c2_47, %c0_48, %c0_49] : memref<18x18x128xf32, #tpu.memory_space<vmem>>, vector<16x16x128xf32>
    %43 = vector.shape_cast %42 : vector<16x16x128xf32> to vector<256x128xf32>
    %c6 = arith.constant 6 : index
    %c0_50 = arith.constant 0 : index
    %c0_51 = arith.constant 0 : index
    %44 = vector.load %arg2[%c6, %c0_50, %c0_51] : memref<9x128x128xf32, #tpu.memory_space<vmem>>, vector<1x128x128xf32>
    %45 = vector.shape_cast %44 : vector<1x128x128xf32> to vector<128x128xf32>
    %cst_52 = arith.constant dense<0.000000e+00> : vector<256x128xf32>
    %46 = tpu.matmul %43, %45, %cst_52 {dimension_numbers = #tpu.dot_dimension_numbers<[1], [0], [0], [1], [0, 0, 1, 1], [], []>} : vector<256x128xf32>, vector<128x128xf32>, vector<256x128xf32> -> vector<256x128xf32>
    %47 = arith.addf %41, %46 : vector<256x128xf32>
    %c2_53 = arith.constant 2 : index
    %c1_54 = arith.constant 1 : index
    %c0_55 = arith.constant 0 : index
    %48 = vector.load %arg9[%c2_53, %c1_54, %c0_55] : memref<18x18x128xf32, #tpu.memory_space<vmem>>, vector<16x16x128xf32>
    %49 = vector.shape_cast %48 : vector<16x16x128xf32> to vector<256x128xf32>
    %c7 = arith.constant 7 : index
    %c0_56 = arith.constant 0 : index
    %c0_57 = arith.constant 0 : index
    %50 = vector.load %arg2[%c7, %c0_56, %c0_57] : memref<9x128x128xf32, #tpu.memory_space<vmem>>, vector<1x128x128xf32>
    %51 = vector.shape_cast %50 : vector<1x128x128xf32> to vector<128x128xf32>
    %cst_58 = arith.constant dense<0.000000e+00> : vector<256x128xf32>
    %52 = tpu.matmul %49, %51, %cst_58 {dimension_numbers = #tpu.dot_dimension_numbers<[1], [0], [0], [1], [0, 0, 1, 1], [], []>} : vector<256x128xf32>, vector<128x128xf32>, vector<256x128xf32> -> vector<256x128xf32>
    %53 = arith.addf %47, %52 : vector<256x128xf32>
    %c2_59 = arith.constant 2 : index
    %c2_60 = arith.constant 2 : index
    %c0_61 = arith.constant 0 : index
    %54 = vector.load %arg9[%c2_59, %c2_60, %c0_61] : memref<18x18x128xf32, #tpu.memory_space<vmem>>, vector<16x16x128xf32>
    %55 = vector.shape_cast %54 : vector<16x16x128xf32> to vector<256x128xf32>
    %c8 = arith.constant 8 : index
    %c0_62 = arith.constant 0 : index
    %c0_63 = arith.constant 0 : index
    %56 = vector.load %arg2[%c8, %c0_62, %c0_63] : memref<9x128x128xf32, #tpu.memory_space<vmem>>, vector<1x128x128xf32>
    %57 = vector.shape_cast %56 : vector<1x128x128xf32> to vector<128x128xf32>
    %cst_64 = arith.constant dense<0.000000e+00> : vector<256x128xf32>
    %58 = tpu.matmul %55, %57, %cst_64 {dimension_numbers = #tpu.dot_dimension_numbers<[1], [0], [0], [1], [0, 0, 1, 1], [], []>} : vector<256x128xf32>, vector<128x128xf32>, vector<256x128xf32> -> vector<256x128xf32>
    %59 = arith.addf %53, %58 : vector<256x128xf32>
    %c0_65 = arith.constant 0 : index
    %c0_66 = arith.constant 0 : index
    %60 = vector.load %arg3[%c0_65, %c0_66] : memref<1x128xf32, #tpu.memory_space<vmem>>, vector<1x128xf32>
    %61 = vector.broadcast %60 : vector<1x128xf32> to vector<256x128xf32>
    %62 = arith.addf %59, %61 : vector<256x128xf32>
    %cst_67 = arith.constant 0.000000e+00 : f32
    %63 = vector.broadcast %cst_67 : f32 to vector<256x128xf32>
    %64 = arith.maximumf %62, %63 : vector<256x128xf32>
    %65 = vector.shape_cast %64 : vector<256x128xf32> to vector<8x32x128xf32>
    %66 = vector.extract_strided_slice %65 {offsets = [0, 0, 0], sizes = [8, 16, 128], strides = [1, 1, 1]} : vector<8x32x128xf32> to vector<8x16x128xf32>
    %67 = vector.extract_strided_slice %65 {offsets = [0, 16, 0], sizes = [8, 16, 128], strides = [1, 1, 1]} : vector<8x32x128xf32> to vector<8x16x128xf32>
    %68 = arith.maximumf %66, %67 : vector<8x16x128xf32>
    %69 = vector.extract_strided_slice %68 {offsets = [0, 0, 0], sizes = [8, 1, 128], strides = [1, 1, 1]} : vector<8x16x128xf32> to vector<8x1x128xf32>
    %70 = vector.extract_strided_slice %68 {offsets = [0, 1, 0], sizes = [8, 1, 128], strides = [1, 1, 1]} : vector<8x16x128xf32> to vector<8x1x128xf32>
    %71 = arith.maximumf %69, %70 : vector<8x1x128xf32>
    %c0_68 = arith.constant 0 : index
    %c0_69 = arith.constant 0 : index
    %c0_70 = arith.constant 0 : index
    %72 = vector.load %arg10[%c0_68, %c0_69, %c0_70] : memref<8x8x128xf32, #tpu.memory_space<vmem>>, vector<8x1x128xf32>
    tpu.vector_store %arg10[%c0_68, %c0_69, %c0_70], %71 {strides = array<i32>} : memref<8x8x128xf32, #tpu.memory_space<vmem>>, vector<8x1x128xf32>,
    %73 = vector.extract_strided_slice %68 {offsets = [0, 2, 0], sizes = [8, 1, 128], strides = [1, 1, 1]} : vector<8x16x128xf32> to vector<8x1x128xf32>
    %74 = vector.extract_strided_slice %68 {offsets = [0, 3, 0], sizes = [8, 1, 128], strides = [1, 1, 1]} : vector<8x16x128xf32> to vector<8x1x128xf32>
    %75 = arith.maximumf %73, %74 : vector<8x1x128xf32>
    %c0_71 = arith.constant 0 : index
    %c1_72 = arith.constant 1 : index
    %c0_73 = arith.constant 0 : index
    %76 = vector.load %arg10[%c0_71, %c1_72, %c0_73] : memref<8x8x128xf32, #tpu.memory_space<vmem>>, vector<8x1x128xf32>
    tpu.vector_store %arg10[%c0_71, %c1_72, %c0_73], %75 {strides = array<i32>} : memref<8x8x128xf32, #tpu.memory_space<vmem>>, vector<8x1x128xf32>,
    %77 = vector.extract_strided_slice %68 {offsets = [0, 4, 0], sizes = [8, 1, 128], strides = [1, 1, 1]} : vector<8x16x128xf32> to vector<8x1x128xf32>
    %78 = vector.extract_strided_slice %68 {offsets = [0, 5, 0], sizes = [8, 1, 128], strides = [1, 1, 1]} : vector<8x16x128xf32> to vector<8x1x128xf32>
    %79 = arith.maximumf %77, %78 : vector<8x1x128xf32>
    %c0_74 = arith.constant 0 : index
    %c2_75 = arith.constant 2 : index
    %c0_76 = arith.constant 0 : index
    %80 = vector.load %arg10[%c0_74, %c2_75, %c0_76] : memref<8x8x128xf32, #tpu.memory_space<vmem>>, vector<8x1x128xf32>
    tpu.vector_store %arg10[%c0_74, %c2_75, %c0_76], %79 {strides = array<i32>} : memref<8x8x128xf32, #tpu.memory_space<vmem>>, vector<8x1x128xf32>,
    %81 = vector.extract_strided_slice %68 {offsets = [0, 6, 0], sizes = [8, 1, 128], strides = [1, 1, 1]} : vector<8x16x128xf32> to vector<8x1x128xf32>
    %82 = vector.extract_strided_slice %68 {offsets = [0, 7, 0], sizes = [8, 1, 128], strides = [1, 1, 1]} : vector<8x16x128xf32> to vector<8x1x128xf32>
    %83 = arith.maximumf %81, %82 : vector<8x1x128xf32>
    %c0_77 = arith.constant 0 : index
    %c3_78 = arith.constant 3 : index
    %c0_79 = arith.constant 0 : index
    %84 = vector.load %arg10[%c0_77, %c3_78, %c0_79] : memref<8x8x128xf32, #tpu.memory_space<vmem>>, vector<8x1x128xf32>
    tpu.vector_store %arg10[%c0_77, %c3_78, %c0_79], %83 {strides = array<i32>} : memref<8x8x128xf32, #tpu.memory_space<vmem>>, vector<8x1x128xf32>,
    %85 = vector.extract_strided_slice %68 {offsets = [0, 8, 0], sizes = [8, 1, 128], strides = [1, 1, 1]} : vector<8x16x128xf32> to vector<8x1x128xf32>
    %86 = vector.extract_strided_slice %68 {offsets = [0, 9, 0], sizes = [8, 1, 128], strides = [1, 1, 1]} : vector<8x16x128xf32> to vector<8x1x128xf32>
    %87 = arith.maximumf %85, %86 : vector<8x1x128xf32>
    %c0_80 = arith.constant 0 : index
    %c4_81 = arith.constant 4 : index
    %c0_82 = arith.constant 0 : index
    %88 = vector.load %arg10[%c0_80, %c4_81, %c0_82] : memref<8x8x128xf32, #tpu.memory_space<vmem>>, vector<8x1x128xf32>
    tpu.vector_store %arg10[%c0_80, %c4_81, %c0_82], %87 {strides = array<i32>} : memref<8x8x128xf32, #tpu.memory_space<vmem>>, vector<8x1x128xf32>,
    %89 = vector.extract_strided_slice %68 {offsets = [0, 10, 0], sizes = [8, 1, 128], strides = [1, 1, 1]} : vector<8x16x128xf32> to vector<8x1x128xf32>
    %90 = vector.extract_strided_slice %68 {offsets = [0, 11, 0], sizes = [8, 1, 128], strides = [1, 1, 1]} : vector<8x16x128xf32> to vector<8x1x128xf32>
    %91 = arith.maximumf %89, %90 : vector<8x1x128xf32>
    %c0_83 = arith.constant 0 : index
    %c5_84 = arith.constant 5 : index
    %c0_85 = arith.constant 0 : index
    %92 = vector.load %arg10[%c0_83, %c5_84, %c0_85] : memref<8x8x128xf32, #tpu.memory_space<vmem>>, vector<8x1x128xf32>
    tpu.vector_store %arg10[%c0_83, %c5_84, %c0_85], %91 {strides = array<i32>} : memref<8x8x128xf32, #tpu.memory_space<vmem>>, vector<8x1x128xf32>,
    %93 = vector.extract_strided_slice %68 {offsets = [0, 12, 0], sizes = [8, 1, 128], strides = [1, 1, 1]} : vector<8x16x128xf32> to vector<8x1x128xf32>
    %94 = vector.extract_strided_slice %68 {offsets = [0, 13, 0], sizes = [8, 1, 128], strides = [1, 1, 1]} : vector<8x16x128xf32> to vector<8x1x128xf32>
    %95 = arith.maximumf %93, %94 : vector<8x1x128xf32>
    %c0_86 = arith.constant 0 : index
    %c6_87 = arith.constant 6 : index
    %c0_88 = arith.constant 0 : index
    %96 = vector.load %arg10[%c0_86, %c6_87, %c0_88] : memref<8x8x128xf32, #tpu.memory_space<vmem>>, vector<8x1x128xf32>
    tpu.vector_store %arg10[%c0_86, %c6_87, %c0_88], %95 {strides = array<i32>} : memref<8x8x128xf32, #tpu.memory_space<vmem>>, vector<8x1x128xf32>,
    %97 = vector.extract_strided_slice %68 {offsets = [0, 14, 0], sizes = [8, 1, 128], strides = [1, 1, 1]} : vector<8x16x128xf32> to vector<8x1x128xf32>
    %98 = vector.extract_strided_slice %68 {offsets = [0, 15, 0], sizes = [8, 1, 128], strides = [1, 1, 1]} : vector<8x16x128xf32> to vector<8x1x128xf32>
    %99 = arith.maximumf %97, %98 : vector<8x1x128xf32>
    %c0_89 = arith.constant 0 : index
    %c7_90 = arith.constant 7 : index
    %c0_91 = arith.constant 0 : index
    %100 = vector.load %arg10[%c0_89, %c7_90, %c0_91] : memref<8x8x128xf32, #tpu.memory_space<vmem>>, vector<8x1x128xf32>
    tpu.vector_store %arg10[%c0_89, %c7_90, %c0_91], %99 {strides = array<i32>} : memref<8x8x128xf32, #tpu.memory_space<vmem>>, vector<8x1x128xf32>,
    %c0_92 = arith.constant 0 : index
    %c0_93 = arith.constant 0 : index
    %c0_94 = arith.constant 0 : index
    %101 = vector.load %arg10[%c0_92, %c0_93, %c0_94] : memref<8x8x128xf32, #tpu.memory_space<vmem>>, vector<8x8x128xf32>
    %cst_95 = arith.constant 0.000000e+00 : f32
    %102 = vector.broadcast %cst_95 : f32 to vector<18x18x128xf32>
    %c0_96 = arith.constant 0 : index
    %c0_97 = arith.constant 0 : index
    %c0_98 = arith.constant 0 : index
    %103 = vector.load %arg9[%c0_96, %c0_97, %c0_98] : memref<18x18x128xf32, #tpu.memory_space<vmem>>, vector<18x18x128xf32>
    tpu.vector_store %arg9[%c0_96, %c0_97, %c0_98], %102 {strides = array<i32>} : memref<18x18x128xf32, #tpu.memory_space<vmem>>, vector<18x18x128xf32>,
    %c1_99 = arith.constant 1 : index
    %c1_100 = arith.constant 1 : index
    %c0_101 = arith.constant 0 : index
    %104 = vector.load %arg9[%c1_99, %c1_100, %c0_101] : memref<18x18x128xf32, #tpu.memory_space<vmem>>, vector<8x8x128xf32>
    tpu.vector_store %arg9[%c1_99, %c1_100, %c0_101], %101 {strides = array<i32>} : memref<18x18x128xf32, #tpu.memory_space<vmem>>, vector<8x8x128xf32>,
    %cst_102 = arith.constant 0.000000e+00 : f32
    %105 = vector.broadcast %cst_102 : f32 to vector<64x128xf32>
    %c0_103 = arith.constant 0 : index
    %c0_104 = arith.constant 0 : index
    %c0_105 = arith.constant 0 : index
    %106 = vector.load %arg9[%c0_103, %c0_104, %c0_105] : memref<18x18x128xf32, #tpu.memory_space<vmem>>, vector<8x8x128xf32>
    %107 = vector.shape_cast %106 : vector<8x8x128xf32> to vector<64x128xf32>
    %c0_106 = arith.constant 0 : index
    %c0_107 = arith.constant 0 : index
    %c0_108 = arith.constant 0 : index
    %108 = vector.load %arg4[%c0_106, %c0_107, %c0_108] : memref<9x128x128xf32, #tpu.memory_space<vmem>>, vector<1x128x128xf32>
    %109 = vector.shape_cast %108 : vector<1x128x128xf32> to vector<128x128xf32>
    %cst_109 = arith.constant dense<0.000000e+00> : vector<64x128xf32>
    %110 = tpu.matmul %107, %109, %cst_109 {dimension_numbers = #tpu.dot_dimension_numbers<[1], [0], [0], [1], [0, 0, 1, 1], [], []>} : vector<64x128xf32>, vector<128x128xf32>, vector<64x128xf32> -> vector<64x128xf32>
    %111 = arith.addf %105, %110 : vector<64x128xf32>
    %c0_110 = arith.constant 0 : index
    %c1_111 = arith.constant 1 : index
    %c0_112 = arith.constant 0 : index
    %112 = vector.load %arg9[%c0_110, %c1_111, %c0_112] : memref<18x18x128xf32, #tpu.memory_space<vmem>>, vector<8x8x128xf32>
    %113 = vector.shape_cast %112 : vector<8x8x128xf32> to vector<64x128xf32>
    %c1_113 = arith.constant 1 : index
    %c0_114 = arith.constant 0 : index
    %c0_115 = arith.constant 0 : index
    %114 = vector.load %arg4[%c1_113, %c0_114, %c0_115] : memref<9x128x128xf32, #tpu.memory_space<vmem>>, vector<1x128x128xf32>
    %115 = vector.shape_cast %114 : vector<1x128x128xf32> to vector<128x128xf32>
    %cst_116 = arith.constant dense<0.000000e+00> : vector<64x128xf32>
    %116 = tpu.matmul %113, %115, %cst_116 {dimension_numbers = #tpu.dot_dimension_numbers<[1], [0], [0], [1], [0, 0, 1, 1], [], []>} : vector<64x128xf32>, vector<128x128xf32>, vector<64x128xf32> -> vector<64x128xf32>
    %117 = arith.addf %111, %116 : vector<64x128xf32>
    %c0_117 = arith.constant 0 : index
    %c2_118 = arith.constant 2 : index
    %c0_119 = arith.constant 0 : index
    %118 = vector.load %arg9[%c0_117, %c2_118, %c0_119] : memref<18x18x128xf32, #tpu.memory_space<vmem>>, vector<8x8x128xf32>
    %119 = vector.shape_cast %118 : vector<8x8x128xf32> to vector<64x128xf32>
    %c2_120 = arith.constant 2 : index
    %c0_121 = arith.constant 0 : index
    %c0_122 = arith.constant 0 : index
    %120 = vector.load %arg4[%c2_120, %c0_121, %c0_122] : memref<9x128x128xf32, #tpu.memory_space<vmem>>, vector<1x128x128xf32>
    %121 = vector.shape_cast %120 : vector<1x128x128xf32> to vector<128x128xf32>
    %cst_123 = arith.constant dense<0.000000e+00> : vector<64x128xf32>
    %122 = tpu.matmul %119, %121, %cst_123 {dimension_numbers = #tpu.dot_dimension_numbers<[1], [0], [0], [1], [0, 0, 1, 1], [], []>} : vector<64x128xf32>, vector<128x128xf32>, vector<64x128xf32> -> vector<64x128xf32>
    %123 = arith.addf %117, %122 : vector<64x128xf32>
    %c1_124 = arith.constant 1 : index
    %c0_125 = arith.constant 0 : index
    %c0_126 = arith.constant 0 : index
    %124 = vector.load %arg9[%c1_124, %c0_125, %c0_126] : memref<18x18x128xf32, #tpu.memory_space<vmem>>, vector<8x8x128xf32>
    %125 = vector.shape_cast %124 : vector<8x8x128xf32> to vector<64x128xf32>
    %c3_127 = arith.constant 3 : index
    %c0_128 = arith.constant 0 : index
    %c0_129 = arith.constant 0 : index
    %126 = vector.load %arg4[%c3_127, %c0_128, %c0_129] : memref<9x128x128xf32, #tpu.memory_space<vmem>>, vector<1x128x128xf32>
    %127 = vector.shape_cast %126 : vector<1x128x128xf32> to vector<128x128xf32>
    %cst_130 = arith.constant dense<0.000000e+00> : vector<64x128xf32>
    %128 = tpu.matmul %125, %127, %cst_130 {dimension_numbers = #tpu.dot_dimension_numbers<[1], [0], [0], [1], [0, 0, 1, 1], [], []>} : vector<64x128xf32>, vector<128x128xf32>, vector<64x128xf32> -> vector<64x128xf32>
    %129 = arith.addf %123, %128 : vector<64x128xf32>
    %c1_131 = arith.constant 1 : index
    %c1_132 = arith.constant 1 : index
    %c0_133 = arith.constant 0 : index
    %130 = vector.load %arg9[%c1_131, %c1_132, %c0_133] : memref<18x18x128xf32, #tpu.memory_space<vmem>>, vector<8x8x128xf32>
    %131 = vector.shape_cast %130 : vector<8x8x128xf32> to vector<64x128xf32>
    %c4_134 = arith.constant 4 : index
    %c0_135 = arith.constant 0 : index
    %c0_136 = arith.constant 0 : index
    %132 = vector.load %arg4[%c4_134, %c0_135, %c0_136] : memref<9x128x128xf32, #tpu.memory_space<vmem>>, vector<1x128x128xf32>
    %133 = vector.shape_cast %132 : vector<1x128x128xf32> to vector<128x128xf32>
    %cst_137 = arith.constant dense<0.000000e+00> : vector<64x128xf32>
    %134 = tpu.matmul %131, %133, %cst_137 {dimension_numbers = #tpu.dot_dimension_numbers<[1], [0], [0], [1], [0, 0, 1, 1], [], []>} : vector<64x128xf32>, vector<128x128xf32>, vector<64x128xf32> -> vector<64x128xf32>
    %135 = arith.addf %129, %134 : vector<64x128xf32>
    %c1_138 = arith.constant 1 : index
    %c2_139 = arith.constant 2 : index
    %c0_140 = arith.constant 0 : index
    %136 = vector.load %arg9[%c1_138, %c2_139, %c0_140] : memref<18x18x128xf32, #tpu.memory_space<vmem>>, vector<8x8x128xf32>
    %137 = vector.shape_cast %136 : vector<8x8x128xf32> to vector<64x128xf32>
    %c5_141 = arith.constant 5 : index
    %c0_142 = arith.constant 0 : index
    %c0_143 = arith.constant 0 : index
    %138 = vector.load %arg4[%c5_141, %c0_142, %c0_143] : memref<9x128x128xf32, #tpu.memory_space<vmem>>, vector<1x128x128xf32>
    %139 = vector.shape_cast %138 : vector<1x128x128xf32> to vector<128x128xf32>
    %cst_144 = arith.constant dense<0.000000e+00> : vector<64x128xf32>
    %140 = tpu.matmul %137, %139, %cst_144 {dimension_numbers = #tpu.dot_dimension_numbers<[1], [0], [0], [1], [0, 0, 1, 1], [], []>} : vector<64x128xf32>, vector<128x128xf32>, vector<64x128xf32> -> vector<64x128xf32>
    %141 = arith.addf %135, %140 : vector<64x128xf32>
    %c2_145 = arith.constant 2 : index
    %c0_146 = arith.constant 0 : index
    %c0_147 = arith.constant 0 : index
    %142 = vector.load %arg9[%c2_145, %c0_146, %c0_147] : memref<18x18x128xf32, #tpu.memory_space<vmem>>, vector<8x8x128xf32>
    %143 = vector.shape_cast %142 : vector<8x8x128xf32> to vector<64x128xf32>
    %c6_148 = arith.constant 6 : index
    %c0_149 = arith.constant 0 : index
    %c0_150 = arith.constant 0 : index
    %144 = vector.load %arg4[%c6_148, %c0_149, %c0_150] : memref<9x128x128xf32, #tpu.memory_space<vmem>>, vector<1x128x128xf32>
    %145 = vector.shape_cast %144 : vector<1x128x128xf32> to vector<128x128xf32>
    %cst_151 = arith.constant dense<0.000000e+00> : vector<64x128xf32>
    %146 = tpu.matmul %143, %145, %cst_151 {dimension_numbers = #tpu.dot_dimension_numbers<[1], [0], [0], [1], [0, 0, 1, 1], [], []>} : vector<64x128xf32>, vector<128x128xf32>, vector<64x128xf32> -> vector<64x128xf32>
    %147 = arith.addf %141, %146 : vector<64x128xf32>
    %c2_152 = arith.constant 2 : index
    %c1_153 = arith.constant 1 : index
    %c0_154 = arith.constant 0 : index
    %148 = vector.load %arg9[%c2_152, %c1_153, %c0_154] : memref<18x18x128xf32, #tpu.memory_space<vmem>>, vector<8x8x128xf32>
    %149 = vector.shape_cast %148 : vector<8x8x128xf32> to vector<64x128xf32>
    %c7_155 = arith.constant 7 : index
    %c0_156 = arith.constant 0 : index
    %c0_157 = arith.constant 0 : index
    %150 = vector.load %arg4[%c7_155, %c0_156, %c0_157] : memref<9x128x128xf32, #tpu.memory_space<vmem>>, vector<1x128x128xf32>
    %151 = vector.shape_cast %150 : vector<1x128x128xf32> to vector<128x128xf32>
    %cst_158 = arith.constant dense<0.000000e+00> : vector<64x128xf32>
    %152 = tpu.matmul %149, %151, %cst_158 {dimension_numbers = #tpu.dot_dimension_numbers<[1], [0], [0], [1], [0, 0, 1, 1], [], []>} : vector<64x128xf32>, vector<128x128xf32>, vector<64x128xf32> -> vector<64x128xf32>
    %153 = arith.addf %147, %152 : vector<64x128xf32>
    %c2_159 = arith.constant 2 : index
    %c2_160 = arith.constant 2 : index
    %c0_161 = arith.constant 0 : index
    %154 = vector.load %arg9[%c2_159, %c2_160, %c0_161] : memref<18x18x128xf32, #tpu.memory_space<vmem>>, vector<8x8x128xf32>
    %155 = vector.shape_cast %154 : vector<8x8x128xf32> to vector<64x128xf32>
    %c8_162 = arith.constant 8 : index
    %c0_163 = arith.constant 0 : index
    %c0_164 = arith.constant 0 : index
    %156 = vector.load %arg4[%c8_162, %c0_163, %c0_164] : memref<9x128x128xf32, #tpu.memory_space<vmem>>, vector<1x128x128xf32>
    %157 = vector.shape_cast %156 : vector<1x128x128xf32> to vector<128x128xf32>
    %cst_165 = arith.constant dense<0.000000e+00> : vector<64x128xf32>
    %158 = tpu.matmul %155, %157, %cst_165 {dimension_numbers = #tpu.dot_dimension_numbers<[1], [0], [0], [1], [0, 0, 1, 1], [], []>} : vector<64x128xf32>, vector<128x128xf32>, vector<64x128xf32> -> vector<64x128xf32>
    %159 = arith.addf %153, %158 : vector<64x128xf32>
    %c0_166 = arith.constant 0 : index
    %c0_167 = arith.constant 0 : index
    %160 = vector.load %arg5[%c0_166, %c0_167] : memref<1x128xf32, #tpu.memory_space<vmem>>, vector<1x128xf32>
    %161 = vector.broadcast %160 : vector<1x128xf32> to vector<64x128xf32>
    %162 = arith.addf %159, %161 : vector<64x128xf32>
    %cst_168 = arith.constant 0.000000e+00 : f32
    %163 = vector.broadcast %cst_168 : f32 to vector<64x128xf32>
    %164 = arith.maximumf %162, %163 : vector<64x128xf32>
    %165 = vector.shape_cast %164 : vector<64x128xf32> to vector<4x16x128xf32>
    %166 = vector.extract_strided_slice %165 {offsets = [0, 0, 0], sizes = [4, 8, 128], strides = [1, 1, 1]} : vector<4x16x128xf32> to vector<4x8x128xf32>
    %167 = vector.extract_strided_slice %165 {offsets = [0, 8, 0], sizes = [4, 8, 128], strides = [1, 1, 1]} : vector<4x16x128xf32> to vector<4x8x128xf32>
    %168 = arith.maximumf %166, %167 : vector<4x8x128xf32>
    %169 = vector.extract_strided_slice %168 {offsets = [0, 0, 0], sizes = [4, 1, 128], strides = [1, 1, 1]} : vector<4x8x128xf32> to vector<4x1x128xf32>
    %170 = vector.extract_strided_slice %168 {offsets = [0, 1, 0], sizes = [4, 1, 128], strides = [1, 1, 1]} : vector<4x8x128xf32> to vector<4x1x128xf32>
    %171 = arith.maximumf %169, %170 : vector<4x1x128xf32>
    %c0_169 = arith.constant 0 : index
    %c0_170 = arith.constant 0 : index
    %c0_171 = arith.constant 0 : index
    %172 = vector.load %arg10[%c0_169, %c0_170, %c0_171] : memref<8x8x128xf32, #tpu.memory_space<vmem>>, vector<4x1x128xf32>
    tpu.vector_store %arg10[%c0_169, %c0_170, %c0_171], %171 {strides = array<i32>} : memref<8x8x128xf32, #tpu.memory_space<vmem>>, vector<4x1x128xf32>,
    %173 = vector.extract_strided_slice %168 {offsets = [0, 2, 0], sizes = [4, 1, 128], strides = [1, 1, 1]} : vector<4x8x128xf32> to vector<4x1x128xf32>
    %174 = vector.extract_strided_slice %168 {offsets = [0, 3, 0], sizes = [4, 1, 128], strides = [1, 1, 1]} : vector<4x8x128xf32> to vector<4x1x128xf32>
    %175 = arith.maximumf %173, %174 : vector<4x1x128xf32>
    %c0_172 = arith.constant 0 : index
    %c1_173 = arith.constant 1 : index
    %c0_174 = arith.constant 0 : index
    %176 = vector.load %arg10[%c0_172, %c1_173, %c0_174] : memref<8x8x128xf32, #tpu.memory_space<vmem>>, vector<4x1x128xf32>
    tpu.vector_store %arg10[%c0_172, %c1_173, %c0_174], %175 {strides = array<i32>} : memref<8x8x128xf32, #tpu.memory_space<vmem>>, vector<4x1x128xf32>,
    %177 = vector.extract_strided_slice %168 {offsets = [0, 4, 0], sizes = [4, 1, 128], strides = [1, 1, 1]} : vector<4x8x128xf32> to vector<4x1x128xf32>
    %178 = vector.extract_strided_slice %168 {offsets = [0, 5, 0], sizes = [4, 1, 128], strides = [1, 1, 1]} : vector<4x8x128xf32> to vector<4x1x128xf32>
    %179 = arith.maximumf %177, %178 : vector<4x1x128xf32>
    %c0_175 = arith.constant 0 : index
    %c2_176 = arith.constant 2 : index
    %c0_177 = arith.constant 0 : index
    %180 = vector.load %arg10[%c0_175, %c2_176, %c0_177] : memref<8x8x128xf32, #tpu.memory_space<vmem>>, vector<4x1x128xf32>
    tpu.vector_store %arg10[%c0_175, %c2_176, %c0_177], %179 {strides = array<i32>} : memref<8x8x128xf32, #tpu.memory_space<vmem>>, vector<4x1x128xf32>,
    %181 = vector.extract_strided_slice %168 {offsets = [0, 6, 0], sizes = [4, 1, 128], strides = [1, 1, 1]} : vector<4x8x128xf32> to vector<4x1x128xf32>
    %182 = vector.extract_strided_slice %168 {offsets = [0, 7, 0], sizes = [4, 1, 128], strides = [1, 1, 1]} : vector<4x8x128xf32> to vector<4x1x128xf32>
    %183 = arith.maximumf %181, %182 : vector<4x1x128xf32>
    %c0_178 = arith.constant 0 : index
    %c3_179 = arith.constant 3 : index
    %c0_180 = arith.constant 0 : index
    %184 = vector.load %arg10[%c0_178, %c3_179, %c0_180] : memref<8x8x128xf32, #tpu.memory_space<vmem>>, vector<4x1x128xf32>
    tpu.vector_store %arg10[%c0_178, %c3_179, %c0_180], %183 {strides = array<i32>} : memref<8x8x128xf32, #tpu.memory_space<vmem>>, vector<4x1x128xf32>,
    %c0_181 = arith.constant 0 : index
    %c0_182 = arith.constant 0 : index
    %c0_183 = arith.constant 0 : index
    %185 = vector.load %arg10[%c0_181, %c0_182, %c0_183] : memref<8x8x128xf32, #tpu.memory_space<vmem>>, vector<4x4x128xf32>
    %cst_184 = arith.constant 0.000000e+00 : f32
    %186 = vector.broadcast %cst_184 : f32 to vector<18x18x128xf32>
    %c0_185 = arith.constant 0 : index
    %c0_186 = arith.constant 0 : index
    %c0_187 = arith.constant 0 : index
    %187 = vector.load %arg9[%c0_185, %c0_186, %c0_187] : memref<18x18x128xf32, #tpu.memory_space<vmem>>, vector<18x18x128xf32>
    tpu.vector_store %arg9[%c0_185, %c0_186, %c0_187], %186 {strides = array<i32>} : memref<18x18x128xf32, #tpu.memory_space<vmem>>, vector<18x18x128xf32>,
    %c1_188 = arith.constant 1 : index
    %c1_189 = arith.constant 1 : index
    %c0_190 = arith.constant 0 : index
    %188 = vector.load %arg9[%c1_188, %c1_189, %c0_190] : memref<18x18x128xf32, #tpu.memory_space<vmem>>, vector<4x4x128xf32>
    tpu.vector_store %arg9[%c1_188, %c1_189, %c0_190], %185 {strides = array<i32>} : memref<18x18x128xf32, #tpu.memory_space<vmem>>, vector<4x4x128xf32>,
    %cst_191 = arith.constant 0.000000e+00 : f32
    %189 = vector.broadcast %cst_191 : f32 to vector<4x128xf32>
    %c0_192 = arith.constant 0 : index
    %c0_193 = arith.constant 0 : index
    %c0_194 = arith.constant 0 : index
    %190 = vector.load %arg9[%c0_192, %c0_193, %c0_194] : memref<18x18x128xf32, #tpu.memory_space<vmem>>, vector<1x4x128xf32>
    %191 = vector.shape_cast %190 : vector<1x4x128xf32> to vector<4x128xf32>
    %c0_195 = arith.constant 0 : index
    %c0_196 = arith.constant 0 : index
    %c0_197 = arith.constant 0 : index
    %192 = vector.load %arg6[%c0_195, %c0_196, %c0_197] : memref<9x128x128xf32, #tpu.memory_space<vmem>>, vector<1x128x128xf32>
    %193 = vector.shape_cast %192 : vector<1x128x128xf32> to vector<128x128xf32>
    %cst_198 = arith.constant dense<0.000000e+00> : vector<4x128xf32>
    %194 = tpu.matmul %191, %193, %cst_198 {dimension_numbers = #tpu.dot_dimension_numbers<[1], [0], [0], [1], [0, 0, 1, 1], [], []>} : vector<4x128xf32>, vector<128x128xf32>, vector<4x128xf32> -> vector<4x128xf32>
    %195 = arith.addf %189, %194 : vector<4x128xf32>
    %c0_199 = arith.constant 0 : index
    %c1_200 = arith.constant 1 : index
    %c0_201 = arith.constant 0 : index
    %196 = vector.load %arg9[%c0_199, %c1_200, %c0_201] : memref<18x18x128xf32, #tpu.memory_space<vmem>>, vector<1x4x128xf32>
    %197 = vector.shape_cast %196 : vector<1x4x128xf32> to vector<4x128xf32>
    %c1_202 = arith.constant 1 : index
    %c0_203 = arith.constant 0 : index
    %c0_204 = arith.constant 0 : index
    %198 = vector.load %arg6[%c1_202, %c0_203, %c0_204] : memref<9x128x128xf32, #tpu.memory_space<vmem>>, vector<1x128x128xf32>
    %199 = vector.shape_cast %198 : vector<1x128x128xf32> to vector<128x128xf32>
    %cst_205 = arith.constant dense<0.000000e+00> : vector<4x128xf32>
    %200 = tpu.matmul %197, %199, %cst_205 {dimension_numbers = #tpu.dot_dimension_numbers<[1], [0], [0], [1], [0, 0, 1, 1], [], []>} : vector<4x128xf32>, vector<128x128xf32>, vector<4x128xf32> -> vector<4x128xf32>
    %201 = arith.addf %195, %200 : vector<4x128xf32>
    %c0_206 = arith.constant 0 : index
    %c2_207 = arith.constant 2 : index
    %c0_208 = arith.constant 0 : index
    %202 = vector.load %arg9[%c0_206, %c2_207, %c0_208] : memref<18x18x128xf32, #tpu.memory_space<vmem>>, vector<1x4x128xf32>
    %203 = vector.shape_cast %202 : vector<1x4x128xf32> to vector<4x128xf32>
    %c2_209 = arith.constant 2 : index
    %c0_210 = arith.constant 0 : index
    %c0_211 = arith.constant 0 : index
    %204 = vector.load %arg6[%c2_209, %c0_210, %c0_211] : memref<9x128x128xf32, #tpu.memory_space<vmem>>, vector<1x128x128xf32>
    %205 = vector.shape_cast %204 : vector<1x128x128xf32> to vector<128x128xf32>
    %cst_212 = arith.constant dense<0.000000e+00> : vector<4x128xf32>
    %206 = tpu.matmul %203, %205, %cst_212 {dimension_numbers = #tpu.dot_dimension_numbers<[1], [0], [0], [1], [0, 0, 1, 1], [], []>} : vector<4x128xf32>, vector<128x128xf32>, vector<4x128xf32> -> vector<4x128xf32>
    %207 = arith.addf %201, %206 : vector<4x128xf32>
    %c1_213 = arith.constant 1 : index
    %c0_214 = arith.constant 0 : index
    %c0_215 = arith.constant 0 : index
    %208 = vector.load %arg9[%c1_213, %c0_214, %c0_215] : memref<18x18x128xf32, #tpu.memory_space<vmem>>, vector<1x4x128xf32>
    %209 = vector.shape_cast %208 : vector<1x4x128xf32> to vector<4x128xf32>
    %c3_216 = arith.constant 3 : index
    %c0_217 = arith.constant 0 : index
    %c0_218 = arith.constant 0 : index
    %210 = vector.load %arg6[%c3_216, %c0_217, %c0_218] : memref<9x128x128xf32, #tpu.memory_space<vmem>>, vector<1x128x128xf32>
    %211 = vector.shape_cast %210 : vector<1x128x128xf32> to vector<128x128xf32>
    %cst_219 = arith.constant dense<0.000000e+00> : vector<4x128xf32>
    %212 = tpu.matmul %209, %211, %cst_219 {dimension_numbers = #tpu.dot_dimension_numbers<[1], [0], [0], [1], [0, 0, 1, 1], [], []>} : vector<4x128xf32>, vector<128x128xf32>, vector<4x128xf32> -> vector<4x128xf32>
    %213 = arith.addf %207, %212 : vector<4x128xf32>
    %c1_220 = arith.constant 1 : index
    %c1_221 = arith.constant 1 : index
    %c0_222 = arith.constant 0 : index
    %214 = vector.load %arg9[%c1_220, %c1_221, %c0_222] : memref<18x18x128xf32, #tpu.memory_space<vmem>>, vector<1x4x128xf32>
    %215 = vector.shape_cast %214 : vector<1x4x128xf32> to vector<4x128xf32>
    %c4_223 = arith.constant 4 : index
    %c0_224 = arith.constant 0 : index
    %c0_225 = arith.constant 0 : index
    %216 = vector.load %arg6[%c4_223, %c0_224, %c0_225] : memref<9x128x128xf32, #tpu.memory_space<vmem>>, vector<1x128x128xf32>
    %217 = vector.shape_cast %216 : vector<1x128x128xf32> to vector<128x128xf32>
    %cst_226 = arith.constant dense<0.000000e+00> : vector<4x128xf32>
    %218 = tpu.matmul %215, %217, %cst_226 {dimension_numbers = #tpu.dot_dimension_numbers<[1], [0], [0], [1], [0, 0, 1, 1], [], []>} : vector<4x128xf32>, vector<128x128xf32>, vector<4x128xf32> -> vector<4x128xf32>
    %219 = arith.addf %213, %218 : vector<4x128xf32>
    %c1_227 = arith.constant 1 : index
    %c2_228 = arith.constant 2 : index
    %c0_229 = arith.constant 0 : index
    %220 = vector.load %arg9[%c1_227, %c2_228, %c0_229] : memref<18x18x128xf32, #tpu.memory_space<vmem>>, vector<1x4x128xf32>
    %221 = vector.shape_cast %220 : vector<1x4x128xf32> to vector<4x128xf32>
    %c5_230 = arith.constant 5 : index
    %c0_231 = arith.constant 0 : index
    %c0_232 = arith.constant 0 : index
    %222 = vector.load %arg6[%c5_230, %c0_231, %c0_232] : memref<9x128x128xf32, #tpu.memory_space<vmem>>, vector<1x128x128xf32>
    %223 = vector.shape_cast %222 : vector<1x128x128xf32> to vector<128x128xf32>
    %cst_233 = arith.constant dense<0.000000e+00> : vector<4x128xf32>
    %224 = tpu.matmul %221, %223, %cst_233 {dimension_numbers = #tpu.dot_dimension_numbers<[1], [0], [0], [1], [0, 0, 1, 1], [], []>} : vector<4x128xf32>, vector<128x128xf32>, vector<4x128xf32> -> vector<4x128xf32>
    %225 = arith.addf %219, %224 : vector<4x128xf32>
    %c2_234 = arith.constant 2 : index
    %c0_235 = arith.constant 0 : index
    %c0_236 = arith.constant 0 : index
    %226 = vector.load %arg9[%c2_234, %c0_235, %c0_236] : memref<18x18x128xf32, #tpu.memory_space<vmem>>, vector<1x4x128xf32>
    %227 = vector.shape_cast %226 : vector<1x4x128xf32> to vector<4x128xf32>
    %c6_237 = arith.constant 6 : index
    %c0_238 = arith.constant 0 : index
    %c0_239 = arith.constant 0 : index
    %228 = vector.load %arg6[%c6_237, %c0_238, %c0_239] : memref<9x128x128xf32, #tpu.memory_space<vmem>>, vector<1x128x128xf32>
    %229 = vector.shape_cast %228 : vector<1x128x128xf32> to vector<128x128xf32>
    %cst_240 = arith.constant dense<0.000000e+00> : vector<4x128xf32>
    %230 = tpu.matmul %227, %229, %cst_240 {dimension_numbers = #tpu.dot_dimension_numbers<[1], [0], [0], [1], [0, 0, 1, 1], [], []>} : vector<4x128xf32>, vector<128x128xf32>, vector<4x128xf32> -> vector<4x128xf32>
    %231 = arith.addf %225, %230 : vector<4x128xf32>
    %c2_241 = arith.constant 2 : index
    %c1_242 = arith.constant 1 : index
    %c0_243 = arith.constant 0 : index
    %232 = vector.load %arg9[%c2_241, %c1_242, %c0_243] : memref<18x18x128xf32, #tpu.memory_space<vmem>>, vector<1x4x128xf32>
    %233 = vector.shape_cast %232 : vector<1x4x128xf32> to vector<4x128xf32>
    %c7_244 = arith.constant 7 : index
    %c0_245 = arith.constant 0 : index
    %c0_246 = arith.constant 0 : index
    %234 = vector.load %arg6[%c7_244, %c0_245, %c0_246] : memref<9x128x128xf32, #tpu.memory_space<vmem>>, vector<1x128x128xf32>
    %235 = vector.shape_cast %234 : vector<1x128x128xf32> to vector<128x128xf32>
    %cst_247 = arith.constant dense<0.000000e+00> : vector<4x128xf32>
    %236 = tpu.matmul %233, %235, %cst_247 {dimension_numbers = #tpu.dot_dimension_numbers<[1], [0], [0], [1], [0, 0, 1, 1], [], []>} : vector<4x128xf32>, vector<128x128xf32>, vector<4x128xf32> -> vector<4x128xf32>
    %237 = arith.addf %231, %236 : vector<4x128xf32>
    %c2_248 = arith.constant 2 : index
    %c2_249 = arith.constant 2 : index
    %c0_250 = arith.constant 0 : index
    %238 = vector.load %arg9[%c2_248, %c2_249, %c0_250] : memref<18x18x128xf32, #tpu.memory_space<vmem>>, vector<1x4x128xf32>
    %239 = vector.shape_cast %238 : vector<1x4x128xf32> to vector<4x128xf32>
    %c8_251 = arith.constant 8 : index
    %c0_252 = arith.constant 0 : index
    %c0_253 = arith.constant 0 : index
    %240 = vector.load %arg6[%c8_251, %c0_252, %c0_253] : memref<9x128x128xf32, #tpu.memory_space<vmem>>, vector<1x128x128xf32>
    %241 = vector.shape_cast %240 : vector<1x128x128xf32> to vector<128x128xf32>
    %cst_254 = arith.constant dense<0.000000e+00> : vector<4x128xf32>
    %242 = tpu.matmul %239, %241, %cst_254 {dimension_numbers = #tpu.dot_dimension_numbers<[1], [0], [0], [1], [0, 0, 1, 1], [], []>} : vector<4x128xf32>, vector<128x128xf32>, vector<4x128xf32> -> vector<4x128xf32>
    %243 = arith.addf %237, %242 : vector<4x128xf32>
    %c0_255 = arith.constant 0 : index
    %c0_256 = arith.constant 0 : index
    %244 = vector.load %arg7[%c0_255, %c0_256] : memref<1x128xf32, #tpu.memory_space<vmem>>, vector<1x128xf32>
    %245 = vector.broadcast %244 : vector<1x128xf32> to vector<4x128xf32>
    %246 = arith.addf %243, %245 : vector<4x128xf32>
    %c0_257 = arith.constant 0 : index
    %c0_258 = arith.constant 0 : index
    %c0_259 = arith.constant 0 : index
    %247 = vector.load %arg8[%c0_257, %c0_258, %c0_259] : memref<1x16x128xf32, #tpu.memory_space<vmem>>, vector<1x4x128xf32>
    %248 = vector.shape_cast %247 : vector<1x4x128xf32> to vector<4x128xf32>
    %249 = vector.shape_cast %246 : vector<4x128xf32> to vector<1x4x128xf32>
    tpu.vector_store %arg8[%c0_257, %c0_258, %c0_259], %249 {strides = array<i32>} : memref<1x16x128xf32, #tpu.memory_space<vmem>>, vector<1x4x128xf32>,
    %cst_260 = arith.constant 0.000000e+00 : f32
    %250 = vector.broadcast %cst_260 : f32 to vector<4x128xf32>
    %c1_261 = arith.constant 1 : index
    %c0_262 = arith.constant 0 : index
    %c0_263 = arith.constant 0 : index
    %251 = vector.load %arg9[%c1_261, %c0_262, %c0_263] : memref<18x18x128xf32, #tpu.memory_space<vmem>>, vector<1x4x128xf32>
    %252 = vector.shape_cast %251 : vector<1x4x128xf32> to vector<4x128xf32>
    %c0_264 = arith.constant 0 : index
    %c0_265 = arith.constant 0 : index
    %c0_266 = arith.constant 0 : index
    %253 = vector.load %arg6[%c0_264, %c0_265, %c0_266] : memref<9x128x128xf32, #tpu.memory_space<vmem>>, vector<1x128x128xf32>
    %254 = vector.shape_cast %253 : vector<1x128x128xf32> to vector<128x128xf32>
    %cst_267 = arith.constant dense<0.000000e+00> : vector<4x128xf32>
    %255 = tpu.matmul %252, %254, %cst_267 {dimension_numbers = #tpu.dot_dimension_numbers<[1], [0], [0], [1], [0, 0, 1, 1], [], []>} : vector<4x128xf32>, vector<128x128xf32>, vector<4x128xf32> -> vector<4x128xf32>
    %256 = arith.addf %250, %255 : vector<4x128xf32>
    %c1_268 = arith.constant 1 : index
    %c1_269 = arith.constant 1 : index
    %c0_270 = arith.constant 0 : index
    %257 = vector.load %arg9[%c1_268, %c1_269, %c0_270] : memref<18x18x128xf32, #tpu.memory_space<vmem>>, vector<1x4x128xf32>
    %258 = vector.shape_cast %257 : vector<1x4x128xf32> to vector<4x128xf32>
    %c1_271 = arith.constant 1 : index
    %c0_272 = arith.constant 0 : index
    %c0_273 = arith.constant 0 : index
    %259 = vector.load %arg6[%c1_271, %c0_272, %c0_273] : memref<9x128x128xf32, #tpu.memory_space<vmem>>, vector<1x128x128xf32>
    %260 = vector.shape_cast %259 : vector<1x128x128xf32> to vector<128x128xf32>
    %cst_274 = arith.constant dense<0.000000e+00> : vector<4x128xf32>
    %261 = tpu.matmul %258, %260, %cst_274 {dimension_numbers = #tpu.dot_dimension_numbers<[1], [0], [0], [1], [0, 0, 1, 1], [], []>} : vector<4x128xf32>, vector<128x128xf32>, vector<4x128xf32> -> vector<4x128xf32>
    %262 = arith.addf %256, %261 : vector<4x128xf32>
    %c1_275 = arith.constant 1 : index
    %c2_276 = arith.constant 2 : index
    %c0_277 = arith.constant 0 : index
    %263 = vector.load %arg9[%c1_275, %c2_276, %c0_277] : memref<18x18x128xf32, #tpu.memory_space<vmem>>, vector<1x4x128xf32>
    %264 = vector.shape_cast %263 : vector<1x4x128xf32> to vector<4x128xf32>
    %c2_278 = arith.constant 2 : index
    %c0_279 = arith.constant 0 : index
    %c0_280 = arith.constant 0 : index
    %265 = vector.load %arg6[%c2_278, %c0_279, %c0_280] : memref<9x128x128xf32, #tpu.memory_space<vmem>>, vector<1x128x128xf32>
    %266 = vector.shape_cast %265 : vector<1x128x128xf32> to vector<128x128xf32>
    %cst_281 = arith.constant dense<0.000000e+00> : vector<4x128xf32>
    %267 = tpu.matmul %264, %266, %cst_281 {dimension_numbers = #tpu.dot_dimension_numbers<[1], [0], [0], [1], [0, 0, 1, 1], [], []>} : vector<4x128xf32>, vector<128x128xf32>, vector<4x128xf32> -> vector<4x128xf32>
    %268 = arith.addf %262, %267 : vector<4x128xf32>
    %c2_282 = arith.constant 2 : index
    %c0_283 = arith.constant 0 : index
    %c0_284 = arith.constant 0 : index
    %269 = vector.load %arg9[%c2_282, %c0_283, %c0_284] : memref<18x18x128xf32, #tpu.memory_space<vmem>>, vector<1x4x128xf32>
    %270 = vector.shape_cast %269 : vector<1x4x128xf32> to vector<4x128xf32>
    %c3_285 = arith.constant 3 : index
    %c0_286 = arith.constant 0 : index
    %c0_287 = arith.constant 0 : index
    %271 = vector.load %arg6[%c3_285, %c0_286, %c0_287] : memref<9x128x128xf32, #tpu.memory_space<vmem>>, vector<1x128x128xf32>
    %272 = vector.shape_cast %271 : vector<1x128x128xf32> to vector<128x128xf32>
    %cst_288 = arith.constant dense<0.000000e+00> : vector<4x128xf32>
    %273 = tpu.matmul %270, %272, %cst_288 {dimension_numbers = #tpu.dot_dimension_numbers<[1], [0], [0], [1], [0, 0, 1, 1], [], []>} : vector<4x128xf32>, vector<128x128xf32>, vector<4x128xf32> -> vector<4x128xf32>
    %274 = arith.addf %268, %273 : vector<4x128xf32>
    %c2_289 = arith.constant 2 : index
    %c1_290 = arith.constant 1 : index
    %c0_291 = arith.constant 0 : index
    %275 = vector.load %arg9[%c2_289, %c1_290, %c0_291] : memref<18x18x128xf32, #tpu.memory_space<vmem>>, vector<1x4x128xf32>
    %276 = vector.shape_cast %275 : vector<1x4x128xf32> to vector<4x128xf32>
    %c4_292 = arith.constant 4 : index
    %c0_293 = arith.constant 0 : index
    %c0_294 = arith.constant 0 : index
    %277 = vector.load %arg6[%c4_292, %c0_293, %c0_294] : memref<9x128x128xf32, #tpu.memory_space<vmem>>, vector<1x128x128xf32>
    %278 = vector.shape_cast %277 : vector<1x128x128xf32> to vector<128x128xf32>
    %cst_295 = arith.constant dense<0.000000e+00> : vector<4x128xf32>
    %279 = tpu.matmul %276, %278, %cst_295 {dimension_numbers = #tpu.dot_dimension_numbers<[1], [0], [0], [1], [0, 0, 1, 1], [], []>} : vector<4x128xf32>, vector<128x128xf32>, vector<4x128xf32> -> vector<4x128xf32>
    %280 = arith.addf %274, %279 : vector<4x128xf32>
    %c2_296 = arith.constant 2 : index
    %c2_297 = arith.constant 2 : index
    %c0_298 = arith.constant 0 : index
    %281 = vector.load %arg9[%c2_296, %c2_297, %c0_298] : memref<18x18x128xf32, #tpu.memory_space<vmem>>, vector<1x4x128xf32>
    %282 = vector.shape_cast %281 : vector<1x4x128xf32> to vector<4x128xf32>
    %c5_299 = arith.constant 5 : index
    %c0_300 = arith.constant 0 : index
    %c0_301 = arith.constant 0 : index
    %283 = vector.load %arg6[%c5_299, %c0_300, %c0_301] : memref<9x128x128xf32, #tpu.memory_space<vmem>>, vector<1x128x128xf32>
    %284 = vector.shape_cast %283 : vector<1x128x128xf32> to vector<128x128xf32>
    %cst_302 = arith.constant dense<0.000000e+00> : vector<4x128xf32>
    %285 = tpu.matmul %282, %284, %cst_302 {dimension_numbers = #tpu.dot_dimension_numbers<[1], [0], [0], [1], [0, 0, 1, 1], [], []>} : vector<4x128xf32>, vector<128x128xf32>, vector<4x128xf32> -> vector<4x128xf32>
    %286 = arith.addf %280, %285 : vector<4x128xf32>
    %c3_303 = arith.constant 3 : index
    %c0_304 = arith.constant 0 : index
    %c0_305 = arith.constant 0 : index
    %287 = vector.load %arg9[%c3_303, %c0_304, %c0_305] : memref<18x18x128xf32, #tpu.memory_space<vmem>>, vector<1x4x128xf32>
    %288 = vector.shape_cast %287 : vector<1x4x128xf32> to vector<4x128xf32>
    %c6_306 = arith.constant 6 : index
    %c0_307 = arith.constant 0 : index
    %c0_308 = arith.constant 0 : index
    %289 = vector.load %arg6[%c6_306, %c0_307, %c0_308] : memref<9x128x128xf32, #tpu.memory_space<vmem>>, vector<1x128x128xf32>
    %290 = vector.shape_cast %289 : vector<1x128x128xf32> to vector<128x128xf32>
    %cst_309 = arith.constant dense<0.000000e+00> : vector<4x128xf32>
    %291 = tpu.matmul %288, %290, %cst_309 {dimension_numbers = #tpu.dot_dimension_numbers<[1], [0], [0], [1], [0, 0, 1, 1], [], []>} : vector<4x128xf32>, vector<128x128xf32>, vector<4x128xf32> -> vector<4x128xf32>
    %292 = arith.addf %286, %291 : vector<4x128xf32>
    %c3_310 = arith.constant 3 : index
    %c1_311 = arith.constant 1 : index
    %c0_312 = arith.constant 0 : index
    %293 = vector.load %arg9[%c3_310, %c1_311, %c0_312] : memref<18x18x128xf32, #tpu.memory_space<vmem>>, vector<1x4x128xf32>
    %294 = vector.shape_cast %293 : vector<1x4x128xf32> to vector<4x128xf32>
    %c7_313 = arith.constant 7 : index
    %c0_314 = arith.constant 0 : index
    %c0_315 = arith.constant 0 : index
    %295 = vector.load %arg6[%c7_313, %c0_314, %c0_315] : memref<9x128x128xf32, #tpu.memory_space<vmem>>, vector<1x128x128xf32>
    %296 = vector.shape_cast %295 : vector<1x128x128xf32> to vector<128x128xf32>
    %cst_316 = arith.constant dense<0.000000e+00> : vector<4x128xf32>
    %297 = tpu.matmul %294, %296, %cst_316 {dimension_numbers = #tpu.dot_dimension_numbers<[1], [0], [0], [1], [0, 0, 1, 1], [], []>} : vector<4x128xf32>, vector<128x128xf32>, vector<4x128xf32> -> vector<4x128xf32>
    %298 = arith.addf %292, %297 : vector<4x128xf32>
    %c3_317 = arith.constant 3 : index
    %c2_318 = arith.constant 2 : index
    %c0_319 = arith.constant 0 : index
    %299 = vector.load %arg9[%c3_317, %c2_318, %c0_319] : memref<18x18x128xf32, #tpu.memory_space<vmem>>, vector<1x4x128xf32>
    %300 = vector.shape_cast %299 : vector<1x4x128xf32> to vector<4x128xf32>
    %c8_320 = arith.constant 8 : index
    %c0_321 = arith.constant 0 : index
    %c0_322 = arith.constant 0 : index
    %301 = vector.load %arg6[%c8_320, %c0_321, %c0_322] : memref<9x128x128xf32, #tpu.memory_space<vmem>>, vector<1x128x128xf32>
    %302 = vector.shape_cast %301 : vector<1x128x128xf32> to vector<128x128xf32>
    %cst_323 = arith.constant dense<0.000000e+00> : vector<4x128xf32>
    %303 = tpu.matmul %300, %302, %cst_323 {dimension_numbers = #tpu.dot_dimension_numbers<[1], [0], [0], [1], [0, 0, 1, 1], [], []>} : vector<4x128xf32>, vector<128x128xf32>, vector<4x128xf32> -> vector<4x128xf32>
    %304 = arith.addf %298, %303 : vector<4x128xf32>
    %c0_324 = arith.constant 0 : index
    %c0_325 = arith.constant 0 : index
    %305 = vector.load %arg7[%c0_324, %c0_325] : memref<1x128xf32, #tpu.memory_space<vmem>>, vector<1x128xf32>
    %306 = vector.broadcast %305 : vector<1x128xf32> to vector<4x128xf32>
    %307 = arith.addf %304, %306 : vector<4x128xf32>
    %c0_326 = arith.constant 0 : index
    %c4_327 = arith.constant 4 : index
    %c0_328 = arith.constant 0 : index
    %308 = vector.load %arg8[%c0_326, %c4_327, %c0_328] : memref<1x16x128xf32, #tpu.memory_space<vmem>>, vector<1x4x128xf32>
    %309 = vector.shape_cast %308 : vector<1x4x128xf32> to vector<4x128xf32>
    %310 = vector.shape_cast %307 : vector<4x128xf32> to vector<1x4x128xf32>
    tpu.vector_store %arg8[%c0_326, %c4_327, %c0_328], %310 {strides = array<i32>} : memref<1x16x128xf32, #tpu.memory_space<vmem>>, vector<1x4x128xf32>,
    %cst_329 = arith.constant 0.000000e+00 : f32
    %311 = vector.broadcast %cst_329 : f32 to vector<4x128xf32>
    %c2_330 = arith.constant 2 : index
    %c0_331 = arith.constant 0 : index
    %c0_332 = arith.constant 0 : index
    %312 = vector.load %arg9[%c2_330, %c0_331, %c0_332] : memref<18x18x128xf32, #tpu.memory_space<vmem>>, vector<1x4x128xf32>
    %313 = vector.shape_cast %312 : vector<1x4x128xf32> to vector<4x128xf32>
    %c0_333 = arith.constant 0 : index
    %c0_334 = arith.constant 0 : index
    %c0_335 = arith.constant 0 : index
    %314 = vector.load %arg6[%c0_333, %c0_334, %c0_335] : memref<9x128x128xf32, #tpu.memory_space<vmem>>, vector<1x128x128xf32>
    %315 = vector.shape_cast %314 : vector<1x128x128xf32> to vector<128x128xf32>
    %cst_336 = arith.constant dense<0.000000e+00> : vector<4x128xf32>
    %316 = tpu.matmul %313, %315, %cst_336 {dimension_numbers = #tpu.dot_dimension_numbers<[1], [0], [0], [1], [0, 0, 1, 1], [], []>} : vector<4x128xf32>, vector<128x128xf32>, vector<4x128xf32> -> vector<4x128xf32>
    %317 = arith.addf %311, %316 : vector<4x128xf32>
    %c2_337 = arith.constant 2 : index
    %c1_338 = arith.constant 1 : index
    %c0_339 = arith.constant 0 : index
    %318 = vector.load %arg9[%c2_337, %c1_338, %c0_339] : memref<18x18x128xf32, #tpu.memory_space<vmem>>, vector<1x4x128xf32>
    %319 = vector.shape_cast %318 : vector<1x4x128xf32> to vector<4x128xf32>
    %c1_340 = arith.constant 1 : index
    %c0_341 = arith.constant 0 : index
    %c0_342 = arith.constant 0 : index
    %320 = vector.load %arg6[%c1_340, %c0_341, %c0_342] : memref<9x128x128xf32, #tpu.memory_space<vmem>>, vector<1x128x128xf32>
    %321 = vector.shape_cast %320 : vector<1x128x128xf32> to vector<128x128xf32>
    %cst_343 = arith.constant dense<0.000000e+00> : vector<4x128xf32>
    %322 = tpu.matmul %319, %321, %cst_343 {dimension_numbers = #tpu.dot_dimension_numbers<[1], [0], [0], [1], [0, 0, 1, 1], [], []>} : vector<4x128xf32>, vector<128x128xf32>, vector<4x128xf32> -> vector<4x128xf32>
    %323 = arith.addf %317, %322 : vector<4x128xf32>
    %c2_344 = arith.constant 2 : index
    %c2_345 = arith.constant 2 : index
    %c0_346 = arith.constant 0 : index
    %324 = vector.load %arg9[%c2_344, %c2_345, %c0_346] : memref<18x18x128xf32, #tpu.memory_space<vmem>>, vector<1x4x128xf32>
    %325 = vector.shape_cast %324 : vector<1x4x128xf32> to vector<4x128xf32>
    %c2_347 = arith.constant 2 : index
    %c0_348 = arith.constant 0 : index
    %c0_349 = arith.constant 0 : index
    %326 = vector.load %arg6[%c2_347, %c0_348, %c0_349] : memref<9x128x128xf32, #tpu.memory_space<vmem>>, vector<1x128x128xf32>
    %327 = vector.shape_cast %326 : vector<1x128x128xf32> to vector<128x128xf32>
    %cst_350 = arith.constant dense<0.000000e+00> : vector<4x128xf32>
    %328 = tpu.matmul %325, %327, %cst_350 {dimension_numbers = #tpu.dot_dimension_numbers<[1], [0], [0], [1], [0, 0, 1, 1], [], []>} : vector<4x128xf32>, vector<128x128xf32>, vector<4x128xf32> -> vector<4x128xf32>
    %329 = arith.addf %323, %328 : vector<4x128xf32>
    %c3_351 = arith.constant 3 : index
    %c0_352 = arith.constant 0 : index
    %c0_353 = arith.constant 0 : index
    %330 = vector.load %arg9[%c3_351, %c0_352, %c0_353] : memref<18x18x128xf32, #tpu.memory_space<vmem>>, vector<1x4x128xf32>
    %331 = vector.shape_cast %330 : vector<1x4x128xf32> to vector<4x128xf32>
    %c3_354 = arith.constant 3 : index
    %c0_355 = arith.constant 0 : index
    %c0_356 = arith.constant 0 : index
    %332 = vector.load %arg6[%c3_354, %c0_355, %c0_356] : memref<9x128x128xf32, #tpu.memory_space<vmem>>, vector<1x128x128xf32>
    %333 = vector.shape_cast %332 : vector<1x128x128xf32> to vector<128x128xf32>
    %cst_357 = arith.constant dense<0.000000e+00> : vector<4x128xf32>
    %334 = tpu.matmul %331, %333, %cst_357 {dimension_numbers = #tpu.dot_dimension_numbers<[1], [0], [0], [1], [0, 0, 1, 1], [], []>} : vector<4x128xf32>, vector<128x128xf32>, vector<4x128xf32> -> vector<4x128xf32>
    %335 = arith.addf %329, %334 : vector<4x128xf32>
    %c3_358 = arith.constant 3 : index
    %c1_359 = arith.constant 1 : index
    %c0_360 = arith.constant 0 : index
    %336 = vector.load %arg9[%c3_358, %c1_359, %c0_360] : memref<18x18x128xf32, #tpu.memory_space<vmem>>, vector<1x4x128xf32>
    %337 = vector.shape_cast %336 : vector<1x4x128xf32> to vector<4x128xf32>
    %c4_361 = arith.constant 4 : index
    %c0_362 = arith.constant 0 : index
    %c0_363 = arith.constant 0 : index
    %338 = vector.load %arg6[%c4_361, %c0_362, %c0_363] : memref<9x128x128xf32, #tpu.memory_space<vmem>>, vector<1x128x128xf32>
    %339 = vector.shape_cast %338 : vector<1x128x128xf32> to vector<128x128xf32>
    %cst_364 = arith.constant dense<0.000000e+00> : vector<4x128xf32>
    %340 = tpu.matmul %337, %339, %cst_364 {dimension_numbers = #tpu.dot_dimension_numbers<[1], [0], [0], [1], [0, 0, 1, 1], [], []>} : vector<4x128xf32>, vector<128x128xf32>, vector<4x128xf32> -> vector<4x128xf32>
    %341 = arith.addf %335, %340 : vector<4x128xf32>
    %c3_365 = arith.constant 3 : index
    %c2_366 = arith.constant 2 : index
    %c0_367 = arith.constant 0 : index
    %342 = vector.load %arg9[%c3_365, %c2_366, %c0_367] : memref<18x18x128xf32, #tpu.memory_space<vmem>>, vector<1x4x128xf32>
    %343 = vector.shape_cast %342 : vector<1x4x128xf32> to vector<4x128xf32>
    %c5_368 = arith.constant 5 : index
    %c0_369 = arith.constant 0 : index
    %c0_370 = arith.constant 0 : index
    %344 = vector.load %arg6[%c5_368, %c0_369, %c0_370] : memref<9x128x128xf32, #tpu.memory_space<vmem>>, vector<1x128x128xf32>
    %345 = vector.shape_cast %344 : vector<1x128x128xf32> to vector<128x128xf32>
    %cst_371 = arith.constant dense<0.000000e+00> : vector<4x128xf32>
    %346 = tpu.matmul %343, %345, %cst_371 {dimension_numbers = #tpu.dot_dimension_numbers<[1], [0], [0], [1], [0, 0, 1, 1], [], []>} : vector<4x128xf32>, vector<128x128xf32>, vector<4x128xf32> -> vector<4x128xf32>
    %347 = arith.addf %341, %346 : vector<4x128xf32>
    %c4_372 = arith.constant 4 : index
    %c0_373 = arith.constant 0 : index
    %c0_374 = arith.constant 0 : index
    %348 = vector.load %arg9[%c4_372, %c0_373, %c0_374] : memref<18x18x128xf32, #tpu.memory_space<vmem>>, vector<1x4x128xf32>
    %349 = vector.shape_cast %348 : vector<1x4x128xf32> to vector<4x128xf32>
    %c6_375 = arith.constant 6 : index
    %c0_376 = arith.constant 0 : index
    %c0_377 = arith.constant 0 : index
    %350 = vector.load %arg6[%c6_375, %c0_376, %c0_377] : memref<9x128x128xf32, #tpu.memory_space<vmem>>, vector<1x128x128xf32>
    %351 = vector.shape_cast %350 : vector<1x128x128xf32> to vector<128x128xf32>
    %cst_378 = arith.constant dense<0.000000e+00> : vector<4x128xf32>
    %352 = tpu.matmul %349, %351, %cst_378 {dimension_numbers = #tpu.dot_dimension_numbers<[1], [0], [0], [1], [0, 0, 1, 1], [], []>} : vector<4x128xf32>, vector<128x128xf32>, vector<4x128xf32> -> vector<4x128xf32>
    %353 = arith.addf %347, %352 : vector<4x128xf32>
    %c4_379 = arith.constant 4 : index
    %c1_380 = arith.constant 1 : index
    %c0_381 = arith.constant 0 : index
    %354 = vector.load %arg9[%c4_379, %c1_380, %c0_381] : memref<18x18x128xf32, #tpu.memory_space<vmem>>, vector<1x4x128xf32>
    %355 = vector.shape_cast %354 : vector<1x4x128xf32> to vector<4x128xf32>
    %c7_382 = arith.constant 7 : index
    %c0_383 = arith.constant 0 : index
    %c0_384 = arith.constant 0 : index
    %356 = vector.load %arg6[%c7_382, %c0_383, %c0_384] : memref<9x128x128xf32, #tpu.memory_space<vmem>>, vector<1x128x128xf32>
    %357 = vector.shape_cast %356 : vector<1x128x128xf32> to vector<128x128xf32>
    %cst_385 = arith.constant dense<0.000000e+00> : vector<4x128xf32>
    %358 = tpu.matmul %355, %357, %cst_385 {dimension_numbers = #tpu.dot_dimension_numbers<[1], [0], [0], [1], [0, 0, 1, 1], [], []>} : vector<4x128xf32>, vector<128x128xf32>, vector<4x128xf32> -> vector<4x128xf32>
    %359 = arith.addf %353, %358 : vector<4x128xf32>
    %c4_386 = arith.constant 4 : index
    %c2_387 = arith.constant 2 : index
    %c0_388 = arith.constant 0 : index
    %360 = vector.load %arg9[%c4_386, %c2_387, %c0_388] : memref<18x18x128xf32, #tpu.memory_space<vmem>>, vector<1x4x128xf32>
    %361 = vector.shape_cast %360 : vector<1x4x128xf32> to vector<4x128xf32>
    %c8_389 = arith.constant 8 : index
    %c0_390 = arith.constant 0 : index
    %c0_391 = arith.constant 0 : index
    %362 = vector.load %arg6[%c8_389, %c0_390, %c0_391] : memref<9x128x128xf32, #tpu.memory_space<vmem>>, vector<1x128x128xf32>
    %363 = vector.shape_cast %362 : vector<1x128x128xf32> to vector<128x128xf32>
    %cst_392 = arith.constant dense<0.000000e+00> : vector<4x128xf32>
    %364 = tpu.matmul %361, %363, %cst_392 {dimension_numbers = #tpu.dot_dimension_numbers<[1], [0], [0], [1], [0, 0, 1, 1], [], []>} : vector<4x128xf32>, vector<128x128xf32>, vector<4x128xf32> -> vector<4x128xf32>
    %365 = arith.addf %359, %364 : vector<4x128xf32>
    %c0_393 = arith.constant 0 : index
    %c0_394 = arith.constant 0 : index
    %366 = vector.load %arg7[%c0_393, %c0_394] : memref<1x128xf32, #tpu.memory_space<vmem>>, vector<1x128xf32>
    %367 = vector.broadcast %366 : vector<1x128xf32> to vector<4x128xf32>
    %368 = arith.addf %365, %367 : vector<4x128xf32>
    %c0_395 = arith.constant 0 : index
    %c8_396 = arith.constant 8 : index
    %c0_397 = arith.constant 0 : index
    %369 = vector.load %arg8[%c0_395, %c8_396, %c0_397] : memref<1x16x128xf32, #tpu.memory_space<vmem>>, vector<1x4x128xf32>
    %370 = vector.shape_cast %369 : vector<1x4x128xf32> to vector<4x128xf32>
    %371 = vector.shape_cast %368 : vector<4x128xf32> to vector<1x4x128xf32>
    tpu.vector_store %arg8[%c0_395, %c8_396, %c0_397], %371 {strides = array<i32>} : memref<1x16x128xf32, #tpu.memory_space<vmem>>, vector<1x4x128xf32>,
    %cst_398 = arith.constant 0.000000e+00 : f32
    %372 = vector.broadcast %cst_398 : f32 to vector<4x128xf32>
    %c3_399 = arith.constant 3 : index
    %c0_400 = arith.constant 0 : index
    %c0_401 = arith.constant 0 : index
    %373 = vector.load %arg9[%c3_399, %c0_400, %c0_401] : memref<18x18x128xf32, #tpu.memory_space<vmem>>, vector<1x4x128xf32>
    %374 = vector.shape_cast %373 : vector<1x4x128xf32> to vector<4x128xf32>
    %c0_402 = arith.constant 0 : index
    %c0_403 = arith.constant 0 : index
    %c0_404 = arith.constant 0 : index
    %375 = vector.load %arg6[%c0_402, %c0_403, %c0_404] : memref<9x128x128xf32, #tpu.memory_space<vmem>>, vector<1x128x128xf32>
    %376 = vector.shape_cast %375 : vector<1x128x128xf32> to vector<128x128xf32>
    %cst_405 = arith.constant dense<0.000000e+00> : vector<4x128xf32>
    %377 = tpu.matmul %374, %376, %cst_405 {dimension_numbers = #tpu.dot_dimension_numbers<[1], [0], [0], [1], [0, 0, 1, 1], [], []>} : vector<4x128xf32>, vector<128x128xf32>, vector<4x128xf32> -> vector<4x128xf32>
    %378 = arith.addf %372, %377 : vector<4x128xf32>
    %c3_406 = arith.constant 3 : index
    %c1_407 = arith.constant 1 : index
    %c0_408 = arith.constant 0 : index
    %379 = vector.load %arg9[%c3_406, %c1_407, %c0_408] : memref<18x18x128xf32, #tpu.memory_space<vmem>>, vector<1x4x128xf32>
    %380 = vector.shape_cast %379 : vector<1x4x128xf32> to vector<4x128xf32>
    %c1_409 = arith.constant 1 : index
    %c0_410 = arith.constant 0 : index
    %c0_411 = arith.constant 0 : index
    %381 = vector.load %arg6[%c1_409, %c0_410, %c0_411] : memref<9x128x128xf32, #tpu.memory_space<vmem>>, vector<1x128x128xf32>
    %382 = vector.shape_cast %381 : vector<1x128x128xf32> to vector<128x128xf32>
    %cst_412 = arith.constant dense<0.000000e+00> : vector<4x128xf32>
    %383 = tpu.matmul %380, %382, %cst_412 {dimension_numbers = #tpu.dot_dimension_numbers<[1], [0], [0], [1], [0, 0, 1, 1], [], []>} : vector<4x128xf32>, vector<128x128xf32>, vector<4x128xf32> -> vector<4x128xf32>
    %384 = arith.addf %378, %383 : vector<4x128xf32>
    %c3_413 = arith.constant 3 : index
    %c2_414 = arith.constant 2 : index
    %c0_415 = arith.constant 0 : index
    %385 = vector.load %arg9[%c3_413, %c2_414, %c0_415] : memref<18x18x128xf32, #tpu.memory_space<vmem>>, vector<1x4x128xf32>
    %386 = vector.shape_cast %385 : vector<1x4x128xf32> to vector<4x128xf32>
    %c2_416 = arith.constant 2 : index
    %c0_417 = arith.constant 0 : index
    %c0_418 = arith.constant 0 : index
    %387 = vector.load %arg6[%c2_416, %c0_417, %c0_418] : memref<9x128x128xf32, #tpu.memory_space<vmem>>, vector<1x128x128xf32>
    %388 = vector.shape_cast %387 : vector<1x128x128xf32> to vector<128x128xf32>
    %cst_419 = arith.constant dense<0.000000e+00> : vector<4x128xf32>
    %389 = tpu.matmul %386, %388, %cst_419 {dimension_numbers = #tpu.dot_dimension_numbers<[1], [0], [0], [1], [0, 0, 1, 1], [], []>} : vector<4x128xf32>, vector<128x128xf32>, vector<4x128xf32> -> vector<4x128xf32>
    %390 = arith.addf %384, %389 : vector<4x128xf32>
    %c4_420 = arith.constant 4 : index
    %c0_421 = arith.constant 0 : index
    %c0_422 = arith.constant 0 : index
    %391 = vector.load %arg9[%c4_420, %c0_421, %c0_422] : memref<18x18x128xf32, #tpu.memory_space<vmem>>, vector<1x4x128xf32>
    %392 = vector.shape_cast %391 : vector<1x4x128xf32> to vector<4x128xf32>
    %c3_423 = arith.constant 3 : index
    %c0_424 = arith.constant 0 : index
    %c0_425 = arith.constant 0 : index
    %393 = vector.load %arg6[%c3_423, %c0_424, %c0_425] : memref<9x128x128xf32, #tpu.memory_space<vmem>>, vector<1x128x128xf32>
    %394 = vector.shape_cast %393 : vector<1x128x128xf32> to vector<128x128xf32>
    %cst_426 = arith.constant dense<0.000000e+00> : vector<4x128xf32>
    %395 = tpu.matmul %392, %394, %cst_426 {dimension_numbers = #tpu.dot_dimension_numbers<[1], [0], [0], [1], [0, 0, 1, 1], [], []>} : vector<4x128xf32>, vector<128x128xf32>, vector<4x128xf32> -> vector<4x128xf32>
    %396 = arith.addf %390, %395 : vector<4x128xf32>
    %c4_427 = arith.constant 4 : index
    %c1_428 = arith.constant 1 : index
    %c0_429 = arith.constant 0 : index
    %397 = vector.load %arg9[%c4_427, %c1_428, %c0_429] : memref<18x18x128xf32, #tpu.memory_space<vmem>>, vector<1x4x128xf32>
    %398 = vector.shape_cast %397 : vector<1x4x128xf32> to vector<4x128xf32>
    %c4_430 = arith.constant 4 : index
    %c0_431 = arith.constant 0 : index
    %c0_432 = arith.constant 0 : index
    %399 = vector.load %arg6[%c4_430, %c0_431, %c0_432] : memref<9x128x128xf32, #tpu.memory_space<vmem>>, vector<1x128x128xf32>
    %400 = vector.shape_cast %399 : vector<1x128x128xf32> to vector<128x128xf32>
    %cst_433 = arith.constant dense<0.000000e+00> : vector<4x128xf32>
    %401 = tpu.matmul %398, %400, %cst_433 {dimension_numbers = #tpu.dot_dimension_numbers<[1], [0], [0], [1], [0, 0, 1, 1], [], []>} : vector<4x128xf32>, vector<128x128xf32>, vector<4x128xf32> -> vector<4x128xf32>
    %402 = arith.addf %396, %401 : vector<4x128xf32>
    %c4_434 = arith.constant 4 : index
    %c2_435 = arith.constant 2 : index
    %c0_436 = arith.constant 0 : index
    %403 = vector.load %arg9[%c4_434, %c2_435, %c0_436] : memref<18x18x128xf32, #tpu.memory_space<vmem>>, vector<1x4x128xf32>
    %404 = vector.shape_cast %403 : vector<1x4x128xf32> to vector<4x128xf32>
    %c5_437 = arith.constant 5 : index
    %c0_438 = arith.constant 0 : index
    %c0_439 = arith.constant 0 : index
    %405 = vector.load %arg6[%c5_437, %c0_438, %c0_439] : memref<9x128x128xf32, #tpu.memory_space<vmem>>, vector<1x128x128xf32>
    %406 = vector.shape_cast %405 : vector<1x128x128xf32> to vector<128x128xf32>
    %cst_440 = arith.constant dense<0.000000e+00> : vector<4x128xf32>
    %407 = tpu.matmul %404, %406, %cst_440 {dimension_numbers = #tpu.dot_dimension_numbers<[1], [0], [0], [1], [0, 0, 1, 1], [], []>} : vector<4x128xf32>, vector<128x128xf32>, vector<4x128xf32> -> vector<4x128xf32>
    %408 = arith.addf %402, %407 : vector<4x128xf32>
    %c5_441 = arith.constant 5 : index
    %c0_442 = arith.constant 0 : index
    %c0_443 = arith.constant 0 : index
    %409 = vector.load %arg9[%c5_441, %c0_442, %c0_443] : memref<18x18x128xf32, #tpu.memory_space<vmem>>, vector<1x4x128xf32>
    %410 = vector.shape_cast %409 : vector<1x4x128xf32> to vector<4x128xf32>
    %c6_444 = arith.constant 6 : index
    %c0_445 = arith.constant 0 : index
    %c0_446 = arith.constant 0 : index
    %411 = vector.load %arg6[%c6_444, %c0_445, %c0_446] : memref<9x128x128xf32, #tpu.memory_space<vmem>>, vector<1x128x128xf32>
    %412 = vector.shape_cast %411 : vector<1x128x128xf32> to vector<128x128xf32>
    %cst_447 = arith.constant dense<0.000000e+00> : vector<4x128xf32>
    %413 = tpu.matmul %410, %412, %cst_447 {dimension_numbers = #tpu.dot_dimension_numbers<[1], [0], [0], [1], [0, 0, 1, 1], [], []>} : vector<4x128xf32>, vector<128x128xf32>, vector<4x128xf32> -> vector<4x128xf32>
    %414 = arith.addf %408, %413 : vector<4x128xf32>
    %c5_448 = arith.constant 5 : index
    %c1_449 = arith.constant 1 : index
    %c0_450 = arith.constant 0 : index
    %415 = vector.load %arg9[%c5_448, %c1_449, %c0_450] : memref<18x18x128xf32, #tpu.memory_space<vmem>>, vector<1x4x128xf32>
    %416 = vector.shape_cast %415 : vector<1x4x128xf32> to vector<4x128xf32>
    %c7_451 = arith.constant 7 : index
    %c0_452 = arith.constant 0 : index
    %c0_453 = arith.constant 0 : index
    %417 = vector.load %arg6[%c7_451, %c0_452, %c0_453] : memref<9x128x128xf32, #tpu.memory_space<vmem>>, vector<1x128x128xf32>
    %418 = vector.shape_cast %417 : vector<1x128x128xf32> to vector<128x128xf32>
    %cst_454 = arith.constant dense<0.000000e+00> : vector<4x128xf32>
    %419 = tpu.matmul %416, %418, %cst_454 {dimension_numbers = #tpu.dot_dimension_numbers<[1], [0], [0], [1], [0, 0, 1, 1], [], []>} : vector<4x128xf32>, vector<128x128xf32>, vector<4x128xf32> -> vector<4x128xf32>
    %420 = arith.addf %414, %419 : vector<4x128xf32>
    %c5_455 = arith.constant 5 : index
    %c2_456 = arith.constant 2 : index
    %c0_457 = arith.constant 0 : index
    %421 = vector.load %arg9[%c5_455, %c2_456, %c0_457] : memref<18x18x128xf32, #tpu.memory_space<vmem>>, vector<1x4x128xf32>
    %422 = vector.shape_cast %421 : vector<1x4x128xf32> to vector<4x128xf32>
    %c8_458 = arith.constant 8 : index
    %c0_459 = arith.constant 0 : index
    %c0_460 = arith.constant 0 : index
    %423 = vector.load %arg6[%c8_458, %c0_459, %c0_460] : memref<9x128x128xf32, #tpu.memory_space<vmem>>, vector<1x128x128xf32>
    %424 = vector.shape_cast %423 : vector<1x128x128xf32> to vector<128x128xf32>
    %cst_461 = arith.constant dense<0.000000e+00> : vector<4x128xf32>
    %425 = tpu.matmul %422, %424, %cst_461 {dimension_numbers = #tpu.dot_dimension_numbers<[1], [0], [0], [1], [0, 0, 1, 1], [], []>} : vector<4x128xf32>, vector<128x128xf32>, vector<4x128xf32> -> vector<4x128xf32>
    %426 = arith.addf %420, %425 : vector<4x128xf32>
    %c0_462 = arith.constant 0 : index
    %c0_463 = arith.constant 0 : index
    %427 = vector.load %arg7[%c0_462, %c0_463] : memref<1x128xf32, #tpu.memory_space<vmem>>, vector<1x128xf32>
    %428 = vector.broadcast %427 : vector<1x128xf32> to vector<4x128xf32>
    %429 = arith.addf %426, %428 : vector<4x128xf32>
    %c0_464 = arith.constant 0 : index
    %c12 = arith.constant 12 : index
    %c0_465 = arith.constant 0 : index
    %430 = vector.load %arg8[%c0_464, %c12, %c0_465] : memref<1x16x128xf32, #tpu.memory_space<vmem>>, vector<1x4x128xf32>
    %431 = vector.shape_cast %430 : vector<1x4x128xf32> to vector<4x128xf32>
    %432 = vector.shape_cast %429 : vector<4x128xf32> to vector<1x4x128xf32>
    tpu.vector_store %arg8[%c0_464, %c12, %c0_465], %432 {strides = array<i32>} : memref<1x16x128xf32, #tpu.memory_space<vmem>>, vector<1x4x128xf32>,
    return
  }
  func.func @transform_0(%arg0: i32) -> (i32, i32, i32, i32) {
    %c0_i32 = arith.constant 0 : i32
    %c0_i32_0 = arith.constant 0 : i32
    %c0_i32_1 = arith.constant 0 : i32
    %c0_i32_2 = arith.constant 0 : i32
    return %arg0, %c0_i32, %c0_i32_0, %c0_i32_1 : i32, i32, i32, i32
  }
  func.func @transform_1(%arg0: i32) -> (i32, i32, i32) {
    %c0_i32 = arith.constant 0 : i32
    %c0_i32_0 = arith.constant 0 : i32
    %c0_i32_1 = arith.constant 0 : i32
    %c0_i32_2 = arith.constant 0 : i32
    return %c0_i32, %c0_i32_0, %c0_i32_1 : i32, i32, i32
  }
  func.func @transform_2(%arg0: i32) -> (i32, i32) {
    %c0_i32 = arith.constant 0 : i32
    %c0_i32_0 = arith.constant 0 : i32
    %c0_i32_1 = arith.constant 0 : i32
    return %c0_i32, %c0_i32_0 : i32, i32
  }
  func.func @transform_3(%arg0: i32) -> (i32, i32, i32) {
    %c0_i32 = arith.constant 0 : i32
    %c0_i32_0 = arith.constant 0 : i32
    %c0_i32_1 = arith.constant 0 : i32
    %c0_i32_2 = arith.constant 0 : i32
    return %c0_i32, %c0_i32_0, %c0_i32_1 : i32, i32, i32
  }
  func.func @transform_4(%arg0: i32) -> (i32, i32) {
    %c0_i32 = arith.constant 0 : i32
    %c0_i32_0 = arith.constant 0 : i32
    %c0_i32_1 = arith.constant 0 : i32
    return %c0_i32, %c0_i32_0 : i32, i32
  }
  func.func @transform_5(%arg0: i32) -> (i32, i32, i32) {
    %c0_i32 = arith.constant 0 : i32
    %c0_i32_0 = arith.constant 0 : i32
    %c0_i32_1 = arith.constant 0 : i32
    %c0_i32_2 = arith.constant 0 : i32
    return %c0_i32, %c0_i32_0, %c0_i32_1 : i32, i32, i32
  }
  func.func @transform_6(%arg0: i32) -> (i32, i32) {
    %c0_i32 = arith.constant 0 : i32
    %c0_i32_0 = arith.constant 0 : i32
    %c0_i32_1 = arith.constant 0 : i32
    return %c0_i32, %c0_i32_0 : i32, i32
  }
  func.func @transform_7(%arg0: i32) -> (i32, i32, i32) {
    %c0_i32 = arith.constant 0 : i32
    %c0_i32_0 = arith.constant 0 : i32
    %c0_i32_1 = arith.constant 0 : i32
    return %arg0, %c0_i32, %c0_i32_0 : i32, i32, i32
  }
}

</mosaic_0001>

<bundles_post_ra>
// kernel: intermediate_cnn_forward.1
= control target key start
LH: loop header
LB: loop body
LE: loop exit
PB: predicated region body
PF: predicated region fallthrough
CT: control target
= control target key end

     0   :  { %s12508_s24 = smov 0   ;;  %s17771_s0 = inlined_call_operand.vmem [shape: f32[2,16,16,128], index: 0, kind: input, shape index: {}]   ;;  %s17772_s1 = inlined_call_operand.vmem [shape: f32[9,128,128], index: 1, kind: input, shape index: {}]   ;;  %s17773_s2 = inlined_call_operand.vmem [shape: f32[1,128], index: 2, kind: input, shape index: {}]   ;;  %s17774_s3 = inlined_call_operand.vmem [shape: f32[9,128,128], index: 3, kind: input, shape index: {}]   ;;  %s17775_s4 = inlined_call_operand.vmem [shape: f32[1,128], index: 4, kind: input, shape index: {}]   ;;  %s17776_s5 = inlined_call_operand.vmem [shape: f32[9,128,128], index: 5, kind: input, shape index: {}]   ;;  %s17777_s6 = inlined_call_operand.vmem [shape: f32[1,128], index: 6, kind: input, shape index: {}]   ;;  %s17778_s7 = inlined_call_operand.vmem [shape: f32[2,16,128], index: 7, kind: output, shape index: {}]  }
   0x1 LB: > { %s7981_s25 = sadd.s32 4294967295, %s12464_s24   ;;  %p7985_p0 = scmp.ge.s32.totalorder %s12464_s24, 1  ;;  %s12464_s24 = sphi %s12508_s24, %s17_s24  }
   0x2   : > { %p237_p1 = scmp.lt.s32.totalorder %s12464_s24, 3 }
   0x4   : > { %p238_p2 = pnand %p7985_p0, %p237_p1 }
   0x6   : > { %241 = sbr.rel (%p238_p2) target bundleno = 1657 (0x679), region = 48 }
   0xb   : > { %v8005_v0 = vld [vmem:[%s17772_s1 + $0xf8] sm:$0xff]  ;;  %v12525_v2 = vld [vmem:[%s17772_s1 + $0xf0] sm:$0xff]  ;;  %p12529_p3 = scmp.lt.s32.totalorder %s7981_s25, 1  ;;  %v12466_v4 = vmov 0.0   ;;  %v8003_v5 = vld [vmem:[%s17772_s1 + $0xe8] sm:$0xff]  ;;  %vm12467_vm0 = vmmov 0  }
   0xc   : > { %v445_v1 = vld [vmem:[%s17772_s1 + $0x78] sm:$0xff]  ;;  %10028 = vmatprep.subr.mxu0 %v8005_v0  ;;  %v12536_v3 = vld [vmem:[%s17772_s1 + $0x70] sm:$0xff]  ;;  %311 = vst [vmem:[#allocation2] sm:$0xff] %v12466_v4  ;;  %312 = vst [vmem:[#allocation2 + $0x8] sm:$0xff] %v12466_v4  ;;  %10140 = vmatprep.mubr.f32.mxu1 %v12466_v4 }
   0xd   : > { %10108 = vmatprep.subr.mxu1 %v445_v1  ;;  %313 = vst [vmem:[#allocation2 + $0x10] sm:$0x3] %v12466_v4  ;;  %314 = vst [vmem:[#allocation2 + $0x18] sm:$0xff] %v12466_v4  ;;  %10029 = vmatpush3.msra.mxu0 %v8005_v0  ;;  %v443_v6 = vld [vmem:[%s17772_s1 + $0x68] sm:$0xff]  ;;  %s18094_s25 = smov (!%p12529_p3, %s7981_s25), 1  ;;  %v8002_v7 = vld [vmem:[%s17772_s1 + $0xe0] sm:$0xff] }
   0xe   : > { %315 = vst [vmem:[#allocation2 + $0x20] sm:$0xff] %v12466_v4  ;;  %316 = vst [vmem:[#allocation2 + $0x28] sm:$0x3] %v12466_v4  ;;  %10109 = vmatpush3.msra.mxu1 %v445_v1  ;;  %10030 = vmatprep.subr.mxu0 %v12525_v2  ;;  %v442_v8 = vld [vmem:[%s17772_s1 + $0x60] sm:$0xff]  ;;  %s8766_s20 = sshll.u32 %s18094_s25, 8  ;;  %v8001_v9 = vld [vmem:[%s17772_s1 + $0xd8] sm:$0xff] }
   0xf   : > { %317 = vst [vmem:[#allocation2 + $0x30] sm:$0xff] %v12466_v4  ;;  %318 = vst [vmem:[#allocation2 + $0x38] sm:$0xff] %v12466_v4  ;;  %10110 = vmatprep.subr.mxu1 %v12536_v3  ;;  %10031 = vmatpush3.msra.mxu0 %v12525_v2  ;;  %v441_v10 = vld [vmem:[%s17772_s1 + $0x58] sm:$0xff]  ;;  %v8000_v11 = vld [vmem:[%s17772_s1 + $0xd0] sm:$0xff]  ;;  %s12630_s10 = scalar_lea.vmem %s17771_s0, %s8766_s20  ;;  %s8767_s14 = sshll.u32 %s18094_s25, 4 }
  0x10   : > { %319 = vst [vmem:[#allocation2 + $0x40] sm:$0x3] %v12466_v4  ;;  %320 = vst [vmem:[#allocation2 + $0x48] sm:$0xff] %v12466_v4  ;;  %10111 = vmatpush3.msra.mxu1 %v12536_v3  ;;  %10032 = vmatprep.subr.mxu0 %v8003_v5  ;;  %v440_v12 = vld [vmem:[%s17772_s1 + $0x50] sm:$0xff]  ;;  %v7999_v13 = vld [vmem:[%s17772_s1 + $0xc8] sm:$0xff]  ;;  %s16770_s20 = scalar_lea.vmem %s17778_s7, %s8767_s14 }
  0x11   : > { %321 = vst [vmem:[#allocation2 + $0x50] sm:$0xff] %v12466_v4  ;;  %322 = vst [vmem:[#allocation2 + $0x58] sm:$0x3] %v12466_v4  ;;  %10112 = vmatprep.subr.mxu1 %v443_v6  ;;  %10033 = vmatpush3.msra.mxu0 %v8003_v5  ;;  %v439_v14 = vld [vmem:[%s17772_s1 + $0x48] sm:$0xff]  ;;  %v7998_v15 = vld [vmem:[%s17772_s1 + $0xc0] sm:$0xff] }
  0x12   : > { %323 = vst [vmem:[#allocation2 + $0x60] sm:$0xff] %v12466_v4  ;;  %324 = vst [vmem:[#allocation2 + $0x68] sm:$0xff] %v12466_v4  ;;  %10113 = vmatpush3.msra.mxu1 %v443_v6  ;;  %10034 = vmatprep.subr.mxu0 %v8002_v7  ;;  %v12642_v16 = vld [vmem:[%s12630_s10] sm:$0xff]  ;;  %v12649_v18 = vld [vmem:[%s12630_s10 + $0x8] sm:$0xff] }
  0x13   : > { %325 = vst [vmem:[#allocation2 + $0x70] sm:$0x3] %v12466_v4  ;;  %326 = vst [vmem:[#allocation2 + $0x78] sm:$0xff] %v12466_v4  ;;  %10114 = vmatprep.subr.mxu1 %v442_v8  ;;  %10035 = vmatpush3.msra.mxu0 %v8002_v7  ;;  %v438_v17 = vld [vmem:[%s17772_s1 + $0x40] sm:$0xff]  ;;  %v12652_v19 = vld [vmem:[%s12630_s10 + $0x10] sm:$0xff] }
  0x14   : > { %327 = vst [vmem:[#allocation2 + $0x80] sm:$0xff] %v12466_v4  ;;  %328 = vst [vmem:[#allocation2 + $0x88] sm:$0x3] %v12466_v4  ;;  %10115 = vmatpush3.msra.mxu1 %v442_v8  ;;  %10036 = vmatprep.subr.mxu0 %v8001_v9  ;;  %v7997_v20 = vld [vmem:[%s17772_s1 + $0xb8] sm:$0xff]  ;;  %v12663_v22 = vld [vmem:[%s12630_s10 + $0x20] sm:$0xff] }
  0x15   : > { %329 = vst [vmem:[#allocation2 + $0x90] sm:$0xff] %v12466_v4  ;;  %330 = vst [vmem:[#allocation2 + $0x98] sm:$0xff] %v12466_v4  ;;  %10116 = vmatprep.subr.mxu1 %v441_v10  ;;  %10037 = vmatpush3.msra.mxu0 %v8001_v9  ;;  %v12660_v21 = vld [vmem:[%s12630_s10 + $0x18] sm:$0xff]  ;;  %v12671_v24 = vld [vmem:[%s12630_s10 + $0x28] sm:$0xff] }
  0x16   : > { %331 = vst [vmem:[#allocation2 + $0xa0] sm:$0x3] %v12466_v4  ;;  %332 = vst [vmem:[#allocation2 + $0xa8] sm:$0xff] %v12466_v4  ;;  %10117 = vmatpush3.msra.mxu1 %v441_v10  ;;  %10038 = vmatprep.subr.mxu0 %v8000_v11  ;;  %v437_v23 = vld [vmem:[%s17772_s1 + $0x38] sm:$0xff]  ;;  %v12674_v25 = vld [vmem:[%s12630_s10 + $0x30] sm:$0xff] }
  0x17   : > { %333 = vst [vmem:[#allocation2 + $0xb0] sm:$0xff] %v12466_v4  ;;  %334 = vst [vmem:[#allocation2 + $0xb8] sm:$0x3] %v12466_v4  ;;  %10118 = vmatprep.subr.mxu1 %v440_v12  ;;  %10039 = vmatpush3.msra.mxu0 %v8000_v11  ;;  %v7996_v26 = vld [vmem:[%s17772_s1 + $0xb0] sm:$0xff]  ;;  %v12682_v27 = vld [vmem:[%s12630_s10 + $0x38] sm:$0xff] }
  0x18   : > { %335 = vst [vmem:[#allocation2 + $0xc0] sm:$0xff] %v12466_v4  ;;  %336 = vst [vmem:[#allocation2 + $0xc8] sm:$0xff] %v12466_v4  ;;  %10119 = vmatpush3.msra.mxu1 %v440_v12  ;;  %10040 = vmatprep.subr.mxu0 %v7999_v13  ;;  %v12685_v28 = vld [vmem:[%s12630_s10 + $0x40] sm:$0xff]  ;;  %v436_v29 = vld [vmem:[%s17772_s1 + $0x30] sm:$0xff] }
  0x19   : > { %337 = vst [vmem:[#allocation2 + $0xd0] sm:$0x3] %v12466_v4  ;;  %338 = vst [vmem:[#allocation2 + $0xd8] sm:$0xff] %v12466_v4  ;;  %10120 = vmatprep.subr.mxu1 %v439_v14  ;;  %10041 = vmatpush3.msra.mxu0 %v7999_v13  ;;  %v12693_v30 = vld [vmem:[%s12630_s10 + $0x48] sm:$0xff]  ;;  %v12696_v31 = vld [vmem:[%s12630_s10 + $0x50] sm:$0xff] }
  0x1a   : > { %339 = vst [vmem:[#allocation2 + $0xe0] sm:$0xff] %v12466_v4  ;;  %340 = vst [vmem:[#allocation2 + $0xe8] sm:$0x3] %v12466_v4  ;;  %10121 = vmatpush3.msra.mxu1 %v439_v14  ;;  %10042 = vmatprep.subr.mxu0 %v7998_v15  ;;  %v7995_v32 = vld [vmem:[%s17772_s1 + $0xa8] sm:$0xff]  ;;  %v12704_v33 = vld [vmem:[%s12630_s10 + $0x58] sm:$0xff] }
  0x1b   : > { %341 = vst [vmem:[#allocation2 + $0xf0] sm:$0xff] %v12466_v4  ;;  %342 = vst [vmem:[#allocation2 + $0xf8] sm:$0xff] %v12466_v4  ;;  %10122 = vmatprep.subr.mxu1 %v438_v17  ;;  %10043 = vmatpush3.msra.mxu0 %v7998_v15  ;;  %v12707_v34 = vld [vmem:[%s12630_s10 + $0x60] sm:$0xff]  ;;  %v435_v35 = vld [vmem:[%s17772_s1 + $0x28] sm:$0xff] }
  0x1c   : > { %343 = vst [vmem:[#allocation2 + $0x100] sm:$0x3] %v12466_v4  ;;  %344 = vst [vmem:[#allocation2 + $0x108] sm:$0xff] %v12466_v4  ;;  %10123 = vmatpush3.msra.mxu1 %v438_v17  ;;  %10044 = vmatprep.subr.mxu0 %v7997_v20  ;;  %v12715_v36 = vld [vmem:[%s12630_s10 + $0x68] sm:$0xff]  ;;  %v12718_v37 = vld [vmem:[%s12630_s10 + $0x70] sm:$0xff] }
  0x1d   : > { %345 = vst [vmem:[#allocation2 + $0x110] sm:$0xff] %v12466_v4  ;;  %346 = vst [vmem:[#allocation2 + $0x118] sm:$0x3] %v12466_v4  ;;  %10124 = vmatprep.subr.mxu1 %v437_v23  ;;  %10045 = vmatpush3.msra.mxu0 %v7997_v20  ;;  %v12723_v38 = vld [vmem:[%s12630_s10 + $0x78] sm:$0xff]  ;;  %v7994_v39 = vld [vmem:[%s17772_s1 + $0xa0] sm:$0xff] }
  0x1e   : > { %347 = vst [vmem:[#allocation2 + $0x120] sm:$0xff] %v12466_v4  ;;  %348 = vst [vmem:[#allocation2 + $0x128] sm:$0xff] %v12466_v4  ;;  %10125 = vmatpush3.msra.mxu1 %v437_v23  ;;  %10046 = vmatprep.subr.mxu0 %v7996_v26  ;;  %v434_v40 = vld [vmem:[%s17772_s1 + $0x20] sm:$0xff]  ;;  %v7993_v42 = vld [vmem:[%s17772_s1 + $0x98] sm:$0xff] }
  0x1f   : > { %349 = vst [vmem:[#allocation2 + $0x130] sm:$0x3] %v12466_v4  ;;  %350 = vst [vmem:[#allocation2 + $0x138] sm:$0xff] %v12466_v4  ;;  %10126 = vmatprep.subr.mxu1 %v436_v29  ;;  %10047 = vmatpush3.msra.mxu0 %v7996_v26  ;;  %v12733_v41 = vld [vmem:[%s12630_s10 + $0x80] sm:$0xff]  ;;  %v433_v43 = vld [vmem:[%s17772_s1 + $0x18] sm:$0xff] }
  0x20   : > { %351 = vst [vmem:[#allocation2 + $0x140] sm:$0xff] %v12466_v4  ;;  %352 = vst [vmem:[#allocation2 + $0x148] sm:$0x3] %v12466_v4  ;;  %10127 = vmatpush3.msra.mxu1 %v436_v29  ;;  %10048 = vmatprep.subr.mxu0 %v7995_v32  ;;  %v12743_v44 = vld [vmem:[%s12630_s10 + $0x88] sm:$0xff]  ;;  %v7992_v45 = vld [vmem:[%s17772_s1 + $0x90] sm:$0xff] }
  0x21   : > { %353 = vst [vmem:[#allocation2 + $0x150] sm:$0xff] %v12466_v4  ;;  %354 = vst [vmem:[#allocation2 + $0x158] sm:$0xff] %v12466_v4  ;;  %10128 = vmatprep.subr.mxu1 %v435_v35  ;;  %10049 = vmatpush3.msra.mxu0 %v7995_v32  ;;  %v432_v46 = vld [vmem:[%s17772_s1 + $0x10] sm:$0xff]  ;;  %v7991_v47 = vld [vmem:[%s17772_s1 + $0x88] sm:$0xff] }
  0x22   : > { %355 = vst [vmem:[#allocation2 + $0x160] sm:$0x3] %v12466_v4  ;;  %356 = vst [vmem:[#allocation2 + $0x168] sm:$0xff] %v12466_v4  ;;  %10129 = vmatpush3.msra.mxu1 %v435_v35  ;;  %10050 = vmatprep.subr.mxu0 %v7994_v39  ;;  %v431_v48 = vld [vmem:[%s17772_s1 + $0x8] sm:$0xff]  ;;  %v12759_v49 = vld [vmem:[%s12630_s10 + $0x90] sm:$0xff] }
  0x23   : > { %357 = vst [vmem:[#allocation2 + $0x170] sm:$0xff] %v12466_v4  ;;  %358 = vst [vmem:[#allocation2 + $0x178] sm:$0x3] %v12466_v4  ;;  %10130 = vmatprep.subr.mxu1 %v434_v40  ;;  %10051 = vmatpush3.msra.mxu0 %v7994_v39  ;;  %v12763_v50 = vld [vmem:[%s12630_s10 + $0x98] sm:$0xff]  ;;  %v7990_v51 = vld [vmem:[%s17772_s1 + $0x80] sm:$0xff] }
  0x24   : > { %359 = vst [vmem:[#allocation2 + $0x180] sm:$0xff] %v12466_v4  ;;  %360 = vst [vmem:[#allocation2 + $0x188] sm:$0xff] %v12466_v4  ;;  %10131 = vmatpush3.msra.mxu1 %v434_v40  ;;  %10052 = vmatprep.subr.mxu0 %v7993_v42  ;;  %v430_v52 = vld [vmem:[%s17772_s1] sm:$0xff]  ;;  %v12777_v55 = vld [vmem:[%s12630_s10 + $0xa8] sm:$0xff] }
  0x25   : > { %361 = vst [vmem:[#allocation2 + $0x190] sm:$0x3] %v12466_v4  ;;  %362 = vst [vmem:[#allocation2 + $0x198] sm:$0xff] %v12466_v4  ;;  %10132 = vmatprep.subr.mxu1 %v433_v43  ;;  %10053 = vmatpush3.msra.mxu0 %v7993_v42  ;;  %v12773_v53 = vld [vmem:[%s12630_s10 + $0xa0] sm:$0xff]  ;;  %v447_v56 = vld [vmem:[#allocation2 + $0x9] sm:$0xff] }
  0x26   : > { %363 = vst [vmem:[#allocation2 + $0x1a0] sm:$0xff] %v12466_v4  ;;  %364 = vst [vmem:[#allocation2 + $0x1a8] sm:$0x3] %v12466_v4  ;;  %10133 = vmatpush3.msra.mxu1 %v433_v43  ;;  %10054 = vmatprep.subr.mxu0 %v7992_v45  ;;  %v446_v54 = vld [vmem:[#allocation2 + $0x1] sm:$0xff]  ;;  %v12781_v57 = vld [vmem:[%s12630_s10 + $0xb0] sm:$0xff] }
  0x27   : > { %366 = vst [vmem:[#allocation2 + $0x19] sm:$0xff] %v12642_v16  ;;  %367 = vst [vmem:[#allocation2 + $0x21] sm:$0xff] %v12649_v18  ;;  %10134 = vmatprep.subr.mxu1 %v432_v46  ;;  %10055 = vmatpush3.msra.mxu0 %v7992_v45  ;;  %v12784_v58 = vld [vmem:[%s12630_s10 + $0xb8] sm:$0xff]  ;;  %v12792_v60 = vld [vmem:[%s12630_s10 + $0xc0] sm:$0xff] }
  0x28   : > { %368 = vst [vmem:[#allocation2 + $0x31] sm:$0xff] %v12652_v19  ;;  %369 = vst [vmem:[#allocation2 + $0x39] sm:$0xff] %v12660_v21  ;;  %10135 = vmatpush3.msra.mxu1 %v432_v46  ;;  %10056 = vmatprep.subr.mxu0 %v7991_v47  ;;  %v8021_v59 = vld [vmem:[%s17772_s1 + $0x178] sm:$0xff]  ;;  %v12799_v62 = vld [vmem:[%s12630_s10 + $0xc8] sm:$0xff] }
  0x29   : > { %370 = vst [vmem:[#allocation2 + $0x49] sm:$0xff] %v12663_v22  ;;  %371 = vst [vmem:[#allocation2 + $0x51] sm:$0xff] %v12671_v24  ;;  %10136 = vmatprep.subr.mxu1 %v431_v48  ;;  %10057 = vmatpush3.msra.mxu0 %v7991_v47  ;;  %v8020_v63 = vld [vmem:[%s17772_s1 + $0x170] sm:$0xff]  ;;  %v8037_v0 = vld [vmem:[%s17772_s1 + $0x1f8] sm:$0xff] }
  0x2a   : > { %372 = vst [vmem:[#allocation2 + $0x61] sm:$0xff] %v12674_v25  ;;  %373 = vst [vmem:[#allocation2 + $0x69] sm:$0xff] %v12682_v27  ;;  %10137 = vmatpush3.msra.mxu1 %v431_v48  ;;  %10058 = vmatprep.subr.mxu0 %v7990_v51  ;;  %v12810_v1 = vld [vmem:[%s12630_s10 + $0xd0] sm:$0xff]  ;;  %v12817_v3 = vld [vmem:[%s12630_s10 + $0xd8] sm:$0xff] }
  0x2b   : > { %374 = vst [vmem:[#allocation2 + $0x79] sm:$0xff] %v12685_v28  ;;  %375 = vst [vmem:[#allocation2 + $0x81] sm:$0xff] %v12693_v30  ;;  %10138 = vmatprep.subr.mxu1 %v430_v52  ;;  %10059 = vmatpush3.msra.mxu0 %v7990_v51  ;;  %v8019_v5 = vld [vmem:[%s17772_s1 + $0x168] sm:$0xff]  ;;  %v12827_v7 = vld [vmem:[%s12630_s10 + $0xe0] sm:$0xff] }
  0x2c   : > { %376 = vst [vmem:[#allocation2 + $0x91] sm:$0xff] %v12696_v31  ;;  %377 = vst [vmem:[#allocation2 + $0x99] sm:$0xff] %v12704_v33  ;;  %10060 = vmatprep.mubr.f32.mxu0 %v446_v54  ;;  %10139 = vmatpush3.msra.mxu1 %v430_v52  ;;  %v12830_v8 = vld [vmem:[%s12630_s10 + $0xe8] sm:$0xff]  ;;  %v8018_v13 = vld [vmem:[%s17772_s1 + $0x160] sm:$0xff] }
  0x2d   : > { %378 = vst [vmem:[#allocation2 + $0xa9] sm:$0xff] %v12707_v34  ;;  %379 = vst [vmem:[#allocation2 + $0xb1] sm:$0xff] %v12715_v36  ;;  %10061 = vmatmul.mubr.f32.vlgmr.msra.gmra.mxu0 %v447_v56  ;;  %10141 = vmatmul.mubr.f32.vlgmr.msra.gmra.mxu1 %v12466_v4  ;;  %v12839_v10 = vld [vmem:[#allocation2 + $0x2] sm:$0xff]  ;;  %v12845_v12 = vld [vmem:[#allocation2 + $0xa] sm:$0xff] }
  0x2e   : > { %380 = vst [vmem:[#allocation2 + $0xc1] sm:$0xff] %v12718_v37  ;;  %381 = vst [vmem:[#allocation2 + $0xc9] sm:$0xff] %v12723_v38  ;;  %v12795_v61 = vld [vmem:[#allocation2 + $0x18] sm:$0xff]  ;;  %10188 = vmatprep.subr.mxu0 %v8021_v59  ;;  %10063 = vmatprep.mubr.f32.mxu0 %v12642_v16  ;;  %v12813_v2 = vld [vmem:[#allocation2 + $0x20] sm:$0xff] }
  0x2f   : > { %382 = vst [vmem:[#allocation2 + $0xd9] sm:$0xff] %v12733_v41  ;;  %383 = vst [vmem:[#allocation2 + $0xe1] sm:$0xff] %v12743_v44  ;;  %10189 = vmatpush3.msra.mxu0 %v8021_v59  ;;  %10143 = vmatprep.mubr.f32.mxu1 %v12795_v61  ;;  %v12824_v6 = vld [vmem:[#allocation2 + $0x30] sm:$0xff]  ;;  %v12837_v9 = vld [vmem:[#allocation2 + $0x38] sm:$0xff] }
  0x30   : > { %384 = vst [vmem:[#allocation2 + $0xf1] sm:$0xff] %v12759_v49  ;;  %385 = vst [vmem:[#allocation2 + $0xf9] sm:$0xff] %v12763_v50  ;;  %10190 = vmatprep.subr.mxu0 %v8020_v63  ;;  %10268 = vmatprep.subr.mxu1 %v8037_v0  ;;  %v12842_v11 = vld [vmem:[#allocation2 + $0x48] sm:$0xff]  ;;  %v8036_v14 = vld [vmem:[%s17772_s1 + $0x1f0] sm:$0xff] }
  0x31   : > { %386 = vst [vmem:[#allocation2 + $0x109] sm:$0xff] %v12773_v53  ;;  %387 = vst [vmem:[#allocation2 + $0x111] sm:$0xff] %v12777_v55  ;;  %10064 = vmatmul.mubr.f32.gmra.mxu0 %v12649_v18  ;;  %10144 = vmatmul.mubr.f32.gmra.mxu1 %v12813_v2  ;;  %v12855_v15 = vld [vmem:[#allocation2 + $0x1a] sm:$0xff]  ;;  %v12860_v17 = vld [vmem:[#allocation2 + $0x22] sm:$0xff] }
  0x32   : > { %17815 = vst [vmem:[#allocation4_spill] sm:$0xff] %v12784_v58  ;;  %388 = vst [vmem:[#allocation2 + $0x121] sm:$0xff] %v12781_v57  ;;  %10191 = vmatpush3.msra.mxu0 %v8020_v63  ;;  %10066 = vmatprep.mubr.f32.mxu0 %v12652_v19  ;;  %v12865_v20 = vld [vmem:[#allocation2 + $0x50] sm:$0xff]  ;;  %v12869_v23 = vld [vmem:[#allocation2 + $0x60] sm:$0xff] }
  0x33   : > { %389 = vst [vmem:[#allocation2 + $0x129] sm:$0xff] %v12784_v58  ;;  %17816 = vst [vmem:[#allocation5_spill] sm:$0xff] %v12792_v60  ;;  %10146 = vmatprep.mubr.f32.mxu1 %v12824_v6  ;;  %10192 = vmatprep.subr.mxu0 %v8019_v5  ;;  %v8017_v26 = vld [vmem:[%s17772_s1 + $0x158] sm:$0xff]  ;;  %v8035_v29 = vld [vmem:[%s17772_s1 + $0x1e8] sm:$0xff] }
  0x34   : > { %390 = vst [vmem:[#allocation2 + $0x139] sm:$0xff] %v12792_v60  ;;  %17817 = vst [vmem:[#allocation6_spill] sm:$0xff] %v12799_v62  ;;  %10193 = vmatpush3.msra.mxu0 %v8019_v5  ;;  %10269 = vmatpush3.msra.mxu1 %v8037_v0  ;;  %v12882_v32 = vld [vmem:[#allocation2 + $0x68] sm:$0xff]  ;;  %v8016_v35 = vld [vmem:[%s17772_s1 + $0x150] sm:$0xff] }
  0x35   : > { %391 = vst [vmem:[#allocation2 + $0x141] sm:$0xff] %v12799_v62  ;;  %17818 = vst [vmem:[#allocation7_spill] sm:$0xff] %v12810_v1  ;;  %10067 = vmatmul.mubr.f32.gmra.mxu0 %v12660_v21  ;;  %10147 = vmatmul.mubr.f32.gmra.mxu1 %v12837_v9  ;;  %v8034_v39 = vld [vmem:[%s17772_s1 + $0x1e0] sm:$0xff]  ;;  %v12898_v42 = vld [vmem:[#allocation2 + $0x90] sm:$0xff] }
  0x36   : > { %392 = vst [vmem:[#allocation2 + $0x151] sm:$0xff] %v12810_v1  ;;  %393 = vst [vmem:[#allocation2 + $0x159] sm:$0xff] %v12817_v3  ;;  %10069 = vmatprep.mubr.f32.mxu0 %v12663_v22  ;;  %10149 = vmatprep.mubr.f32.mxu1 %v12842_v11  ;;  %v12896_v40 = vld [vmem:[#allocation2 + $0x80] sm:$0xff]  ;;  %v8015_v43 = vld [vmem:[%s17772_s1 + $0x148] sm:$0xff] }
  0x37   : > { %17819 = vst [vmem:[#allocation8_spill] sm:$0xff] %v12827_v7  ;;  %394 = vst [vmem:[#allocation2 + $0x169] sm:$0xff] %v12827_v7  ;;  %10194 = vmatprep.subr.mxu0 %v8018_v13  ;;  %10270 = vmatprep.subr.mxu1 %v8036_v14  ;;  %v8033_v45 = vld [vmem:[%s17772_s1 + $0x1d8] sm:$0xff]  ;;  %v12912_v47 = vld [vmem:[#allocation2 + $0xa8] sm:$0xff] }
  0x38   : > { %395 = vst [vmem:[#allocation2 + $0x171] sm:$0xff] %v12830_v8  ;;  %3311 = vst [vmem:[#allocation2] sm:$0xff] %v12466_v4  ;;  %10195 = vmatpush3.msra.mxu0 %v8018_v13  ;;  %10271 = vmatpush3.msra.mxu1 %v8036_v14  ;;  %v12910_v46 = vld [vmem:[#allocation2 + $0x98] sm:$0xff]  ;;  %v8014_v48 = vld [vmem:[%s17772_s1 + $0x140] sm:$0xff] }
  0x39   : > { %3312 = vst [vmem:[#allocation2 + $0x8] sm:$0xff] %v12466_v4  ;;  %3313 = vst [vmem:[#allocation2 + $0x10] sm:$0x3] %v12466_v4  ;;  %10070 = vmatmul.mubr.f32.gmra.mxu0 %v12671_v24  ;;  %10150 = vmatmul.mubr.f32.gmra.mxu1 %v12865_v20  ;;  %v8032_v51 = vld [vmem:[%s17772_s1 + $0x1d0] sm:$0xff]  ;;  %v12926_v54 = vld [vmem:[#allocation2 + $0xc0] sm:$0xff] }
  0x3a   : > { %4663 = vst [vmem:[#allocation2 + $0x10] sm:$0x3] %v12466_v4  ;;  %3314 = vst [vmem:[#allocation2 + $0x18] sm:$0xff] %v12466_v4  ;;  %10072 = vmatprep.mubr.f32.mxu0 %v12674_v25  ;;  %10152 = vmatprep.mubr.f32.mxu1 %v12869_v23  ;;  %v12924_v52 = vld [vmem:[#allocation2 + $0xb0] sm:$0xff]  ;;  %v8013_v56 = vld [vmem:[%s17772_s1 + $0x138] sm:$0xff] }
  0x3b   : > { %3315 = vst [vmem:[#allocation2 + $0x20] sm:$0xff] %v12466_v4  ;;  %3316 = vst [vmem:[#allocation2 + $0x28] sm:$0x3] %v12466_v4  ;;  %10196 = vmatprep.subr.mxu0 %v8017_v26  ;;  %10272 = vmatprep.subr.mxu1 %v8035_v29  ;;  %v8031_v59 = vld [vmem:[%s17772_s1 + $0x1c8] sm:$0xff]  ;;  %v12937_v63 = vld [vmem:[%s12630_s10 + $0xf0] sm:$0xff] }
  0x3c   : > { %4666 = vst [vmem:[#allocation2 + $0x28] sm:$0x3] %v12466_v4  ;;  %v12884_v4 = vld [vmem:[#allocation2 + $0x78] sm:$0xff]  ;;  %10197 = vmatpush3.msra.mxu0 %v8017_v26  ;;  %10273 = vmatpush3.msra.mxu1 %v8035_v29  ;;  %17820 = vst [vmem:[#allocation9_spill] sm:$0xff] %v12937_v63  ;;  %v12941_v0 = vld [vmem:[#allocation2 + $0xc8] sm:$0xff] }
  0x3d   : > { %10073 = vmatmul.mubr.f32.gmra.mxu0 %v12682_v27  ;;  %10153 = vmatmul.mubr.f32.gmra.mxu1 %v12882_v32  ;;  %396 = vst [vmem:[#allocation2 + $0x181] sm:$0xff] %v12937_v63  ;;  %v12945_v5 = vld [vmem:[%s12630_s10 + $0xf8] sm:$0xff]  ;;  %v8012_v14 = vld [vmem:[%s17772_s1 + $0x130] sm:$0xff]  ;;  %v8030_v26 = vld [vmem:[%s17772_s1 + $0x1c0] sm:$0xff] }
  0x3e   : > { %10075 = vmatprep.mubr.f32.mxu0 %v12685_v28  ;;  %10155 = vmatprep.mubr.f32.mxu1 %v12884_v4  ;;  %17821 = vst [vmem:[#allocation10_spill] sm:$0xff] %v12945_v5  ;;  %v12947_v13 = vld [vmem:[#allocation2 + $0xd8] sm:$0xff]  ;;  %397 = vst [vmem:[#allocation2 + $0x189] sm:$0xff] %v12945_v5  ;;  %v12960_v29 = vld [vmem:[#allocation2 + $0xe0] sm:$0xff] }
  0x3f   : > { %10198 = vmatprep.subr.mxu0 %v8016_v35  ;;  %10274 = vmatprep.subr.mxu1 %v8034_v39  ;;  %v8026_v5 = vld [vmem:[%s17772_s1 + $0x1a0] sm:$0xff] }
  0x40   : > { %10199 = vmatpush3.msra.mxu0 %v8016_v35  ;;  %10275 = vmatpush3.msra.mxu1 %v8034_v39  ;;  %v12962_v35 = vld [vmem:[#allocation2 + $0xf0] sm:$0xff]  ;;  %v8011_v39 = vld [vmem:[%s17772_s1 + $0x128] sm:$0xff]  ;;  %v13016_v63 = vld [vmem:[#allocation2 + $0x140] sm:$0xff] }
  0x41   : > { %10076 = vmatmul.mubr.f32.gmra.mxu0 %v12693_v30  ;;  %10156 = vmatmul.mubr.f32.gmra.mxu1 %v12896_v40 }
  0x42   : > { %10078 = vmatprep.mubr.f32.mxu0 %v12696_v31  ;;  %10158 = vmatprep.mubr.f32.mxu1 %v12898_v42 }
  0x43   : > { %10200 = vmatprep.subr.mxu0 %v8015_v43  ;;  %10276 = vmatprep.subr.mxu1 %v8033_v45 }
  0x44   : > { %10201 = vmatpush3.msra.mxu0 %v8015_v43  ;;  %10277 = vmatpush3.msra.mxu1 %v8033_v45  ;;  %v8029_v43 = vld [vmem:[%s17772_s1 + $0x1b8] sm:$0xff] }
  0x45   : > { %10079 = vmatmul.mubr.f32.gmra.mxu0 %v12704_v33  ;;  %10159 = vmatmul.mubr.f32.gmra.mxu1 %v12910_v46  ;;  %v12974_v45 = vld [vmem:[#allocation2 + $0xf8] sm:$0xff] }
  0x46   : > { %10081 = vmatprep.mubr.f32.mxu0 %v12707_v34  ;;  %10161 = vmatprep.mubr.f32.mxu1 %v12912_v47 }
  0x47   : > { %10202 = vmatprep.subr.mxu0 %v8014_v48  ;;  %10278 = vmatprep.subr.mxu1 %v8032_v51 }
  0x48   : > { %10203 = vmatpush3.msra.mxu0 %v8014_v48  ;;  %10279 = vmatpush3.msra.mxu1 %v8032_v51  ;;  %v12976_v48 = vld [vmem:[#allocation2 + $0x108] sm:$0xff]  ;;  %v8010_v51 = vld [vmem:[%s17772_s1 + $0x120] sm:$0xff] }
  0x49   : > { %10082 = vmatmul.mubr.f32.gmra.mxu0 %v12715_v36  ;;  %10162 = vmatmul.mubr.f32.gmra.mxu1 %v12924_v52 }
  0x4a   : > { %10084 = vmatprep.mubr.f32.mxu0 %v12718_v37  ;;  %10164 = vmatprep.mubr.f32.mxu1 %v12926_v54 }
  0x4b   : > { %10204 = vmatprep.subr.mxu0 %v8013_v56  ;;  %10280 = vmatprep.subr.mxu1 %v8031_v59 }
  0x4c   : > { %10205 = vmatpush3.msra.mxu0 %v8013_v56  ;;  %10281 = vmatpush3.msra.mxu1 %v8031_v59  ;;  %v8028_v56 = vld [vmem:[%s17772_s1 + $0x1b0] sm:$0xff] }
  0x4d   : > { %10085 = vmatmul.mubr.f32.gmra.mxu0 %v12723_v38  ;;  %10165 = vmatmul.mubr.f32.gmra.mxu1 %v12941_v0  ;;  %v12988_v59 = vld [vmem:[#allocation2 + $0x110] sm:$0xff] }
  0x4e   : > { %10087 = vmatprep.mubr.f32.mxu0 %v12733_v41  ;;  %10167 = vmatprep.mubr.f32.mxu1 %v12947_v13 }
  0x4f   : > { %10206 = vmatprep.subr.mxu0 %v8012_v14  ;;  %10282 = vmatprep.subr.mxu1 %v8030_v26 }
  0x50   : > { %10207 = vmatpush3.msra.mxu0 %v8012_v14  ;;  %10283 = vmatpush3.msra.mxu1 %v8030_v26  ;;  %v12990_v14 = vld [vmem:[#allocation2 + $0x120] sm:$0xff]  ;;  %v8009_v26 = vld [vmem:[%s17772_s1 + $0x118] sm:$0xff] }
  0x51   : > { %10088 = vmatmul.mubr.f32.gmra.mxu0 %v12743_v44  ;;  %10168 = vmatmul.mubr.f32.gmra.mxu1 %v12960_v29 }
  0x52   : > { %10090 = vmatprep.mubr.f32.mxu0 %v12759_v49  ;;  %10170 = vmatprep.mubr.f32.mxu1 %v12962_v35 }
  0x53   : > { %10208 = vmatprep.subr.mxu0 %v8011_v39  ;;  %10284 = vmatprep.subr.mxu1 %v8029_v43 }
  0x54   : > { %10209 = vmatpush3.msra.mxu0 %v8011_v39  ;;  %10285 = vmatpush3.msra.mxu1 %v8029_v43  ;;  %v8027_v39 = vld [vmem:[%s17772_s1 + $0x1a8] sm:$0xff] }
  0x55   : > { %10091 = vmatmul.mubr.f32.gmra.mxu0 %v12763_v50  ;;  %10171 = vmatmul.mubr.f32.gmra.mxu1 %v12974_v45  ;;  %v13002_v43 = vld [vmem:[#allocation2 + $0x128] sm:$0xff] }
  0x56   : > { %10093 = vmatprep.mubr.f32.mxu0 %v12773_v53  ;;  %10173 = vmatprep.mubr.f32.mxu1 %v12976_v48 }
  0x57   : > { %10210 = vmatprep.subr.mxu0 %v8010_v51  ;;  %10286 = vmatprep.subr.mxu1 %v8028_v56 }
  0x58   : > { %10211 = vmatpush3.msra.mxu0 %v8010_v51  ;;  %10287 = vmatpush3.msra.mxu1 %v8028_v56  ;;  %v13004_v51 = vld [vmem:[#allocation2 + $0x138] sm:$0xff]  ;;  %v8008_v56 = vld [vmem:[%s17772_s1 + $0x110] sm:$0xff] }
  0x59   : > { %10094 = vmatmul.mubr.f32.gmra.mxu0 %v12777_v55  ;;  %10174 = vmatmul.mubr.f32.gmra.mxu1 %v12988_v59 }
  0x5a   : > { %10096 = vmatprep.mubr.f32.mxu0 %v12781_v57  ;;  %10176 = vmatprep.mubr.f32.mxu1 %v12990_v14 }
  0x5b   : > { %10212 = vmatprep.subr.mxu0 %v8009_v26  ;;  %10288 = vmatprep.subr.mxu1 %v8027_v39 }
  0x5c   : > { %10213 = vmatpush3.msra.mxu0 %v8009_v26  ;;  %10289 = vmatpush3.msra.mxu1 %v8027_v39  ;;  %v13018_v26 = vld [vmem:[#allocation2 + $0x150] sm:$0xff]  ;;  %v8007_v39 = vld [vmem:[%s17772_s1 + $0x108] sm:$0xff] }
  0x5d   : > { %10097 = vmatmul.mubr.f32.gmra.mxu0 %v12784_v58  ;;  %10177 = vmatmul.mubr.f32.gmra.mxu1 %v13002_v43  ;;  %v8025_v58 = vld [vmem:[%s17772_s1 + $0x198] sm:$0xff] }
  0x5e   : > { %10099 = vmatprep.mubr.f32.mxu0 %v12792_v60  ;;  %10179 = vmatprep.mubr.f32.mxu1 %v13004_v51  ;;  %v13030_v60 = vld [vmem:[#allocation2 + $0x158] sm:$0xff] }
  0x5f   : > { %10214 = vmatprep.subr.mxu0 %v8008_v56  ;;  %10290 = vmatprep.subr.mxu1 %v8026_v5 }
  0x60   : > { %10215 = vmatpush3.msra.mxu0 %v8008_v56  ;;  %10291 = vmatpush3.msra.mxu1 %v8026_v5  ;;  %v13032_v56 = vld [vmem:[#allocation2 + $0x168] sm:$0xff]  ;;  %v8006_v5 = vld [vmem:[%s17772_s1 + $0x100] sm:$0xff] }
  0x61   : > { %10100 = vmatmul.mubr.f32.gmra.mxu0 %v12799_v62  ;;  %10180 = vmatmul.mubr.f32.gmra.mxu1 %v13016_v63  ;;  %v8024_v62 = vld [vmem:[%s17772_s1 + $0x190] sm:$0xff] }
  0x62   : > { %10102 = vmatprep.mubr.f32.mxu0 %v12810_v1  ;;  %10182 = vmatprep.mubr.f32.mxu1 %v13018_v26  ;;  %v13044_v1 = vld [vmem:[#allocation2 + $0x170] sm:$0xff] }
  0x63   : > { %10216 = vmatprep.subr.mxu0 %v8007_v39  ;;  %10292 = vmatprep.subr.mxu1 %v8025_v58 }
  0x64   : > { %10217 = vmatpush3.msra.mxu0 %v8007_v39  ;;  %10293 = vmatpush3.msra.mxu1 %v8025_v58  ;;  %v8023_v58 = vld [vmem:[%s17772_s1 + $0x188] sm:$0xff]  ;;  %v8053_v39 = vld [vmem:[%s17772_s1 + $0x278] sm:$0xff] }
  0x65   : > { %10103 = vmatmul.mubr.f32.gmra.mxu0 %v12817_v3  ;;  %10183 = vmatmul.mubr.f32.gmra.mxu1 %v13030_v60 }
  0x66   : > { %10105 = vmatprep.mubr.f32.mxu0 %v12827_v7  ;;  %10185 = vmatprep.mubr.f32.mxu1 %v13032_v56  ;;  %v8022_v7 = vld [vmem:[%s17772_s1 + $0x180] sm:$0xff] }
  0x67   : > { %10218 = vmatprep.subr.mxu0 %v8006_v5  ;;  %10294 = vmatprep.subr.mxu1 %v8024_v62 }
  0x68   : > { %10219 = vmatpush3.msra.mxu0 %v8006_v5  ;;  %10295 = vmatpush3.msra.mxu1 %v8024_v62  ;;  %v8052_v62 = vld [vmem:[%s17772_s1 + $0x270] sm:$0xff]  ;;  %v8051_v5 = vld [vmem:[%s17772_s1 + $0x268] sm:$0xff] }
  0x69   : > { %10106 = vmatmul.mubr.f32.gmra.mxu0 %v12830_v8  ;;  %10186 = vmatmul.mubr.f32.gmra.mxu1 %v13044_v1 }
  0x6a   : > { %10296 = vmatprep.subr.mxu1 %v8023_v58  ;;  %10220 = vmatprep.mubr.f32.mxu0 %v12839_v10  ;;  %v13068_v10 = vld [vmem:[#allocation2 + $0x32] sm:$0xff] }
  0x6b   : > { %10297 = vmatpush3.msra.mxu1 %v8023_v58  ;;  %10348 = vmatprep.subr.mxu0 %v8053_v39  ;;  %v13097_v58 = vld [vmem:[#allocation2 + $0x62] sm:$0xff] }
  0x6c   : > { %10298 = vmatprep.subr.mxu1 %v8022_v7  ;;  %10300 = vmatprep.mubr.f32.mxu1 %v12795_v61  ;;  %v8050_v61 = vld [vmem:[%s17772_s1 + $0x260] sm:$0xff] }
  0x6d   : > { %10221 = vmatmul.mubr.f32.vlgmr.msra.gmra.mxu0 %v12845_v12  ;;  %10299 = vmatpush3.msra.mxu1 %v8022_v7  ;;  %v13080_v7 = vld [vmem:[#allocation2 + $0x3a] sm:$0xff] }
  0x6e   : > { %10349 = vmatpush3.msra.mxu0 %v8053_v39  ;;  %10301 = vmatmul.mubr.f32.vlgmr.msra.gmra.mxu1 %v12813_v2  ;;  %v8069_v2 = vld [vmem:[%s17772_s1 + $0x2f8] sm:$0xff]  ;;  %v8048_v39 = vld [vmem:[%s17772_s1 + $0x250] sm:$0xff] }
  0x6f   : > { %10223 = vmatprep.mubr.f32.mxu0 %v12855_v15  ;;  %10350 = vmatprep.subr.mxu0 %v8052_v62  ;;  %v8049_v12 = vld [vmem:[%s17772_s1 + $0x258] sm:$0xff] }
  0x70   : > { %10303 = vmatprep.mubr.f32.mxu1 %v12824_v6  ;;  %10351 = vmatpush3.msra.mxu0 %v8052_v62  ;;  %v13083_v6 = vld [vmem:[#allocation2 + $0x4a] sm:$0xff]  ;;  %v13111_v62 = vld [vmem:[#allocation2 + $0x7a] sm:$0xff] }
  0x71   : > { %10224 = vmatmul.mubr.f32.gmra.mxu0 %v12860_v17  ;;  %10352 = vmatprep.subr.mxu0 %v8051_v5 }
  0x72   : > { %10304 = vmatmul.mubr.f32.gmra.mxu1 %v12837_v9  ;;  %10226 = vmatprep.mubr.f32.mxu0 %v13068_v10  ;;  %v8068_v9 = vld [vmem:[%s17772_s1 + $0x2f0] sm:$0xff] }
  0x73   : > { %10306 = vmatprep.mubr.f32.mxu1 %v12842_v11  ;;  %10353 = vmatpush3.msra.mxu0 %v8051_v5  ;;  %v13094_v11 = vld [vmem:[#allocation2 + $0x52] sm:$0xff]  ;;  %v8047_v5 = vld [vmem:[%s17772_s1 + $0x248] sm:$0xff] }
  0x74   : > { %10354 = vmatprep.subr.mxu0 %v8050_v61  ;;  %10428 = vmatprep.subr.mxu1 %v8069_v2 }
  0x75   : > { %10227 = vmatmul.mubr.f32.gmra.mxu0 %v13080_v7  ;;  %10429 = vmatpush3.msra.mxu1 %v8069_v2  ;;  %v8046_v2 = vld [vmem:[%s17772_s1 + $0x240] sm:$0xff] }
  0x76   : > { %10307 = vmatmul.mubr.f32.gmra.mxu1 %v12865_v20  ;;  %10229 = vmatprep.mubr.f32.mxu0 %v13083_v6  ;;  %v8067_v20 = vld [vmem:[%s17772_s1 + $0x2e8] sm:$0xff] }
  0x77   : > { %10309 = vmatprep.mubr.f32.mxu1 %v12869_v23  ;;  %10355 = vmatpush3.msra.mxu0 %v8050_v61  ;;  %v13108_v23 = vld [vmem:[#allocation2 + $0x6a] sm:$0xff]  ;;  %v13125_v61 = vld [vmem:[#allocation2 + $0x92] sm:$0xff] }
  0x78   : > { %10356 = vmatprep.subr.mxu0 %v8049_v12  ;;  %10430 = vmatprep.subr.mxu1 %v8068_v9 }
  0x79   : > { %10230 = vmatmul.mubr.f32.gmra.mxu0 %v13094_v11  ;;  %10431 = vmatpush3.msra.mxu1 %v8068_v9  ;;  %v8045_v9 = vld [vmem:[%s17772_s1 + $0x238] sm:$0xff] }
  0x7a   : > { %10310 = vmatmul.mubr.f32.gmra.mxu1 %v12882_v32  ;;  %10232 = vmatprep.mubr.f32.mxu0 %v13097_v58  ;;  %v8066_v32 = vld [vmem:[%s17772_s1 + $0x2e0] sm:$0xff] }
  0x7b   : > { %10312 = vmatprep.mubr.f32.mxu1 %v12884_v4  ;;  %10357 = vmatpush3.msra.mxu0 %v8049_v12  ;;  %v13122_v4 = vld [vmem:[#allocation2 + $0x82] sm:$0xff]  ;;  %v13139_v12 = vld [vmem:[#allocation2 + $0xaa] sm:$0xff] }
  0x7c   : > { %10358 = vmatprep.subr.mxu0 %v8048_v39  ;;  %10432 = vmatprep.subr.mxu1 %v8067_v20 }
  0x7d   : > { %10233 = vmatmul.mubr.f32.gmra.mxu0 %v13108_v23  ;;  %10433 = vmatpush3.msra.mxu1 %v8067_v20  ;;  %v8044_v20 = vld [vmem:[%s17772_s1 + $0x230] sm:$0xff] }
  0x7e   : > { %10313 = vmatmul.mubr.f32.gmra.mxu1 %v12896_v40  ;;  %10235 = vmatprep.mubr.f32.mxu0 %v13111_v62  ;;  %v8065_v40 = vld [vmem:[%s17772_s1 + $0x2d8] sm:$0xff] }
  0x7f   : > { %10315 = vmatprep.mubr.f32.mxu1 %v12898_v42  ;;  %10359 = vmatpush3.msra.mxu0 %v8048_v39  ;;  %v13136_v42 = vld [vmem:[#allocation2 + $0x9a] sm:$0xff]  ;;  %v13153_v39 = vld [vmem:[#allocation2 + $0xc2] sm:$0xff] }
  0x80   : > { %10360 = vmatprep.subr.mxu0 %v8047_v5  ;;  %10434 = vmatprep.subr.mxu1 %v8066_v32 }
  0x81   : > { %10236 = vmatmul.mubr.f32.gmra.mxu0 %v13122_v4  ;;  %10435 = vmatpush3.msra.mxu1 %v8066_v32  ;;  %v8043_v32 = vld [vmem:[%s17772_s1 + $0x228] sm:$0xff] }
  0x82   : > { %10316 = vmatmul.mubr.f32.gmra.mxu1 %v12910_v46  ;;  %10238 = vmatprep.mubr.f32.mxu0 %v13125_v61  ;;  %v8064_v46 = vld [vmem:[%s17772_s1 + $0x2d0] sm:$0xff] }
  0x83   : > { %10318 = vmatprep.mubr.f32.mxu1 %v12912_v47  ;;  %10361 = vmatpush3.msra.mxu0 %v8047_v5  ;;  %v13150_v47 = vld [vmem:[#allocation2 + $0xb2] sm:$0xff]  ;;  %v13167_v5 = vld [vmem:[#allocation2 + $0xda] sm:$0xff] }
  0x84   : > { %10362 = vmatprep.subr.mxu0 %v8046_v2  ;;  %10436 = vmatprep.subr.mxu1 %v8065_v40 }
  0x85   : > { %10239 = vmatmul.mubr.f32.gmra.mxu0 %v13136_v42  ;;  %10437 = vmatpush3.msra.mxu1 %v8065_v40  ;;  %v8042_v40 = vld [vmem:[%s17772_s1 + $0x220] sm:$0xff] }
  0x86   : > { %10319 = vmatmul.mubr.f32.gmra.mxu1 %v12924_v52  ;;  %10241 = vmatprep.mubr.f32.mxu0 %v13139_v12  ;;  %v8063_v52 = vld [vmem:[%s17772_s1 + $0x2c8] sm:$0xff] }
  0x87   : > { %10321 = vmatprep.mubr.f32.mxu1 %v12926_v54  ;;  %10363 = vmatpush3.msra.mxu0 %v8046_v2  ;;  %v13164_v54 = vld [vmem:[#allocation2 + $0xca] sm:$0xff]  ;;  %v13181_v2 = vld [vmem:[#allocation2 + $0xf2] sm:$0xff] }
  0x88   : > { %10364 = vmatprep.subr.mxu0 %v8045_v9  ;;  %10438 = vmatprep.subr.mxu1 %v8064_v46 }
  0x89   : > { %10242 = vmatmul.mubr.f32.gmra.mxu0 %v13150_v47  ;;  %10439 = vmatpush3.msra.mxu1 %v8064_v46  ;;  %v8041_v46 = vld [vmem:[%s17772_s1 + $0x218] sm:$0xff] }
  0x8a   : > { %10322 = vmatmul.mubr.f32.gmra.mxu1 %v12941_v0  ;;  %10244 = vmatprep.mubr.f32.mxu0 %v13153_v39  ;;  %v8062_v0 = vld [vmem:[%s17772_s1 + $0x2c0] sm:$0xff] }
  0x8b   : > { %10324 = vmatprep.mubr.f32.mxu1 %v12947_v13  ;;  %10365 = vmatpush3.msra.mxu0 %v8045_v9  ;;  %v13178_v13 = vld [vmem:[#allocation2 + $0xe2] sm:$0xff]  ;;  %v13195_v9 = vld [vmem:[#allocation2 + $0x10a] sm:$0xff] }
  0x8c   : > { %10366 = vmatprep.subr.mxu0 %v8044_v20  ;;  %10440 = vmatprep.subr.mxu1 %v8063_v52 }
  0x8d   : > { %10245 = vmatmul.mubr.f32.gmra.mxu0 %v13164_v54  ;;  %10441 = vmatpush3.msra.mxu1 %v8063_v52  ;;  %v8040_v52 = vld [vmem:[%s17772_s1 + $0x210] sm:$0xff] }
  0x8e   : > { %10325 = vmatmul.mubr.f32.gmra.mxu1 %v12960_v29  ;;  %10247 = vmatprep.mubr.f32.mxu0 %v13167_v5  ;;  %v8061_v29 = vld [vmem:[%s17772_s1 + $0x2b8] sm:$0xff] }
  0x8f   : > { %10327 = vmatprep.mubr.f32.mxu1 %v12962_v35  ;;  %10367 = vmatpush3.msra.mxu0 %v8044_v20  ;;  %v13192_v35 = vld [vmem:[#allocation2 + $0xfa] sm:$0xff]  ;;  %v13209_v20 = vld [vmem:[#allocation2 + $0x122] sm:$0xff] }
  0x90   : > { %10368 = vmatprep.subr.mxu0 %v8043_v32  ;;  %10442 = vmatprep.subr.mxu1 %v8062_v0 }
  0x91   : > { %10248 = vmatmul.mubr.f32.gmra.mxu0 %v13178_v13  ;;  %10443 = vmatpush3.msra.mxu1 %v8062_v0  ;;  %v8039_v0 = vld [vmem:[%s17772_s1 + $0x208] sm:$0xff] }
  0x92   : > { %10328 = vmatmul.mubr.f32.gmra.mxu1 %v12974_v45  ;;  %10250 = vmatprep.mubr.f32.mxu0 %v13181_v2  ;;  %v8060_v45 = vld [vmem:[%s17772_s1 + $0x2b0] sm:$0xff] }
  0x93   : > { %10330 = vmatprep.mubr.f32.mxu1 %v12976_v48  ;;  %10369 = vmatpush3.msra.mxu0 %v8043_v32  ;;  %v13206_v48 = vld [vmem:[#allocation2 + $0x112] sm:$0xff]  ;;  %v13223_v32 = vld [vmem:[#allocation2 + $0x13a] sm:$0xff] }
  0x94   : > { %10370 = vmatprep.subr.mxu0 %v8042_v40  ;;  %10444 = vmatprep.subr.mxu1 %v8061_v29 }
  0x95   : > { %10251 = vmatmul.mubr.f32.gmra.mxu0 %v13192_v35  ;;  %10445 = vmatpush3.msra.mxu1 %v8061_v29  ;;  %v8057_v29 = vld [vmem:[%s17772_s1 + $0x298] sm:$0xff] }
  0x96   : > { %10331 = vmatmul.mubr.f32.gmra.mxu1 %v12988_v59  ;;  %10253 = vmatprep.mubr.f32.mxu0 %v13195_v9  ;;  %v8059_v59 = vld [vmem:[%s17772_s1 + $0x2a8] sm:$0xff] }
  0x97   : > { %10333 = vmatprep.mubr.f32.mxu1 %v12990_v14  ;;  %10371 = vmatpush3.msra.mxu0 %v8042_v40  ;;  %v13220_v14 = vld [vmem:[#allocation2 + $0x12a] sm:$0xff]  ;;  %v13237_v40 = vld [vmem:[#allocation2 + $0x152] sm:$0xff] }
  0x98   : > { %10372 = vmatprep.subr.mxu0 %v8041_v46  ;;  %10446 = vmatprep.subr.mxu1 %v8060_v45 }
  0x99   : > { %10254 = vmatmul.mubr.f32.gmra.mxu0 %v13206_v48  ;;  %10447 = vmatpush3.msra.mxu1 %v8060_v45  ;;  %v8056_v45 = vld [vmem:[%s17772_s1 + $0x290] sm:$0xff] }
  0x9a   : > { %10334 = vmatmul.mubr.f32.gmra.mxu1 %v13002_v43  ;;  %10256 = vmatprep.mubr.f32.mxu0 %v13209_v20  ;;  %v8058_v43 = vld [vmem:[%s17772_s1 + $0x2a0] sm:$0xff] }
  0x9b   : > { %10336 = vmatprep.mubr.f32.mxu1 %v13004_v51  ;;  %10373 = vmatpush3.msra.mxu0 %v8041_v46  ;;  %v13234_v51 = vld [vmem:[#allocation2 + $0x142] sm:$0xff]  ;;  %v13251_v46 = vld [vmem:[#allocation2 + $0x16a] sm:$0xff] }
  0x9c   : > { %10374 = vmatprep.subr.mxu0 %v8040_v52  ;;  %10448 = vmatprep.subr.mxu1 %v8059_v59 }
  0x9d   : > { %10257 = vmatmul.mubr.f32.gmra.mxu0 %v13220_v14  ;;  %10449 = vmatpush3.msra.mxu1 %v8059_v59  ;;  %v13267_v59 = vld [vmem:[#allocation2 + $0x188] sm:$0xff] }
  0x9e   : > { %10337 = vmatmul.mubr.f32.gmra.mxu1 %v13016_v63  ;;  %10259 = vmatprep.mubr.f32.mxu0 %v13223_v32  ;;  %v8038_v63 = vld [vmem:[%s17772_s1 + $0x200] sm:$0xff]  ;;  %17824 = vst [vmem:[#allocation13_spill] sm:$0xff] %v13267_v59 }
  0x9f   : > { %10339 = vmatprep.mubr.f32.mxu1 %v13018_v26  ;;  %10375 = vmatpush3.msra.mxu0 %v8040_v52  ;;  %v13248_v26 = vld [vmem:[#allocation2 + $0x15a] sm:$0xff] }
  0xa0   : > { %10376 = vmatprep.subr.mxu0 %v8039_v0  ;;  %10450 = vmatprep.subr.mxu1 %v8058_v43  ;;  %v13256_v52 = vld [vmem:[#allocation2 + $0x180] sm:$0xff] }
  0xa1   : > { %10260 = vmatmul.mubr.f32.gmra.mxu0 %v13234_v51  ;;  %10451 = vmatpush3.msra.mxu1 %v8058_v43  ;;  %17822 = vst [vmem:[#allocation11_spill] sm:$0xff] %v13256_v52  ;;  %v8084_v43 = vld [vmem:[%s17772_s1 + $0x370] sm:$0xff] }
  0xa2   : > { %10340 = vmatmul.mubr.f32.gmra.mxu1 %v13030_v60  ;;  %10262 = vmatprep.mubr.f32.mxu0 %v13237_v40  ;;  %v13261_v60 = vld [vmem:[#allocation2 + $0x172] sm:$0xff] }
  0xa3   : > { %10342 = vmatprep.mubr.f32.mxu1 %v13032_v56  ;;  %10377 = vmatpush3.msra.mxu0 %v8039_v0  ;;  %17823 = vst [vmem:[#allocation12_spill] sm:$0xff] %v13261_v60  ;;  %v8055_v56 = vld [vmem:[%s17772_s1 + $0x288] sm:$0xff]  ;;  %v8085_v0 = vld [vmem:[%s17772_s1 + $0x378] sm:$0xff] }
  0xa4   : > { %10452 = vmatprep.subr.mxu1 %v8057_v29  ;;  %10378 = vmatprep.subr.mxu0 %v8038_v63 }
  0xa5   : > { %10263 = vmatmul.mubr.f32.gmra.mxu0 %v13248_v26  ;;  %10453 = vmatpush3.msra.mxu1 %v8057_v29  ;;  %v13281_v29 = vld [vmem:[#allocation2 + $0x30] sm:$0xff] }
  0xa6   : > { %10343 = vmatmul.mubr.f32.gmra.mxu1 %v13044_v1  ;;  %10265 = vmatprep.mubr.f32.mxu0 %v13251_v46  ;;  %v8054_v1 = vld [vmem:[%s17772_s1 + $0x280] sm:$0xff] }
  0xa7   : > { %10454 = vmatprep.subr.mxu1 %v8056_v45  ;;  %10345 = vmatprep.mubr.f32.mxu1 %v13256_v52  ;;  %v13288_v52 = vld [vmem:[#allocation2 + $0x38] sm:$0xff] }
  0xa8   : > { %10379 = vmatpush3.msra.mxu0 %v8038_v63  ;;  %10455 = vmatpush3.msra.mxu1 %v8056_v45  ;;  %v13283_v63 = vld [vmem:[#allocation2 + $0x31] sm:$0xff] }
  0xa9   : > { %10266 = vmatmul.mubr.f32.gmra.mxu0 %v13261_v60  ;;  %10456 = vmatprep.subr.mxu1 %v8055_v56  ;;  %v13285_v45 = vld [vmem:[#allocation2 + $0x32] sm:$0xff]  ;;  %v13295_v60 = vld [vmem:[#allocation2 + $0x3a] sm:$0xff] }
  0xaa   : > { %10346 = vmatmul.mubr.f32.gmra.mxu1 %v13267_v59  ;;  %10380 = vmatprep.mubr.f32.mxu0 %v12642_v16  ;;  %17825 = vst [vmem:[#allocation14_spill] sm:$0xff] %v13285_v45  ;;  %v13290_v59 = vld [vmem:[#allocation2 + $0x39] sm:$0xff]  ;;  %17826 = vst [vmem:[#allocation15_spill] sm:$0xff] %v13295_v60  ;;  %v13341_v45 = vld [vmem:[#allocation2 + $0x69] sm:$0xff] }
  0xab   : > { %10457 = vmatpush3.msra.mxu1 %v8055_v56  ;;  %10508 = vmatprep.subr.mxu0 %v8085_v0  ;;  %v13292_v16 = vld [vmem:[#allocation2 + $0x198] sm:$0xff]  ;;  %v13306_v56 = vld [vmem:[#allocation2 + $0x48] sm:$0xff] }
  0xac   : > { %10458 = vmatprep.subr.mxu1 %v8054_v1  ;;  %10460 = vmatprep.mubr.f32.mxu1 %v12855_v15  ;;  %3317 = vst [vmem:[#allocation2 + $0x30] sm:$0xff] %v13292_v16  ;;  %3319 = vst [vmem:[#allocation2 + $0x40] sm:$0x3] %v13292_v16  ;;  %v8083_v15 = vld [vmem:[%s17772_s1 + $0x368] sm:$0xff]  ;;  %v13318_v60 = vld [vmem:[#allocation2 + $0x52] sm:$0xff] }
  0xad   : > { %10381 = vmatmul.mubr.f32.vlgmr.msra.gmra.mxu0 %v12649_v18  ;;  %10459 = vmatpush3.msra.mxu1 %v8054_v1  ;;  %3318 = vst [vmem:[#allocation2 + $0x38] sm:$0xff] %v13292_v16  ;;  %4669 = vst [vmem:[#allocation2 + $0x40] sm:$0x3] %v13292_v16  ;;  %v13308_v18 = vld [vmem:[#allocation2 + $0x49] sm:$0xff] }
  0xae   : > { %10509 = vmatpush3.msra.mxu0 %v8085_v0  ;;  %10461 = vmatmul.mubr.f32.vlgmr.msra.gmra.mxu1 %v12860_v17  ;;  %v13310_v1 = vld [vmem:[#allocation2 + $0x4a] sm:$0xff]  ;;  %17828 = vst [vmem:[#allocation17_spill] sm:$0xff] %v13318_v60  ;;  %v13337_v60 = vld [vmem:[#allocation2 + $0x62] sm:$0xff] }
  0xaf   : > { %10383 = vmatprep.mubr.f32.mxu0 %v12652_v19  ;;  %10510 = vmatprep.subr.mxu0 %v8084_v43  ;;  %17827 = vst [vmem:[#allocation16_spill] sm:$0xff] %v13310_v1  ;;  %v13313_v0 = vld [vmem:[#allocation2 + $0x50] sm:$0xff]  ;;  %3320 = vst [vmem:[#allocation2 + $0x48] sm:$0xff] %v13292_v16  ;;  %v8082_v19 = vld [vmem:[%s17772_s1 + $0x360] sm:$0xff] }
  0xb0   : > { %10463 = vmatprep.mubr.f32.mxu1 %v13068_v10  ;;  %10511 = vmatpush3.msra.mxu0 %v8084_v43  ;;  %v13315_v17 = vld [vmem:[#allocation2 + $0x51] sm:$0xff]  ;;  %v13335_v43 = vld [vmem:[#allocation2 + $0x61] sm:$0xff]  ;;  %17829 = vst [vmem:[#allocation18_spill] sm:$0xff] %v13337_v60 }
  0xb1   : > { %10384 = vmatmul.mubr.f32.gmra.mxu0 %v12660_v21  ;;  %10512 = vmatprep.subr.mxu0 %v8083_v15  ;;  %v8101_v10 = vld [vmem:[%s17772_s1 + $0x3f8] sm:$0xff]  ;;  %3322 = vst [vmem:[#allocation2 + $0x58] sm:$0x3] %v13292_v16  ;;  %3321 = vst [vmem:[#allocation2 + $0x50] sm:$0xff] %v13292_v16  ;;  %v13333_v21 = vld [vmem:[#allocation2 + $0x60] sm:$0xff] }
  0xb2   : > { %10464 = vmatmul.mubr.f32.gmra.mxu1 %v13080_v7  ;;  %10386 = vmatprep.mubr.f32.mxu0 %v12663_v22  ;;  %4672 = vst [vmem:[#allocation2 + $0x58] sm:$0x3] %v13292_v16  ;;  %v13339_v1 = vld [vmem:[#allocation2 + $0x68] sm:$0xff]  ;;  %3323 = vst [vmem:[#allocation2 + $0x60] sm:$0xff] %v13292_v16  ;;  %v8081_v7 = vld [vmem:[%s17772_s1 + $0x358] sm:$0xff] }
  0xb3   : > { %10466 = vmatprep.mubr.f32.mxu1 %v13083_v6  ;;  %10513 = vmatpush3.msra.mxu0 %v8083_v15  ;;  %v13344_v22 = vld [vmem:[#allocation2 + $0x6a] sm:$0xff]  ;;  %v13361_v15 = vld [vmem:[#allocation2 + $0x79] sm:$0xff]  ;;  %v13367_v60 = vld [vmem:[#allocation2 + $0x81] sm:$0xff] }
  0xb4   : > { %10514 = vmatprep.subr.mxu0 %v8082_v19  ;;  %10588 = vmatprep.subr.mxu1 %v8101_v10  ;;  %17830 = vst [vmem:[#allocation19_spill] sm:$0xff] %v13344_v22  ;;  %v8100_v6 = vld [vmem:[%s17772_s1 + $0x3f0] sm:$0xff]  ;;  %3325 = vst [vmem:[#allocation2 + $0x70] sm:$0x3] %v13292_v16  ;;  %v13365_v22 = vld [vmem:[#allocation2 + $0x80] sm:$0xff] }
  0xb5   : > { %10387 = vmatmul.mubr.f32.gmra.mxu0 %v12671_v24  ;;  %10589 = vmatpush3.msra.mxu1 %v8101_v10  ;;  %3324 = vst [vmem:[#allocation2 + $0x68] sm:$0xff] %v13292_v16  ;;  %4675 = vst [vmem:[#allocation2 + $0x70] sm:$0x3] %v13292_v16  ;;  %v13359_v24 = vld [vmem:[#allocation2 + $0x78] sm:$0xff] }
  0xb6   : > { %10467 = vmatmul.mubr.f32.gmra.mxu1 %v13094_v11  ;;  %10389 = vmatprep.mubr.f32.mxu0 %v12674_v25  ;;  %v13363_v10 = vld [vmem:[#allocation2 + $0x7a] sm:$0xff]  ;;  %v13370_v25 = vld [vmem:[#allocation2 + $0x82] sm:$0xff]  ;;  %v8080_v11 = vld [vmem:[%s17772_s1 + $0x350] sm:$0xff] }
  0xb7   : > { %10469 = vmatprep.mubr.f32.mxu1 %v13097_v58  ;;  %10515 = vmatpush3.msra.mxu0 %v8082_v19  ;;  %17831 = vst [vmem:[#allocation20_spill] sm:$0xff] %v13363_v10  ;;  %3326 = vst [vmem:[#allocation2 + $0x78] sm:$0xff] %v13292_v16  ;;  %v8099_v58 = vld [vmem:[%s17772_s1 + $0x3e8] sm:$0xff]  ;;  %v13387_v19 = vld [vmem:[#allocation2 + $0x91] sm:$0xff] }
  0xb8   : > { %10516 = vmatprep.subr.mxu0 %v8081_v7  ;;  %10590 = vmatprep.subr.mxu1 %v8100_v6  ;;  %17832 = vst [vmem:[#allocation21_spill] sm:$0xff] %v13370_v25  ;;  %3328 = vst [vmem:[#allocation2 + $0x88] sm:$0x3] %v13292_v16  ;;  %v13391_v25 = vld [vmem:[#allocation2 + $0x98] sm:$0xff] }
  0xb9   : > { %10390 = vmatmul.mubr.f32.gmra.mxu0 %v12682_v27  ;;  %10591 = vmatpush3.msra.mxu1 %v8100_v6  ;;  %3327 = vst [vmem:[#allocation2 + $0x80] sm:$0xff] %v13292_v16  ;;  %4678 = vst [vmem:[#allocation2 + $0x88] sm:$0x3] %v13292_v16  ;;  %v13385_v27 = vld [vmem:[#allocation2 + $0x90] sm:$0xff]  ;;  %v13393_v10 = vld [vmem:[#allocation2 + $0x99] sm:$0xff] }
  0xba   : > { %10470 = vmatmul.mubr.f32.gmra.mxu1 %v13108_v23  ;;  %10392 = vmatprep.mubr.f32.mxu0 %v12685_v28  ;;  %v13389_v6 = vld [vmem:[#allocation2 + $0x92] sm:$0xff]  ;;  %v13396_v28 = vld [vmem:[#allocation2 + $0x9a] sm:$0xff]  ;;  %v8079_v23 = vld [vmem:[%s17772_s1 + $0x348] sm:$0xff] }
  0xbb   : > { %10472 = vmatprep.mubr.f32.mxu1 %v13111_v62  ;;  %10517 = vmatpush3.msra.mxu0 %v8081_v7  ;;  %17833 = vst [vmem:[#allocation22_spill] sm:$0xff] %v13389_v6  ;;  %3329 = vst [vmem:[#allocation2 + $0x90] sm:$0xff] %v13292_v16  ;;  %v8098_v62 = vld [vmem:[%s17772_s1 + $0x3e0] sm:$0xff]  ;;  %v13413_v7 = vld [vmem:[#allocation2 + $0xa9] sm:$0xff] }
  0xbc   : > { %10518 = vmatprep.subr.mxu0 %v8080_v11  ;;  %10592 = vmatprep.subr.mxu1 %v8099_v58  ;;  %17834 = vst [vmem:[#allocation23_spill] sm:$0xff] %v13396_v28  ;;  %3331 = vst [vmem:[#allocation2 + $0xa0] sm:$0x3] %v13292_v16  ;;  %v13417_v28 = vld [vmem:[#allocation2 + $0xb0] sm:$0xff] }
  0xbd   : > { %10393 = vmatmul.mubr.f32.gmra.mxu0 %v12693_v30  ;;  %10593 = vmatpush3.msra.mxu1 %v8099_v58  ;;  %3330 = vst [vmem:[#allocation2 + $0x98] sm:$0xff] %v13292_v16  ;;  %4681 = vst [vmem:[#allocation2 + $0xa0] sm:$0x3] %v13292_v16  ;;  %v13411_v30 = vld [vmem:[#allocation2 + $0xa8] sm:$0xff]  ;;  %v13419_v6 = vld [vmem:[#allocation2 + $0xb1] sm:$0xff] }
  0xbe   : > { %10473 = vmatmul.mubr.f32.gmra.mxu1 %v13122_v4  ;;  %10395 = vmatprep.mubr.f32.mxu0 %v12696_v31  ;;  %v13415_v58 = vld [vmem:[#allocation2 + $0xaa] sm:$0xff]  ;;  %v13422_v31 = vld [vmem:[#allocation2 + $0xb2] sm:$0xff]  ;;  %v8078_v4 = vld [vmem:[%s17772_s1 + $0x340] sm:$0xff] }
  0xbf   : > { %10475 = vmatprep.mubr.f32.mxu1 %v13125_v61  ;;  %10519 = vmatpush3.msra.mxu0 %v8080_v11  ;;  %17835 = vst [vmem:[#allocation24_spill] sm:$0xff] %v13415_v58  ;;  %3332 = vst [vmem:[#allocation2 + $0xa8] sm:$0xff] %v13292_v16  ;;  %v8097_v61 = vld [vmem:[%s17772_s1 + $0x3d8] sm:$0xff]  ;;  %v13439_v11 = vld [vmem:[#allocation2 + $0xc1] sm:$0xff] }
  0xc0   : > { %10520 = vmatprep.subr.mxu0 %v8079_v23  ;;  %10594 = vmatprep.subr.mxu1 %v8098_v62  ;;  %17836 = vst [vmem:[#allocation25_spill] sm:$0xff] %v13422_v31  ;;  %3334 = vst [vmem:[#allocation2 + $0xb8] sm:$0x3] %v13292_v16  ;;  %v13443_v31 = vld [vmem:[#allocation2 + $0xc8] sm:$0xff] }
  0xc1   : > { %10396 = vmatmul.mubr.f32.gmra.mxu0 %v12704_v33  ;;  %10595 = vmatpush3.msra.mxu1 %v8098_v62  ;;  %3333 = vst [vmem:[#allocation2 + $0xb0] sm:$0xff] %v13292_v16  ;;  %4684 = vst [vmem:[#allocation2 + $0xb8] sm:$0x3] %v13292_v16  ;;  %v13437_v33 = vld [vmem:[#allocation2 + $0xc0] sm:$0xff]  ;;  %v13445_v58 = vld [vmem:[#allocation2 + $0xc9] sm:$0xff] }
  0xc2   : > { %10476 = vmatmul.mubr.f32.gmra.mxu1 %v13136_v42  ;;  %10398 = vmatprep.mubr.f32.mxu0 %v12707_v34  ;;  %v13441_v62 = vld [vmem:[#allocation2 + $0xc2] sm:$0xff]  ;;  %v13448_v34 = vld [vmem:[#allocation2 + $0xca] sm:$0xff]  ;;  %v8077_v42 = vld [vmem:[%s17772_s1 + $0x338] sm:$0xff] }
  0xc3   : > { %10478 = vmatprep.mubr.f32.mxu1 %v13139_v12  ;;  %10521 = vmatpush3.msra.mxu0 %v8079_v23  ;;  %17837 = vst [vmem:[#allocation26_spill] sm:$0xff] %v13441_v62  ;;  %3335 = vst [vmem:[#allocation2 + $0xc0] sm:$0xff] %v13292_v16  ;;  %v8096_v12 = vld [vmem:[%s17772_s1 + $0x3d0] sm:$0xff]  ;;  %v13465_v23 = vld [vmem:[#allocation2 + $0xd9] sm:$0xff] }
  0xc4   : > { %10522 = vmatprep.subr.mxu0 %v8078_v4  ;;  %10596 = vmatprep.subr.mxu1 %v8097_v61  ;;  %17838 = vst [vmem:[#allocation27_spill] sm:$0xff] %v13448_v34  ;;  %3337 = vst [vmem:[#allocation2 + $0xd0] sm:$0x3] %v13292_v16  ;;  %v13469_v34 = vld [vmem:[#allocation2 + $0xe0] sm:$0xff] }
  0xc5   : > { %10399 = vmatmul.mubr.f32.gmra.mxu0 %v12715_v36  ;;  %10597 = vmatpush3.msra.mxu1 %v8097_v61  ;;  %3336 = vst [vmem:[#allocation2 + $0xc8] sm:$0xff] %v13292_v16  ;;  %4687 = vst [vmem:[#allocation2 + $0xd0] sm:$0x3] %v13292_v16  ;;  %v13463_v36 = vld [vmem:[#allocation2 + $0xd8] sm:$0xff]  ;;  %v13471_v62 = vld [vmem:[#allocation2 + $0xe1] sm:$0xff] }
  0xc6   : > { %10479 = vmatmul.mubr.f32.gmra.mxu1 %v13150_v47  ;;  %10401 = vmatprep.mubr.f32.mxu0 %v12718_v37  ;;  %v13467_v61 = vld [vmem:[#allocation2 + $0xda] sm:$0xff]  ;;  %v13474_v37 = vld [vmem:[#allocation2 + $0xe2] sm:$0xff]  ;;  %v8076_v47 = vld [vmem:[%s17772_s1 + $0x330] sm:$0xff] }
  0xc7   : > { %10481 = vmatprep.mubr.f32.mxu1 %v13153_v39  ;;  %10523 = vmatpush3.msra.mxu0 %v8078_v4  ;;  %17839 = vst [vmem:[#allocation28_spill] sm:$0xff] %v13467_v61  ;;  %3338 = vst [vmem:[#allocation2 + $0xd8] sm:$0xff] %v13292_v16  ;;  %v8095_v39 = vld [vmem:[%s17772_s1 + $0x3c8] sm:$0xff]  ;;  %v13491_v4 = vld [vmem:[#allocation2 + $0xf1] sm:$0xff] }
  0xc8   : > { %10524 = vmatprep.subr.mxu0 %v8077_v42  ;;  %10598 = vmatprep.subr.mxu1 %v8096_v12  ;;  %17840 = vst [vmem:[#allocation29_spill] sm:$0xff] %v13474_v37  ;;  %3340 = vst [vmem:[#allocation2 + $0xe8] sm:$0x3] %v13292_v16  ;;  %v13495_v37 = vld [vmem:[#allocation2 + $0xf8] sm:$0xff] }
  0xc9   : > { %10402 = vmatmul.mubr.f32.gmra.mxu0 %v12723_v38  ;;  %10599 = vmatpush3.msra.mxu1 %v8096_v12  ;;  %3339 = vst [vmem:[#allocation2 + $0xe0] sm:$0xff] %v13292_v16  ;;  %4690 = vst [vmem:[#allocation2 + $0xe8] sm:$0x3] %v13292_v16  ;;  %v13489_v38 = vld [vmem:[#allocation2 + $0xf0] sm:$0xff]  ;;  %v13497_v61 = vld [vmem:[#allocation2 + $0xf9] sm:$0xff] }
  0xca   : > { %10482 = vmatmul.mubr.f32.gmra.mxu1 %v13164_v54  ;;  %10404 = vmatprep.mubr.f32.mxu0 %v12733_v41  ;;  %v13493_v12 = vld [vmem:[#allocation2 + $0xf2] sm:$0xff]  ;;  %v13500_v41 = vld [vmem:[#allocation2 + $0xfa] sm:$0xff]  ;;  %v8075_v54 = vld [vmem:[%s17772_s1 + $0x328] sm:$0xff] }
  0xcb   : > { %10484 = vmatprep.mubr.f32.mxu1 %v13167_v5  ;;  %10525 = vmatpush3.msra.mxu0 %v8077_v42  ;;  %17841 = vst [vmem:[#allocation30_spill] sm:$0xff] %v13493_v12  ;;  %4691 = vst [vmem:[#allocation2 + $0xf0] sm:$0xff] %v13292_v16  ;;  %v8094_v5 = vld [vmem:[%s17772_s1 + $0x3c0] sm:$0xff]  ;;  %v13517_v42 = vld [vmem:[#allocation2 + $0x109] sm:$0xff] }
  0xcc   : > { %10526 = vmatprep.subr.mxu0 %v8076_v47  ;;  %10600 = vmatprep.subr.mxu1 %v8095_v39  ;;  %17842 = vst [vmem:[#allocation31_spill] sm:$0xff] %v13500_v41  ;;  %3343 = vst [vmem:[#allocation2 + $0x100] sm:$0x3] %v13292_v16  ;;  %v13521_v41 = vld [vmem:[#allocation2 + $0x110] sm:$0xff] }
  0xcd   : > { %10405 = vmatmul.mubr.f32.gmra.mxu0 %v12743_v44  ;;  %10601 = vmatpush3.msra.mxu1 %v8095_v39  ;;  %4692 = vst [vmem:[#allocation2 + $0xf8] sm:$0xff] %v13292_v16  ;;  %4693 = vst [vmem:[#allocation2 + $0x100] sm:$0x3] %v13292_v16  ;;  %v13515_v44 = vld [vmem:[#allocation2 + $0x108] sm:$0xff]  ;;  %v13523_v12 = vld [vmem:[#allocation2 + $0x111] sm:$0xff] }
  0xce   : > { %10485 = vmatmul.mubr.f32.gmra.mxu1 %v13178_v13  ;;  %10407 = vmatprep.mubr.f32.mxu0 %v12759_v49  ;;  %v13519_v39 = vld [vmem:[#allocation2 + $0x10a] sm:$0xff]  ;;  %v13526_v49 = vld [vmem:[#allocation2 + $0x112] sm:$0xff]  ;;  %v8074_v13 = vld [vmem:[%s17772_s1 + $0x320] sm:$0xff] }
  0xcf   : > { %10487 = vmatprep.mubr.f32.mxu1 %v13181_v2  ;;  %10527 = vmatpush3.msra.mxu0 %v8076_v47  ;;  %17843 = vst [vmem:[#allocation32_spill] sm:$0xff] %v13519_v39  ;;  %4694 = vst [vmem:[#allocation2 + $0x108] sm:$0xff] %v13292_v16  ;;  %v8093_v2 = vld [vmem:[%s17772_s1 + $0x3b8] sm:$0xff]  ;;  %v13543_v47 = vld [vmem:[#allocation2 + $0x121] sm:$0xff] }
  0xd0   : > { %10528 = vmatprep.subr.mxu0 %v8075_v54  ;;  %10602 = vmatprep.subr.mxu1 %v8094_v5  ;;  %17844 = vst [vmem:[#allocation33_spill] sm:$0xff] %v13526_v49  ;;  %3346 = vst [vmem:[#allocation2 + $0x118] sm:$0x3] %v13292_v16  ;;  %v13547_v49 = vld [vmem:[#allocation2 + $0x128] sm:$0xff] }
  0xd1   : > { %10408 = vmatmul.mubr.f32.gmra.mxu0 %v12763_v50  ;;  %10603 = vmatpush3.msra.mxu1 %v8094_v5  ;;  %4695 = vst [vmem:[#allocation2 + $0x110] sm:$0xff] %v13292_v16  ;;  %4696 = vst [vmem:[#allocation2 + $0x118] sm:$0x3] %v13292_v16  ;;  %v13541_v50 = vld [vmem:[#allocation2 + $0x120] sm:$0xff]  ;;  %v13549_v39 = vld [vmem:[#allocation2 + $0x129] sm:$0xff] }
  0xd2   : > { %10488 = vmatmul.mubr.f32.gmra.mxu1 %v13192_v35  ;;  %10410 = vmatprep.mubr.f32.mxu0 %v12773_v53  ;;  %v13545_v5 = vld [vmem:[#allocation2 + $0x122] sm:$0xff]  ;;  %v13552_v53 = vld [vmem:[#allocation2 + $0x12a] sm:$0xff]  ;;  %v8073_v35 = vld [vmem:[%s17772_s1 + $0x318] sm:$0xff] }
  0xd3   : > { %10490 = vmatprep.mubr.f32.mxu1 %v13195_v9  ;;  %10529 = vmatpush3.msra.mxu0 %v8075_v54  ;;  %17845 = vst [vmem:[#allocation34_spill] sm:$0xff] %v13545_v5  ;;  %4697 = vst [vmem:[#allocation2 + $0x120] sm:$0xff] %v13292_v16  ;;  %v8092_v9 = vld [vmem:[%s17772_s1 + $0x3b0] sm:$0xff]  ;;  %v13569_v54 = vld [vmem:[#allocation2 + $0x139] sm:$0xff] }
  0xd4   : > { %10530 = vmatprep.subr.mxu0 %v8074_v13  ;;  %10604 = vmatprep.subr.mxu1 %v8093_v2  ;;  %17846 = vst [vmem:[#allocation35_spill] sm:$0xff] %v13552_v53  ;;  %3349 = vst [vmem:[#allocation2 + $0x130] sm:$0x3] %v13292_v16  ;;  %v13573_v53 = vld [vmem:[#allocation2 + $0x140] sm:$0xff] }
  0xd5   : > { %10411 = vmatmul.mubr.f32.gmra.mxu0 %v12777_v55  ;;  %10605 = vmatpush3.msra.mxu1 %v8093_v2  ;;  %4698 = vst [vmem:[#allocation2 + $0x128] sm:$0xff] %v13292_v16  ;;  %4699 = vst [vmem:[#allocation2 + $0x130] sm:$0x3] %v13292_v16  ;;  %v13567_v55 = vld [vmem:[#allocation2 + $0x138] sm:$0xff]  ;;  %v13575_v5 = vld [vmem:[#allocation2 + $0x141] sm:$0xff] }
  0xd6   : > { %10491 = vmatmul.mubr.f32.gmra.mxu1 %v13206_v48  ;;  %10413 = vmatprep.mubr.f32.mxu0 %v12781_v57  ;;  %v13571_v2 = vld [vmem:[#allocation2 + $0x13a] sm:$0xff]  ;;  %17848 = vst [vmem:[#allocation37_spill] sm:$0xff] %v13573_v53  ;;  %17849 = vst [vmem:[#allocation38_spill] sm:$0xff] %v13575_v5  ;;  %v13578_v57 = vld [vmem:[#allocation2 + $0x142] sm:$0xff] }
  0xd7   : > { %10493 = vmatprep.mubr.f32.mxu1 %v13209_v20  ;;  %10531 = vmatpush3.msra.mxu0 %v8074_v13  ;;  %17847 = vst [vmem:[#allocation36_spill] sm:$0xff] %v13571_v2  ;;  %4700 = vst [vmem:[#allocation2 + $0x138] sm:$0xff] %v13292_v16  ;;  %v17851_v48 = vld [vmem:[#allocation4_spill] sm:$0xff]  ;;  %v8091_v13 = vld [vmem:[%s17772_s1 + $0x3a8] sm:$0xff] }
  0xd8   : > { %10532 = vmatprep.subr.mxu0 %v8073_v35  ;;  %10606 = vmatprep.subr.mxu1 %v8092_v9  ;;  %17850 = vst [vmem:[#allocation39_spill] sm:$0xff] %v13578_v57  ;;  %v8072_v20 = vld [vmem:[%s17772_s1 + $0x310] sm:$0xff]  ;;  %3352 = vst [vmem:[#allocation2 + $0x148] sm:$0x3] %v13292_v16  ;;  %v17852_v2 = vld [vmem:[#allocation5_spill] sm:$0xff] }
  0xd9   : > { %10414 = vmatmul.mubr.f32.gmra.mxu0 %v17851_v48  ;;  %10607 = vmatpush3.msra.mxu1 %v8092_v9  ;;  %4701 = vst [vmem:[#allocation2 + $0x140] sm:$0xff] %v13292_v16  ;;  %4702 = vst [vmem:[#allocation2 + $0x148] sm:$0x3] %v13292_v16  ;;  %v13593_v48 = vld [vmem:[#allocation2 + $0x150] sm:$0xff]  ;;  %v13599_v5 = vld [vmem:[#allocation2 + $0x158] sm:$0xff] }
  0xda   : > { %10494 = vmatmul.mubr.f32.gmra.mxu1 %v13220_v14  ;;  %10416 = vmatprep.mubr.f32.mxu0 %v17852_v2  ;;  %v13595_v9 = vld [vmem:[#allocation2 + $0x151] sm:$0xff]  ;;  %17854 = vst [vmem:[#allocation5_spill] sm:$0xff] %v13599_v5  ;;  %v13601_v53 = vld [vmem:[#allocation2 + $0x159] sm:$0xff] }
  0xdb   : > { %10496 = vmatprep.mubr.f32.mxu1 %v13223_v32  ;;  %10533 = vmatpush3.msra.mxu0 %v8073_v35  ;;  %v13597_v57 = vld [vmem:[#allocation2 + $0x152] sm:$0xff]  ;;  %17855 = vst [vmem:[#allocation40_spill] sm:$0xff] %v13601_v53  ;;  %v13604_v14 = vld [vmem:[#allocation2 + $0x15a] sm:$0xff]  ;;  %v8071_v32 = vld [vmem:[%s17772_s1 + $0x308] sm:$0xff] }
  0xdc   : > { %17853 = vst [vmem:[#allocation4_spill] sm:$0xff] %v13597_v57  ;;  %10534 = vmatprep.subr.mxu0 %v8072_v20  ;;  %10608 = vmatprep.subr.mxu1 %v8091_v13  ;;  %4703 = vst [vmem:[#allocation2 + $0x150] sm:$0xff] %v13292_v16  ;;  %v17857_v2 = vld [vmem:[#allocation6_spill] sm:$0xff]  ;;  %v17858_v57 = vld [vmem:[#allocation7_spill] sm:$0xff] }
  0xdd   : > { %17856 = vst [vmem:[#allocation41_spill] sm:$0xff] %v13604_v14  ;;  %10417 = vmatmul.mubr.f32.gmra.mxu0 %v17857_v2  ;;  %10609 = vmatpush3.msra.mxu1 %v8091_v13  ;;  %v8090_v35 = vld [vmem:[%s17772_s1 + $0x3a0] sm:$0xff]  ;;  %3355 = vst [vmem:[#allocation2 + $0x160] sm:$0x3] %v13292_v16  ;;  %v13619_v13 = vld [vmem:[#allocation2 + $0x168] sm:$0xff] }
  0xde   : > { %4704 = vst [vmem:[#allocation2 + $0x158] sm:$0xff] %v13292_v16  ;;  %10497 = vmatmul.mubr.f32.gmra.mxu1 %v13234_v51  ;;  %10419 = vmatprep.mubr.f32.mxu0 %v17858_v57  ;;  %4705 = vst [vmem:[#allocation2 + $0x160] sm:$0x3] %v13292_v16  ;;  %v13621_v2 = vld [vmem:[#allocation2 + $0x169] sm:$0xff]  ;;  %v13627_v5 = vld [vmem:[#allocation2 + $0x171] sm:$0xff] }
  0xdf   : > { %10499 = vmatprep.mubr.f32.mxu1 %v13237_v40  ;;  %10535 = vmatpush3.msra.mxu0 %v8072_v20  ;;  %v13623_v14 = vld [vmem:[#allocation2 + $0x16a] sm:$0xff]  ;;  %v13630_v51 = vld [vmem:[#allocation2 + $0x172] sm:$0xff]  ;;  %v8070_v57 = vld [vmem:[%s17772_s1 + $0x300] sm:$0xff] }
  0xe0   : > { %17859 = vst [vmem:[#allocation6_spill] sm:$0xff] %v13623_v14  ;;  %10536 = vmatprep.subr.mxu0 %v8071_v32  ;;  %10610 = vmatprep.subr.mxu1 %v8090_v35  ;;  %v13625_v53 = vld [vmem:[#allocation2 + $0x170] sm:$0xff]  ;;  %4706 = vst [vmem:[#allocation2 + $0x168] sm:$0xff] %v13292_v16  ;;  %v8089_v40 = vld [vmem:[%s17772_s1 + $0x398] sm:$0xff] }
  0xe1   : > { %17860 = vst [vmem:[#allocation7_spill] sm:$0xff] %v13630_v51  ;;  %10420 = vmatmul.mubr.f32.gmra.mxu0 %v12817_v3  ;;  %10611 = vmatpush3.msra.mxu1 %v8090_v35  ;;  %3358 = vst [vmem:[#allocation2 + $0x178] sm:$0x3] %v13292_v16  ;;  %v17861_v20 = vld [vmem:[#allocation8_spill] sm:$0xff]  ;;  %v1893_v3 = vld [vmem:[#allocation2 + $0x182] sm:$0xff] }
  0xe2   : > { %4707 = vst [vmem:[#allocation2 + $0x170] sm:$0xff] %v13292_v16  ;;  %10500 = vmatmul.mubr.f32.gmra.mxu1 %v13248_v26  ;;  %10422 = vmatprep.mubr.f32.mxu0 %v17861_v20  ;;  %4708 = vst [vmem:[#allocation2 + $0x178] sm:$0x3] %v13292_v16  ;;  %v13645_v35 = vld [vmem:[#allocation2 + $0x182] sm:$0xff]  ;;  %v8088_v51 = vld [vmem:[%s17772_s1 + $0x390] sm:$0xff] }
  0xe3   : > { %10502 = vmatprep.mubr.f32.mxu1 %v13251_v46  ;;  %10537 = vmatpush3.msra.mxu0 %v8071_v32  ;;  %17862 = vst [vmem:[#allocation8_spill] sm:$0xff] %v13645_v35  ;;  %v1894_v14 = vld [vmem:[#allocation2 + $0x18a] sm:$0xff]  ;;  %4709 = vst [vmem:[#allocation2 + $0x180] sm:$0xff] %v13292_v16  ;;  %v17865_v32 = vld [vmem:[#allocation9_spill] sm:$0xff] }
  0xe4   : > { %10612 = vmatprep.subr.mxu1 %v8089_v40  ;;  %10538 = vmatprep.subr.mxu0 %v8070_v57  ;;  %v13651_v26 = vld [vmem:[#allocation2 + $0x18a] sm:$0xff]  ;;  %v13672_v35 = vld [vmem:[#allocation2 + $0x1a2] sm:$0xff] }
  0xe5   : > { %17863 = vst [vmem:[#allocation42_spill] sm:$0xff] %v13651_v26  ;;  %10423 = vmatmul.mubr.f32.gmra.mxu0 %v12830_v8  ;;  %10613 = vmatpush3.msra.mxu1 %v8089_v40  ;;  %3361 = vst [vmem:[#allocation2 + $0x190] sm:$0x3] %v13292_v16  ;;  %v17864_v46 = vld [vmem:[#allocation12_spill] sm:$0xff]  ;;  %v8087_v20 = vld [vmem:[%s17772_s1 + $0x388] sm:$0xff] }
  0xe6   : > { %4710 = vst [vmem:[#allocation2 + $0x188] sm:$0xff] %v13292_v16  ;;  %10503 = vmatmul.mubr.f32.gmra.mxu1 %v17864_v46  ;;  %10425 = vmatprep.mubr.f32.mxu0 %v17865_v32  ;;  %4711 = vst [vmem:[#allocation2 + $0x190] sm:$0x3] %v13292_v16  ;;  %v13662_v26 = vld [vmem:[#allocation2 + $0x199] sm:$0xff]  ;;  %v13669_v46 = vld [vmem:[#allocation2 + $0x1a1] sm:$0xff] }
  0xe7   : > { %10614 = vmatprep.subr.mxu1 %v8088_v51  ;;  %10505 = vmatprep.mubr.f32.mxu1 %v1893_v3  ;;  %v13664_v8 = vld [vmem:[#allocation2 + $0x19a] sm:$0xff]  ;;  %17867 = vst [vmem:[#allocation43_spill] sm:$0xff] %v13672_v35  ;;  %3364 = vst [vmem:[#allocation2 + $0x1a8] sm:$0x3] %v13292_v16 }
  0xe8   : > { %17866 = vst [vmem:[#allocation12_spill] sm:$0xff] %v13664_v8  ;;  %10539 = vmatpush3.msra.mxu0 %v8070_v57  ;;  %10615 = vmatpush3.msra.mxu1 %v8088_v51  ;;  %v8117_v40 = vld [vmem:[%s17772_s1 + $0x478] sm:$0xff]  ;;  %4712 = vst [vmem:[#allocation2 + $0x198] sm:$0xff] %v13292_v16  ;;  %v17868_v32 = vld [vmem:[#allocation10_spill] sm:$0xff] }
  0xe9   : > { %10426 = vmatmul.mubr.f32.gmra.mxu0 %v17868_v32  ;;  %10616 = vmatprep.subr.mxu1 %v8087_v20  ;;  %v8086_v3 = vld [vmem:[%s17772_s1 + $0x380] sm:$0xff]  ;;  %4713 = vst [vmem:[#allocation2 + $0x1a0] sm:$0xff] %v13292_v16  ;;  %4714 = vst [vmem:[#allocation2 + $0x1a8] sm:$0x3] %v13292_v16  ;;  %v8116_v51 = vld [vmem:[%s17772_s1 + $0x470] sm:$0xff] }
  0xea   : > { %10506 = vmatmul.mubr.f32.gmra.mxu1 %v1894_v14  ;;  %10540 = vmatprep.mubr.f32.mxu0 %v13281_v29  ;;  %v8115_v29 = vld [vmem:[%s17772_s1 + $0x468] sm:$0xff] }
  0xeb   : > { %10617 = vmatpush3.msra.mxu1 %v8087_v20  ;;  %10668 = vmatprep.subr.mxu0 %v8117_v40 }
  0xec   : > { %10618 = vmatprep.subr.mxu1 %v8086_v3  ;;  %10620 = vmatprep.mubr.f32.mxu1 %v13283_v63 }
  0xed   : > { %v10062_v57 = vpop.f32.mrf.mxu0  ;;  %v10142_v35 = vpop.f32.mrf.mxu1  ;;  %10541 = vmatmul.mubr.f32.vlgmr.msra.gmra.mxu0 %v13288_v52  ;;  %10619 = vmatpush3.msra.mxu1 %v8086_v3 }
  0xee   : > { %v13687_v8 = vadd.f32 %v10142_v35, %v10062_v57  ;;  %10669 = vmatpush3.msra.mxu0 %v8117_v40  ;;  %10621 = vmatmul.mubr.f32.vlgmr.msra.gmra.mxu1 %v13290_v59  ;;  %v8114_v59 = vld [vmem:[%s17772_s1 + $0x460] sm:$0xff]  ;;  %v8113_v57 = vld [vmem:[%s17772_s1 + $0x458] sm:$0xff] }
  0xef   : > { %v561_v14 = vpop.f32.mrf.mxu0  ;;  %v786_v63 = vpop.f32.mrf.mxu1  ;;  %10543 = vmatprep.mubr.f32.mxu0 %v13306_v56  ;;  %10670 = vmatprep.subr.mxu0 %v8116_v51 }
  0xf0   : > { %v13694_v20 = vadd.f32 %v786_v63, %v561_v14  ;;  %10623 = vmatprep.mubr.f32.mxu1 %v13308_v18  ;;  %10671 = vmatpush3.msra.mxu0 %v8116_v51  ;;  %v8112_v63 = vld [vmem:[%s17772_s1 + $0x450] sm:$0xff] }
  0xf1   : > { %v10065_v52 = vpop.f32.mrf.mxu0  ;;  %v10145_v35 = vpop.f32.mrf.mxu1  ;;  %10544 = vmatmul.mubr.f32.gmra.mxu0 %v13313_v0  ;;  %10672 = vmatprep.subr.mxu0 %v8115_v29 }
  0xf2   : > { %v13701_v40 = vadd.f32 %v10145_v35, %v10065_v52  ;;  %10624 = vmatmul.mubr.f32.gmra.mxu1 %v13315_v17  ;;  %10546 = vmatprep.mubr.f32.mxu0 %v13333_v21 }
  0xf3   : > { %v571_v56 = vpop.f32.mrf.mxu0  ;;  %v796_v3 = vpop.f32.mrf.mxu1  ;;  %10626 = vmatprep.mubr.f32.mxu1 %v13335_v43  ;;  %10673 = vmatpush3.msra.mxu0 %v8115_v29 }
  0xf4   : > { %v13706_v18 = vadd.f32 %v796_v3, %v571_v56  ;;  %10674 = vmatprep.subr.mxu0 %v8114_v59 }
  0xf5   : > { %v10068_v0 = vpop.f32.mrf.mxu0  ;;  %v10148_v51 = vpop.f32.mrf.mxu1  ;;  %10547 = vmatmul.mubr.f32.gmra.mxu0 %v13339_v1 }
  0xf6   : > { %v13712_v14 = vadd.f32 %v10148_v51, %v10068_v0  ;;  %10627 = vmatmul.mubr.f32.gmra.mxu1 %v13341_v45  ;;  %10549 = vmatprep.mubr.f32.mxu0 %v13359_v24  ;;  %v8110_v0 = vld [vmem:[%s17772_s1 + $0x440] sm:$0xff] }
  0xf7   : > { %v581_v17 = vpop.f32.mrf.mxu0  ;;  %v806_v21 = vpop.f32.mrf.mxu1  ;;  %10629 = vmatprep.mubr.f32.mxu1 %v13361_v15  ;;  %10675 = vmatpush3.msra.mxu0 %v8114_v59  ;;  %v8111_v59 = vld [vmem:[%s17772_s1 + $0x448] sm:$0xff] }
  0xf8   : > { %v13717_v43 = vadd.f32 %v806_v21, %v581_v17  ;;  %10676 = vmatprep.subr.mxu0 %v8113_v57  ;;  %v8109_v17 = vld [vmem:[%s17772_s1 + $0x438] sm:$0xff] }
  0xf9   : > { %v10071_v29 = vpop.f32.mrf.mxu0  ;;  %v10151_v1 = vpop.f32.mrf.mxu1  ;;  %10550 = vmatmul.mubr.f32.gmra.mxu0 %v13365_v22 }
  0xfa   : > { %v13723_v52 = vadd.f32 %v10151_v1, %v10071_v29  ;;  %10630 = vmatmul.mubr.f32.gmra.mxu1 %v13367_v60  ;;  %10552 = vmatprep.mubr.f32.mxu0 %v13385_v27  ;;  %v8108_v1 = vld [vmem:[%s17772_s1 + $0x430] sm:$0xff] }
  0xfb   : > { %v591_v45 = vpop.f32.mrf.mxu0  ;;  %v816_v24 = vpop.f32.mrf.mxu1  ;;  %10632 = vmatprep.mubr.f32.mxu1 %v13387_v19  ;;  %10677 = vmatpush3.msra.mxu0 %v8113_v57 }
  0xfc   : > { %v13728_v15 = vadd.f32 %v816_v24, %v591_v45  ;;  %10678 = vmatprep.subr.mxu0 %v8112_v63  ;;  %v8107_v24 = vld [vmem:[%s17772_s1 + $0x428] sm:$0xff] }
  0xfd   : > { %v10074_v35 = vpop.f32.mrf.mxu0  ;;  %v10154_v22 = vpop.f32.mrf.mxu1  ;;  %10553 = vmatmul.mubr.f32.gmra.mxu0 %v13391_v25 }
  0xfe   : > { %v13734_v56 = vadd.f32 %v10154_v22, %v10074_v35  ;;  %10633 = vmatmul.mubr.f32.gmra.mxu1 %v13393_v10  ;;  %10555 = vmatprep.mubr.f32.mxu0 %v13411_v30  ;;  %v8106_v22 = vld [vmem:[%s17772_s1 + $0x420] sm:$0xff] }
  0xff   : > { %v601_v60 = vpop.f32.mrf.mxu0  ;;  %v826_v27 = vpop.f32.mrf.mxu1  ;;  %10635 = vmatprep.mubr.f32.mxu1 %v13413_v7  ;;  %10679 = vmatpush3.msra.mxu0 %v8112_v63 }
 0x100   : > { %v13739_v19 = vadd.f32 %v826_v27, %v601_v60  ;;  %10680 = vmatprep.subr.mxu0 %v8111_v59  ;;  %v8105_v60 = vld [vmem:[%s17772_s1 + $0x418] sm:$0xff] }
 0x101   : > { %v10077_v3 = vpop.f32.mrf.mxu0  ;;  %v10157_v25 = vpop.f32.mrf.mxu1  ;;  %10556 = vmatmul.mubr.f32.gmra.mxu0 %v13417_v28 }
 0x102   : > { %v13745_v51 = vadd.f32 %v10157_v25, %v10077_v3  ;;  %10636 = vmatmul.mubr.f32.gmra.mxu1 %v13419_v6  ;;  %10558 = vmatprep.mubr.f32.mxu0 %v13437_v33  ;;  %v17869_v3 = vld [vmem:[#allocation37_spill] sm:$0xff]  ;;  %v8104_v25 = vld [vmem:[%s17772_s1 + $0x410] sm:$0xff] }
 0x103   : > { %v611_v10 = vpop.f32.mrf.mxu0  ;;  %v836_v30 = vpop.f32.mrf.mxu1  ;;  %10638 = vmatprep.mubr.f32.mxu1 %v13439_v11  ;;  %10681 = vmatpush3.msra.mxu0 %v8111_v59 }
 0x104   : > { %v13750_v7 = vadd.f32 %v836_v30, %v611_v10  ;;  %10682 = vmatprep.subr.mxu0 %v8110_v0 }
 0x105   : > { %v10080_v57 = vpop.f32.mrf.mxu0  ;;  %v10160_v28 = vpop.f32.mrf.mxu1  ;;  %10559 = vmatmul.mubr.f32.gmra.mxu0 %v13443_v31 }
 0x106   : > { %v13756_v21 = vadd.f32 %v10160_v28, %v10080_v57  ;;  %10639 = vmatmul.mubr.f32.gmra.mxu1 %v13445_v58  ;;  %10561 = vmatprep.mubr.f32.mxu0 %v13463_v36  ;;  %v17871_v57 = vld [vmem:[#allocation5_spill] sm:$0xff]  ;;  %v8103_v28 = vld [vmem:[%s17772_s1 + $0x408] sm:$0xff] }
 0x107   : > { %v621_v6 = vpop.f32.mrf.mxu0  ;;  %v846_v33 = vpop.f32.mrf.mxu1  ;;  %10641 = vmatprep.mubr.f32.mxu1 %v13465_v23  ;;  %10683 = vmatpush3.msra.mxu0 %v8110_v0 }
 0x108   : > { %v13761_v11 = vadd.f32 %v846_v33, %v621_v6  ;;  %10684 = vmatprep.subr.mxu0 %v8109_v17  ;;  %v17872_v6 = vld [vmem:[#allocation40_spill] sm:$0xff] }
 0x109   : > { %v10083_v29 = vpop.f32.mrf.mxu0  ;;  %v10163_v31 = vpop.f32.mrf.mxu1  ;;  %10562 = vmatmul.mubr.f32.gmra.mxu0 %v13469_v34 }
 0x10a   : > { %v13767_v63 = vadd.f32 %v10163_v31, %v10083_v29  ;;  %10642 = vmatmul.mubr.f32.gmra.mxu1 %v13471_v62  ;;  %10564 = vmatprep.mubr.f32.mxu0 %v13489_v38  ;;  %v8102_v31 = vld [vmem:[%s17772_s1 + $0x400] sm:$0xff] }
 0x10b   : > { %v631_v58 = vpop.f32.mrf.mxu0  ;;  %v856_v36 = vpop.f32.mrf.mxu1  ;;  %10644 = vmatprep.mubr.f32.mxu1 %v13491_v4  ;;  %10685 = vmatpush3.msra.mxu0 %v8109_v17 }
 0x10c   : > { %v13772_v23 = vadd.f32 %v856_v36, %v631_v58  ;;  %10686 = vmatprep.subr.mxu0 %v8108_v1 }
 0x10d   : > { %v10086_v45 = vpop.f32.mrf.mxu0  ;;  %v10166_v34 = vpop.f32.mrf.mxu1  ;;  %10565 = vmatmul.mubr.f32.gmra.mxu0 %v13495_v37 }
 0x10e   : > { %v13778_v35 = vadd.f32 %v10166_v34, %v10086_v45  ;;  %10645 = vmatmul.mubr.f32.gmra.mxu1 %v13497_v61  ;;  %10567 = vmatprep.mubr.f32.mxu0 %v13515_v44  ;;  %v17875_v34 = vld [vmem:[#allocation13_spill] sm:$0xff] }
 0x10f   : > { %v13782_v62 = vpop.f32.mrf.mxu0  ;;  %v13784_v38 = vpop.f32.mrf.mxu1  ;;  %10647 = vmatprep.mubr.f32.mxu1 %v13517_v42  ;;  %10687 = vmatpush3.msra.mxu0 %v8108_v1 }
 0x110   : > { %10688 = vmatprep.subr.mxu0 %v8107_v24 }
 0x111   : > { %v10089_v4 = vpop.f32.mrf.mxu0  ;;  %v10169_v37 = vpop.f32.mrf.mxu1  ;;  %10568 = vmatmul.mubr.f32.gmra.mxu0 %v13521_v41 }
 0x112   : > { %v13791_v59 = vadd.f32 %v10169_v37, %v10089_v4  ;;  %10648 = vmatmul.mubr.f32.gmra.mxu1 %v13523_v12  ;;  %10570 = vmatprep.mubr.f32.mxu0 %v13541_v50 }
 0x113   : > { %v13795_v61 = vpop.f32.mrf.mxu0  ;;  %v13797_v44 = vpop.f32.mrf.mxu1  ;;  %10650 = vmatprep.mubr.f32.mxu1 %v13543_v47  ;;  %10689 = vmatpush3.msra.mxu0 %v8107_v24 }
 0x114   : > { %10690 = vmatprep.subr.mxu0 %v8106_v22 }
 0x115   : > { %v10092_v42 = vpop.f32.mrf.mxu0  ;;  %v10172_v41 = vpop.f32.mrf.mxu1  ;;  %10571 = vmatmul.mubr.f32.gmra.mxu0 %v13547_v49 }
 0x116   : > { %v13804_v27 = vadd.f32 %v10172_v41, %v10092_v42  ;;  %10651 = vmatmul.mubr.f32.gmra.mxu1 %v13549_v39  ;;  %10573 = vmatprep.mubr.f32.mxu0 %v13567_v55  ;;  %v17870_v39 = vld [vmem:[#allocation38_spill] sm:$0xff] }
 0x117   : > { %v13808_v12 = vpop.f32.mrf.mxu0  ;;  %v13810_v50 = vpop.f32.mrf.mxu1  ;;  %10653 = vmatprep.mubr.f32.mxu1 %v13569_v54  ;;  %10691 = vmatpush3.msra.mxu0 %v8106_v22  ;;  %v17876_v41 = vld [vmem:[#allocation14_spill] sm:$0xff] }
 0x118   : > { %10692 = vmatprep.subr.mxu0 %v8105_v60 }
 0x119   : > { %v10095_v47 = vpop.f32.mrf.mxu0  ;;  %v10175_v49 = vpop.f32.mrf.mxu1  ;;  %10574 = vmatmul.mubr.f32.gmra.mxu0 %v17869_v3 }
 0x11a   : > { %v13817_v0 = vadd.f32 %v10175_v49, %v10095_v47  ;;  %10654 = vmatmul.mubr.f32.gmra.mxu1 %v17870_v39  ;;  %10576 = vmatprep.mubr.f32.mxu0 %v13593_v48  ;;  %v17879_v49 = vld [vmem:[#allocation15_spill] sm:$0xff] }
 0x11b   : > { %v13821_v55 = vpop.f32.mrf.mxu0  ;;  %v13823_v10 = vpop.f32.mrf.mxu1  ;;  %10656 = vmatprep.mubr.f32.mxu1 %v13595_v9  ;;  %10693 = vmatpush3.msra.mxu0 %v8105_v60 }
 0x11c   : > { %10694 = vmatprep.subr.mxu0 %v8104_v25 }
 0x11d   : > { %v10098_v54 = vpop.f32.mrf.mxu0  ;;  %v10178_v30 = vpop.f32.mrf.mxu1  ;;  %10577 = vmatmul.mubr.f32.gmra.mxu0 %v17871_v57  ;;  %v17881_v57 = vld [vmem:[#allocation17_spill] sm:$0xff] }
 0x11e   : > { %v13830_v17 = vadd.f32 %v10178_v30, %v10098_v54  ;;  %10657 = vmatmul.mubr.f32.gmra.mxu1 %v17872_v6  ;;  %10579 = vmatprep.mubr.f32.mxu0 %v13619_v13  ;;  %v17873_v13 = vld [vmem:[#allocation11_spill] sm:$0xff] }
 0x11f   : > { %v13834_v48 = vpop.f32.mrf.mxu0  ;;  %v13836_v33 = vpop.f32.mrf.mxu1  ;;  %10659 = vmatprep.mubr.f32.mxu1 %v13621_v2  ;;  %10695 = vmatpush3.msra.mxu0 %v8104_v25  ;;  %v17874_v2 = vld [vmem:[#allocation9_spill] sm:$0xff]  ;;  %v17880_v25 = vld [vmem:[#allocation16_spill] sm:$0xff] }
 0x120   : > { %10696 = vmatprep.subr.mxu0 %v8103_v28 }
 0x121   : > { %v10101_v9 = vpop.f32.mrf.mxu0  ;;  %v10181_v29 = vpop.f32.mrf.mxu1  ;;  %10580 = vmatmul.mubr.f32.gmra.mxu0 %v13625_v53 }
 0x122   : > { %v13843_v1 = vadd.f32 %v10181_v29, %v10101_v9  ;;  %10660 = vmatmul.mubr.f32.gmra.mxu1 %v13627_v5  ;;  %10582 = vmatprep.mubr.f32.mxu0 %v17873_v13  ;;  %v17882_v9 = vld [vmem:[#allocation18_spill] sm:$0xff] }
 0x123   : > { %v13847_v58 = vpop.f32.mrf.mxu0  ;;  %v13849_v36 = vpop.f32.mrf.mxu1  ;;  %10662 = vmatprep.mubr.f32.mxu1 %v17874_v2  ;;  %10697 = vmatpush3.msra.mxu0 %v8103_v28  ;;  %v17883_v2 = vld [vmem:[#allocation19_spill] sm:$0xff] }
 0x124   : > { %10698 = vmatprep.subr.mxu0 %v8102_v31 }
 0x125   : > { %v10104_v45 = vpop.f32.mrf.mxu0  ;;  %v10184_v53 = vpop.f32.mrf.mxu1  ;;  %10583 = vmatmul.mubr.f32.gmra.mxu0 %v17875_v34  ;;  %v17884_v34 = vld [vmem:[#allocation20_spill] sm:$0xff] }
 0x126   : > { %v13853_v24 = vadd.f32 %v10184_v53, %v10104_v45  ;;  %10663 = vmatmul.mubr.f32.gmra.mxu1 %v17868_v32  ;;  %10585 = vmatprep.mubr.f32.mxu0 %v13292_v16 }
 0x127   : > { %v13857_v5 = vpop.f32.mrf.mxu0  ;;  %v13859_v4 = vpop.f32.mrf.mxu1  ;;  %10665 = vmatprep.mubr.f32.mxu1 %v13662_v26  ;;  %10699 = vmatpush3.msra.mxu0 %v8102_v31 }
 0x129   : > { %v10107_v37 = vpop.f32.mrf.mxu0  ;;  %v10187_v22 = vpop.f32.mrf.mxu1  ;;  %10586 = vmatmul.mubr.f32.gmra.mxu0 %v13292_v16 }
 0x12a   : > { %v13863_v42 = vadd.f32 %v10187_v22, %v10107_v37  ;;  %10666 = vmatmul.mubr.f32.gmra.mxu1 %v13669_v46  ;;  %10700 = vmatprep.mubr.f32.mxu0 %v17876_v41 }
 0x12b   : > { %v13867_v32 = vpop.f32.mrf.mxu0  ;;  %v13869_v60 = vpop.f32.mrf.mxu1 }
 0x12c   : > { %17877 = vst [vmem:[#allocation10_spill] sm:$0xff] %v13867_v32  ;;  %17878 = vst [vmem:[#allocation37_spill] sm:$0xff] %v13869_v60  ;;  %v17913_v60 = vld [vmem:[#allocation4_spill] sm:$0xff]  ;;  %v17916_v32 = vld [vmem:[#allocation41_spill] sm:$0xff] }
 0x12d   : > { %v10222_v47 = vpop.f32.mrf.mxu0  ;;  %10701 = vmatmul.mubr.f32.vlgmr.msra.gmra.mxu0 %v17879_v49 }
 0x12e   : > { %v1220_v26 = vadd.f32 %v10222_v47, %v13687_v8  ;;  %v10302_v3 = vpop.f32.mrf.mxu1  ;;  %10703 = vmatprep.mubr.f32.mxu0 %v17880_v25  ;;  %v17885_v47 = vld [vmem:[#allocation21_spill] sm:$0xff] }
 0x12f   : > { %v1060_v39 = vpop.f32.mrf.mxu0 }
 0x130   : > { %v13875_v16 = vadd.f32 %v1060_v39, %v13694_v20  ;;  %v13877_v54 = vadd.f32 %v10302_v3, %v1220_v26  ;;  %v13879_v46 = vpop.f32.mrf.mxu1  ;;  %v17886_v3 = vld [vmem:[#allocation22_spill] sm:$0xff] }
 0x131   : > { %v10225_v30 = vpop.f32.mrf.mxu0  ;;  %10704 = vmatmul.mubr.f32.gmra.mxu0 %v17881_v57  ;;  %v17887_v57 = vld [vmem:[#allocation23_spill] sm:$0xff] }
 0x132   : > { %v1222_v28 = vadd.f32 %v10225_v30, %v13701_v40  ;;  %v10305_v6 = vpop.f32.mrf.mxu1  ;;  %10706 = vmatprep.mubr.f32.mxu0 %v17882_v9  ;;  %v17888_v9 = vld [vmem:[#allocation24_spill] sm:$0xff] }
 0x133   : > { %v1070_v8 = vpop.f32.mrf.mxu0 }
 0x134   : > { %v13885_v29 = vadd.f32 %v1070_v8, %v13706_v18  ;;  %v13887_v31 = vadd.f32 %v10305_v6, %v1222_v28  ;;  %v13889_v20 = vpop.f32.mrf.mxu1 }
 0x135   : > { %v10228_v13 = vpop.f32.mrf.mxu0  ;;  %10707 = vmatmul.mubr.f32.gmra.mxu0 %v17883_v2 }
 0x136   : > { %v1224_v45 = vadd.f32 %v10228_v13, %v13712_v14  ;;  %v10308_v53 = vpop.f32.mrf.mxu1  ;;  %10709 = vmatprep.mubr.f32.mxu0 %v17884_v34 }
 0x137   : > { %v1080_v40 = vpop.f32.mrf.mxu0 }
 0x138   : > { %v13895_v37 = vadd.f32 %v1080_v40, %v13717_v43  ;;  %v13897_v22 = vadd.f32 %v10308_v53, %v1224_v45  ;;  %v13899_v18 = vpop.f32.mrf.mxu1  ;;  %v17890_v45 = vld [vmem:[#allocation25_spill] sm:$0xff]  ;;  %v17891_v40 = vld [vmem:[#allocation26_spill] sm:$0xff] }
 0x139   : > { %v10231_v41 = vpop.f32.mrf.mxu0  ;;  %10710 = vmatmul.mubr.f32.gmra.mxu0 %v17885_v47 }
 0x13a   : > { %v1226_v49 = vadd.f32 %v10231_v41, %v13723_v52  ;;  %v10311_v26 = vpop.f32.mrf.mxu1  ;;  %10712 = vmatprep.mubr.f32.mxu0 %v17886_v3 }
 0x13b   : > { %v1090_v14 = vpop.f32.mrf.mxu0 }
 0x13c   : > { %v13905_v25 = vadd.f32 %v1090_v14, %v13728_v15  ;;  %v13907_v39 = vadd.f32 %v10311_v26, %v1226_v49  ;;  %v13909_v43 = vpop.f32.mrf.mxu1  ;;  %v17894_v26 = vld [vmem:[#allocation27_spill] sm:$0xff] }
 0x13d   : > { %v10234_v30 = vpop.f32.mrf.mxu0  ;;  %10713 = vmatmul.mubr.f32.gmra.mxu0 %v17887_v57 }
 0x13e   : > { %v1228_v28 = vadd.f32 %v10234_v30, %v13734_v56  ;;  %v10314_v6 = vpop.f32.mrf.mxu1  ;;  %10715 = vmatprep.mubr.f32.mxu0 %v17888_v9  ;;  %v17895_v30 = vld [vmem:[#allocation28_spill] sm:$0xff]  ;;  %v17898_v9 = vld [vmem:[#allocation29_spill] sm:$0xff] }
 0x13f   : > { %v1100_v52 = vpop.f32.mrf.mxu0 }
 0x140   : > { %v13915_v8 = vadd.f32 %v1100_v52, %v13739_v19  ;;  %v13917_v13 = vadd.f32 %v10314_v6, %v1228_v28  ;;  %v13919_v15 = vpop.f32.mrf.mxu1 }
 0x141   : > { %17889 = vst [vmem:[#allocation38_spill] sm:$0xff] %v13919_v15  ;;  %v10237_v2 = vpop.f32.mrf.mxu0  ;;  %10716 = vmatmul.mubr.f32.gmra.mxu0 %v17890_v45  ;;  %v17899_v45 = vld [vmem:[#allocation30_spill] sm:$0xff] }
 0x142   : > { %v1230_v53 = vadd.f32 %v10237_v2, %v13745_v51  ;;  %v10317_v34 = vpop.f32.mrf.mxu1  ;;  %10718 = vmatprep.mubr.f32.mxu0 %v17891_v40 }
 0x143   : > { %v1110_v56 = vpop.f32.mrf.mxu0 }
 0x144   : > { %v13925_v41 = vadd.f32 %v1110_v56, %v13750_v7  ;;  %v13927_v47 = vadd.f32 %v10317_v34, %v1230_v53  ;;  %v13929_v19 = vpop.f32.mrf.mxu1  ;;  %v17902_v56 = vld [vmem:[#allocation31_spill] sm:$0xff] }
 0x145   : > { %17893 = vst [vmem:[#allocation40_spill] sm:$0xff] %v13929_v19  ;;  %v10240_v49 = vpop.f32.mrf.mxu0  ;;  %10719 = vmatmul.mubr.f32.gmra.mxu0 %v17894_v26 }
 0x146   : > { %17892 = vst [vmem:[#allocation5_spill] sm:$0xff] %v13925_v41  ;;  %v1232_v3 = vadd.f32 %v10240_v49, %v13756_v21  ;;  %v10320_v14 = vpop.f32.mrf.mxu1  ;;  %10721 = vmatprep.mubr.f32.mxu0 %v17895_v30 }
 0x147   : > { %v1120_v51 = vpop.f32.mrf.mxu0 }
 0x148   : > { %v13935_v57 = vadd.f32 %v1120_v51, %v13761_v11  ;;  %v13937_v28 = vadd.f32 %v10320_v14, %v1232_v3  ;;  %v13939_v7 = vpop.f32.mrf.mxu1  ;;  %v17903_v3 = vld [vmem:[#allocation32_spill] sm:$0xff]  ;;  %v17906_v51 = vld [vmem:[#allocation33_spill] sm:$0xff] }
 0x149   : > { %17897 = vst [vmem:[#allocation9_spill] sm:$0xff] %v13939_v7  ;;  %v10243_v6 = vpop.f32.mrf.mxu0  ;;  %10722 = vmatmul.mubr.f32.gmra.mxu0 %v17898_v9 }
 0x14a   : > { %17896 = vst [vmem:[#allocation11_spill] sm:$0xff] %v13935_v57  ;;  %v1234_v52 = vadd.f32 %v10243_v6, %v13767_v63  ;;  %v10323_v2 = vpop.f32.mrf.mxu1  ;;  %10724 = vmatprep.mubr.f32.mxu0 %v17899_v45 }
 0x14b   : > { %v1130_v21 = vpop.f32.mrf.mxu0 }
 0x14c   : > { %v13945_v53 = vadd.f32 %v1130_v21, %v13772_v23  ;;  %v13947_v34 = vadd.f32 %v10323_v2, %v1234_v52  ;;  %v13949_v11 = vpop.f32.mrf.mxu1  ;;  %v17907_v52 = vld [vmem:[#allocation34_spill] sm:$0xff] }
 0x14d   : > { %17901 = vst [vmem:[#allocation14_spill] sm:$0xff] %v13949_v11  ;;  %v10246_v40 = vpop.f32.mrf.mxu0  ;;  %10725 = vmatmul.mubr.f32.gmra.mxu0 %v17902_v56 }
 0x14e   : > { %17900 = vst [vmem:[#allocation13_spill] sm:$0xff] %v13945_v53  ;;  %v1236_v49 = vadd.f32 %v10246_v40, %v13778_v35  ;;  %v10326_v26 = vpop.f32.mrf.mxu1  ;;  %10727 = vmatprep.mubr.f32.mxu0 %v17903_v3  ;;  %v17910_v40 = vld [vmem:[#allocation35_spill] sm:$0xff] }
 0x14f   : > { %v13954_v63 = vpop.f32.mrf.mxu0 }
 0x150   : > { %17904 = vst [vmem:[#allocation15_spill] sm:$0xff] %v13954_v63  ;;  %v13956_v14 = vadd.f32 %v10326_v26, %v1236_v49  ;;  %v13958_v30 = vpop.f32.mrf.mxu1  ;;  %v17911_v26 = vld [vmem:[#allocation36_spill] sm:$0xff] }
 0x151   : > { %17905 = vst [vmem:[#allocation16_spill] sm:$0xff] %v13958_v30  ;;  %v10249_v23 = vpop.f32.mrf.mxu0  ;;  %10728 = vmatmul.mubr.f32.gmra.mxu0 %v17906_v51  ;;  %v8147_v30 = vld [vmem:[%s17774_s3 + $0x160] sm:$0xff] }
 0x152   : > { %v1238_v6 = vadd.f32 %v10249_v23, %v13791_v59  ;;  %v10329_v9 = vpop.f32.mrf.mxu1  ;;  %10730 = vmatprep.mubr.f32.mxu0 %v17907_v52  ;;  %v17912_v52 = vld [vmem:[#allocation39_spill] sm:$0xff] }
 0x153   : > { %v13963_v2 = vpop.f32.mrf.mxu0 }
 0x154   : > { %17908 = vst [vmem:[#allocation17_spill] sm:$0xff] %v13963_v2  ;;  %v13965_v35 = vadd.f32 %v10329_v9, %v1238_v6  ;;  %v13967_v45 = vpop.f32.mrf.mxu1  ;;  %v17924_v2 = vld [vmem:[#allocation43_spill] sm:$0xff] }
 0x155   : > { %17909 = vst [vmem:[#allocation18_spill] sm:$0xff] %v13967_v45  ;;  %v10252_v21 = vpop.f32.mrf.mxu0  ;;  %10731 = vmatmul.mubr.f32.gmra.mxu0 %v17910_v40  ;;  %v17917_v45 = vld [vmem:[#allocation6_spill] sm:$0xff] }
 0x156   : > { %v1240_v56 = vadd.f32 %v10252_v21, %v13804_v27  ;;  %v10332_v49 = vpop.f32.mrf.mxu1  ;;  %10733 = vmatprep.mubr.f32.mxu0 %v17911_v26 }
 0x157   : > { %v13972_v3 = vpop.f32.mrf.mxu0 }
 0x158   : > { %v13974_v59 = vadd.f32 %v10332_v49, %v1240_v56  ;;  %v13976_v23 = vpop.f32.mrf.mxu1 }
 0x159   : > { %v10255_v51 = vpop.f32.mrf.mxu0  ;;  %10734 = vmatmul.mubr.f32.gmra.mxu0 %v17912_v52 }
 0x15a   : > { %v1242_v6 = vadd.f32 %v10255_v51, %v13817_v0  ;;  %v10335_v9 = vpop.f32.mrf.mxu1  ;;  %10736 = vmatprep.mubr.f32.mxu0 %v17913_v60 }
 0x15b   : > { %v13981_v40 = vpop.f32.mrf.mxu0 }
 0x15c   : > { %17914 = vst [vmem:[#allocation19_spill] sm:$0xff] %v13981_v40  ;;  %v13983_v27 = vadd.f32 %v10335_v9, %v1242_v6  ;;  %v13985_v21 = vpop.f32.mrf.mxu1  ;;  %v17918_v40 = vld [vmem:[#allocation7_spill] sm:$0xff] }
 0x15d   : > { %17915 = vst [vmem:[#allocation20_spill] sm:$0xff] %v13985_v21  ;;  %v10258_v26 = vpop.f32.mrf.mxu0  ;;  %10737 = vmatmul.mubr.f32.gmra.mxu0 %v17916_v32  ;;  %v17919_v21 = vld [vmem:[#allocation8_spill] sm:$0xff] }
 0x15e   : > { %v1244_v56 = vadd.f32 %v10258_v26, %v13830_v17  ;;  %v10338_v49 = vpop.f32.mrf.mxu1  ;;  %10739 = vmatprep.mubr.f32.mxu0 %v17917_v45  ;;  %v8134_v45 = vld [vmem:[%s17774_s3 + $0xf8] sm:$0xff] }
 0x15f   : > { %v13990_v52 = vpop.f32.mrf.mxu0  ;;  %10748 = vmatprep.subr.mxu1 %v8134_v45 }
 0x160   : > { %v13992_v0 = vadd.f32 %v10338_v49, %v1244_v56  ;;  %v13994_v51 = vpop.f32.mrf.mxu1  ;;  %v17922_v49 = vld [vmem:[#allocation42_spill] sm:$0xff]  ;;  %10749 = vmatpush3.msra.mxu1 %v8134_v45  ;;  %v8132_v45 = vld [vmem:[%s17774_s3 + $0xe8] sm:$0xff] }
 0x161   : > { %v10261_v60 = vpop.f32.mrf.mxu0  ;;  %10740 = vmatmul.mubr.f32.gmra.mxu0 %v17918_v40 }
 0x162   : > { %v1246_v6 = vadd.f32 %v10261_v60, %v13843_v1  ;;  %v10341_v9 = vpop.f32.mrf.mxu1  ;;  %10742 = vmatprep.mubr.f32.mxu0 %v17919_v21  ;;  %v17923_v60 = vld [vmem:[#allocation12_spill] sm:$0xff] }
 0x163   : > { %v13999_v32 = vpop.f32.mrf.mxu0 }
 0x164   : > { %17920 = vst [vmem:[#allocation21_spill] sm:$0xff] %v13999_v32  ;;  %v14001_v17 = vadd.f32 %v10341_v9, %v1246_v6  ;;  %v14003_v26 = vpop.f32.mrf.mxu1 }
 0x165   : > { %17921 = vst [vmem:[#allocation22_spill] sm:$0xff] %v14003_v26  ;;  %v10264_v56 = vpop.f32.mrf.mxu0  ;;  %10743 = vmatmul.mubr.f32.gmra.mxu0 %v17922_v49  ;;  %v8133_v26 = vld [vmem:[%s17774_s3 + $0xf0] sm:$0xff] }
 0x166   : > { %v1248_v40 = vadd.f32 %v10264_v56, %v13853_v24  ;;  %v10344_v1 = vpop.f32.mrf.mxu1  ;;  %10745 = vmatprep.mubr.f32.mxu0 %v17923_v60  ;;  %10750 = vmatprep.subr.mxu1 %v8133_v26 }
 0x167   : > { %v14011_v21 = vpop.f32.mrf.mxu0  ;;  %10751 = vmatpush3.msra.mxu1 %v8133_v26 }
 0x168   : > { %v14013_v6 = vadd.f32 %v10344_v1, %v1248_v40  ;;  %v14015_v9 = vpop.f32.mrf.mxu1  ;;  %10752 = vmatprep.subr.mxu1 %v8132_v45 }
 0x169   : > { %v10267_v32 = vpop.f32.mrf.mxu0  ;;  %10746 = vmatmul.mubr.f32.gmra.mxu0 %v17924_v2  ;;  %10753 = vmatpush3.msra.mxu1 %v8132_v45  ;;  %v8131_v2 = vld [vmem:[%s17774_s3 + $0xe0] sm:$0xff] }
 0x16a   : > { %v1250_v24 = vadd.f32 %v10267_v32, %v13863_v42  ;;  %v10347_v56 = vpop.f32.mrf.mxu1  ;;  %10754 = vmatprep.subr.mxu1 %v8131_v2 }
 0x16b   : > { %v14022_v49 = vpop.f32.mrf.mxu0  ;;  %10755 = vmatpush3.msra.mxu1 %v8131_v2  ;;  %v8129_v2 = vld [vmem:[%s17774_s3 + $0xd0] sm:$0xff] }
 0x16c   : > { %17925 = vst [vmem:[#allocation23_spill] sm:$0xff] %v14022_v49  ;;  %v14027_v40 = vadd.f32 %v10347_v56, %v1250_v24  ;;  %v14029_v1 = vpop.f32.mrf.mxu1  ;;  %v8150_v24 = vld [vmem:[%s17774_s3 + $0x178] sm:$0xff] }
 0x16d   : > { %17926 = vst [vmem:[#allocation24_spill] sm:$0xff] %v14029_v1  ;;  %v10382_v60 = vpop.f32.mrf.mxu0  ;;  %v8130_v56 = vld [vmem:[%s17774_s3 + $0xd8] sm:$0xff]  ;;  %10836 = vmatprep.subr.mxu0 %v8150_v24 }
 0x16e   : > { %v1832_v42 = vadd.f32 %v10382_v60, %v13877_v54  ;;  %v10462_v32 = vpop.f32.mrf.mxu1  ;;  %10756 = vmatprep.subr.mxu1 %v8130_v56  ;;  %10837 = vmatpush3.msra.mxu0 %v8150_v24  ;;  %v8149_v60 = vld [vmem:[%s17774_s3 + $0x170] sm:$0xff]  ;;  %v8148_v24 = vld [vmem:[%s17774_s3 + $0x168] sm:$0xff] }
 0x16f   : > { %v14035_v26 = vpop.f32.mrf.mxu0  ;;  %10757 = vmatpush3.msra.mxu1 %v8130_v56  ;;  %10838 = vmatprep.subr.mxu0 %v8149_v60 }
 0x170   : > { %v14043_v45 = vadd.f32 %v10462_v32, %v1832_v42  ;;  %v14045_v1 = vpop.f32.mrf.mxu1  ;;  %10758 = vmatprep.subr.mxu1 %v8129_v2  ;;  %10839 = vmatpush3.msra.mxu0 %v8149_v60 }
 0x171   : > { %v10385_v54 = vpop.f32.mrf.mxu0  ;;  %10759 = vmatpush3.msra.mxu1 %v8129_v2  ;;  %10840 = vmatprep.subr.mxu0 %v8148_v24  ;;  %v8127_v2 = vld [vmem:[%s17774_s3 + $0xc0] sm:$0xff] }
 0x172   : > { %v14054_v49 = vadd.f32 %v10385_v54, %v13887_v31  ;;  %v14056_v42 = vpop.f32.mrf.mxu1  ;;  %v8128_v31 = vld [vmem:[%s17774_s3 + $0xc8] sm:$0xff]  ;;  %10841 = vmatpush3.msra.mxu0 %v8148_v24  ;;  %v8146_v24 = vld [vmem:[%s17774_s3 + $0x158] sm:$0xff] }
 0x173   : > { %v14058_v32 = vpop.f32.mrf.mxu0  ;;  %10760 = vmatprep.subr.mxu1 %v8128_v31  ;;  %10842 = vmatprep.subr.mxu0 %v8147_v30 }
 0x174   : > { %v14063_v56 = vpop.f32.mrf.mxu1  ;;  %10761 = vmatpush3.msra.mxu1 %v8128_v31  ;;  %10843 = vmatpush3.msra.mxu0 %v8147_v30 }
 0x175   : > { %v10388_v54 = vpop.f32.mrf.mxu0  ;;  %10762 = vmatprep.subr.mxu1 %v8127_v2  ;;  %10844 = vmatprep.subr.mxu0 %v8146_v24 }
 0x176   : > { %v1836_v60 = vadd.f32 %v10388_v54, %v13897_v22  ;;  %v10468_v63 = vpop.f32.mrf.mxu1  ;;  %10763 = vmatpush3.msra.mxu1 %v8127_v2  ;;  %v8126_v22 = vld [vmem:[%s17774_s3 + $0xb8] sm:$0xff]  ;;  %10845 = vmatpush3.msra.mxu0 %v8146_v24 }
 0x177   : > { %v14075_v11 = vpop.f32.mrf.mxu0  ;;  %10764 = vmatprep.subr.mxu1 %v8126_v22 }
 0x178   : > { %v14080_v53 = vadd.f32 %v10468_v63, %v1836_v60  ;;  %v14082_v7 = vpop.f32.mrf.mxu1  ;;  %v8145_v63 = vld [vmem:[%s17774_s3 + $0x150] sm:$0xff]  ;;  %10765 = vmatpush3.msra.mxu1 %v8126_v22  ;;  %v8124_v22 = vld [vmem:[%s17774_s3 + $0xa8] sm:$0xff] }
 0x179   : > { %v10391_v31 = vpop.f32.mrf.mxu0  ;;  %v8125_v60 = vld [vmem:[%s17774_s3 + $0xb0] sm:$0xff]  ;;  %10846 = vmatprep.subr.mxu0 %v8145_v63 }
 0x17a   : > { %v14088_v30 = vadd.f32 %v10391_v31, %v13907_v39  ;;  %v14090_v54 = vpop.f32.mrf.mxu1  ;;  %10766 = vmatprep.subr.mxu1 %v8125_v60  ;;  %10847 = vmatpush3.msra.mxu0 %v8145_v63  ;;  %v8144_v39 = vld [vmem:[%s17774_s3 + $0x148] sm:$0xff]  ;;  %v8143_v63 = vld [vmem:[%s17774_s3 + $0x140] sm:$0xff] }
 0x17b   : > { %17928 = vst [vmem:[#allocation26_spill] sm:$0xff] %v14090_v54  ;;  %v14098_v2 = vpop.f32.mrf.mxu0  ;;  %10767 = vmatpush3.msra.mxu1 %v8125_v60  ;;  %10848 = vmatprep.subr.mxu0 %v8144_v39  ;;  %v8123_v60 = vld [vmem:[%s17774_s3 + $0xa0] sm:$0xff] }
 0x17c   : > { %17927 = vst [vmem:[#allocation25_spill] sm:$0xff] %v14088_v30  ;;  %v14100_v24 = vpop.f32.mrf.mxu1  ;;  %10768 = vmatprep.subr.mxu1 %v8124_v22  ;;  %10849 = vmatpush3.msra.mxu0 %v8144_v39  ;;  %v8122_v39 = vld [vmem:[%s17774_s3 + $0x98] sm:$0xff] }
 0x17d   : > { %17929 = vst [vmem:[#allocation27_spill] sm:$0xff] %v14100_v24  ;;  %v10394_v31 = vpop.f32.mrf.mxu0  ;;  %10769 = vmatpush3.msra.mxu1 %v8124_v22  ;;  %10850 = vmatprep.subr.mxu0 %v8143_v63 }
 0x17e   : > { %v1840_v54 = vadd.f32 %v10394_v31, %v13917_v13  ;;  %v10474_v30 = vpop.f32.mrf.mxu1  ;;  %10770 = vmatprep.subr.mxu1 %v8123_v60  ;;  %10851 = vmatpush3.msra.mxu0 %v8143_v63  ;;  %v8142_v13 = vld [vmem:[%s17774_s3 + $0x138] sm:$0xff]  ;;  %v8121_v63 = vld [vmem:[%s17774_s3 + $0x90] sm:$0xff] }
 0x17f   : > { %v14115_v24 = vpop.f32.mrf.mxu0  ;;  %10771 = vmatpush3.msra.mxu1 %v8123_v60  ;;  %10852 = vmatprep.subr.mxu0 %v8142_v13 }
 0x180   : > { %17930 = vst [vmem:[#allocation28_spill] sm:$0xff] %v14115_v24  ;;  %v14117_v57 = vadd.f32 %v10474_v30, %v1840_v54  ;;  %v14119_v19 = vpop.f32.mrf.mxu1  ;;  %10772 = vmatprep.subr.mxu1 %v8122_v39  ;;  %10853 = vmatpush3.msra.mxu0 %v8142_v13  ;;  %v8141_v54 = vld [vmem:[%s17774_s3 + $0x130] sm:$0xff]  ;;  %v8120_v13 = vld [vmem:[%s17774_s3 + $0x88] sm:$0xff] }
 0x181   : > { %17931 = vst [vmem:[#allocation29_spill] sm:$0xff] %v14119_v19  ;;  %v10397_v22 = vpop.f32.mrf.mxu0  ;;  %10773 = vmatpush3.msra.mxu1 %v8122_v39  ;;  %10854 = vmatprep.subr.mxu0 %v8141_v54 }
 0x182   : > { %v14128_v31 = vadd.f32 %v10397_v22, %v13927_v47  ;;  %v14130_v30 = vpop.f32.mrf.mxu1  ;;  %10774 = vmatprep.subr.mxu1 %v8121_v63  ;;  %10855 = vmatpush3.msra.mxu0 %v8141_v54  ;;  %v8140_v47 = vld [vmem:[%s17774_s3 + $0x128] sm:$0xff]  ;;  %v8139_v54 = vld [vmem:[%s17774_s3 + $0x120] sm:$0xff] }
 0x183   : > { %17933 = vst [vmem:[#allocation31_spill] sm:$0xff] %v14130_v30  ;;  %v14138_v60 = vpop.f32.mrf.mxu0  ;;  %10775 = vmatpush3.msra.mxu1 %v8121_v63  ;;  %10856 = vmatprep.subr.mxu0 %v8140_v47  ;;  %v8119_v63 = vld [vmem:[%s17774_s3 + $0x80] sm:$0xff] }
 0x184   : > { %17932 = vst [vmem:[#allocation30_spill] sm:$0xff] %v14128_v31  ;;  %17934 = vst [vmem:[#allocation32_spill] sm:$0xff] %v14138_v60  ;;  %v14140_v19 = vpop.f32.mrf.mxu1  ;;  %10776 = vmatprep.subr.mxu1 %v8120_v13  ;;  %10857 = vmatpush3.msra.mxu0 %v8140_v47  ;;  %v3397_v31 = vld [vmem:[#allocation2 + $0x1] sm:$0xff] }
 0x185   : > { %17935 = vst [vmem:[#allocation33_spill] sm:$0xff] %v14140_v19  ;;  %v10400_v39 = vpop.f32.mrf.mxu0  ;;  %10777 = vmatpush3.msra.mxu1 %v8120_v13  ;;  %10858 = vmatprep.subr.mxu0 %v8139_v54 }
 0x186   : > { %v1844_v22 = vadd.f32 %v10400_v39, %v13937_v28  ;;  %v10480_v30 = vpop.f32.mrf.mxu1  ;;  %10778 = vmatprep.subr.mxu1 %v8119_v63  ;;  %10859 = vmatpush3.msra.mxu0 %v8139_v54  ;;  %v8138_v28 = vld [vmem:[%s17774_s3 + $0x118] sm:$0xff] }
 0x187   : > { %v14155_v19 = vpop.f32.mrf.mxu0  ;;  %10779 = vmatpush3.msra.mxu1 %v8119_v63  ;;  %10860 = vmatprep.subr.mxu0 %v8138_v28 }
 0x188   : > { %17936 = vst [vmem:[#allocation34_spill] sm:$0xff] %v14155_v19  ;;  %v14157_v60 = vadd.f32 %v10480_v30, %v1844_v22  ;;  %v14159_v24 = vpop.f32.mrf.mxu1  ;;  %10780 = vmatprep.mubr.f32.mxu1 %v3397_v31  ;;  %10861 = vmatpush3.msra.mxu0 %v8138_v28  ;;  %v8137_v30 = vld [vmem:[%s17774_s3 + $0x110] sm:$0xff]  ;;  %v8136_v31 = vld [vmem:[%s17774_s3 + $0x108] sm:$0xff]  ;;  %v8135_v28 = vld [vmem:[%s17774_s3 + $0x100] sm:$0xff] }
 0x189   : > { %17937 = vst [vmem:[#allocation35_spill] sm:$0xff] %v14159_v24  ;;  %v10403_v47 = vpop.f32.mrf.mxu0  ;;  %10862 = vmatprep.subr.mxu0 %v8137_v30  ;;  %v14189_v24 = vld [vmem:[#allocation2] sm:$0xff] }
 0x18a   : > { %v14165_v13 = vadd.f32 %v10403_v47, %v13947_v34  ;;  %v14167_v39 = vpop.f32.mrf.mxu1  ;;  %10863 = vmatpush3.msra.mxu0 %v8137_v30  ;;  %17944 = vst [vmem:[#allocation8_spill] sm:$0xff] %v14189_v24 }
 0x18b   : > { %17939 = vst [vmem:[#allocation39_spill] sm:$0xff] %v14167_v39  ;;  %v14172_v22 = vpop.f32.mrf.mxu0  ;;  %10864 = vmatprep.subr.mxu0 %v8136_v31 }
 0x18c   : > { %17938 = vst [vmem:[#allocation36_spill] sm:$0xff] %v14165_v13  ;;  %17940 = vst [vmem:[#allocation4_spill] sm:$0xff] %v14172_v22  ;;  %v14174_v54 = vpop.f32.mrf.mxu1  ;;  %10865 = vmatpush3.msra.mxu0 %v8136_v31  ;;  %v3632_v13 = vld [vmem:[#allocation2 + $0x2] sm:$0xff] }
 0x18d   : > { %17941 = vst [vmem:[#allocation41_spill] sm:$0xff] %v14174_v54  ;;  %v10406_v63 = vpop.f32.mrf.mxu0  ;;  %10866 = vmatprep.subr.mxu0 %v8135_v28  ;;  %10868 = vmatprep.mubr.f32.mxu0 %v3632_v13  ;;  %4662 = vst [vmem:[#allocation2 + $0x8] sm:$0xff] %v14189_v24 }
 0x18e   : > { %v1848_v34 = vadd.f32 %v10406_v63, %v13956_v14  ;;  %v10486_v47 = vpop.f32.mrf.mxu1  ;;  %10867 = vmatpush3.msra.mxu0 %v8135_v28  ;;  %4661 = vst [vmem:[#allocation2] sm:$0xff] %v14189_v24 }
 0x18f   : > { %v14183_v39 = vpop.f32.mrf.mxu0 }
 0x190   : > { %17942 = vst [vmem:[#allocation6_spill] sm:$0xff] %v14183_v39  ;;  %v14185_v54 = vadd.f32 %v10486_v47, %v1848_v34  ;;  %v14187_v30 = vpop.f32.mrf.mxu1 }
 0x191   : > { %17943 = vst [vmem:[#allocation7_spill] sm:$0xff] %v14187_v30  ;;  %v10409_v14 = vpop.f32.mrf.mxu0 }
 0x192   : > { %v14194_v31 = vadd.f32 %v10409_v14, %v13965_v35  ;;  %v14196_v63 = vpop.f32.mrf.mxu1 }
 0x193   : > { %17946 = vst [vmem:[#allocation12_spill] sm:$0xff] %v14196_v63  ;;  %v14198_v39 = vpop.f32.mrf.mxu0 }
 0x194   : > { %17945 = vst [vmem:[#allocation42_spill] sm:$0xff] %v14194_v31  ;;  %17947 = vst [vmem:[#allocation43_spill] sm:$0xff] %v14198_v39  ;;  %v14200_v34 = vpop.f32.mrf.mxu1 }
 0x195   : > { %17948 = vst [vmem:[#allocation44_spill] sm:$0xff] %v14200_v34  ;;  %v10412_v47 = vpop.f32.mrf.mxu0  ;;  %v14219_v34 = vld [vmem:[%s17774_s3 + $0x78] sm:$0xff] }
 0x196   : > { %v1852_v28 = vadd.f32 %v10412_v47, %v13974_v59  ;;  %v10492_v13 = vpop.f32.mrf.mxu1  ;;  %17952 = vst [vmem:[#allocation48_spill] sm:$0xff] %v14219_v34  ;;  %10792 = vmatprep.subr.mxu1 %v14219_v34 }
 0x197   : > { %v14203_v30 = vpop.f32.mrf.mxu0 }
 0x198   : > { %v14205_v22 = vadd.f32 %v10492_v13, %v1852_v28  ;;  %v14207_v19 = vpop.f32.mrf.mxu1 }
 0x199   : > { %v10415_v24 = vpop.f32.mrf.mxu0 }
 0x19a   : > { %v14210_v35 = vadd.f32 %v10415_v24, %v13983_v27  ;;  %v14212_v14 = vpop.f32.mrf.mxu1  ;;  %v927_v27 = vadd.f32 %v13859_v4, %v13857_v5 }
 0x19b   : > { %17950 = vst [vmem:[#allocation46_spill] sm:$0xff] %v14212_v14  ;;  %v14214_v63 = vpop.f32.mrf.mxu0 }
 0x19c   : > { %17949 = vst [vmem:[#allocation45_spill] sm:$0xff] %v14210_v35  ;;  %17951 = vst [vmem:[#allocation47_spill] sm:$0xff] %v14214_v63  ;;  %v14221_v59 = vpop.f32.mrf.mxu1  ;;  %v1247_v63 = vadd.f32 %v14011_v21, %v927_v27 }
 0x19d   : > { %17953 = vst [vmem:[#allocation49_spill] sm:$0xff] %v14221_v59  ;;  %v10418_v47 = vpop.f32.mrf.mxu0 }
 0x19e   : > { %v1856_v28 = vadd.f32 %v10418_v47, %v13992_v0  ;;  %v10498_v13 = vpop.f32.mrf.mxu1  ;;  %v14244_v0 = vld [vmem:[%s17774_s3 + $0x278] sm:$0xff]  ;;  %v1553_v47 = vadd.f32 %v14015_v9, %v1247_v63 }
 0x19f   : > { %v14225_v31 = vpop.f32.mrf.mxu0  ;;  %17957 = vst [vmem:[#allocation53_spill] sm:$0xff] %v14244_v0  ;;  %10924 = vmatprep.subr.mxu0 %v14244_v0 }
 0x1a0   : > { %v14229_v24 = vadd.f32 %v10498_v13, %v1856_v28  ;;  %v14231_v14 = vpop.f32.mrf.mxu1 }
 0x1a1   : > { %v10421_v35 = vpop.f32.mrf.mxu0 }
 0x1a2   : > { %v14235_v59 = vadd.f32 %v10421_v35, %v14001_v17  ;;  %v14237_v34 = vpop.f32.mrf.mxu1 }
 0x1a3   : > { %17955 = vst [vmem:[#allocation51_spill] sm:$0xff] %v14237_v34  ;;  %v14239_v39 = vpop.f32.mrf.mxu0 }
 0x1a4   : > { %17954 = vst [vmem:[#allocation50_spill] sm:$0xff] %v14235_v59  ;;  %17956 = vst [vmem:[#allocation52_spill] sm:$0xff] %v14239_v39  ;;  %v14246_v5 = vpop.f32.mrf.mxu1 }
 0x1a5   : > { %17958 = vst [vmem:[#allocation54_spill] sm:$0xff] %v14246_v5  ;;  %v10424_v4 = vpop.f32.mrf.mxu0 }
 0x1a6   : > { %v1860_v21 = vadd.f32 %v10424_v4, %v14013_v6  ;;  %v10504_v17 = vpop.f32.mrf.mxu1 }
 0x1a7   : > { %v1812_v35 = vpop.f32.mrf.mxu0 }
 0x1a8   : > { %v1859_v28 = vadd.f32 %v1812_v35, %v1553_v47  ;;  %v14251_v13 = vadd.f32 %v10504_v17, %v1860_v21  ;;  %v2118_v27 = vpop.f32.mrf.mxu1 }
 0x1a9   : > { %v10427_v34 = vpop.f32.mrf.mxu0 }
 0x1aa   : > { %v14254_v59 = vadd.f32 %v10427_v34, %v14027_v40  ;;  %v14256_v39 = vadd.f32 %v2118_v27, %v1859_v28  ;;  %v14258_v5 = vpop.f32.mrf.mxu1 }
 0x1ab   : > { %17960 = vst [vmem:[#allocation56_spill] sm:$0xff] %v14258_v5  ;;  %v14260_v0 = vpop.f32.mrf.mxu0 }
 0x1ac   : > { %17959 = vst [vmem:[#allocation55_spill] sm:$0xff] %v14254_v59  ;;  %17961 = vst [vmem:[#allocation57_spill] sm:$0xff] %v14260_v0  ;;  %v14262_v41 = vpop.f32.mrf.mxu1 }
 0x1ad   : > { %17962 = vst [vmem:[#allocation58_spill] sm:$0xff] %v14262_v41  ;;  %v10542_v9 = vpop.f32.mrf.mxu0 }
 0x1ae   : > { %v14265_v6 = vadd.f32 %v10542_v9, %v14043_v45  ;;  %v14267_v63 = vpop.f32.mrf.mxu1 }
 0x1af   : > { %v14269_v4 = vpop.f32.mrf.mxu0 }
 0x1b0   : > { %v14271_v47 = vpop.f32.mrf.mxu1 }
 0x1b1   : > { %v14273_v40 = vpop.f32.mrf.mxu0 }
 0x1b2   : > { %v14277_v21 = vpop.f32.mrf.mxu1 }
 0x1b3   : > { %v14275_v34 = vpop.f32.mrf.mxu0 }
 0x1b4   : > { %v14282_v28 = vpop.f32.mrf.mxu1 }
 0x1b5   : > { %v10548_v17 = vpop.f32.mrf.mxu0  ;;  %17964 = vst [vmem:[#allocation60_spill] sm:$0xff] %v14282_v28 }
 0x1b6   : > { %v14280_v35 = vadd.f32 %v10548_v17, %v14080_v53  ;;  %v14288_v9 = vpop.f32.mrf.mxu1 }
 0x1b7   : > { %v14284_v45 = vpop.f32.mrf.mxu0  ;;  %17966 = vst [vmem:[#allocation62_spill] sm:$0xff] %v14288_v9 }
 0x1b8   : > { %17963 = vst [vmem:[#allocation59_spill] sm:$0xff] %v14280_v35  ;;  %v14295_v0 = vpop.f32.mrf.mxu1 }
 0x1b9   : > { %v14286_v27 = vpop.f32.mrf.mxu0 }
 0x1ba   : > { %17965 = vst [vmem:[#allocation61_spill] sm:$0xff] %v14286_v27  ;;  %v14301_v17 = vpop.f32.mrf.mxu1 }
 0x1bb   : > { %v14290_v41 = vpop.f32.mrf.mxu0  ;;  %17971 = vst [vmem:[#allocation67_spill] sm:$0xff] %v14301_v17 }
 0x1bc   : > { %17967 = vst [vmem:[#allocation63_spill] sm:$0xff] %v14290_v41  ;;  %v14308_v9 = vpop.f32.mrf.mxu1 }
 0x1bd   : > { %v10554_v5 = vpop.f32.mrf.mxu0 }
 0x1be   : > { %v14293_v59 = vadd.f32 %v10554_v5, %v14117_v57  ;;  %v887_v5 = vadd.f32 %v13810_v50, %v13808_v12  ;;  %v907_v12 = vadd.f32 %v13836_v33, %v13834_v48 }
 0x1bf   : > { %v14297_v15 = vpop.f32.mrf.mxu0 }
 0x1c0   : > { %17968 = vst [vmem:[#allocation64_spill] sm:$0xff] %v14293_v59  ;;  %17969 = vst [vmem:[#allocation65_spill] sm:$0xff] %v14297_v15  ;;  %v14316_v59 = vpop.f32.mrf.mxu1  ;;  %v1239_v15 = vadd.f32 %v13972_v3, %v887_v5 }
 0x1c1   : > { %v14299_v53 = vpop.f32.mrf.mxu0 }
 0x1c2   : > { %17970 = vst [vmem:[#allocation66_spill] sm:$0xff] %v14299_v53 }
 0x1c3   : > { %v14303_v35 = vpop.f32.mrf.mxu0 }
 0x1c4   : > { %17972 = vst [vmem:[#allocation68_spill] sm:$0xff] %v14303_v35 }
 0x1c5   : > { %v10560_v28 = vpop.f32.mrf.mxu0 }
 0x1c6   : > { %v14306_v27 = vadd.f32 %v10560_v28, %v14157_v60  ;;  %v14324_v60 = vpop.f32.mrf.mxu1 }
 0x1c7   : > { %v14310_v41 = vpop.f32.mrf.mxu0 }
 0x1c8   : > { %17973 = vst [vmem:[#allocation69_spill] sm:$0xff] %v14306_v27  ;;  %v1545_v27 = vadd.f32 %v13976_v23, %v1239_v15 }
 0x1c9   : > { %v14312_v57 = vpop.f32.mrf.mxu0 }
 0x1ca   : > { %17974 = vst [vmem:[#allocation70_spill] sm:$0xff] %v14312_v57  ;;  %v1851_v50 = vadd.f32 %v14203_v30, %v1545_v27 }
 0x1cb   : > { %v14318_v53 = vpop.f32.mrf.mxu0 }
 0x1cc   : > { %17975 = vst [vmem:[#allocation71_spill] sm:$0xff] %v14318_v53  ;;  %v14334_v53 = vpop.f32.mrf.mxu1  ;;  %v2157_v5 = vadd.f32 %v14207_v19, %v1851_v50 }
 0x1cd   : > { %v10566_v35 = vpop.f32.mrf.mxu0 }
 0x1ce   : > { %v14322_v17 = vadd.f32 %v10566_v35, %v14185_v54  ;;  %v1243_v54 = vadd.f32 %v13990_v52, %v907_v12  ;;  %v14343_v15 = vpop.f32.mrf.mxu1 }
 0x1cf   : > { %v14326_v28 = vpop.f32.mrf.mxu0 }
 0x1d0   : > { %17976 = vst [vmem:[#allocation72_spill] sm:$0xff] %v14322_v17  ;;  %v14351_v27 = vpop.f32.mrf.mxu1 }
 0x1d1   : > { %v14329_v57 = vpop.f32.mrf.mxu0 }
 0x1d2   : > { %17977 = vst [vmem:[#allocation73_spill] sm:$0xff] %v14329_v57  ;;  %v1549_v57 = vadd.f32 %v13994_v51, %v1243_v54  ;;  %v14359_v50 = vpop.f32.mrf.mxu1 }
 0x1d3   : > { %v14336_v3 = vpop.f32.mrf.mxu0 }
 0x1d4   : > { %v1855_v30 = vadd.f32 %v14225_v31, %v1549_v57  ;;  %v1525_v31 = vadd.f32 %v13879_v46, %v13875_v16  ;;  %v14367_v57 = vpop.f32.mrf.mxu1 }
 0x1d5   : > { %v10572_v35 = vpop.f32.mrf.mxu0 }
 0x1d6   : > { %v14341_v17 = vadd.f32 %v10572_v35, %v14205_v22  ;;  %v2161_v19 = vadd.f32 %v14231_v14, %v1855_v30 }
 0x1d7   : > { %v2385_v23 = vpop.f32.mrf.mxu0 }
 0x1d8   : > { %v14346_v48 = vadd.f32 %v2385_v23, %v2157_v5  ;;  %v1831_v23 = vadd.f32 %v14035_v26, %v1525_v31  ;;  %v1529_v26 = vadd.f32 %v13899_v18, %v13895_v37 }
 0x1d9   : > { %v14348_v33 = vpop.f32.mrf.mxu0 }
 0x1db   : > { %v14353_v52 = vpop.f32.mrf.mxu0 }
 0x1dd   : > { %v10578_v12 = vpop.f32.mrf.mxu0 }
 0x1de   : > { %v14357_v22 = vadd.f32 %v10578_v12, %v14229_v24  ;;  %v1527_v24 = vadd.f32 %v13889_v20, %v13885_v29  ;;  %v14377_v12 = vpop.f32.mrf.mxu1  ;;  %v2140_v29 = vadd.f32 %v14056_v42, %v14054_v49 }
 0x1df   : > { %v2405_v35 = vpop.f32.mrf.mxu0 }
 0x1e0   : > { %v14361_v51 = vadd.f32 %v2405_v35, %v2161_v19  ;;  %v2137_v35 = vadd.f32 %v14045_v1, %v1831_v23  ;;  %v1833_v16 = vadd.f32 %v14058_v32, %v1527_v24  ;;  %v2447_v37 = vadd.f32 %v14273_v40, %v2140_v29  ;;  %v17980_v40 = vld [vmem:[#allocation5_spill] sm:$0xff] }
 0x1e1   : > { %v14363_v54 = vpop.f32.mrf.mxu0  ;;  %v1531_v23 = vadd.f32 %v13909_v43, %v13905_v25  ;;  %v14418_v43 = vadd.f32 %v13823_v10, %v13821_v55  ;;  %v17982_v55 = vld [vmem:[#allocation11_spill] sm:$0xff]  ;;  %v17983_v10 = vld [vmem:[#allocation9_spill] sm:$0xff] }
 0x1e2   : > { %v2444_v20 = vadd.f32 %v14269_v4, %v2137_v35  ;;  %v2139_v32 = vadd.f32 %v14063_v56, %v1833_v16  ;;  %v867_v4 = vadd.f32 %v13784_v38, %v13782_v62  ;;  %v877_v56 = vadd.f32 %v13797_v44, %v13795_v61  ;;  %v17979_v44 = vld [vmem:[#allocation38_spill] sm:$0xff] }
 0x1e3   : > { %v14369_v5 = vpop.f32.mrf.mxu0  ;;  %v2753_v62 = vadd.f32 %v14277_v21, %v2447_v37  ;;  %v14424_v61 = vadd.f32 %v13849_v36, %v13847_v58  ;;  %v17986_v58 = vld [vmem:[#allocation14_spill] sm:$0xff] }
 0x1e4   : > { %v2750_v49 = vadd.f32 %v14271_v47, %v2444_v20  ;;  %v2446_v42 = vadd.f32 %v14275_v34, %v2139_v32  ;;  %v1837_v47 = vadd.f32 %v14098_v2, %v1531_v23  ;;  %v17981_v34 = vld [vmem:[#allocation40_spill] sm:$0xff]  ;;  %v17987_v32 = vld [vmem:[#allocation15_spill] sm:$0xff]  ;;  %v17989_v37 = vld [vmem:[#allocation26_spill] sm:$0xff] }
 0x1e5   : > { %v10584_v14 = vpop.f32.mrf.mxu0  ;;  %v17984_v2 = vld [vmem:[#allocation60_spill] sm:$0xff] }
 0x1e6   : > { %v14375_v30 = vadd.f32 %v10584_v14, %v14251_v13  ;;  %v1835_v13 = vadd.f32 %v14075_v11, %v1529_v26  ;;  %v14392_v14 = vpop.f32.mrf.mxu1  ;;  %v1537_v26 = vadd.f32 %v17983_v10, %v17982_v55  ;;  %v2752_v29 = vadd.f32 %v17984_v2, %v2446_v42  ;;  %v17990_v23 = vld [vmem:[#allocation28_spill] sm:$0xff]  ;;  %v17994_v55 = vld [vmem:[#allocation62_spill] sm:$0xff]  ;;  %v17995_v10 = vld [vmem:[#allocation61_spill] sm:$0xff] }
 0x1e7   : > { %v2425_v19 = vpop.f32.mrf.mxu0 }
 0x1e8   : > { %v14382_v46 = vadd.f32 %v2425_v19, %v14256_v39  ;;  %v2751_v39 = vadd.f32 %v14267_v63, %v14265_v6  ;;  %v2141_v24 = vadd.f32 %v14082_v7, %v1835_v13  ;;  %v14409_v6 = vpop.f32.mrf.mxu1  ;;  %v14414_v63 = vld [vmem:[%s17773_s2] ss:$0 sm:$0xff]  ;;  %v1533_v7 = vadd.f32 %v17979_v44, %v13915_v8  ;;  %v17985_v13 = vld [vmem:[#allocation13_spill] sm:$0xff] }
 0x1e9   : > { %v14386_v31 = vpop.f32.mrf.mxu0  ;;  %v1535_v19 = vadd.f32 %v17981_v34, %v17980_v40  ;;  %v1539_v36 = vadd.f32 %v17986_v58, %v17985_v13  ;;  %v17988_v8 = vld [vmem:[#allocation25_spill] sm:$0xff]  ;;  %v17992_v40 = vld [vmem:[#allocation32_spill] sm:$0xff]  ;;  %v17996_v58 = vld [vmem:[#allocation63_spill] sm:$0xff] }
 0x1ea   : > { %v2448_v35 = vadd.f32 %v14284_v45, %v2141_v24  ;;  %v14441_v45 = vpop.f32.mrf.mxu1 }
 0x1eb   : > { %v14394_v1 = vpop.f32.mrf.mxu0  ;;  %v1841_v34 = vadd.f32 %v17992_v40, %v1535_v19  ;;  %v17999_v19 = vld [vmem:[#allocation29_spill] sm:$0xff] }
 0x1ec   : > { %17978 = vst [vmem:[#allocation74_spill] sm:$0xff] %v14394_v1  ;;  %v2754_v13 = vadd.f32 %v14295_v0, %v2448_v35 }
 0x1ed   : > { %v10702_v18 = vpop.f32.mrf.mxu0 }
 0x1ee   : > { %v3057_v11 = vadd.f32 %v10702_v18, %v2751_v39  ;;  %v1235_v39 = vadd.f32 %v17987_v32, %v867_v4  ;;  %v2144_v18 = vadd.f32 %v17989_v37, %v17988_v8 }
 0x1ef   : > { %v2897_v25 = vpop.f32.mrf.mxu0 }
 0x1f0   : > { %v3056_v38 = vadd.f32 %v2897_v25, %v2750_v49  ;;  %v3096_v21 = vadd.f32 %v14414_v63, %v3057_v11  ;;  %v1839_v49 = vadd.f32 %v17990_v23, %v1533_v7  ;;  %v17991_v25 = vld [vmem:[#allocation27_spill] sm:$0xff]  ;;  %v2451_v2 = vadd.f32 %v17995_v10, %v2144_v18  ;;  %v18002_v10 = vld [vmem:[#allocation33_spill] sm:$0xff] }
 0x1f1   : > { %v10705_v16 = vpop.f32.mrf.mxu0  ;;  %v2143_v44 = vadd.f32 %v17991_v25, %v1837_v47  ;;  %v14458_v25 = vpop.f32.mrf.mxu1 }
 0x1f2   : > { %v3059_v20 = vadd.f32 %v10705_v16, %v2753_v62  ;;  %v3095_v42 = vadd.f32 %v14414_v63, %v3056_v38  ;;  %v17993_v16 = vld [vmem:[#allocation59_spill] sm:$0xff]  ;;  %v3128_v8 = vmax.f32 %v3096_v21, 0.0  ;;  %v17997_v38 = vld [vmem:[#allocation16_spill] sm:$0xff] }
 0x1f3   : > { %v2907_v24 = vpop.f32.mrf.mxu0  ;;  %v2755_v4 = vadd.f32 %v17994_v55, %v17993_v16  ;;  %v2450_v32 = vadd.f32 %v17996_v58, %v2143_v44  ;;  %v14454_v23 = vadd.f32 %v17997_v38, %v1235_v39  ;;  %v18000_v44 = vld [vmem:[#allocation30_spill] sm:$0xff]  ;;  %v18001_v21 = vld [vmem:[#allocation31_spill] sm:$0xff]  ;;  %v18004_v38 = vld [vmem:[#allocation65_spill] sm:$0xff] }
 0x1f4   : > { %v3098_v11 = vadd.f32 %v14414_v63, %v3059_v20  ;;  %v3058_v62 = vadd.f32 %v2907_v24, %v2752_v29  ;;  %v17998_v29 = vld [vmem:[#allocation17_spill] sm:$0xff]  ;;  %v2145_v24 = vadd.f32 %v17999_v19, %v1839_v49  ;;  %v3127_v16 = vmax.f32 %v3095_v42, 0.0  ;;  %v18003_v58 = vld [vmem:[#allocation67_spill] sm:$0xff]  ;;  %v18006_v42 = vld [vmem:[#allocation64_spill] sm:$0xff] }
 0x1f5   : > { %v10708_v7 = vpop.f32.mrf.mxu0  ;;  %v1237_v20 = vadd.f32 %v17998_v29, %v877_v56  ;;  %v2757_v39 = vadd.f32 %v18003_v58, %v2451_v2  ;;  %v18005_v29 = vld [vmem:[#allocation34_spill] sm:$0xff]  ;;  %v2756_v19 = vadd.f32 %v14308_v9, %v2450_v32  ;;  %v18009_v32 = vld [vmem:[#allocation4_spill] sm:$0xff] }
 0x1f6   : > { %v3130_v37 = vmax.f32 %v3098_v11, 0.0  ;;  %v3097_v47 = vadd.f32 %v14414_v63, %v3058_v62  ;;  %v3061_v40 = vadd.f32 %v10708_v7, %v2755_v4  ;;  %v2148_v11 = vadd.f32 %v18001_v21, %v18000_v44  ;;  %v18010_v58 = vld [vmem:[#allocation68_spill] sm:$0xff] }
 0x1f7   : > { %v2917_v18 = vpop.f32.mrf.mxu0  ;;  %v2147_v62 = vadd.f32 %v18002_v10, %v1841_v34  ;;  %v2452_v1 = vadd.f32 %v18004_v38, %v2145_v24  ;;  %v1843_v49 = vadd.f32 %v18005_v29, %v1537_v26  ;;  %v18008_v10 = vld [vmem:[#allocation18_spill] sm:$0xff] }
 0x1f8   : > { %v3160_v0 = vmax.f32 %v3128_v8, %v3130_v37  ;;  %v3129_v35 = vmax.f32 %v3097_v47, 0.0  ;;  %v3060_v55 = vadd.f32 %v2917_v18, %v2754_v13  ;;  %v2759_v8 = vadd.f32 %v14316_v59, %v18006_v42  ;;  %v18007_v13 = vld [vmem:[#allocation66_spill] sm:$0xff]  ;;  %v14470_v47 = vpop.f32.mrf.mxu1 }
 0x1f9   : > { %v10711_v56 = vpop.f32.mrf.mxu0  ;;  %v2455_v37 = vadd.f32 %v18007_v13, %v2148_v11  ;;  %v3100_v34 = vadd.f32 %v14414_v63, %v3061_v40  ;;  %v1543_v9 = vadd.f32 %v18008_v10, %v1237_v20  ;;  %v2454_v38 = vadd.f32 %v18010_v58, %v2147_v62  ;;  %v18014_v13 = vld [vmem:[#allocation39_spill] sm:$0xff]  ;;  %v18016_v10 = vld [vmem:[#allocation6_spill] sm:$0xff] }
 0x1fa   : > { %v3247_v4 = vrot.slane %v3160_v0, 1  ;;  %v3159_v7 = vmax.f32 %v3127_v16, %v3129_v35  ;;  %v3063_v18 = vadd.f32 %v10711_v56, %v2757_v39  ;;  %v3099_v21 = vadd.f32 %v14414_v63, %v3060_v55  ;;  %v18011_v39 = vld [vmem:[#allocation19_spill] sm:$0xff]  ;;  %v14483_v29 = vpop.f32.mrf.mxu1 }
 0x1fb   : > { %v2927_v2 = vpop.f32.mrf.mxu0  ;;  %v1845_v16 = vadd.f32 %v18009_v32, %v1539_v36  ;;  %v2758_v35 = vadd.f32 %v14324_v60, %v2452_v1  ;;  %v1241_v20 = vadd.f32 %v18011_v39, %v14418_v43  ;;  %v18012_v56 = vld [vmem:[#allocation35_spill] sm:$0xff]  ;;  %v3132_v60 = vmax.f32 %v3100_v34, 0.0  ;;  %v18015_v43 = vld [vmem:[#allocation41_spill] sm:$0xff] }
 0x1fc   : > { %v3263_v44 = vmax.f32 %v3160_v0, %v3247_v4  ;;  %v3183_v24 = vrot.slane %v3159_v7, 1  ;;  %v3062_v26 = vadd.f32 %v2927_v2, %v2756_v19  ;;  %v3102_v59 = vadd.f32 %v14414_v63, %v3063_v18  ;;  %v18017_v32 = vld [vmem:[#allocation43_spill] sm:$0xff]  ;;  %v14497_v58 = vpop.f32.mrf.mxu1 }
 0x1fd   : > { %v10714_v11 = vpop.f32.mrf.mxu0  ;;  %v2149_v36 = vadd.f32 %v18012_v56, %v1843_v49  ;;  %v2761_v62 = vadd.f32 %v14334_v53, %v2455_v37  ;;  %v3131_v4 = vmax.f32 %v3099_v21, 0.0  ;;  %v2151_v2 = vadd.f32 %v18015_v43, %v1845_v16  ;;  %v18024_v43 = vld [vmem:[#allocation7_spill] sm:$0xff] }
 0x1fe   : > { %3271 = vst [vmem:[#allocation3 + $0x4] sm:$0x1] %v3263_v44  ;;  %3279 = vst [vmem:[#allocation3 + $0x3] sm:$0x4] %v3263_v44  ;;  %v3199_v40 = vmax.f32 %v3159_v7, %v3183_v24  ;;  %v3101_v0 = vadd.f32 %v14414_v63, %v3062_v26  ;;  %v3065_v55 = vadd.f32 %v10714_v11, %v2759_v8  ;;  %v3134_v1 = vmax.f32 %v3102_v59, 0.0  ;;  %v18013_v8 = vld [vmem:[#allocation36_spill] sm:$0xff] }
 0x1ff   : > { %3287 = vst [vmem:[#allocation3 + $0x2] sm:$0x10] %v3263_v44  ;;  %3295 = vst [vmem:[#allocation3 + $0x1] sm:$0x40] %v3263_v44  ;;  %v2937_v19 = vpop.f32.mrf.mxu0  ;;  %v2152_v18 = vadd.f32 %v18014_v13, %v18013_v8  ;;  %v2456_v49 = vadd.f32 %v14310_v41, %v2149_v36  ;;  %v2760_v24 = vadd.f32 %v14343_v15, %v2454_v38  ;;  %v18018_v59 = vld [vmem:[#allocation69_spill] sm:$0xff] }
 0x200   : > { %3207 = vst [vmem:[#allocation3] sm:$0x1] %v3199_v40  ;;  %3215 = vst [vmem:[#allocation3 - $0x1] sm:$0x4] %v3199_v40  ;;  %v3133_v7 = vmax.f32 %v3101_v0, 0.0  ;;  %v3064_v42 = vadd.f32 %v2937_v19, %v2758_v35  ;;  %v3162_v44 = vmax.f32 %v3132_v60, %v3134_v1  ;;  %v3104_v53 = vadd.f32 %v14414_v63, %v3065_v55  ;;  %v18019_v55 = vld [vmem:[#allocation70_spill] sm:$0xff] }
 0x201   : > { %3223 = vst [vmem:[#allocation3 - $0x2] sm:$0x10] %v3199_v40  ;;  %3231 = vst [vmem:[#allocation3 - $0x3] sm:$0x40] %v3199_v40  ;;  %v10717_v34 = vpop.f32.mrf.mxu0  ;;  %v1847_v21 = vadd.f32 %v18016_v10, %v14454_v23  ;;  %v1849_v35 = vadd.f32 %v18017_v32, %v1543_v9  ;;  %v2763_v11 = vadd.f32 %v14351_v27, %v18018_v59  ;;  %v18020_v23 = vld [vmem:[#allocation71_spill] sm:$0xff]  ;;  %v18027_v32 = vld [vmem:[#allocation12_spill] sm:$0xff] }
 0x202   : > { %v3161_v26 = vmax.f32 %v3131_v4, %v3133_v7  ;;  %v3067_v37 = vadd.f32 %v10717_v34, %v2761_v62  ;;  %v3248_v16 = vrot.slane %v3162_v44, 1  ;;  %v3103_v0 = vadd.f32 %v14414_v63, %v3064_v42  ;;  %v18021_v4 = vld [vmem:[#allocation10_spill] sm:$0xff]  ;;  %v18022_v7 = vld [vmem:[#allocation37_spill] sm:$0xff]  ;;  %v18023_v42 = vld [vmem:[#allocation20_spill] sm:$0xff] }
 0x203   : > { %v2947_v41 = vpop.f32.mrf.mxu0  ;;  %v2459_v39 = vadd.f32 %v18019_v55, %v2152_v18  ;;  %v2762_v56 = vadd.f32 %v14359_v50, %v2456_v49  ;;  %v2458_v36 = vadd.f32 %v18020_v23, %v2151_v2  ;;  %v3136_v27 = vmax.f32 %v3104_v53, 0.0  ;;  %v14511_v18 = vpop.f32.mrf.mxu1  ;;  %v18030_v23 = vld [vmem:[#allocation72_spill] sm:$0xff] }
 0x204   : > { %v3184_v40 = vrot.slane %v3161_v26, 1  ;;  %v3106_v15 = vadd.f32 %v14414_v63, %v3067_v37  ;;  %v3066_v38 = vadd.f32 %v2947_v41, %v2760_v24  ;;  %v3264_v9 = vmax.f32 %v3162_v44, %v3248_v16  ;;  %v3395_v44 = vld [vmem:[%s17774_s3 + $0x70] sm:$0xff]  ;;  %v18025_v37 = vld [vmem:[#allocation21_spill] sm:$0xff] }
 0x205   : > { %v10720_v60 = vpop.f32.mrf.mxu0  ;;  %v14507_v8 = vadd.f32 %v18022_v7, %v18021_v4  ;;  %v1547_v13 = vadd.f32 %v18023_v42, %v1241_v20  ;;  %v2153_v34 = vadd.f32 %v18024_v43, %v1847_v21  ;;  %v3135_v20 = vmax.f32 %v3103_v0, 0.0  ;;  %v18026_v21 = vld [vmem:[#allocation42_spill] sm:$0xff]  ;;  %v3394_v0 = vld [vmem:[%s17774_s3 + $0x68] sm:$0xff] }
 0x206   : > { %v3200_v1 = vmax.f32 %v3161_v26, %v3184_v40  ;;  %v3138_v19 = vmax.f32 %v3106_v15, 0.0  ;;  %v3105_v62 = vadd.f32 %v14414_v63, %v3066_v38  ;;  %3272 = vst [vmem:[#allocation3 + $0xc] sm:$0x1] %v3264_v9  ;;  %3280 = vst [vmem:[#allocation3 + $0xb] sm:$0x4] %v3264_v9  ;;  %v3069_v2 = vadd.f32 %v10720_v60, %v2763_v11  ;;  %v18028_v11 = vld [vmem:[#allocation44_spill] sm:$0xff] }
 0x207   : > { %3288 = vst [vmem:[#allocation3 + $0xa] sm:$0x10] %v3264_v9  ;;  %3296 = vst [vmem:[#allocation3 + $0x9] sm:$0x40] %v3264_v9  ;;  %v2957_v49 = vpop.f32.mrf.mxu0  ;;  %v1245_v10 = vadd.f32 %v18025_v37, %v14424_v61  ;;  %v2156_v59 = vadd.f32 %v18027_v32, %v18026_v21  ;;  %v2155_v16 = vadd.f32 %v18028_v11, %v1849_v35  ;;  %v18029_v15 = vld [vmem:[#allocation48_spill] sm:$0xff]  ;;  %v18031_v35 = vld [vmem:[#allocation73_spill] sm:$0xff] }
 0x208   : > { %v14513_v50 = vld [vmem:[#allocation3] sm:$0xff]  ;;  %3208 = vst [vmem:[#allocation3 + $0x8] sm:$0x1] %v3200_v1  ;;  %3216 = vst [vmem:[#allocation3 + $0x7] sm:$0x4] %v3200_v1  ;;  %v3164_v24 = vmax.f32 %v3136_v27, %v3138_v19  ;;  %v3137_v26 = vmax.f32 %v3105_v62, 0.0  ;;  %v3068_v53 = vadd.f32 %v2957_v49, %v2762_v56  ;;  %v2765_v41 = vadd.f32 %v14367_v57, %v2459_v39  ;;  %v14535_v57 = vpop.f32.mrf.mxu1 }
 0x209   : > { %3365 = vst [vmem:[#allocation2 + $0x19] sm:$0xff] %v14513_v50  ;;  %3224 = vst [vmem:[#allocation3 + $0x6] sm:$0x10] %v3200_v1  ;;  %10781 = vmatmul.mubr.f32.vlgmr.msra.gmra.mxu1 %v14513_v50  ;;  %v10723_v40 = vpop.f32.mrf.mxu0  ;;  %v2764_v38 = vadd.f32 %v14377_v12, %v2458_v36  ;;  %v2460_v55 = vadd.f32 %v14326_v28, %v2153_v34  ;;  %v2767_v9 = vadd.f32 %v14392_v14, %v18030_v23  ;;  %v3393_v12 = vld [vmem:[%s17774_s3 + $0x60] sm:$0xff]  ;;  %v18033_v7 = vld [vmem:[#allocation47_spill] sm:$0xff] }
 0x20a   : > { %3232 = vst [vmem:[#allocation3 + $0x5] sm:$0x40] %v3200_v1  ;;  %10793 = vmatpush3.msra.mxu1 %v18029_v15  ;;  %v3249_v56 = vrot.slane %v3164_v24, 1  ;;  %v3163_v61 = vmax.f32 %v3135_v20, %v3137_v26  ;;  %v2463_v60 = vadd.f32 %v18031_v35, %v2156_v59  ;;  %v3108_v39 = vadd.f32 %v14414_v63, %v3069_v2  ;;  %v18032_v14 = vld [vmem:[#allocation22_spill] sm:$0xff]  ;;  %v18034_v26 = vld [vmem:[#allocation23_spill] sm:$0xff]  ;;  %v14560_v21 = vpop.f32.mrf.mxu1 }
 0x20b   : > { %10794 = vmatprep.subr.mxu1 %v3395_v44  ;;  %v3071_v1 = vadd.f32 %v10723_v40, %v2765_v41  ;;  %v2967_v27 = vpop.f32.mrf.mxu0  ;;  %v3107_v19 = vadd.f32 %v14414_v63, %v3068_v53  ;;  %v1551_v4 = vadd.f32 %v18032_v14, %v1245_v10  ;;  %v1853_v42 = vadd.f32 %v18033_v7, %v1547_v13  ;;  %v8181_v13 = vld [vmem:[%s17774_s3 + $0x270] sm:$0xff]  ;;  %v18035_v53 = vld [vmem:[#allocation45_spill] sm:$0xff]  ;;  %v18036_v37 = vld [vmem:[#allocation46_spill] sm:$0xff] }
 0x20c   : > { %10795 = vmatpush3.msra.mxu1 %v3395_v44  ;;  %v3265_v28 = vmax.f32 %v3164_v24, %v3249_v56  ;;  %v3185_v36 = vrot.slane %v3163_v61, 1  ;;  %v3070_v62 = vadd.f32 %v2967_v27, %v2764_v38  ;;  %v2462_v43 = vadd.f32 %v14336_v3, %v2155_v16  ;;  %v3392_v3 = vld [vmem:[%s17774_s3 + $0x58] sm:$0xff]  ;;  %v18037_v56 = vld [vmem:[#allocation8_spill] sm:$0xff]  ;;  %v14591_v14 = vpop.f32.mrf.mxu1 }
 0x20d   : > { %10796 = vmatprep.subr.mxu1 %v3394_v0  ;;  %v3110_v34 = vadd.f32 %v14414_v63, %v3071_v1  ;;  %v10726_v2 = vpop.f32.mrf.mxu0  ;;  %v2766_v49 = vadd.f32 %v14409_v6, %v2460_v55  ;;  %v14556_v6 = vadd.f32 %v18034_v26, %v14507_v8  ;;  %v2160_v10 = vadd.f32 %v18036_v37, %v18035_v53  ;;  %v3391_v55 = vld [vmem:[%s17774_s3 + $0x50] sm:$0xff]  ;;  %v8178_v53 = vld [vmem:[%s17774_s3 + $0x258] sm:$0xff] }
 0x20e   : > { %10797 = vmatpush3.msra.mxu1 %v3394_v0  ;;  %3273 = vst [vmem:[#allocation3 + $0x14] sm:$0x1] %v3265_v28  ;;  %3281 = vst [vmem:[#allocation3 + $0x13] sm:$0x4] %v3265_v28  ;;  %v3201_v44 = vmax.f32 %v3163_v61, %v3185_v36  ;;  %v3109_v20 = vadd.f32 %v14414_v63, %v3070_v62  ;;  %v3073_v24 = vadd.f32 %v10726_v2, %v2767_v9  ;;  %v18041_v37 = vld [vmem:[#allocation24_spill] sm:$0xff] }
 0x20f   : > { %3289 = vst [vmem:[#allocation3 + $0x12] sm:$0x10] %v3265_v28  ;;  %3297 = vst [vmem:[#allocation3 + $0x11] sm:$0x40] %v3265_v28  ;;  %10798 = vmatprep.subr.mxu1 %v3393_v12  ;;  %v3140_v59 = vmax.f32 %v3108_v39, 0.0  ;;  %v3142_v11 = vmax.f32 %v3110_v34, 0.0  ;;  %v2977_v16 = vpop.f32.mrf.mxu0  ;;  %v2769_v15 = vadd.f32 %v14441_v45, %v2463_v60  ;;  %v2768_v23 = vadd.f32 %v14458_v25, %v2462_v43 }
 0x210   : > { %v14564_v41 = vld [vmem:[#allocation2 + $0x1a] sm:$0xff]  ;;  %10799 = vmatpush3.msra.mxu1 %v3393_v12  ;;  %3209 = vst [vmem:[#allocation3 + $0x10] sm:$0x1] %v3201_v44  ;;  %3217 = vst [vmem:[#allocation3 + $0xf] sm:$0x4] %v3201_v44  ;;  %v3139_v8 = vmax.f32 %v3107_v19, 0.0  ;;  %v3072_v38 = vadd.f32 %v2977_v16, %v2766_v49  ;;  %v3112_v27 = vadd.f32 %v14414_v63, %v3073_v24 }
 0x211   : > { %v14562_v32 = vld [vmem:[#allocation3 + $0x8] sm:$0xff]  ;;  %3225 = vst [vmem:[#allocation3 + $0xe] sm:$0x10] %v3201_v44  ;;  %3233 = vst [vmem:[#allocation3 + $0xd] sm:$0x40] %v3201_v44  ;;  %v3141_v0 = vmax.f32 %v3109_v20, 0.0  ;;  %10869 = vmatmul.mubr.f32.vlgmr.msra.gmra.mxu0 %v14564_v41  ;;  %v3166_v9 = vmax.f32 %v3140_v59, %v3142_v11  ;;  %v10729_v35 = vpop.f32.mrf.mxu0  ;;  %10800 = vmatprep.subr.mxu1 %v3392_v3  ;;  %v2771_v19 = vadd.f32 %v14470_v47, %v14341_v17 }
 0x212   : > { %v14566_v40 = vld [vmem:[#allocation2 + $0x18] sm:$0xff]  ;;  %3366 = vst [vmem:[#allocation2 + $0x31] sm:$0xff] %v14562_v32  ;;  %10783 = vmatprep.mubr.f32.mxu1 %v14562_v32  ;;  %4665 = vst [vmem:[#allocation2 + $0x20] sm:$0xff] %v18037_v56  ;;  %v8180_v39 = vld [vmem:[%s17774_s3 + $0x268] sm:$0xff]  ;;  %v3075_v12 = vadd.f32 %v10729_v35, %v2769_v15  ;;  %10801 = vmatpush3.msra.mxu1 %v3392_v3  ;;  %v2467_v62 = vadd.f32 %v14348_v33, %v2160_v10 }
 0x213   : > { %4664 = vst [vmem:[#allocation2 + $0x18] sm:$0xff] %v18037_v56  ;;  %v18038_v45 = vld [vmem:[#allocation49_spill] sm:$0xff]  ;;  %v3165_v1 = vmax.f32 %v3139_v8, %v3141_v0  ;;  %v3390_v28 = vld [vmem:[%s17774_s3 + $0x48] sm:$0xff]  ;;  %v18040_v25 = vld [vmem:[#allocation52_spill] sm:$0xff]  ;;  %v3250_v7 = vrot.slane %v3166_v9, 1  ;;  %10802 = vmatprep.subr.mxu1 %v3391_v55  ;;  %v3111_v2 = vadd.f32 %v14414_v63, %v3072_v38  ;;  %v2770_v33 = vadd.f32 %v14483_v29, %v14346_v48 }
 0x214   : > { %v2159_v61 = vadd.f32 %v18038_v45, %v1853_v42  ;;  %v18039_v60 = vld [vmem:[#allocation53_spill] sm:$0xff]  ;;  %v1857_v36 = vadd.f32 %v18040_v25, %v1551_v4  ;;  %v2987_v42 = vpop.f32.mrf.mxu0  ;;  %v8179_v43 = vld [vmem:[%s17774_s3 + $0x260] sm:$0xff]  ;;  %v3114_v4 = vadd.f32 %v14414_v63, %v3075_v12  ;;  %10803 = vmatpush3.msra.mxu1 %v3391_v55  ;;  %v14610_v48 = vadd.f32 %v18041_v37, %v14556_v6  ;;  %v8177_v38 = vld [vmem:[%s17774_s3 + $0x250] sm:$0xff] }
 0x215   : > { %10925 = vmatpush3.msra.mxu0 %v18039_v60  ;;  %v3186_v34 = vrot.slane %v3165_v1, 1  ;;  %v3074_v49 = vadd.f32 %v2987_v42, %v2768_v23  ;;  %v3389_v17 = vld [vmem:[%s17774_s3 + $0x40] sm:$0xff]  ;;  %v3266_v44 = vmax.f32 %v3166_v9, %v3250_v7  ;;  %10804 = vmatprep.subr.mxu1 %v3390_v28  ;;  %v3388_v16 = vld [vmem:[%s17774_s3 + $0x38] sm:$0xff]  ;;  %v3143_v6 = vmax.f32 %v3111_v2, 0.0  ;;  %v18043_v23 = vld [vmem:[#allocation51_spill] sm:$0xff] }
 0x216   : > { %10926 = vmatprep.subr.mxu0 %v8181_v13  ;;  %v2466_v47 = vadd.f32 %v14353_v52, %v2159_v61  ;;  %v10732_v20 = vpop.f32.mrf.mxu0  ;;  %v3146_v3 = vmax.f32 %v3114_v4, 0.0  ;;  %10805 = vmatpush3.msra.mxu1 %v3390_v28  ;;  %v14612_v52 = vpop.f32.mrf.mxu1  ;;  %v18042_v61 = vld [vmem:[#allocation50_spill] sm:$0xff]  ;;  %v2775_v28 = vadd.f32 %v14535_v57, %v14357_v22  ;;  %v3386_v22 = vld [vmem:[%s17774_s3 + $0x28] sm:$0xff]  ;;  %v2774_v4 = vadd.f32 %v14560_v21, %v14361_v51 }
 0x217   : > { %10927 = vmatpush3.msra.mxu0 %v8181_v13  ;;  %v3202_v24 = vmax.f32 %v3165_v1, %v3186_v34  ;;  %v3144_v13 = vmax.f32 %v3112_v27, 0.0  ;;  %v3113_v26 = vadd.f32 %v14414_v63, %v3074_v49  ;;  %3274 = vst [vmem:[#allocation3 + $0x1c] sm:$0x1] %v3266_v44  ;;  %3282 = vst [vmem:[#allocation3 + $0x1b] sm:$0x4] %v3266_v44  ;;  %10806 = vmatprep.subr.mxu1 %v3389_v17  ;;  %v18044_v35 = vld [vmem:[#allocation54_spill] sm:$0xff] }
 0x218   : > { %10928 = vmatprep.subr.mxu0 %v8180_v39  ;;  %v14614_v29 = vld [vmem:[#allocation3 + $0x10] sm:$0xff]  ;;  %3290 = vst [vmem:[#allocation3 + $0x1a] sm:$0x10] %v3266_v44  ;;  %3298 = vst [vmem:[#allocation3 + $0x19] sm:$0x40] %v3266_v44  ;;  %v3077_v10 = vadd.f32 %v10732_v20, %v2771_v19  ;;  %v2997_v59 = vpop.f32.mrf.mxu0  ;;  %v2164_v9 = vadd.f32 %v18043_v23, %v18042_v61  ;;  %v2163_v60 = vadd.f32 %v18044_v35, %v1857_v36  ;;  %v3387_v27 = vld [vmem:[%s17774_s3 + $0x30] sm:$0xff] }
 0x219   : > { %10929 = vmatpush3.msra.mxu0 %v8180_v39  ;;  %v14616_v11 = vld [vmem:[#allocation2 + $0x32] sm:$0xff]  ;;  %3367 = vst [vmem:[#allocation2 + $0x49] sm:$0xff] %v14614_v29  ;;  %3210 = vst [vmem:[#allocation3 + $0x18] sm:$0x1] %v3202_v24  ;;  %v3168_v15 = vmax.f32 %v3144_v13, %v3146_v3  ;;  %v3145_v8 = vmax.f32 %v3113_v26, 0.0  ;;  %v3076_v0 = vadd.f32 %v2997_v59, %v2770_v33  ;;  %10784 = vmatmul.mubr.f32.gmra.mxu1 %v14614_v29  ;;  %v3385_v51 = vld [vmem:[%s17774_s3 + $0x20] sm:$0xff] }
 0x21a   : > { %10930 = vmatprep.subr.mxu0 %v8179_v43  ;;  %3218 = vst [vmem:[#allocation3 + $0x17] sm:$0x4] %v3202_v24  ;;  %3226 = vst [vmem:[#allocation3 + $0x16] sm:$0x10] %v3202_v24  ;;  %10871 = vmatprep.mubr.f32.mxu0 %v14616_v11  ;;  %v14627_v55 = vld [vmem:[#allocation2 + $0x30] sm:$0xff]  ;;  %v2773_v39 = vadd.f32 %v14497_v58, %v2467_v62  ;;  %v10735_v1 = vpop.f32.mrf.mxu0  ;;  %v2772_v12 = vadd.f32 %v14511_v18, %v2466_v47  ;;  %v8176_v58 = vld [vmem:[%s17774_s3 + $0x248] sm:$0xff]  ;;  %v14647_v62 = vpop.f32.mrf.mxu1 }
 0x21b   : > { %10931 = vmatpush3.msra.mxu0 %v8179_v43  ;;  %3234 = vst [vmem:[#allocation3 + $0x15] sm:$0x40] %v3202_v24  ;;  %v14629_v45 = vld [vmem:[#allocation2 + $0x31] sm:$0xff]  ;;  %10807 = vmatpush3.msra.mxu1 %v3389_v17  ;;  %v3251_v25 = vrot.slane %v3168_v15, 1  ;;  %v3167_v36 = vmax.f32 %v3143_v6, %v3145_v8  ;;  %v2471_v19 = vadd.f32 %v14363_v54, %v2164_v9  ;;  %v8175_v54 = vld [vmem:[%s17774_s3 + $0x240] sm:$0xff] }
 0x21c   : > { %10932 = vmatprep.subr.mxu0 %v8178_v53  ;;  %4668 = vst [vmem:[#allocation2 + $0x38] sm:$0xff] %v18037_v56  ;;  %4667 = vst [vmem:[#allocation2 + $0x30] sm:$0xff] %v18037_v56  ;;  %10808 = vmatprep.subr.mxu1 %v3388_v16  ;;  %v3116_v7 = vadd.f32 %v14414_v63, %v3077_v10  ;;  %v3079_v42 = vadd.f32 %v10735_v1, %v2773_v39  ;;  %v3007_v43 = vpop.f32.mrf.mxu0  ;;  %v2731_v24 = vpop.f32.mrf.mxu1  ;;  %v8174_v10 = vld [vmem:[%s17774_s3 + $0x238] sm:$0xff] }
 0x21d   : > { %10933 = vmatpush3.msra.mxu0 %v8178_v53  ;;  %10809 = vmatpush3.msra.mxu1 %v3388_v16  ;;  %v3267_v18 = vmax.f32 %v3168_v15, %v3251_v25  ;;  %v3187_v57 = vrot.slane %v3167_v36, 1  ;;  %v3115_v34 = vadd.f32 %v14414_v63, %v3076_v0  ;;  %v3078_v2 = vadd.f32 %v3007_v43, %v2772_v12  ;;  %v3384_v15 = vld [vmem:[%s17774_s3 + $0x18] sm:$0xff]  ;;  %v18046_v0 = vld [vmem:[#allocation55_spill] sm:$0xff]  ;;  %v18048_v12 = vld [vmem:[#allocation58_spill] sm:$0xff] }
 0x21e   : > { %10934 = vmatprep.subr.mxu0 %v8177_v38  ;;  %10810 = vmatprep.subr.mxu1 %v3387_v27  ;;  %v2470_v49 = vadd.f32 %v14369_v5, %v2163_v60  ;;  %v3118_v17 = vadd.f32 %v14414_v63, %v3079_v42  ;;  %v10738_v33 = vpop.f32.mrf.mxu0  ;;  %v18045_v5 = vld [vmem:[#allocation57_spill] sm:$0xff]  ;;  %v3148_v3 = vmax.f32 %v3116_v7, 0.0  ;;  %v2777_v59 = vadd.f32 %v14591_v14, %v2471_v19  ;;  %v8173_v60 = vld [vmem:[%s17774_s3 + $0x230] sm:$0xff]  ;;  %v8172_v42 = vld [vmem:[%s17774_s3 + $0x228] sm:$0xff] }
 0x21f   : > { %10935 = vmatpush3.msra.mxu0 %v8177_v38  ;;  %10811 = vmatpush3.msra.mxu1 %v3387_v27  ;;  %3275 = vst [vmem:[#allocation3 + $0x24] sm:$0x1] %v3267_v18  ;;  %3283 = vst [vmem:[#allocation3 + $0x23] sm:$0x4] %v3267_v18  ;;  %v3203_v47 = vmax.f32 %v3167_v36, %v3187_v57  ;;  %v3117_v44 = vadd.f32 %v14414_v63, %v3078_v2  ;;  %v18047_v38 = vld [vmem:[#allocation56_spill] sm:$0xff] }
 0x220   : > { %10936 = vmatprep.subr.mxu0 %v8176_v58  ;;  %3291 = vst [vmem:[#allocation3 + $0x22] sm:$0x10] %v3267_v18  ;;  %3299 = vst [vmem:[#allocation3 + $0x21] sm:$0x40] %v3267_v18  ;;  %v3081_v20 = vadd.f32 %v10738_v33, %v2775_v28  ;;  %10812 = vmatprep.subr.mxu1 %v3386_v22  ;;  %v1861_v21 = vadd.f32 %v18045_v5, %v14610_v48  ;;  %v3150_v26 = vmax.f32 %v3118_v17, 0.0  ;;  %v3017_v53 = vpop.f32.mrf.mxu0  ;;  %v14669_v37 = vld [vmem:[#allocation2 + $0x4a] sm:$0xff] }
 0x221   : > { %10937 = vmatpush3.msra.mxu0 %v8176_v58  ;;  %10813 = vmatpush3.msra.mxu1 %v3386_v22  ;;  %3211 = vst [vmem:[#allocation3 + $0x20] sm:$0x1] %v3203_v47  ;;  %3219 = vst [vmem:[#allocation3 + $0x1f] sm:$0x4] %v3203_v47  ;;  %v3147_v48 = vmax.f32 %v3115_v34, 0.0  ;;  %v3149_v16 = vmax.f32 %v3117_v44, 0.0  ;;  %v3080_v6 = vadd.f32 %v3017_v53, %v2774_v4  ;;  %v10667_v58 = vpop.f32.mrf.mxu1 }
 0x222   : > { %v14667_v13 = vld [vmem:[#allocation3 + $0x18] sm:$0xff]  ;;  %10938 = vmatprep.subr.mxu0 %v8175_v54  ;;  %3227 = vst [vmem:[#allocation3 + $0x1e] sm:$0x10] %v3203_v47  ;;  %3235 = vst [vmem:[#allocation3 + $0x1d] sm:$0x40] %v3203_v47  ;;  %10872 = vmatmul.mubr.f32.gmra.mxu0 %v14669_v37  ;;  %v2168_v61 = vadd.f32 %v18047_v38, %v18046_v0  ;;  %v2776_v23 = vadd.f32 %v14612_v52, %v2470_v49  ;;  %v10741_v35 = vpop.f32.mrf.mxu0  ;;  %v3383_v52 = vld [vmem:[%s17774_s3 + $0x10] sm:$0xff] }
 0x223   : > { %3368 = vst [vmem:[#allocation2 + $0x61] sm:$0xff] %v14667_v13  ;;  %10786 = vmatprep.mubr.f32.mxu1 %v14667_v13  ;;  %v14681_v8 = vld [vmem:[#allocation2 + $0x48] sm:$0xff]  ;;  %v3170_v9 = vmax.f32 %v3148_v3, %v3150_v26  ;;  %10939 = vmatpush3.msra.mxu0 %v8175_v54  ;;  %v3169_v39 = vmax.f32 %v3147_v48, %v3149_v16  ;;  %v8171_v47 = vld [vmem:[%s17774_s3 + $0x220] sm:$0xff]  ;;  %v2741_v44 = vpop.f32.mrf.mxu1 }
 0x224   : > { %v14683_v14 = vld [vmem:[#allocation2 + $0x49] sm:$0xff]  ;;  %10814 = vmatprep.subr.mxu1 %v3385_v51  ;;  %v3120_v1 = vadd.f32 %v14414_v63, %v3081_v20  ;;  %v3083_v27 = vadd.f32 %v10741_v35, %v2777_v59  ;;  %10940 = vmatprep.subr.mxu0 %v8174_v10  ;;  %v2167_v28 = vadd.f32 %v18048_v12, %v1861_v21  ;;  %v3027_v7 = vpop.f32.mrf.mxu0  ;;  %v3381_v21 = vld [vmem:[%s17774_s3] sm:$0xff] }
 0x225   : > { %4671 = vst [vmem:[#allocation2 + $0x50] sm:$0xff] %v18037_v56  ;;  %4670 = vst [vmem:[#allocation2 + $0x48] sm:$0xff] %v18037_v56  ;;  %10815 = vmatpush3.msra.mxu1 %v3385_v51  ;;  %v2779_v25 = vadd.f32 %v14647_v62, %v14375_v30  ;;  %v2475_v36 = vadd.f32 %v14386_v31, %v2168_v61  ;;  %v3252_v19 = vrot.slane %v3170_v9, 1  ;;  %10941 = vmatpush3.msra.mxu0 %v8174_v10  ;;  %v3382_v30 = vld [vmem:[%s17774_s3 + $0x8] sm:$0xff]  ;;  %v18049_v62 = vld [vmem:[#allocation74_spill] sm:$0xff] }
 0x226   : > { %10816 = vmatprep.subr.mxu1 %v3384_v15  ;;  %v3188_v43 = vrot.slane %v3169_v39, 1  ;;  %v3119_v22 = vadd.f32 %v14414_v63, %v3080_v6  ;;  %v3122_v18 = vadd.f32 %v14414_v63, %v3083_v27  ;;  %v3082_v57 = vadd.f32 %v3027_v7, %v2776_v23  ;;  %10942 = vmatprep.subr.mxu0 %v8173_v60  ;;  %v10744_v54 = vpop.f32.mrf.mxu0  ;;  %v8170_v10 = vld [vmem:[%s17774_s3 + $0x218] sm:$0xff]  ;;  %v8169_v23 = vld [vmem:[%s17774_s3 + $0x210] sm:$0xff]  ;;  %v8168_v12 = vld [vmem:[%s17774_s3 + $0x208] sm:$0xff] }
 0x227   : > { %10817 = vmatpush3.msra.mxu1 %v3384_v15  ;;  %v2778_v31 = vadd.f32 %v2731_v24, %v14382_v46  ;;  %v2474_v34 = vadd.f32 %v18049_v62, %v2167_v28  ;;  %v3268_v2 = vmax.f32 %v3170_v9, %v3252_v19  ;;  %10943 = vmatpush3.msra.mxu0 %v8173_v60  ;;  %v3152_v49 = vmax.f32 %v3120_v1, 0.0  ;;  %v14735_v15 = vld [vmem:[%s17774_s3 + $0x1f8] sm:$0xff] }
 0x228   : > { %10818 = vmatprep.subr.mxu1 %v3383_v52  ;;  %v3204_v4 = vmax.f32 %v3169_v39, %v3188_v43  ;;  %v3154_v17 = vmax.f32 %v3122_v18, 0.0  ;;  %v3121_v33 = vadd.f32 %v14414_v63, %v3082_v57  ;;  %10944 = vmatprep.subr.mxu0 %v8172_v42  ;;  %v3085_v46 = vadd.f32 %v10744_v54, %v2779_v25  ;;  %v3037_v51 = vpop.f32.mrf.mxu0  ;;  %v8167_v43 = vld [vmem:[%s17774_s3 + $0x200] sm:$0xff] }
 0x229   : > { %10819 = vmatpush3.msra.mxu1 %v3383_v52  ;;  %v14715_v20 = vld [vmem:[#allocation3 + $0x20] sm:$0xff]  ;;  %3276 = vst [vmem:[#allocation3 + $0x2c] sm:$0x1] %v3268_v2  ;;  %3284 = vst [vmem:[#allocation3 + $0x2b] sm:$0x4] %v3268_v2  ;;  %10945 = vmatpush3.msra.mxu0 %v8172_v42  ;;  %v3151_v24 = vmax.f32 %v3119_v22, 0.0  ;;  %v3084_v53 = vadd.f32 %v3037_v51, %v2778_v31  ;;  %v2781_v16 = vadd.f32 %v10667_v58, %v2475_v36 }
 0x22a   : > { %3292 = vst [vmem:[#allocation3 + $0x2a] sm:$0x10] %v3268_v2  ;;  %3300 = vst [vmem:[#allocation3 + $0x29] sm:$0x40] %v3268_v2  ;;  %v14717_v5 = vld [vmem:[#allocation2 + $0x62] sm:$0xff]  ;;  %10820 = vmatprep.subr.mxu1 %v3382_v30  ;;  %v3172_v3 = vmax.f32 %v3152_v49, %v3154_v17  ;;  %v3153_v26 = vmax.f32 %v3121_v33, 0.0  ;;  %10787 = vmatmul.mubr.f32.gmra.mxu1 %v14715_v20  ;;  %v10747_v6 = vpop.f32.mrf.mxu0  ;;  %v2780_v0 = vadd.f32 %v2741_v44, %v2474_v34 }
 0x22b   : > { %3369 = vst [vmem:[#allocation2 + $0x79] sm:$0xff] %v14715_v20  ;;  %3212 = vst [vmem:[#allocation3 + $0x28] sm:$0x1] %v3204_v4  ;;  %10874 = vmatprep.mubr.f32.mxu0 %v14717_v5  ;;  %v14728_v59 = vld [vmem:[#allocation2 + $0x60] sm:$0xff]  ;;  %10946 = vmatprep.subr.mxu0 %v8171_v47  ;;  %v3124_v9 = vadd.f32 %v14414_v63, %v3085_v46  ;;  %v3087_v35 = vadd.f32 %v10747_v6, %v2781_v16  ;;  %v8214_v31 = vld [vmem:[%s17774_s3 + $0x378] sm:$0xff] }
 0x22c   : > { %3220 = vst [vmem:[#allocation3 + $0x27] sm:$0x4] %v3204_v4  ;;  %3228 = vst [vmem:[#allocation3 + $0x26] sm:$0x10] %v3204_v4  ;;  %v14730_v48 = vld [vmem:[#allocation2 + $0x61] sm:$0xff]  ;;  %10821 = vmatpush3.msra.mxu1 %v3382_v30  ;;  %v3253_v38 = vrot.slane %v3172_v3, 1  ;;  %v3171_v61 = vmax.f32 %v3151_v24, %v3153_v26  ;;  %10947 = vmatpush3.msra.mxu0 %v8171_v47  ;;  %v3047_v60 = vpop.f32.mrf.mxu0  ;;  %v3123_v27 = vadd.f32 %v14414_v63, %v3084_v53 }
 0x22d   : > { %3236 = vst [vmem:[#allocation3 + $0x25] sm:$0x40] %v3204_v4  ;;  %4674 = vst [vmem:[#allocation2 + $0x68] sm:$0xff] %v18037_v56  ;;  %10822 = vmatprep.subr.mxu1 %v3381_v21  ;;  %10948 = vmatprep.subr.mxu0 %v8170_v10  ;;  %v3086_v52 = vadd.f32 %v3047_v60, %v2780_v0  ;;  %v3126_v28 = vadd.f32 %v14414_v63, %v3087_v35  ;;  %v3156_v19 = vmax.f32 %v3124_v9, 0.0  ;;  %v8165_v44 = vld [vmem:[%s17774_s3 + $0x1f0] sm:$0xff]  ;;  %v8164_v46 = vld [vmem:[%s17774_s3 + $0x1e8] sm:$0xff] }
 0x22e   : > { %4673 = vst [vmem:[#allocation2 + $0x60] sm:$0xff] %v18037_v56  ;;  %10823 = vmatpush3.msra.mxu1 %v3381_v21  ;;  %v3269_v39 = vmax.f32 %v3172_v3, %v3253_v38  ;;  %v3189_v1 = vrot.slane %v3171_v61, 1  ;;  %10949 = vmatpush3.msra.mxu0 %v8170_v10  ;;  %v3155_v22 = vmax.f32 %v3123_v27, 0.0  ;;  %v14792_v51 = vld [vmem:[#allocation2 + $0xd9] sm:$0xff]  ;;  %v8213_v10 = vld [vmem:[%s17774_s3 + $0x370] sm:$0xff]  ;;  %v8208_v38 = vld [vmem:[%s17774_s3 + $0x348] sm:$0xff] }
 0x22f   : > { %10880 = vmatprep.subr.mxu1 %v14735_v15  ;;  %10950 = vmatprep.subr.mxu0 %v8169_v23  ;;  %v3125_v36 = vadd.f32 %v14414_v63, %v3086_v52  ;;  %v3158_v7 = vmax.f32 %v3126_v28, 0.0  ;;  %v14794_v21 = vld [vmem:[#allocation2 + $0xda] sm:$0xff]  ;;  %v8161_v0 = vld [vmem:[%s17774_s3 + $0x1d0] sm:$0xff] }
 0x230   : > { %3277 = vst [vmem:[#allocation3 + $0x34] sm:$0x1] %v3269_v39  ;;  %3285 = vst [vmem:[#allocation3 + $0x33] sm:$0x4] %v3269_v39  ;;  %v3205_v25 = vmax.f32 %v3171_v61, %v3189_v1  ;;  %10951 = vmatpush3.msra.mxu0 %v8169_v23  ;;  %v8163_v53 = vld [vmem:[%s17774_s3 + $0x1e0] sm:$0xff]  ;;  %v8162_v16 = vld [vmem:[%s17774_s3 + $0x1d8] sm:$0xff] }
 0x231   : > { %3293 = vst [vmem:[#allocation3 + $0x32] sm:$0x10] %v3269_v39  ;;  %3301 = vst [vmem:[#allocation3 + $0x31] sm:$0x40] %v3269_v39  ;;  %10952 = vmatprep.subr.mxu0 %v8168_v12  ;;  %v3157_v63 = vmax.f32 %v3125_v36, 0.0  ;;  %v3174_v30 = vmax.f32 %v3156_v19, %v3158_v7  ;;  %v8211_v6 = vld [vmem:[%s17774_s3 + $0x360] sm:$0xff] }
 0x232   : > { %v14752_v42 = vld [vmem:[#allocation2 + $0x7a] sm:$0xff]  ;;  %3213 = vst [vmem:[#allocation3 + $0x30] sm:$0x1] %v3205_v25  ;;  %3221 = vst [vmem:[#allocation3 + $0x2f] sm:$0x4] %v3205_v25  ;;  %10953 = vmatpush3.msra.mxu0 %v8168_v12  ;;  %v8157_v60 = vld [vmem:[%s17774_s3 + $0x1b0] sm:$0xff] }
 0x233   : > { %3229 = vst [vmem:[#allocation3 + $0x2e] sm:$0x10] %v3205_v25  ;;  %3237 = vst [vmem:[#allocation3 + $0x2d] sm:$0x40] %v3205_v25  ;;  %10875 = vmatmul.mubr.f32.gmra.mxu0 %v14752_v42  ;;  %v14760_v18 = vld [vmem:[#allocation2 + $0x78] sm:$0xff]  ;;  %v3173_v62 = vmax.f32 %v3155_v22, %v3157_v63  ;;  %10954 = vmatprep.subr.mxu0 %v8167_v43  ;;  %v3254_v34 = vrot.slane %v3174_v30, 1 }
 0x234   : > { %v14750_v58 = vld [vmem:[#allocation3 + $0x28] sm:$0xff]  ;;  %10955 = vmatpush3.msra.mxu0 %v8167_v43  ;;  %4688 = vst [vmem:[#allocation2 + $0xd8] sm:$0xff] %v18037_v56  ;;  %4689 = vst [vmem:[#allocation2 + $0xe0] sm:$0xff] %v18037_v56  ;;  %v8159_v61 = vld [vmem:[%s17774_s3 + $0x1c0] sm:$0xff] }
 0x235   : > { %3370 = vst [vmem:[#allocation2 + $0x91] sm:$0xff] %v14750_v58  ;;  %10789 = vmatprep.mubr.f32.mxu1 %v14750_v58  ;;  %v14762_v57 = vld [vmem:[#allocation2 + $0x79] sm:$0xff]  ;;  %v3190_v2 = vrot.slane %v3173_v62, 1  ;;  %11012 = vmatprep.subr.mxu0 %v8214_v31  ;;  %v3270_v54 = vmax.f32 %v3174_v30, %v3254_v34  ;;  %v8156_v39 = vld [vmem:[%s17774_s3 + $0x1a8] sm:$0xff]  ;;  %v8153_v25 = vld [vmem:[%s17774_s3 + $0x190] sm:$0xff] }
 0x236   : > { %4677 = vst [vmem:[#allocation2 + $0x80] sm:$0xff] %v18037_v56  ;;  %4676 = vst [vmem:[#allocation2 + $0x78] sm:$0xff] %v18037_v56  ;;  %v8207_v23 = vld [vmem:[%s17774_s3 + $0x340] sm:$0xff]  ;;  %v8158_v9 = vld [vmem:[%s17774_s3 + $0x1b8] sm:$0xff] }
 0x237   : > { %v3206_v4 = vmax.f32 %v3173_v62, %v3190_v2  ;;  %3278 = vst [vmem:[#allocation3 + $0x3c] sm:$0x1] %v3270_v54  ;;  %3286 = vst [vmem:[#allocation3 + $0x3b] sm:$0x4] %v3270_v54  ;;  %v8206_v35 = vld [vmem:[%s17774_s3 + $0x338] sm:$0xff]  ;;  %v8204_v1 = vld [vmem:[%s17774_s3 + $0x328] sm:$0xff] }
 0x238   : > { %3294 = vst [vmem:[#allocation3 + $0x3a] sm:$0x10] %v3270_v54  ;;  %3302 = vst [vmem:[#allocation3 + $0x39] sm:$0x40] %v3270_v54  ;;  %v8155_v27 = vld [vmem:[%s17774_s3 + $0x1a0] sm:$0xff]  ;;  %v8154_v12 = vld [vmem:[%s17774_s3 + $0x198] sm:$0xff] }
 0x239   : > { %3214 = vst [vmem:[#allocation3 + $0x38] sm:$0x1] %v3206_v4  ;;  %3222 = vst [vmem:[#allocation3 + $0x37] sm:$0x4] %v3206_v4  ;;  %v8203_v52 = vld [vmem:[%s17774_s3 + $0x320] sm:$0xff]  ;;  %v8202_v28 = vld [vmem:[%s17774_s3 + $0x318] sm:$0xff] }
 0x23a   : > { %v14769_v49 = vld [vmem:[#allocation3 + $0x30] sm:$0xff]  ;;  %3230 = vst [vmem:[#allocation3 + $0x36] sm:$0x10] %v3206_v4  ;;  %3238 = vst [vmem:[#allocation3 + $0x35] sm:$0x40] %v3206_v4  ;;  %v8201_v36 = vld [vmem:[%s17774_s3 + $0x310] sm:$0xff] }
 0x23b   : > { %3371 = vst [vmem:[#allocation2 + $0xa9] sm:$0xff] %v14769_v49  ;;  %10790 = vmatmul.mubr.f32.gmra.mxu1 %v14769_v49  ;;  %v8200_v19 = vld [vmem:[%s17774_s3 + $0x308] sm:$0xff]  ;;  %v8151_v7 = vld [vmem:[%s17774_s3 + $0x180] sm:$0xff]  ;;  %v8198_v22 = vld [vmem:[%s17774_s3 + $0x2f8] sm:$0xff] }
 0x23c   : > { %v14771_v17 = vld [vmem:[#allocation2 + $0x92] sm:$0xff]  ;;  %10824 = vmatprep.mubr.f32.mxu1 %v18037_v56  ;;  %v8199_v43 = vld [vmem:[%s17774_s3 + $0x300] sm:$0xff]  ;;  %v8244_v62 = vld [vmem:[%s17774_s3 + $0x468] sm:$0xff] }
 0x23d   : > { %10877 = vmatprep.mubr.f32.mxu0 %v14771_v17  ;;  %v14776_v33 = vld [vmem:[#allocation2 + $0x90] sm:$0xff]  ;;  %v8246_v63 = vld [vmem:[%s17774_s3 + $0x478] sm:$0xff]  ;;  %v8243_v34 = vld [vmem:[%s17774_s3 + $0x460] sm:$0xff] }
 0x23e   : > { %v14778_v47 = vld [vmem:[#allocation2 + $0x91] sm:$0xff]  ;;  %v8192_v4 = vld [vmem:[%s17774_s3 + $0x2c8] sm:$0xff] }
 0x23f   : > { %4679 = vst [vmem:[#allocation2 + $0x90] sm:$0xff] %v18037_v56  ;;  %4680 = vst [vmem:[#allocation2 + $0x98] sm:$0xff] %v18037_v56  ;;  %10825 = vmatmul.mubr.f32.vlgmr.msra.gmra.mxu1 %v14566_v40  ;;  %v8197_v30 = vld [vmem:[%s17774_s3 + $0x2f0] sm:$0xff]  ;;  %v8242_v2 = vld [vmem:[%s17774_s3 + $0x458] sm:$0xff] }
 0x240   : > { %10881 = vmatpush3.msra.mxu1 %v14735_v15  ;;  %10827 = vmatprep.mubr.f32.mxu1 %v14627_v55  ;;  %v8241_v54 = vld [vmem:[%s17774_s3 + $0x450] sm:$0xff] }
 0x241   : > { %10882 = vmatprep.subr.mxu1 %v8165_v44  ;;  %v14798_v24 = vld [vmem:[#allocation3 + $0x38] sm:$0xff] }
 0x242   : > { %v14800_v3 = vld [vmem:[#allocation2 + $0xaa] sm:$0xff]  ;;  %10883 = vmatpush3.msra.mxu1 %v8165_v44  ;;  %3372 = vst [vmem:[#allocation2 + $0xc1] sm:$0xff] %v14798_v24  ;;  %v8191_v44 = vld [vmem:[%s17774_s3 + $0x2c0] sm:$0xff] }
 0x243   : > { %v14802_v26 = vld [vmem:[#allocation2 + $0xa8] sm:$0xff]  ;;  %10878 = vmatmul.mubr.f32.gmra.mxu0 %v14800_v3  ;;  %10884 = vmatprep.subr.mxu1 %v8164_v46  ;;  %4683 = vst [vmem:[#allocation2 + $0xb0] sm:$0xff] %v18037_v56 }
 0x244   : > { %4682 = vst [vmem:[#allocation2 + $0xa8] sm:$0xff] %v18037_v56  ;;  %10956 = vmatprep.mubr.f32.mxu0 %v14513_v50  ;;  %10828 = vmatmul.mubr.f32.gmra.mxu1 %v14681_v8  ;;  %v8212_v50 = vld [vmem:[%s17774_s3 + $0x368] sm:$0xff] }
 0x245   : > { %10885 = vmatpush3.msra.mxu1 %v8164_v46  ;;  %10830 = vmatprep.mubr.f32.mxu1 %v14728_v59  ;;  %v8239_v46 = vld [vmem:[%s17774_s3 + $0x440] sm:$0xff] }
 0x246   : > { %10886 = vmatprep.subr.mxu1 %v8163_v53 }
 0x247   : > { %10957 = vmatmul.mubr.f32.vlgmr.msra.gmra.mxu0 %v14562_v32  ;;  %10887 = vmatpush3.msra.mxu1 %v8163_v53  ;;  %v8238_v53 = vld [vmem:[%s17774_s3 + $0x438] sm:$0xff] }
 0x248   : > { %11013 = vmatpush3.msra.mxu0 %v8214_v31  ;;  %10959 = vmatprep.mubr.f32.mxu0 %v14614_v29  ;;  %v8210_v29 = vld [vmem:[%s17774_s3 + $0x358] sm:$0xff]  ;;  %v8245_v31 = vld [vmem:[%s17774_s3 + $0x470] sm:$0xff] }
 0x249   : > { %11014 = vmatprep.subr.mxu0 %v8213_v10  ;;  %10888 = vmatprep.subr.mxu1 %v8162_v16  ;;  %v14829_v15 = vld [vmem:[#allocation2 + $0xc0] sm:$0xff] }
 0x24a   : > { %11015 = vmatpush3.msra.mxu0 %v8213_v10  ;;  %10831 = vmatmul.mubr.f32.gmra.mxu1 %v14760_v18  ;;  %v14831_v32 = vld [vmem:[#allocation2 + $0xc2] sm:$0xff]  ;;  %v8189_v10 = vld [vmem:[%s17774_s3 + $0x2b0] sm:$0xff] }
 0x24b   : > { %11016 = vmatprep.subr.mxu0 %v8212_v50  ;;  %10960 = vmatmul.mubr.f32.gmra.mxu0 %v14667_v13  ;;  %4685 = vst [vmem:[#allocation2 + $0xc0] sm:$0xff] %v18037_v56  ;;  %4686 = vst [vmem:[#allocation2 + $0xc8] sm:$0xff] %v18037_v56  ;;  %v8209_v13 = vld [vmem:[%s17774_s3 + $0x350] sm:$0xff] }
 0x24c   : > { %11017 = vmatpush3.msra.mxu0 %v8212_v50  ;;  %10962 = vmatprep.mubr.f32.mxu0 %v14715_v20  ;;  %v8160_v20 = vld [vmem:[%s17774_s3 + $0x1c8] sm:$0xff] }
 0x24d   : > { %11018 = vmatprep.subr.mxu0 %v8211_v6  ;;  %10889 = vmatpush3.msra.mxu1 %v8162_v16  ;;  %v8188_v16 = vld [vmem:[%s17774_s3 + $0x2a8] sm:$0xff] }
 0x24e   : > { %11019 = vmatpush3.msra.mxu0 %v8211_v6  ;;  %10833 = vmatprep.mubr.f32.mxu1 %v14776_v33  ;;  %v8236_v50 = vld [vmem:[%s17774_s3 + $0x428] sm:$0xff]  ;;  %v8187_v6 = vld [vmem:[%s17774_s3 + $0x2a0] sm:$0xff] }
 0x24f   : > { %11020 = vmatprep.subr.mxu0 %v8210_v29  ;;  %10963 = vmatmul.mubr.f32.gmra.mxu0 %v14750_v58  ;;  %v8152_v58 = vld [vmem:[%s17774_s3 + $0x188] sm:$0xff] }
 0x250   : > { %11021 = vmatpush3.msra.mxu0 %v8210_v29  ;;  %10890 = vmatprep.subr.mxu1 %v8161_v0  ;;  %v8186_v29 = vld [vmem:[%s17774_s3 + $0x298] sm:$0xff] }
 0x251   : > { %10965 = vmatprep.mubr.f32.mxu0 %v14769_v49  ;;  %11022 = vmatprep.subr.mxu0 %v8209_v13 }
 0x252   : > { %10891 = vmatpush3.msra.mxu1 %v8161_v0  ;;  %11023 = vmatpush3.msra.mxu0 %v8209_v13  ;;  %v8234_v0 = vld [vmem:[%s17774_s3 + $0x418] sm:$0xff]  ;;  %v8185_v13 = vld [vmem:[%s17774_s3 + $0x290] sm:$0xff] }
 0x253   : > { %10892 = vmatprep.subr.mxu1 %v8160_v20  ;;  %11024 = vmatprep.subr.mxu0 %v8208_v38 }
 0x254   : > { %10834 = vmatmul.mubr.f32.gmra.mxu1 %v14802_v26  ;;  %10966 = vmatmul.mubr.f32.gmra.mxu0 %v14798_v24 }
 0x255   : > { %10893 = vmatpush3.msra.mxu1 %v8160_v20  ;;  %11025 = vmatpush3.msra.mxu0 %v8208_v38  ;;  %v8233_v20 = vld [vmem:[%s17774_s3 + $0x410] sm:$0xff]  ;;  %v8184_v38 = vld [vmem:[%s17774_s3 + $0x288] sm:$0xff] }
 0x256   : > { %10894 = vmatprep.subr.mxu1 %v8159_v61  ;;  %10912 = vmatprep.mubr.f32.mxu1 %v14566_v40  ;;  %v8205_v40 = vld [vmem:[%s17774_s3 + $0x330] sm:$0xff] }
 0x257   : > { %11026 = vmatprep.subr.mxu0 %v8207_v23  ;;  %11044 = vmatprep.mubr.f32.mxu0 %v14627_v55 }
 0x258   : > { %10895 = vmatpush3.msra.mxu1 %v8159_v61  ;;  %11027 = vmatpush3.msra.mxu0 %v8207_v23  ;;  %v8232_v61 = vld [vmem:[%s17774_s3 + $0x408] sm:$0xff]  ;;  %v8183_v23 = vld [vmem:[%s17774_s3 + $0x280] sm:$0xff] }
 0x259   : > { %10896 = vmatprep.subr.mxu1 %v8158_v9  ;;  %11028 = vmatprep.subr.mxu0 %v8206_v35 }
 0x25a   : > { %10897 = vmatpush3.msra.mxu1 %v8158_v9  ;;  %11029 = vmatpush3.msra.mxu0 %v8206_v35  ;;  %v8231_v9 = vld [vmem:[%s17774_s3 + $0x400] sm:$0xff]  ;;  %v8230_v35 = vld [vmem:[%s17774_s3 + $0x3f8] sm:$0xff] }
 0x25b   : > { %10898 = vmatprep.subr.mxu1 %v8157_v60  ;;  %11030 = vmatprep.subr.mxu0 %v8205_v40 }
 0x25c   : > { %10899 = vmatpush3.msra.mxu1 %v8157_v60  ;;  %11031 = vmatpush3.msra.mxu0 %v8205_v40  ;;  %v8229_v60 = vld [vmem:[%s17774_s3 + $0x3f0] sm:$0xff]  ;;  %v8228_v40 = vld [vmem:[%s17774_s3 + $0x3e8] sm:$0xff] }
 0x25d   : > { %10900 = vmatprep.subr.mxu1 %v8156_v39  ;;  %11032 = vmatprep.subr.mxu0 %v8204_v1 }
 0x25e   : > { %10901 = vmatpush3.msra.mxu1 %v8156_v39  ;;  %11033 = vmatpush3.msra.mxu0 %v8204_v1  ;;  %v8221_v39 = vld [vmem:[%s17774_s3 + $0x3b0] sm:$0xff] }
 0x25f   : > { %10902 = vmatprep.subr.mxu1 %v8155_v27  ;;  %11034 = vmatprep.subr.mxu0 %v8203_v52  ;;  %v8217_v1 = vld [vmem:[%s17774_s3 + $0x390] sm:$0xff] }
 0x260   : > { %10903 = vmatpush3.msra.mxu1 %v8155_v27  ;;  %11035 = vmatpush3.msra.mxu0 %v8203_v52  ;;  %v8216_v27 = vld [vmem:[%s17774_s3 + $0x388] sm:$0xff]  ;;  %v8215_v52 = vld [vmem:[%s17774_s3 + $0x380] sm:$0xff] }
 0x261   : > { %10904 = vmatprep.subr.mxu1 %v8154_v12  ;;  %11036 = vmatprep.subr.mxu0 %v8202_v28 }
 0x262   : > { %10905 = vmatpush3.msra.mxu1 %v8154_v12  ;;  %11037 = vmatpush3.msra.mxu0 %v8202_v28  ;;  %v8263_v12 = vld [vmem:[%s17776_s5 + $0xf8] sm:$0xff]  ;;  %v8262_v28 = vld [vmem:[%s17776_s5 + $0xf0] sm:$0xff] }
 0x263   : > { %10906 = vmatprep.subr.mxu1 %v8153_v25  ;;  %11038 = vmatprep.subr.mxu0 %v8201_v36 }
 0x264   : > { %10907 = vmatpush3.msra.mxu1 %v8153_v25  ;;  %11039 = vmatpush3.msra.mxu0 %v8201_v36  ;;  %v8261_v25 = vld [vmem:[%s17776_s5 + $0xe8] sm:$0xff] }
 0x265   : > { %10908 = vmatprep.subr.mxu1 %v8152_v58  ;;  %11040 = vmatprep.subr.mxu0 %v8200_v19  ;;  %v8253_v36 = vld [vmem:[%s17776_s5 + $0xa8] sm:$0xff] }
 0x266   : > { %10909 = vmatpush3.msra.mxu1 %v8152_v58  ;;  %11041 = vmatpush3.msra.mxu0 %v8200_v19  ;;  %v8252_v58 = vld [vmem:[%s17776_s5 + $0xa0] sm:$0xff]  ;;  %v8251_v19 = vld [vmem:[%s17776_s5 + $0x98] sm:$0xff] }
 0x267   : > { %10910 = vmatprep.subr.mxu1 %v8151_v7  ;;  %11042 = vmatprep.subr.mxu0 %v8199_v43 }
 0x268   : > { %10911 = vmatpush3.msra.mxu1 %v8151_v7  ;;  %11043 = vmatpush3.msra.mxu0 %v8199_v43  ;;  %v8250_v7 = vld [vmem:[%s17776_s5 + $0x90] sm:$0xff]  ;;  %v8249_v43 = vld [vmem:[%s17776_s5 + $0x88] sm:$0xff] }
 0x269   : > { %10913 = vmatmul.mubr.f32.vlgmr.msra.gmra.mxu1 %v14627_v55  ;;  %10968 = vmatprep.subr.mxu1 %v8198_v22  ;;  %v8196_v55 = vld [vmem:[%s17774_s3 + $0x2e8] sm:$0xff] }
 0x26a   : > { %11045 = vmatmul.mubr.f32.vlgmr.msra.gmra.mxu0 %v14681_v8  ;;  %11100 = vmatprep.subr.mxu0 %v8246_v63 }
 0x26b   : > { %10915 = vmatprep.mubr.f32.mxu1 %v14681_v8  ;;  %10969 = vmatpush3.msra.mxu1 %v8198_v22  ;;  %v8195_v8 = vld [vmem:[%s17774_s3 + $0x2e0] sm:$0xff] }
 0x26c   : > { %11047 = vmatprep.mubr.f32.mxu0 %v14728_v59  ;;  %11101 = vmatpush3.msra.mxu0 %v8246_v63  ;;  %v8248_v22 = vld [vmem:[%s17776_s5 + $0x80] sm:$0xff] }
 0x26d   : > { %10970 = vmatprep.subr.mxu1 %v8197_v30  ;;  %11102 = vmatprep.subr.mxu0 %v8245_v31  ;;  %v4736_v63 = vld [vmem:[#allocation2 + $0x1] sm:$0xf] }
 0x26e   : > { %10971 = vmatpush3.msra.mxu1 %v8197_v30  ;;  %11103 = vmatpush3.msra.mxu0 %v8245_v31  ;;  %v4735_v30 = vld [vmem:[%s17776_s5 + $0x78] sm:$0xff] }
 0x26f   : > { %10916 = vmatmul.mubr.f32.gmra.mxu1 %v14728_v59  ;;  %10972 = vmatprep.subr.mxu1 %v8196_v55  ;;  %v8194_v59 = vld [vmem:[%s17774_s3 + $0x2d8] sm:$0xff] }
 0x270   : > { %11048 = vmatmul.mubr.f32.gmra.mxu0 %v14760_v18  ;;  %11104 = vmatprep.subr.mxu0 %v8244_v62  ;;  %v8279_v31 = vld [vmem:[%s17776_s5 + $0x178] sm:$0xff] }
 0x271   : > { %10918 = vmatprep.mubr.f32.mxu1 %v14760_v18  ;;  %10973 = vmatpush3.msra.mxu1 %v8196_v55  ;;  %v8193_v18 = vld [vmem:[%s17774_s3 + $0x2d0] sm:$0xff] }
 0x272   : > { %11050 = vmatprep.mubr.f32.mxu0 %v14776_v33  ;;  %11105 = vmatpush3.msra.mxu0 %v8244_v62  ;;  %v4734_v55 = vld [vmem:[%s17776_s5 + $0x70] sm:$0xff] }
 0x273   : > { %10974 = vmatprep.subr.mxu1 %v8195_v8  ;;  %11106 = vmatprep.subr.mxu0 %v8243_v34  ;;  %v8278_v62 = vld [vmem:[%s17776_s5 + $0x170] sm:$0xff] }
 0x274   : > { %10975 = vmatpush3.msra.mxu1 %v8195_v8  ;;  %11107 = vmatpush3.msra.mxu0 %v8243_v34  ;;  %v4733_v8 = vld [vmem:[%s17776_s5 + $0x68] sm:$0xff] }
 0x275   : > { %10919 = vmatmul.mubr.f32.gmra.mxu1 %v14776_v33  ;;  %10976 = vmatprep.subr.mxu1 %v8194_v59  ;;  %v8240_v33 = vld [vmem:[%s17774_s3 + $0x448] sm:$0xff] }
 0x276   : > { %11051 = vmatmul.mubr.f32.gmra.mxu0 %v14802_v26  ;;  %11108 = vmatprep.subr.mxu0 %v8242_v2  ;;  %v8277_v34 = vld [vmem:[%s17776_s5 + $0x168] sm:$0xff] }
 0x277   : > { %10921 = vmatprep.mubr.f32.mxu1 %v14802_v26  ;;  %10977 = vmatpush3.msra.mxu1 %v8194_v59  ;;  %v8190_v26 = vld [vmem:[%s17774_s3 + $0x2b8] sm:$0xff]  ;;  %v4732_v59 = vld [vmem:[%s17776_s5 + $0x60] sm:$0xff] }
 0x278   : > { %11053 = vmatprep.mubr.f32.mxu0 %v14829_v15  ;;  %11109 = vmatpush3.msra.mxu0 %v8242_v2  ;;  %v8276_v2 = vld [vmem:[%s17776_s5 + $0x160] sm:$0xff] }
 0x279   : > { %10978 = vmatprep.subr.mxu1 %v8193_v18  ;;  %11110 = vmatprep.subr.mxu0 %v8241_v54 }
 0x27a   : > { %10979 = vmatpush3.msra.mxu1 %v8193_v18  ;;  %11111 = vmatpush3.msra.mxu0 %v8241_v54  ;;  %v4731_v18 = vld [vmem:[%s17776_s5 + $0x58] sm:$0xff] }
 0x27b   : > { %10922 = vmatmul.mubr.f32.gmra.mxu1 %v14829_v15  ;;  %10980 = vmatprep.subr.mxu1 %v8192_v4  ;;  %v8235_v15 = vld [vmem:[%s17774_s3 + $0x420] sm:$0xff]  ;;  %v8275_v54 = vld [vmem:[%s17776_s5 + $0x158] sm:$0xff] }
 0x27c   : > { %11054 = vmatmul.mubr.f32.gmra.mxu0 %v18037_v56  ;;  %11112 = vmatprep.subr.mxu0 %v8240_v33 }
 0x27d   : > { %10981 = vmatpush3.msra.mxu1 %v8192_v4  ;;  %11000 = vmatprep.mubr.f32.mxu1 %v14564_v41  ;;  %v8237_v41 = vld [vmem:[%s17774_s3 + $0x430] sm:$0xff] }
 0x27e   : > { %11113 = vmatpush3.msra.mxu0 %v8240_v33  ;;  %11132 = vmatprep.mubr.f32.mxu0 %v14616_v11  ;;  %v4730_v4 = vld [vmem:[%s17776_s5 + $0x50] sm:$0xff] }
 0x27f   : > { %10982 = vmatprep.subr.mxu1 %v8191_v44  ;;  %11114 = vmatprep.subr.mxu0 %v8239_v46  ;;  %v8274_v33 = vld [vmem:[%s17776_s5 + $0x150] sm:$0xff] }
 0x280   : > { %10983 = vmatpush3.msra.mxu1 %v8191_v44  ;;  %11115 = vmatpush3.msra.mxu0 %v8239_v46  ;;  %v4729_v44 = vld [vmem:[%s17776_s5 + $0x48] sm:$0xff] }
 0x281   : > { %10984 = vmatprep.subr.mxu1 %v8190_v26  ;;  %11116 = vmatprep.subr.mxu0 %v8238_v53  ;;  %v8273_v46 = vld [vmem:[%s17776_s5 + $0x148] sm:$0xff] }
 0x282   : > { %10985 = vmatpush3.msra.mxu1 %v8190_v26  ;;  %11117 = vmatpush3.msra.mxu0 %v8238_v53  ;;  %v4728_v26 = vld [vmem:[%s17776_s5 + $0x40] sm:$0xff] }
 0x283   : > { %10986 = vmatprep.subr.mxu1 %v8189_v10  ;;  %11118 = vmatprep.subr.mxu0 %v8237_v41  ;;  %v8272_v53 = vld [vmem:[%s17776_s5 + $0x140] sm:$0xff] }
 0x284   : > { %10987 = vmatpush3.msra.mxu1 %v8189_v10  ;;  %11119 = vmatpush3.msra.mxu0 %v8237_v41  ;;  %v4727_v10 = vld [vmem:[%s17776_s5 + $0x38] sm:$0xff] }
 0x285   : > { %10988 = vmatprep.subr.mxu1 %v8188_v16  ;;  %11120 = vmatprep.subr.mxu0 %v8236_v50  ;;  %v8271_v41 = vld [vmem:[%s17776_s5 + $0x138] sm:$0xff] }
 0x286   : > { %10989 = vmatpush3.msra.mxu1 %v8188_v16  ;;  %11121 = vmatpush3.msra.mxu0 %v8236_v50  ;;  %v4726_v16 = vld [vmem:[%s17776_s5 + $0x30] sm:$0xff] }
 0x287   : > { %10990 = vmatprep.subr.mxu1 %v8187_v6  ;;  %11122 = vmatprep.subr.mxu0 %v8235_v15  ;;  %v8270_v50 = vld [vmem:[%s17776_s5 + $0x130] sm:$0xff] }
 0x288   : > { %10991 = vmatpush3.msra.mxu1 %v8187_v6  ;;  %11123 = vmatpush3.msra.mxu0 %v8235_v15  ;;  %v4725_v6 = vld [vmem:[%s17776_s5 + $0x28] sm:$0xff] }
 0x289   : > { %10992 = vmatprep.subr.mxu1 %v8186_v29  ;;  %11124 = vmatprep.subr.mxu0 %v8234_v0  ;;  %v8269_v15 = vld [vmem:[%s17776_s5 + $0x128] sm:$0xff] }
 0x28a   : > { %10993 = vmatpush3.msra.mxu1 %v8186_v29  ;;  %11125 = vmatpush3.msra.mxu0 %v8234_v0  ;;  %v4724_v29 = vld [vmem:[%s17776_s5 + $0x20] sm:$0xff] }
 0x28b   : > { %10994 = vmatprep.subr.mxu1 %v8185_v13  ;;  %11126 = vmatprep.subr.mxu0 %v8233_v20  ;;  %v8268_v0 = vld [vmem:[%s17776_s5 + $0x120] sm:$0xff] }
 0x28c   : > { %10995 = vmatpush3.msra.mxu1 %v8185_v13  ;;  %11127 = vmatpush3.msra.mxu0 %v8233_v20  ;;  %v4723_v13 = vld [vmem:[%s17776_s5 + $0x18] sm:$0xff] }
 0x28d   : > { %10996 = vmatprep.subr.mxu1 %v8184_v38  ;;  %11128 = vmatprep.subr.mxu0 %v8232_v61  ;;  %v8267_v20 = vld [vmem:[%s17776_s5 + $0x118] sm:$0xff] }
 0x28e   : > { %10997 = vmatpush3.msra.mxu1 %v8184_v38  ;;  %11129 = vmatpush3.msra.mxu0 %v8232_v61  ;;  %v4722_v38 = vld [vmem:[%s17776_s5 + $0x10] sm:$0xff] }
 0x28f   : > { %10998 = vmatprep.subr.mxu1 %v8183_v23  ;;  %11130 = vmatprep.subr.mxu0 %v8231_v9  ;;  %v8266_v61 = vld [vmem:[%s17776_s5 + $0x110] sm:$0xff] }
 0x290   : > { %10999 = vmatpush3.msra.mxu1 %v8183_v23  ;;  %11131 = vmatpush3.msra.mxu0 %v8231_v9  ;;  %v4721_v23 = vld [vmem:[%s17776_s5 + $0x8] sm:$0xff] }
 0x291   : > { %11001 = vmatmul.mubr.f32.vlgmr.msra.gmra.mxu1 %v14616_v11  ;;  %11056 = vmatprep.subr.mxu1 %v8230_v35  ;;  %v8227_v11 = vld [vmem:[%s17774_s3 + $0x3e0] sm:$0xff]  ;;  %v8265_v9 = vld [vmem:[%s17776_s5 + $0x108] sm:$0xff] }
 0x292   : > { %11133 = vmatmul.mubr.f32.vlgmr.msra.gmra.mxu0 %v14669_v37  ;;  %11003 = vmatprep.mubr.f32.mxu1 %v14669_v37  ;;  %v8226_v37 = vld [vmem:[%s17774_s3 + $0x3d8] sm:$0xff] }
 0x293   : > { %11057 = vmatpush3.msra.mxu1 %v8230_v35  ;;  %11135 = vmatprep.mubr.f32.mxu0 %v14717_v5  ;;  %v4720_v35 = vld [vmem:[%s17776_s5] sm:$0xff] }
 0x294   : > { %11058 = vmatprep.subr.mxu1 %v8229_v60  ;;  %11179 = vmatprep.subr.mxu0 %v18037_v56 }
 0x295   : > { %11059 = vmatpush3.msra.mxu1 %v8229_v60  ;;  %11180 = vmatpush3.msra.mxu0 %v4735_v30  ;;  %v8264_v60 = vld [vmem:[%s17776_s5 + $0x100] sm:$0xff]  ;;  %v8283_v30 = vld [vmem:[%s17776_s5 + $0x198] sm:$0xff] }
 0x296   : > { %11004 = vmatmul.mubr.f32.gmra.mxu1 %v14717_v5  ;;  %11060 = vmatprep.subr.mxu1 %v8228_v40  ;;  %v8225_v5 = vld [vmem:[%s17774_s3 + $0x3d0] sm:$0xff] }
 0x297   : > { %11136 = vmatmul.mubr.f32.gmra.mxu0 %v14752_v42  ;;  %11006 = vmatprep.mubr.f32.mxu1 %v14752_v42  ;;  %v8224_v42 = vld [vmem:[%s17774_s3 + $0x3c8] sm:$0xff] }
 0x298   : > { %11061 = vmatpush3.msra.mxu1 %v8228_v40  ;;  %11138 = vmatprep.mubr.f32.mxu0 %v14771_v17  ;;  %v4719_v40 = vld [vmem:[#allocation2] sm:$0xf] }
 0x299   : > { %11062 = vmatprep.subr.mxu1 %v8227_v11  ;;  %11181 = vmatprep.subr.mxu0 %v18037_v56 }
 0x29a   : > { %11063 = vmatpush3.msra.mxu1 %v8227_v11  ;;  %11182 = vmatpush3.msra.mxu0 %v4734_v55  ;;  %v4894_v11 = vld [vmem:[#allocation2 + $0x2] sm:$0xf]  ;;  %v8282_v55 = vld [vmem:[%s17776_s5 + $0x190] sm:$0xff] }
 0x29b   : > { %11007 = vmatmul.mubr.f32.gmra.mxu1 %v14771_v17  ;;  %11064 = vmatprep.subr.mxu1 %v8226_v37  ;;  %v8223_v17 = vld [vmem:[%s17774_s3 + $0x3c0] sm:$0xff] }
 0x29c   : > { %11139 = vmatmul.mubr.f32.gmra.mxu0 %v14800_v3  ;;  %11009 = vmatprep.mubr.f32.mxu1 %v14800_v3  ;;  %v8222_v3 = vld [vmem:[%s17774_s3 + $0x3b8] sm:$0xff] }
 0x29d   : > { %11065 = vmatpush3.msra.mxu1 %v8226_v37  ;;  %11141 = vmatprep.mubr.f32.mxu0 %v14831_v32  ;;  %v8295_v37 = vld [vmem:[%s17776_s5 + $0x1f8] sm:$0xff] }
 0x29e   : > { %11066 = vmatprep.subr.mxu1 %v8225_v5  ;;  %11183 = vmatprep.subr.mxu0 %v18037_v56 }
 0x29f   : > { %11067 = vmatpush3.msra.mxu1 %v8225_v5  ;;  %11184 = vmatpush3.msra.mxu0 %v4733_v8  ;;  %v8311_v5 = vld [vmem:[%s17776_s5 + $0x278] sm:$0xff] }
 0x2a0   : > { %11010 = vmatmul.mubr.f32.gmra.mxu1 %v14831_v32  ;;  %11068 = vmatprep.subr.mxu1 %v8224_v42  ;;  %v8220_v32 = vld [vmem:[%s17774_s3 + $0x3a8] sm:$0xff] }
 0x2a1   : > { %11069 = vmatpush3.msra.mxu1 %v8224_v42  ;;  %11088 = vmatprep.mubr.f32.mxu1 %v14629_v45  ;;  %v8219_v45 = vld [vmem:[%s17774_s3 + $0x3a0] sm:$0xff]  ;;  %v8294_v42 = vld [vmem:[%s17776_s5 + $0x1f0] sm:$0xff] }
 0x2a2   : > { %11070 = vmatprep.subr.mxu1 %v8223_v17  ;;  %11142 = vmatmul.mubr.f32.gmra.mxu0 %v14794_v21  ;;  %v8218_v21 = vld [vmem:[%s17774_s3 + $0x398] sm:$0xff] }
 0x2a3   : > { %11071 = vmatpush3.msra.mxu1 %v8223_v17  ;;  %11185 = vmatprep.subr.mxu0 %v18037_v56  ;;  %v8310_v17 = vld [vmem:[%s17776_s5 + $0x270] sm:$0xff] }
 0x2a4   : > { %11072 = vmatprep.subr.mxu1 %v8222_v3  ;;  %11186 = vmatpush3.msra.mxu0 %v4732_v59  ;;  %v8297_v59 = vld [vmem:[%s17776_s5 + $0x208] sm:$0xff] }
 0x2a5   : > { %11073 = vmatpush3.msra.mxu1 %v8222_v3  ;;  %11187 = vmatprep.subr.mxu0 %v18037_v56  ;;  %v8293_v3 = vld [vmem:[%s17776_s5 + $0x1e8] sm:$0xff] }
 0x2a6   : > { %11074 = vmatprep.subr.mxu1 %v8221_v39  ;;  %11188 = vmatpush3.msra.mxu0 %v4731_v18 }
 0x2a7   : > { %11075 = vmatpush3.msra.mxu1 %v8221_v39  ;;  %11189 = vmatprep.subr.mxu0 %v18037_v56  ;;  %v8309_v39 = vld [vmem:[%s17776_s5 + $0x268] sm:$0xff] }
 0x2a8   : > { %11076 = vmatprep.subr.mxu1 %v8220_v32  ;;  %11190 = vmatpush3.msra.mxu0 %v4730_v4  ;;  %v8296_v4 = vld [vmem:[%s17776_s5 + $0x200] sm:$0xff] }
 0x2a9   : > { %11077 = vmatpush3.msra.mxu1 %v8220_v32  ;;  %11191 = vmatprep.subr.mxu0 %v18037_v56  ;;  %v8292_v32 = vld [vmem:[%s17776_s5 + $0x1e0] sm:$0xff] }
 0x2aa   : > { %11078 = vmatprep.subr.mxu1 %v8219_v45  ;;  %11192 = vmatpush3.msra.mxu0 %v4729_v44 }
 0x2ab   : > { %11079 = vmatpush3.msra.mxu1 %v8219_v45  ;;  %11193 = vmatprep.subr.mxu0 %v18037_v56  ;;  %v8308_v45 = vld [vmem:[%s17776_s5 + $0x260] sm:$0xff] }
 0x2ac   : > { %11080 = vmatprep.subr.mxu1 %v8218_v21  ;;  %11194 = vmatpush3.msra.mxu0 %v4728_v26 }
 0x2ad   : > { %11081 = vmatpush3.msra.mxu1 %v8218_v21  ;;  %11195 = vmatprep.subr.mxu0 %v18037_v56  ;;  %v8291_v21 = vld [vmem:[%s17776_s5 + $0x1d8] sm:$0xff] }
 0x2ae   : > { %11082 = vmatprep.subr.mxu1 %v8217_v1  ;;  %11196 = vmatpush3.msra.mxu0 %v4727_v10 }
 0x2af   : > { %11083 = vmatpush3.msra.mxu1 %v8217_v1  ;;  %11197 = vmatprep.subr.mxu0 %v18037_v56  ;;  %v8307_v1 = vld [vmem:[%s17776_s5 + $0x258] sm:$0xff] }
 0x2b0   : > { %11084 = vmatprep.subr.mxu1 %v8216_v27  ;;  %11198 = vmatpush3.msra.mxu0 %v4726_v16 }
 0x2b1   : > { %11085 = vmatpush3.msra.mxu1 %v8216_v27  ;;  %11199 = vmatprep.subr.mxu0 %v18037_v56  ;;  %v8290_v27 = vld [vmem:[%s17776_s5 + $0x1d0] sm:$0xff] }
 0x2b2   : > { %11086 = vmatprep.subr.mxu1 %v8215_v52  ;;  %11200 = vmatpush3.msra.mxu0 %v4725_v6 }
 0x2b3   : > { %11087 = vmatpush3.msra.mxu1 %v8215_v52  ;;  %11201 = vmatprep.subr.mxu0 %v18037_v56  ;;  %v8306_v52 = vld [vmem:[%s17776_s5 + $0x250] sm:$0xff] }
 0x2b4   : > { %11089 = vmatmul.mubr.f32.vlgmr.msra.gmra.mxu1 %v14683_v14  ;;  %11144 = vmatprep.subr.mxu1 %v18037_v56  ;;  %v8260_v14 = vld [vmem:[%s17776_s5 + $0xe0] sm:$0xff] }
 0x2b5   : > { %11091 = vmatprep.mubr.f32.mxu1 %v14730_v48  ;;  %11145 = vmatpush3.msra.mxu1 %v8263_v12  ;;  %v8259_v48 = vld [vmem:[%s17776_s5 + $0xd8] sm:$0xff] }
 0x2b6   : > { %11146 = vmatprep.subr.mxu1 %v18037_v56  ;;  %11202 = vmatpush3.msra.mxu0 %v4724_v29 }
 0x2b7   : > { %11147 = vmatpush3.msra.mxu1 %v8262_v28  ;;  %11203 = vmatprep.subr.mxu0 %v18037_v56  ;;  %v8289_v28 = vld [vmem:[%s17776_s5 + $0x1c8] sm:$0xff] }
 0x2b8   : > { %11092 = vmatmul.mubr.f32.gmra.mxu1 %v14762_v57  ;;  %11148 = vmatprep.subr.mxu1 %v18037_v56  ;;  %v8258_v57 = vld [vmem:[%s17776_s5 + $0xd0] sm:$0xff] }
 0x2b9   : > { %11094 = vmatprep.mubr.f32.mxu1 %v14778_v47  ;;  %11149 = vmatpush3.msra.mxu1 %v8261_v25  ;;  %v8257_v47 = vld [vmem:[%s17776_s5 + $0xc8] sm:$0xff] }
 0x2ba   : > { %11150 = vmatprep.subr.mxu1 %v18037_v56  ;;  %11204 = vmatpush3.msra.mxu0 %v4723_v13  ;;  %v8305_v25 = vld [vmem:[%s17776_s5 + $0x248] sm:$0xff] }
 0x2bb   : > { %11151 = vmatpush3.msra.mxu1 %v8260_v14  ;;  %11205 = vmatprep.subr.mxu0 %v18037_v56  ;;  %v8288_v14 = vld [vmem:[%s17776_s5 + $0x1c0] sm:$0xff] }
 0x2bc   : > { %11095 = vmatmul.mubr.f32.gmra.mxu1 %v14769_v49  ;;  %11152 = vmatprep.subr.mxu1 %v18037_v56  ;;  %v8256_v49 = vld [vmem:[%s17776_s5 + $0xc0] sm:$0xff] }
 0x2bd   : > { %11097 = vmatprep.mubr.f32.mxu1 %v14798_v24  ;;  %11153 = vmatpush3.msra.mxu1 %v8259_v48  ;;  %v8255_v24 = vld [vmem:[%s17776_s5 + $0xb8] sm:$0xff]  ;;  %v8304_v48 = vld [vmem:[%s17776_s5 + $0x240] sm:$0xff] }
 0x2be   : > { %11154 = vmatprep.subr.mxu1 %v18037_v56  ;;  %11206 = vmatpush3.msra.mxu0 %v4722_v38 }
 0x2bf   : > { %11155 = vmatpush3.msra.mxu1 %v8258_v57  ;;  %11207 = vmatprep.subr.mxu0 %v18037_v56 }
 0x2c0   : > { %11098 = vmatmul.mubr.f32.gmra.mxu1 %v14792_v51  ;;  %11156 = vmatprep.subr.mxu1 %v18037_v56  ;;  %v8254_v51 = vld [vmem:[%s17776_s5 + $0xb0] sm:$0xff] }
 0x2c1   : > { %11157 = vmatpush3.msra.mxu1 %v8257_v47  ;;  %11176 = vmatprep.mubr.msk.f32.mxu1 %vm12467_vm0, %v18037_v56  ;;  %v8287_v47 = vld [vmem:[%s17776_s5 + $0x1b8] sm:$0xff] }
 0x2c2   : > { %11158 = vmatprep.subr.mxu1 %v18037_v56  ;;  %11208 = vmatpush3.msra.mxu0 %v4721_v23 }
 0x2c3   : > { %11159 = vmatpush3.msra.mxu1 %v8256_v49  ;;  %11209 = vmatprep.subr.mxu0 %v18037_v56  ;;  %v8303_v49 = vld [vmem:[%s17776_s5 + $0x238] sm:$0xff] }
 0x2c4   : > { %11160 = vmatprep.subr.mxu1 %v18037_v56  ;;  %11210 = vmatpush3.msra.mxu0 %v4720_v35 }
 0x2c5   : > { %11161 = vmatpush3.msra.mxu1 %v8255_v24  ;;  %11211 = vmatprep.mubr.msk.f32.mxu0 %vm12467_vm0, %v18037_v56 }
 0x2c6   : > { %11162 = vmatprep.subr.mxu1 %v18037_v56  ;;  %11212 = vmatmul.mubr.f32.vlgmr.msra.gmra.mxu0 %v4719_v40 }
 0x2c7   : > { %11163 = vmatpush3.msra.mxu1 %v8254_v51  ;;  %11249 = vmatprep.subr.mxu0 %v18037_v56  ;;  %v8286_v51 = vld [vmem:[%s17776_s5 + $0x1b0] sm:$0xff] }
 0x2c8   : > { %11164 = vmatprep.subr.mxu1 %v18037_v56  ;;  %11250 = vmatpush3.msra.mxu0 %v8295_v37 }
 0x2c9   : > { %11165 = vmatpush3.msra.mxu1 %v8253_v36  ;;  %11251 = vmatprep.subr.mxu0 %v18037_v56  ;;  %v15339_v12 = vpop.f32.mrf.mxu1  ;;  %v8302_v36 = vld [vmem:[%s17776_s5 + $0x230] sm:$0xff] }
 0x2ca   : > { %11166 = vmatprep.subr.mxu1 %v18037_v56  ;;  %11252 = vmatpush3.msra.mxu0 %v8294_v42 }
 0x2cb   : > { %11167 = vmatpush3.msra.mxu1 %v8252_v58  ;;  %11253 = vmatprep.subr.mxu0 %v18037_v56  ;;  %v15357_v57 = vpop.f32.mrf.mxu1  ;;  %v8285_v58 = vld [vmem:[%s17776_s5 + $0x1a8] sm:$0xff] }
 0x2cc   : > { %11168 = vmatprep.subr.mxu1 %v18037_v56  ;;  %11254 = vmatpush3.msra.mxu0 %v8293_v3 }
 0x2cd   : > { %11169 = vmatpush3.msra.mxu1 %v8251_v19  ;;  %11255 = vmatprep.subr.mxu0 %v18037_v56  ;;  %v8301_v19 = vld [vmem:[%s17776_s5 + $0x228] sm:$0xff] }
 0x2ce   : > { %11170 = vmatprep.subr.mxu1 %v18037_v56  ;;  %11256 = vmatpush3.msra.mxu0 %v8292_v32 }
 0x2cf   : > { %11171 = vmatpush3.msra.mxu1 %v8250_v7  ;;  %11257 = vmatprep.subr.mxu0 %v18037_v56 }
 0x2d0   : > { %11172 = vmatprep.subr.mxu1 %v18037_v56  ;;  %11258 = vmatpush3.msra.mxu0 %v8291_v21 }
 0x2d1   : > { %11173 = vmatpush3.msra.mxu1 %v8249_v43  ;;  %11259 = vmatprep.subr.mxu0 %v18037_v56  ;;  %v8284_v43 = vld [vmem:[%s17776_s5 + $0x1a0] sm:$0xff] }
 0x2d2   : > { %11174 = vmatprep.subr.mxu1 %v18037_v56  ;;  %11260 = vmatpush3.msra.mxu0 %v8290_v27 }
 0x2d3   : > { %11175 = vmatpush3.msra.mxu1 %v8248_v22  ;;  %11261 = vmatprep.subr.mxu0 %v18037_v56  ;;  %v8300_v22 = vld [vmem:[%s17776_s5 + $0x220] sm:$0xff] }
 0x2d4   : > { %11214 = vmatprep.subr.mxu1 %v18037_v56  ;;  %11177 = vmatmul.mubr.f32.vlgmr.msra.gmra.mxu1 %v4736_v63 }
 0x2d5   : > { %11215 = vmatpush3.msra.mxu1 %v8279_v31  ;;  %11246 = vmatprep.mubr.msk.f32.mxu1 %vm12467_vm0, %v18037_v56  ;;  %v8299_v31 = vld [vmem:[%s17776_s5 + $0x218] sm:$0xff] }
 0x2d6   : > { %11216 = vmatprep.subr.mxu1 %v18037_v56  ;;  %11262 = vmatpush3.msra.mxu0 %v8289_v28 }
 0x2d7   : > { %11217 = vmatpush3.msra.mxu1 %v8278_v62  ;;  %11263 = vmatprep.subr.mxu0 %v18037_v56  ;;  %v8298_v62 = vld [vmem:[%s17776_s5 + $0x210] sm:$0xff] }
 0x2d8   : > { %11218 = vmatprep.subr.mxu1 %v18037_v56  ;;  %11264 = vmatpush3.msra.mxu0 %v8288_v14 }
 0x2d9   : > { %11219 = vmatpush3.msra.mxu1 %v8277_v34  ;;  %v15367_v24 = vpop.f32.mrf.mxu1  ;;  %11265 = vmatprep.subr.mxu0 %v18037_v56  ;;  %v8281_v34 = vld [vmem:[%s17776_s5 + $0x188] sm:$0xff] }
 0x2da   : > { %11220 = vmatprep.subr.mxu1 %v18037_v56  ;;  %11266 = vmatpush3.msra.mxu0 %v8287_v47 }
 0x2db   : > { %11221 = vmatpush3.msra.mxu1 %v8276_v2  ;;  %11267 = vmatprep.subr.mxu0 %v18037_v56  ;;  %v15385_v7 = vpop.f32.mrf.mxu1  ;;  %v15423_v2 = vpop.f32.mrf.mxu0 }
 0x2dc   : > { %11222 = vmatprep.subr.mxu1 %v18037_v56  ;;  %11268 = vmatpush3.msra.mxu0 %v8286_v51 }
 0x2dd   : > { %11223 = vmatpush3.msra.mxu1 %v8275_v54  ;;  %11269 = vmatprep.subr.mxu0 %v18037_v56  ;;  %v8280_v54 = vld [vmem:[%s17776_s5 + $0x180] sm:$0xff] }
 0x2de   : > { %11224 = vmatprep.subr.mxu1 %v18037_v56  ;;  %11270 = vmatpush3.msra.mxu0 %v8285_v58 }
 0x2df   : > { %11225 = vmatpush3.msra.mxu1 %v8274_v33  ;;  %11271 = vmatprep.subr.mxu0 %v18037_v56  ;;  %v3723_v33 = vpop.f32.mrf.mxu0 }
 0x2e0   : > { %11226 = vmatprep.subr.mxu1 %v18037_v56  ;;  %11272 = vmatpush3.msra.mxu0 %v8284_v43 }
 0x2e1   : > { %11227 = vmatpush3.msra.mxu1 %v8273_v46  ;;  %11273 = vmatprep.subr.mxu0 %v18037_v56 }
 0x2e2   : > { %11228 = vmatprep.subr.mxu1 %v18037_v56  ;;  %11274 = vmatpush3.msra.mxu0 %v8283_v30  ;;  %v10873_v46 = vpop.f32.mrf.mxu0 }
 0x2e3   : > { %11229 = vmatpush3.msra.mxu1 %v8272_v53  ;;  %11275 = vmatprep.subr.mxu0 %v18037_v56 }
 0x2e4   : > { %11230 = vmatprep.subr.mxu1 %v18037_v56  ;;  %11276 = vmatpush3.msra.mxu0 %v8282_v55  ;;  %v3733_v53 = vpop.f32.mrf.mxu0 }
 0x2e5   : > { %11231 = vmatpush3.msra.mxu1 %v8271_v41  ;;  %11277 = vmatprep.subr.mxu0 %v18037_v56 }
 0x2e6   : > { %11232 = vmatprep.subr.mxu1 %v18037_v56  ;;  %11278 = vmatpush3.msra.mxu0 %v8281_v34 }
 0x2e7   : > { %11233 = vmatpush3.msra.mxu1 %v8270_v50  ;;  %11279 = vmatprep.subr.mxu0 %v18037_v56 }
 0x2e8   : > { %11234 = vmatprep.subr.mxu1 %v18037_v56  ;;  %11280 = vmatpush3.msra.mxu0 %v8280_v54 }
 0x2e9   : > { %11235 = vmatpush3.msra.mxu1 %v8269_v15  ;;  %11281 = vmatprep.mubr.msk.f32.mxu0 %vm12467_vm0, %v18037_v56 }
 0x2ea   : > { %11236 = vmatprep.subr.mxu1 %v18037_v56  ;;  %v15395_v63 = vpop.f32.mrf.mxu1  ;;  %11319 = vmatprep.subr.mxu0 %v18037_v56 }
 0x2eb   : > { %11237 = vmatpush3.msra.mxu1 %v8268_v0 }
 0x2ec   : > { %11238 = vmatprep.subr.mxu1 %v18037_v56  ;;  %v15413_v8 = vpop.f32.mrf.mxu1 }
 0x2ed   : > { %11239 = vmatpush3.msra.mxu1 %v8267_v20 }
 0x2ee   : > { %11240 = vmatprep.subr.mxu1 %v18037_v56 }
 0x2ef   : > { %11241 = vmatpush3.msra.mxu1 %v8266_v61 }
 0x2f0   : > { %11242 = vmatprep.subr.mxu1 %v18037_v56 }
 0x2f1   : > { %11243 = vmatpush3.msra.mxu1 %v8265_v9 }
 0x2f2   : > { %11244 = vmatprep.subr.mxu1 %v18037_v56 }
 0x2f3   : > { %11245 = vmatpush3.msra.mxu1 %v8264_v60  ;;  %v10876_v10 = vpop.f32.mrf.mxu0 }
 0x2f4   : > { %11284 = vmatprep.subr.mxu1 %v18037_v56  ;;  %11247 = vmatmul.mubr.f32.vlgmr.msra.gmra.mxu1 %v4894_v11 }
 0x2f5   : > { %11285 = vmatpush3.msra.mxu1 %v8311_v5  ;;  %11316 = vmatprep.mubr.msk.f32.mxu1 %vm12467_vm0, %v18037_v56  ;;  %v15445_v16 = vpop.f32.mrf.mxu0 }
 0x2f6   : > { %11286 = vmatprep.subr.mxu1 %v18037_v56 }
 0x2f7   : > { %11287 = vmatpush3.msra.mxu1 %v8310_v17 }
 0x2f8   : > { %11288 = vmatprep.subr.mxu1 %v18037_v56 }
 0x2f9   : > { %11289 = vmatpush3.msra.mxu1 %v8309_v39 }
 0x2fa   : > { %11290 = vmatprep.subr.mxu1 %v18037_v56 }
 0x2fb   : > { %11291 = vmatpush3.msra.mxu1 %v8308_v45  ;;  %v15425_v18 = vpop.f32.mrf.mxu1 }
 0x2fc   : > { %11292 = vmatprep.subr.mxu1 %v18037_v56 }
 0x2fd   : > { %11293 = vmatpush3.msra.mxu1 %v8307_v1  ;;  %v15437_v44 = vpop.f32.mrf.mxu1 }
 0x2fe   : > { %11294 = vmatprep.subr.mxu1 %v18037_v56 }
 0x2ff   : > { %11295 = vmatpush3.msra.mxu1 %v8306_v52  ;;  %v10826_v26 = vpop.f32.mrf.mxu1 }
 0x300   : > { %11296 = vmatprep.subr.mxu1 %v18037_v56  ;;  %v3599_v58 = vadd.f32 %v10826_v26, %v15339_v12 }
 0x301   : > { %11297 = vmatpush3.msra.mxu1 %v8305_v25  ;;  %v3593_v41 = vpop.f32.mrf.mxu1 }
 0x302   : > { %11298 = vmatprep.subr.mxu1 %v18037_v56  ;;  %v3594_v43 = vadd.f32 %v3593_v41, %v15357_v57 }
 0x303   : > { %11299 = vmatpush3.msra.mxu1 %v8304_v48  ;;  %v15447_v6 = vpop.f32.mrf.mxu0 }
 0x304   : > { %11300 = vmatprep.subr.mxu1 %v18037_v56  ;;  %v10829_v50 = vpop.f32.mrf.mxu1 }
 0x305   : > { %11301 = vmatpush3.msra.mxu1 %v8303_v49  ;;  %v15449_v29 = vpop.f32.mrf.mxu0  ;;  %v3609_v30 = vadd.f32 %v10829_v50, %v15367_v24 }
 0x306   : > { %11302 = vmatprep.subr.mxu1 %v18037_v56  ;;  %v3603_v15 = vpop.f32.mrf.mxu1 }
 0x307   : > { %11303 = vmatpush3.msra.mxu1 %v8302_v36  ;;  %v10958_v13 = vpop.f32.mrf.mxu0 }
 0x308   : > { %11304 = vmatprep.subr.mxu1 %v18037_v56 }
 0x309   : > { %11305 = vmatpush3.msra.mxu1 %v8301_v19  ;;  %v3999_v38 = vpop.f32.mrf.mxu0 }
 0x30a   : > { %11306 = vmatprep.subr.mxu1 %v18037_v56  ;;  %v10832_v0 = vpop.f32.mrf.mxu1 }
 0x30b   : > { %11307 = vmatpush3.msra.mxu1 %v8300_v22  ;;  %v10961_v23 = vpop.f32.mrf.mxu0  ;;  %v3619_v54 = vadd.f32 %v10832_v0, %v15395_v63 }
 0x30c   : > { %11308 = vmatprep.subr.mxu1 %v18037_v56  ;;  %v3613_v20 = vpop.f32.mrf.mxu1 }
 0x30d   : > { %11309 = vmatpush3.msra.mxu1 %v8299_v31  ;;  %v4009_v35 = vpop.f32.mrf.mxu0  ;;  %v3763_v31 = vadd.f32 %v15423_v2, %v3599_v58  ;;  %v3614_v57 = vadd.f32 %v3613_v20, %v15413_v8  ;;  %v3767_v41 = vadd.f32 %v10876_v10, %v3619_v54 }
 0x30e   : > { %11310 = vmatprep.subr.mxu1 %v18037_v56 }
 0x30f   : > { %11311 = vmatpush3.msra.mxu1 %v8298_v62  ;;  %v10964_v40 = vpop.f32.mrf.mxu0  ;;  %v3604_v62 = vadd.f32 %v3603_v15, %v15385_v7 }
 0x310   : > { %11312 = vmatprep.subr.mxu1 %v18037_v56 }
 0x311   : > { %11313 = vmatpush3.msra.mxu1 %v8297_v59  ;;  %v15451_v37 = vpop.f32.mrf.mxu0  ;;  %v3762_v59 = vadd.f32 %v3723_v33, %v3594_v43 }
 0x312   : > { %11314 = vmatprep.subr.mxu1 %v18037_v56 }
 0x313   : > { %11315 = vmatpush3.msra.mxu1 %v8296_v4 }
 0x314   : > { %11354 = vmatprep.subr.mxu1 %v18037_v56  ;;  %v10835_v61 = vpop.f32.mrf.mxu1  ;;  %v15453_v42 = vpop.f32.mrf.mxu0 }
 0x315   : > { %v3629_v24 = vadd.f32 %v10835_v61, %v15425_v18 }
 0x316   : > { %v3623_v9 = vpop.f32.mrf.mxu1  ;;  %v15455_v3 = vpop.f32.mrf.mxu0 }
 0x317   : > { %v3624_v33 = vadd.f32 %v3623_v9, %v15437_v44 }
 0x319   : > { %v3768_v61 = vadd.f32 %v15449_v29, %v3624_v33 }
 0x329   : > { %v10914_v60 = vpop.f32.mrf.mxu1 }
 0x32a   : > { %v11046_v32 = vpop.f32.mrf.mxu0  ;;  %v3901_v34 = vadd.f32 %v10914_v60, %v3763_v31 }
 0x32b   : > { %v3861_v11 = vpop.f32.mrf.mxu1 }
 0x32c   : > { %v4275_v21 = vpop.f32.mrf.mxu0  ;;  %v3900_v56 = vadd.f32 %v3861_v11, %v3762_v59 }
 0x32e   : > { %v4038_v7 = vadd.f32 %v3999_v38, %v3900_v56 }
 0x32f   : > { %v10917_v5 = vpop.f32.mrf.mxu1 }
 0x330   : > { %v11049_v27 = vpop.f32.mrf.mxu0 }
 0x331   : > { %v3871_v17 = vpop.f32.mrf.mxu1 }
 0x332   : > { %v15457_v28 = vpop.f32.mrf.mxu0 }
 0x335   : > { %v10920_v39 = vpop.f32.mrf.mxu1 }
 0x336   : > { %v15459_v14 = vpop.f32.mrf.mxu0  ;;  %v3905_v15 = vadd.f32 %v10920_v39, %v3767_v41 }
 0x337   : > { %v3881_v45 = vpop.f32.mrf.mxu1 }
 0x338   : > { %v15461_v47 = vpop.f32.mrf.mxu0  ;;  %v4043_v56 = vadd.f32 %v10964_v40, %v3905_v15 }
 0x339   : > { %18050 = vst [vmem:[#allocation38_spill] sm:$0xff] %v15461_v47  ;;  %v4039_v47 = vadd.f32 %v10958_v13, %v3901_v34 }
 0x33b   : > { %v10923_v1 = vpop.f32.mrf.mxu1 }
 0x33c   : > { %v15463_v51 = vpop.f32.mrf.mxu0 }
 0x33d   : > { %v3891_v52 = vpop.f32.mrf.mxu1  ;;  %18051 = vst [vmem:[#allocation5_spill] sm:$0xff] %v15463_v51  ;;  %v3765_v51 = vadd.f32 %v10873_v46, %v3609_v30  ;;  %v3766_v46 = vadd.f32 %v15445_v16, %v3614_v57  ;;  %v8247_v16 = vld [vmem:[%s17775_s4] ss:$0 sm:$0xff] }
 0x33e   : > { %v15466_v19 = vpop.f32.mrf.mxu0  ;;  %v3906_v39 = vadd.f32 %v3891_v52, %v3768_v61 }
 0x33f   : > { %18052 = vst [vmem:[#allocation40_spill] sm:$0xff] %v15466_v19  ;;  %v3903_v26 = vadd.f32 %v10917_v5, %v3765_v51  ;;  %v3764_v19 = vadd.f32 %v3733_v53, %v3604_v62  ;;  %v3769_v53 = vadd.f32 %v15447_v6, %v3629_v24  ;;  %v3904_v18 = vadd.f32 %v3881_v45, %v3766_v46 }
 0x340   : > { %v4044_v51 = vadd.f32 %v15455_v3, %v3906_v39 }
 0x341   : > { %v3902_v50 = vadd.f32 %v3871_v17, %v3764_v19  ;;  %v4041_v60 = vadd.f32 %v10961_v23, %v3903_v26  ;;  %v3907_v10 = vadd.f32 %v10923_v1, %v3769_v53  ;;  %v4042_v1 = vadd.f32 %v15451_v37, %v3904_v18 }
 0x343   : > { %v4040_v8 = vadd.f32 %v4009_v35, %v3902_v50  ;;  %v4045_v29 = vadd.f32 %v15453_v42, %v3907_v10 }
 0x351   : > { %v11002_v25 = vpop.f32.mrf.mxu1 }
 0x352   : > { %v11134_v55 = vpop.f32.mrf.mxu0  ;;  %v4177_v58 = vadd.f32 %v11002_v25, %v4039_v47 }
 0x353   : > { %v4137_v48 = vpop.f32.mrf.mxu1 }
 0x354   : > { %v4551_v12 = vpop.f32.mrf.mxu0  ;;  %v4176_v0 = vadd.f32 %v4137_v48, %v4038_v7  ;;  %v4315_v20 = vadd.f32 %v11046_v32, %v4177_v58  ;;  %v18055_v58 = vld [vmem:[#allocation40_spill] sm:$0xff] }
 0x356   : > { %v11005_v49 = vpop.f32.mrf.mxu1  ;;  %v4314_v17 = vadd.f32 %v4275_v21, %v4176_v0 }
 0x357   : > { %v11137_v63 = vpop.f32.mrf.mxu0  ;;  %v4179_v11 = vadd.f32 %v11005_v49, %v4041_v60 }
 0x358   : > { %v4147_v36 = vpop.f32.mrf.mxu1 }
 0x359   : > { %v4561_v5 = vpop.f32.mrf.mxu0  ;;  %v4178_v44 = vadd.f32 %v4147_v36, %v4040_v8  ;;  %v4317_v32 = vadd.f32 %v11049_v27, %v4179_v11 }
 0x35b   : > { %v11008_v22 = vpop.f32.mrf.mxu1  ;;  %v4316_v21 = vadd.f32 %v15457_v28, %v4178_v44 }
 0x35c   : > { %v4181_v23 = vadd.f32 %v11008_v22, %v4043_v56  ;;  %v11140_v45 = vpop.f32.mrf.mxu0 }
 0x35d   : > { %v4157_v4 = vpop.f32.mrf.mxu1 }
 0x35e   : > { %v4180_v52 = vadd.f32 %v4157_v4, %v4042_v1  ;;  %v4319_v19 = vadd.f32 %v15459_v14, %v4181_v23  ;;  %v4571_v31 = vpop.f32.mrf.mxu0  ;;  %v18054_v14 = vld [vmem:[#allocation5_spill] sm:$0xff] }
 0x360   : > { %v11011_v2 = vpop.f32.mrf.mxu1 }
 0x361   : > { %v4183_v43 = vadd.f32 %v11011_v2, %v4045_v29 }
 0x362   : > { %v4167_v13 = vpop.f32.mrf.mxu1  ;;  %v11143_v26 = vpop.f32.mrf.mxu0 }
 0x363   : > { %v4182_v37 = vadd.f32 %v4167_v13, %v4044_v51  ;;  %v4321_v41 = vadd.f32 %v18054_v14, %v4183_v43  ;;  %v8342_v51 = vld [vmem:[%s17776_s5 + $0x370] sm:$0xff]  ;;  %v8341_v43 = vld [vmem:[%s17776_s5 + $0x368] sm:$0xff]  ;;  %v8332_v14 = vld [vmem:[%s17776_s5 + $0x320] sm:$0xff] }
 0x364   : > { %v4581_v13 = vpop.f32.mrf.mxu0 }
 0x365   : > { %v4320_v7 = vadd.f32 %v18055_v58, %v4182_v37  ;;  %v8339_v37 = vld [vmem:[%s17776_s5 + $0x358] sm:$0xff]  ;;  %v8330_v58 = vld [vmem:[%s17776_s5 + $0x310] sm:$0xff] }
 0x374   : > { %v11090_v38 = vpop.f32.mrf.mxu1 }
 0x375   : > { %v4453_v9 = vadd.f32 %v11090_v38, %v4315_v20 }
 0x376   : > { %v4413_v6 = vpop.f32.mrf.mxu1 }
 0x377   : > { %v4591_v25 = vadd.f32 %v11134_v55, %v4453_v9  ;;  %v4452_v35 = vadd.f32 %v4413_v6, %v4314_v17 }
 0x378   : > { %v11093_v40 = vpop.f32.mrf.mxu1 }
 0x379   : > { %v4606_v48 = vadd.f32 %v8247_v16, %v4591_v25  ;;  %v4590_v47 = vadd.f32 %v4551_v12, %v4452_v35  ;;  %v4455_v49 = vadd.f32 %v11093_v40, %v4317_v32  ;;  %v18053_v12 = vld [vmem:[#allocation38_spill] sm:$0xff] }
 0x37a   : > { %v4423_v36 = vpop.f32.mrf.mxu1  ;;  %v4318_v28 = vadd.f32 %v18053_v12, %v4180_v52  ;;  %v15503_v52 = vld [vmem:[%s17776_s5 + $0x2f0] sm:$0xff]  ;;  %v15581_v12 = vld [vmem:[%s17776_s5 + $0x2b8] sm:$0xff] }
 0x37b   : > { %v4605_v22 = vadd.f32 %v8247_v16, %v4590_v47  ;;  %v4593_v27 = vadd.f32 %v11137_v63, %v4455_v49  ;;  %v4454_v30 = vadd.f32 %v4423_v36, %v4316_v21  ;;  %v4614_v55 = vmax.f32 %v4606_v48, 0.0  ;;  %v15498_v48 = vld [vmem:[%s17776_s5 + $0x378] sm:$0xff]  ;;  %v18056_v36 = vld [vmem:[#allocation8_spill] sm:$0xff] }
 0x37c   : > { %v11096_v42 = vpop.f32.mrf.mxu1 }
 0x37d   : > { %v4613_v62 = vmax.f32 %v4605_v22, 0.0  ;;  %v4608_v34 = vadd.f32 %v8247_v16, %v4593_v27  ;;  %v4592_v59 = vadd.f32 %v4561_v5, %v4454_v30  ;;  %v4457_v54 = vadd.f32 %v11096_v42, %v4319_v19  ;;  %v15515_v19 = vld [vmem:[%s17776_s5 + $0x2e8] sm:$0xff]  ;;  %v15526_v27 = vld [vmem:[%s17776_s5 + $0x2e0] sm:$0xff]  ;;  %v8338_v42 = vld [vmem:[%s17776_s5 + $0x350] sm:$0xff] }
 0x37e   : > { %v4433_v4 = vpop.f32.mrf.mxu1  ;;  %v8340_v30 = vld [vmem:[%s17776_s5 + $0x360] sm:$0xff] }
 0x37f   : > { %v4621_v3 = vmax.f32 %v4613_v62, %v4614_v55  ;;  %v4607_v57 = vadd.f32 %v8247_v16, %v4592_v59  ;;  %v4595_v24 = vadd.f32 %v11140_v45, %v4457_v54  ;;  %v4456_v2 = vadd.f32 %v4433_v4, %v4318_v28  ;;  %v15548_v55 = vld [vmem:[%s17776_s5 + $0x2d0] sm:$0xff]  ;;  %v15559_v62 = vld [vmem:[%s17776_s5 + $0x2c8] sm:$0xff]  ;;  %v15570_v59 = vld [vmem:[%s17776_s5 + $0x2c0] sm:$0xff] }
 0x380   : > { %v11099_v50 = vpop.f32.mrf.mxu1  ;;  %v4616_v15 = vmax.f32 %v4608_v34, 0.0  ;;  %v8337_v34 = vld [vmem:[%s17776_s5 + $0x348] sm:$0xff]  ;;  %v8336_v54 = vld [vmem:[%s17776_s5 + $0x340] sm:$0xff]  ;;  %v8335_v28 = vld [vmem:[%s17776_s5 + $0x338] sm:$0xff] }
 0x381   : > { %v4629_v33 = vrot.slane %v4621_v3, 1  ;;  %v4615_v63 = vmax.f32 %v4607_v57, 0.0  ;;  %v4459_v0 = vadd.f32 %v11099_v50, %v4321_v41  ;;  %v4610_v60 = vadd.f32 %v8247_v16, %v4595_v24  ;;  %v15592_v4 = vld [vmem:[%s17776_s5 + $0x2b0] sm:$0xff]  ;;  %v8333_v57 = vld [vmem:[%s17776_s5 + $0x328] sm:$0xff]  ;;  %v15614_v24 = vld [vmem:[%s17776_s5 + $0x2a0] sm:$0xff] }
 0x382   : > { %v4594_v46 = vadd.f32 %v4571_v31, %v4456_v2  ;;  %v4443_v53 = vpop.f32.mrf.mxu1  ;;  %v15537_v31 = vld [vmem:[%s17776_s5 + $0x2d8] sm:$0xff]  ;;  %v15636_v50 = vld [vmem:[%s17776_s5 + $0x290] sm:$0xff] }
 0x383   : > { %v4637_v11 = vmax.f32 %v4621_v3, %v4629_v33  ;;  %v4622_v8 = vmax.f32 %v4615_v63, %v4616_v15  ;;  %v4458_v20 = vadd.f32 %v4443_v53, %v4320_v7  ;;  %v4597_v10 = vadd.f32 %v11143_v26, %v4459_v0  ;;  %v8334_v26 = vld [vmem:[%s17776_s5 + $0x330] sm:$0xff]  ;;  %v15603_v3 = vld [vmem:[%s17776_s5 + $0x2a8] sm:$0xff]  ;;  %v15625_v41 = vld [vmem:[%s17776_s5 + $0x298] sm:$0xff] }
 0x384   : > { %v4609_v18 = vadd.f32 %v8247_v16, %v4594_v46  ;;  %v4618_v56 = vmax.f32 %v4610_v60, 0.0  ;;  %v8331_v2 = vld [vmem:[%s17776_s5 + $0x318] sm:$0xff]  ;;  %v15647_v7 = vld [vmem:[%s17776_s5 + $0x288] sm:$0xff]  ;;  %v15658_v15 = vld [vmem:[%s17776_s5 + $0x280] sm:$0xff] }
 0x385   : > { %4641 = vst [vmem:[#allocation3] sm:$0x1] %v4637_v11  ;;  %4645 = vst [vmem:[#allocation3 - $0x1] sm:$0x4] %v4637_v11  ;;  %v4630_v61 = vrot.slane %v4622_v8, 1  ;;  %v4596_v5 = vadd.f32 %v4581_v13, %v4458_v20  ;;  %v4612_v44 = vadd.f32 %v8247_v16, %v4597_v10  ;;  %v8329_v33 = vld [vmem:[%s17776_s5 + $0x308] sm:$0xff] }
 0x386   : > { %4649 = vst [vmem:[#allocation3 - $0x2] sm:$0x10] %v4637_v11  ;;  %4653 = vst [vmem:[#allocation3 - $0x3] sm:$0x40] %v4637_v11  ;;  %v4617_v38 = vmax.f32 %v4609_v18, 0.0  ;;  %v8328_v63 = vld [vmem:[%s17776_s5 + $0x300] sm:$0xff] }
 0x387   : > { %v4638_v9 = vmax.f32 %v4622_v8, %v4630_v61  ;;  %v4611_v17 = vadd.f32 %v8247_v16, %v4596_v5  ;;  %v4620_v23 = vmax.f32 %v4612_v44, 0.0  ;;  %v15493_v16 = vld [vmem:[%s17776_s5 + $0x2f8] sm:$0xff]  ;;  %v15684_v13 = vld [vmem:[%s17776_s5 + $0x3f0] sm:$0xff]  ;;  %v15695_v8 = vld [vmem:[%s17776_s5 + $0x3e8] sm:$0xff]  ;;  %v4890_v44 = vpop.f32.mrf.mxu0 }
 0x388   : > { %v4623_v39 = vmax.f32 %v4617_v38, %v4618_v56  ;;  %v15672_v0 = vld [vmem:[%s17776_s5 + $0x3f8] sm:$0xff]  ;;  %v8374_v11 = vld [vmem:[%s17776_s5 + $0x470] sm:$0xff]  ;;  %v8373_v20 = vld [vmem:[%s17776_s5 + $0x468] sm:$0xff] }
 0x389   : > { %4642 = vst [vmem:[#allocation3 + $0x8] sm:$0x1] %v4638_v9  ;;  %4646 = vst [vmem:[#allocation3 + $0x7] sm:$0x4] %v4638_v9  ;;  %v4619_v6 = vmax.f32 %v4611_v17, 0.0  ;;  %v8375_v53 = vld [vmem:[%s17776_s5 + $0x478] sm:$0xff] }
 0x38a   : > { %4650 = vst [vmem:[#allocation3 + $0x6] sm:$0x10] %v4638_v9  ;;  %4654 = vst [vmem:[#allocation3 + $0x5] sm:$0x40] %v4638_v9  ;;  %v4631_v25 = vrot.slane %v4623_v39, 1  ;;  %v15706_v10 = vld [vmem:[%s17776_s5 + $0x3e0] sm:$0xff] }
 0x38b   : > { %v4624_v35 = vmax.f32 %v4619_v6, %v4620_v23  ;;  %v8372_v61 = vld [vmem:[%s17776_s5 + $0x460] sm:$0xff]  ;;  %v15717_v56 = vld [vmem:[%s17776_s5 + $0x3d8] sm:$0xff]  ;;  %v15728_v17 = vld [vmem:[%s17776_s5 + $0x3d0] sm:$0xff]  ;;  %v11213_v23 = vpop.f32.mrf.mxu0 }
 0x38c   : > { %v4639_v45 = vmax.f32 %v4623_v39, %v4631_v25  ;;  %v8371_v38 = vld [vmem:[%s17776_s5 + $0x458] sm:$0xff]  ;;  %v8370_v39 = vld [vmem:[%s17776_s5 + $0x450] sm:$0xff]  ;;  %v15739_v25 = vld [vmem:[%s17776_s5 + $0x3c8] sm:$0xff] }
 0x38d   : > { %v4657_v32 = vld [vmem:[#allocation3] sm:$0xf]  ;;  %v4632_v1 = vrot.slane %v4624_v35, 1  ;;  %v12422_v23 = vld [vmem:[%s17776_s5 + $0x48] sm:$0xff] }
 0x38e   : > { %4715 = vst [vmem:[#allocation2 + $0x19] sm:$0xf] %v4657_v32  ;;  %4643 = vst [vmem:[#allocation3 + $0x10] sm:$0x1] %v4639_v45 }
 0x38f   : > { %4647 = vst [vmem:[#allocation3 + $0xf] sm:$0x4] %v4639_v45  ;;  %4651 = vst [vmem:[#allocation3 + $0xe] sm:$0x10] %v4639_v45  ;;  %v4640_v29 = vmax.f32 %v4624_v35, %v4632_v1  ;;  %v8369_v35 = vld [vmem:[%s17776_s5 + $0x448] sm:$0xff]  ;;  %v15752_v1 = vld [vmem:[%s17776_s5 + $0x3c0] sm:$0xff] }
 0x390   : > { %4655 = vst [vmem:[#allocation3 + $0xd] sm:$0x40] %v4639_v45 }
 0x391   : > { %v4658_v40 = vld [vmem:[#allocation3 + $0x8] sm:$0xf]  ;;  %4644 = vst [vmem:[#allocation3 + $0x18] sm:$0x1] %v4640_v29  ;;  %4648 = vst [vmem:[#allocation3 + $0x17] sm:$0x4] %v4640_v29 }
 0x392   : > { %4716 = vst [vmem:[#allocation2 + $0x31] sm:$0xf] %v4658_v40  ;;  %4652 = vst [vmem:[#allocation3 + $0x16] sm:$0x10] %v4640_v29  ;;  %v15763_v40 = vld [vmem:[%s17776_s5 + $0x3b8] sm:$0xff] }
 0x393   : > { %4656 = vst [vmem:[#allocation3 + $0x15] sm:$0x40] %v4640_v29  ;;  %v8368_v29 = vld [vmem:[%s17776_s5 + $0x440] sm:$0xff] }
 0x394   : > { %v4820_v18 = vpop.f32.mrf.mxu1 }
 0x395   : > { %v4983_v47 = vld [vmem:[#allocation2 + $0x18] sm:$0xf]  ;;  %v4891_v9 = vadd.f32 %v4890_v44, %v4820_v18  ;;  %v15918_v44 = vld [vmem:[%s17776_s5 + $0xc8] sm:$0xff] }
 0x396   : > { %v5072_v49 = vld [vmem:[#allocation2 + $0x19] sm:$0xf]  ;;  %11282 = vmatmul.mubr.f32.vlgmr.msra.gmra.mxu0 %v4983_v47  ;;  %v11178_v5 = vpop.f32.mrf.mxu1 }
 0x397   : > { %v4659_v21 = vld [vmem:[#allocation3 + $0x10] sm:$0xf]  ;;  %11317 = vmatmul.mubr.f32.vlgmr.msra.gmra.mxu1 %v5072_v49  ;;  %11320 = vmatpush3.msra.mxu0 %v15493_v16  ;;  %v5161_v60 = vld [vmem:[#allocation2 + $0x1a] sm:$0xf]  ;;  %v15774_v49 = vld [vmem:[%s17776_s5 + $0x3b0] sm:$0xff] }
 0x398   : > { %4717 = vst [vmem:[#allocation2 + $0x49] sm:$0xf] %v4659_v21  ;;  %11355 = vmatpush3.msra.mxu1 %v15498_v48  ;;  %11321 = vmatprep.subr.mxu0 %v18056_v36  ;;  %v8367_v47 = vld [vmem:[%s17776_s5 + $0x438] sm:$0xff]  ;;  %v8366_v21 = vld [vmem:[%s17776_s5 + $0x430] sm:$0xff] }
 0x399   : > { %11356 = vmatprep.subr.mxu1 %v18056_v36  ;;  %11322 = vmatpush3.msra.mxu0 %v15503_v52  ;;  %v5250_v46 = vld [vmem:[#allocation2 + $0x30] sm:$0xf]  ;;  %v15896_v18 = vld [vmem:[%s17776_s5 + $0xd8] sm:$0xff] }
 0x39a   : > { %v4660_v22 = vld [vmem:[#allocation3 + $0x18] sm:$0xf]  ;;  %11357 = vmatpush3.msra.mxu1 %v8342_v51  ;;  %11323 = vmatprep.subr.mxu0 %v18056_v36  ;;  %v15907_v5 = vld [vmem:[%s17776_s5 + $0xd0] sm:$0xff] }
 0x39b   : > { %4718 = vst [vmem:[#allocation2 + $0x61] sm:$0xf] %v4660_v22  ;;  %11358 = vmatprep.subr.mxu1 %v18056_v36  ;;  %11324 = vmatpush3.msra.mxu0 %v15515_v19  ;;  %v15785_v51 = vld [vmem:[%s17776_s5 + $0x3a8] sm:$0xff]  ;;  %v15796_v22 = vld [vmem:[%s17776_s5 + $0x3a0] sm:$0xff] }
 0x39c   : > { %11359 = vmatpush3.msra.mxu1 %v8341_v43  ;;  %11325 = vmatprep.subr.mxu0 %v18056_v36  ;;  %v8365_v43 = vld [vmem:[%s17776_s5 + $0x428] sm:$0xff] }
 0x39d   : > { %11360 = vmatprep.subr.mxu1 %v18056_v36  ;;  %11326 = vmatpush3.msra.mxu0 %v15526_v27 }
 0x39e   : > { %11361 = vmatpush3.msra.mxu1 %v8340_v30  ;;  %11327 = vmatprep.subr.mxu0 %v18056_v36  ;;  %v8364_v30 = vld [vmem:[%s17776_s5 + $0x420] sm:$0xff] }
 0x39f   : > { %11362 = vmatprep.subr.mxu1 %v18056_v36  ;;  %11328 = vmatpush3.msra.mxu0 %v15537_v31 }
 0x3a0   : > { %11363 = vmatpush3.msra.mxu1 %v8339_v37  ;;  %11329 = vmatprep.subr.mxu0 %v18056_v36  ;;  %v15807_v37 = vld [vmem:[%s17776_s5 + $0x398] sm:$0xff] }
 0x3a1   : > { %11364 = vmatprep.subr.mxu1 %v18056_v36  ;;  %11330 = vmatpush3.msra.mxu0 %v15548_v55 }
 0x3a2   : > { %11365 = vmatpush3.msra.mxu1 %v8338_v42  ;;  %11331 = vmatprep.subr.mxu0 %v18056_v36  ;;  %v8363_v42 = vld [vmem:[%s17776_s5 + $0x418] sm:$0xff] }
 0x3a3   : > { %11366 = vmatprep.subr.mxu1 %v18056_v36  ;;  %11332 = vmatpush3.msra.mxu0 %v15559_v62 }
 0x3a4   : > { %11367 = vmatpush3.msra.mxu1 %v8337_v34  ;;  %11333 = vmatprep.subr.mxu0 %v18056_v36  ;;  %v15818_v34 = vld [vmem:[%s17776_s5 + $0x390] sm:$0xff] }
 0x3a5   : > { %11368 = vmatprep.subr.mxu1 %v18056_v36  ;;  %11334 = vmatpush3.msra.mxu0 %v15570_v59 }
 0x3a6   : > { %11369 = vmatpush3.msra.mxu1 %v8336_v54  ;;  %11335 = vmatprep.subr.mxu0 %v18056_v36  ;;  %v8362_v54 = vld [vmem:[%s17776_s5 + $0x410] sm:$0xff] }
 0x3a7   : > { %11370 = vmatprep.subr.mxu1 %v18056_v36  ;;  %11336 = vmatpush3.msra.mxu0 %v15581_v12 }
 0x3a8   : > { %11371 = vmatpush3.msra.mxu1 %v8335_v28  ;;  %11337 = vmatprep.subr.mxu0 %v18056_v36  ;;  %v15829_v28 = vld [vmem:[%s17776_s5 + $0x388] sm:$0xff] }
 0x3a9   : > { %11372 = vmatprep.subr.mxu1 %v18056_v36  ;;  %11338 = vmatpush3.msra.mxu0 %v15592_v4 }
 0x3aa   : > { %11373 = vmatpush3.msra.mxu1 %v8334_v26  ;;  %11339 = vmatprep.subr.mxu0 %v18056_v36  ;;  %v8361_v26 = vld [vmem:[%s17776_s5 + $0x408] sm:$0xff] }
 0x3ab   : > { %11374 = vmatprep.subr.mxu1 %v18056_v36  ;;  %11340 = vmatpush3.msra.mxu0 %v15603_v3 }
 0x3ac   : > { %11375 = vmatpush3.msra.mxu1 %v8333_v57  ;;  %11341 = vmatprep.subr.mxu0 %v18056_v36  ;;  %v15840_v57 = vld [vmem:[%s17776_s5 + $0x380] sm:$0xff] }
 0x3ad   : > { %11376 = vmatprep.subr.mxu1 %v18056_v36  ;;  %11342 = vmatpush3.msra.mxu0 %v15614_v24 }
 0x3ae   : > { %11377 = vmatpush3.msra.mxu1 %v8332_v14  ;;  %11343 = vmatprep.subr.mxu0 %v18056_v36  ;;  %v8360_v14 = vld [vmem:[%s17776_s5 + $0x400] sm:$0xff] }
 0x3af   : > { %11378 = vmatprep.subr.mxu1 %v18056_v36  ;;  %11344 = vmatpush3.msra.mxu0 %v15625_v41 }
 0x3b0   : > { %11379 = vmatpush3.msra.mxu1 %v8331_v2  ;;  %11345 = vmatprep.subr.mxu0 %v18056_v36  ;;  %v15854_v2 = vld [vmem:[%s17776_s5 + $0xf8] sm:$0xff] }
 0x3b1   : > { %11380 = vmatprep.subr.mxu1 %v18056_v36  ;;  %11346 = vmatpush3.msra.mxu0 %v15636_v50 }
 0x3b2   : > { %11381 = vmatpush3.msra.mxu1 %v8330_v58  ;;  %11347 = vmatprep.subr.mxu0 %v18056_v36  ;;  %v5339_v58 = vld [vmem:[#allocation2 + $0x31] sm:$0xf] }
 0x3b3   : > { %11382 = vmatprep.subr.mxu1 %v18056_v36  ;;  %11348 = vmatpush3.msra.mxu0 %v15647_v7 }
 0x3b4   : > { %11383 = vmatpush3.msra.mxu1 %v8329_v33  ;;  %11349 = vmatprep.subr.mxu0 %v18056_v36  ;;  %v4978_v6 = vpop.f32.mrf.mxu1  ;;  %v5428_v33 = vld [vmem:[#allocation2 + $0x32] sm:$0xf] }
 0x3b5   : > { %11384 = vmatprep.subr.mxu1 %v18056_v36  ;;  %11350 = vmatpush3.msra.mxu0 %v15658_v15  ;;  %v15744_v32 = vadd.f32 %v4978_v6, %v4891_v9  ;;  %v12421_v9 = vld [vmem:[%s17776_s5 + $0x50] sm:$0xff]  ;;  %v15940_v6 = vld [vmem:[%s17776_s5 + $0xb8] sm:$0xff] }
 0x3b6   : > { %11351 = vmatprep.mubr.msk.f32.mxu0 %vm12467_vm0, %v18056_v36  ;;  %11385 = vmatpush3.msra.mxu1 %v8328_v63  ;;  %v11248_v45 = vpop.f32.mrf.mxu1  ;;  %v5542_v63 = vld [vmem:[%s17776_s5 + $0x78] sm:$0xff] }
 0x3b7   : > { %11386 = vmatprep.mubr.msk.f32.mxu1 %vm12467_vm0, %v18056_v36  ;;  %11352 = vmatmul.mubr.f32.vlgmr.msra.gmra.mxu0 %v5161_v60  ;;  %v15866_v60 = vld [vmem:[%s17776_s5 + $0xf0] sm:$0xff] }
 0x3b8   : > { %11387 = vmatmul.mubr.f32.vlgmr.msra.gmra.mxu1 %v5250_v46  ;;  %11389 = vmatprep.subr.mxu0 %v18056_v36  ;;  %v5541_v46 = vld [vmem:[%s17776_s5 + $0x70] sm:$0xff] }
 0x3b9   : > { %11424 = vmatprep.subr.mxu1 %v18056_v36  ;;  %11390 = vmatpush3.msra.mxu0 %v15672_v0  ;;  %v15951_v45 = vld [vmem:[%s17776_s5 + $0xb0] sm:$0xff] }
 0x3ba   : > { %11425 = vmatpush3.msra.mxu1 %v8375_v53  ;;  %11391 = vmatprep.subr.mxu0 %v18056_v36  ;;  %v15877_v53 = vld [vmem:[%s17776_s5 + $0xe8] sm:$0xff] }
 0x3bb   : > { %11426 = vmatprep.subr.mxu1 %v18056_v36  ;;  %11392 = vmatpush3.msra.mxu0 %v15684_v13 }
 0x3bc   : > { %11427 = vmatpush3.msra.mxu1 %v8374_v11  ;;  %11393 = vmatprep.subr.mxu0 %v18056_v36  ;;  %v5540_v11 = vld [vmem:[%s17776_s5 + $0x68] sm:$0xff] }
 0x3bd   : > { %11428 = vmatprep.subr.mxu1 %v18056_v36  ;;  %11394 = vmatpush3.msra.mxu0 %v15695_v8 }
 0x3be   : > { %11429 = vmatpush3.msra.mxu1 %v8373_v20  ;;  %11395 = vmatprep.subr.mxu0 %v18056_v36  ;;  %v15888_v20 = vld [vmem:[%s17776_s5 + $0xe0] sm:$0xff] }
 0x3bf   : > { %11430 = vmatprep.subr.mxu1 %v18056_v36  ;;  %11396 = vmatpush3.msra.mxu0 %v15706_v10 }
 0x3c0   : > { %11431 = vmatpush3.msra.mxu1 %v8372_v61  ;;  %11397 = vmatprep.subr.mxu0 %v18056_v36  ;;  %v12419_v61 = vld [vmem:[%s17776_s5 + $0x60] sm:$0xff] }
 0x3c1   : > { %11432 = vmatprep.subr.mxu1 %v18056_v36  ;;  %11398 = vmatpush3.msra.mxu0 %v15717_v56 }
 0x3c2   : > { %11433 = vmatpush3.msra.mxu1 %v8371_v38  ;;  %11399 = vmatprep.subr.mxu0 %v18056_v36  ;;  %v12420_v38 = vld [vmem:[%s17776_s5 + $0x58] sm:$0xff] }
 0x3c3   : > { %11434 = vmatprep.subr.mxu1 %v18056_v36  ;;  %11400 = vmatpush3.msra.mxu0 %v15728_v17 }
 0x3c4   : > { %11435 = vmatpush3.msra.mxu1 %v8370_v39  ;;  %11401 = vmatprep.subr.mxu0 %v18056_v36  ;;  %v15929_v39 = vld [vmem:[%s17776_s5 + $0xc0] sm:$0xff] }
 0x3c5   : > { %11436 = vmatprep.subr.mxu1 %v18056_v36  ;;  %11402 = vmatpush3.msra.mxu0 %v15739_v25 }
 0x3c6   : > { %11437 = vmatpush3.msra.mxu1 %v8369_v35  ;;  %11403 = vmatprep.subr.mxu0 %v18056_v36  ;;  %v12423_v35 = vld [vmem:[%s17776_s5 + $0x40] sm:$0xff] }
 0x3c7   : > { %11438 = vmatprep.subr.mxu1 %v18056_v36  ;;  %11404 = vmatpush3.msra.mxu0 %v15752_v1 }
 0x3c8   : > { %11439 = vmatpush3.msra.mxu1 %v8368_v29  ;;  %11405 = vmatprep.subr.mxu0 %v18056_v36  ;;  %v12424_v29 = vld [vmem:[%s17776_s5 + $0x38] sm:$0xff] }
 0x3c9   : > { %11440 = vmatprep.subr.mxu1 %v18056_v36  ;;  %11406 = vmatpush3.msra.mxu0 %v15763_v40 }
 0x3ca   : > { %11441 = vmatpush3.msra.mxu1 %v8367_v47  ;;  %11407 = vmatprep.subr.mxu0 %v18056_v36  ;;  %v15962_v47 = vld [vmem:[%s17776_s5 + $0xa8] sm:$0xff] }
 0x3cb   : > { %11442 = vmatprep.subr.mxu1 %v18056_v36  ;;  %11408 = vmatpush3.msra.mxu0 %v15774_v49 }
 0x3cc   : > { %11443 = vmatpush3.msra.mxu1 %v8366_v21  ;;  %11409 = vmatprep.subr.mxu0 %v18056_v36  ;;  %v12425_v21 = vld [vmem:[%s17776_s5 + $0x30] sm:$0xff] }
 0x3cd   : > { %11444 = vmatprep.subr.mxu1 %v18056_v36  ;;  %11410 = vmatpush3.msra.mxu0 %v15785_v51 }
 0x3ce   : > { %11445 = vmatpush3.msra.mxu1 %v8365_v43  ;;  %11411 = vmatprep.subr.mxu0 %v18056_v36  ;;  %v15973_v43 = vld [vmem:[%s17776_s5 + $0xa0] sm:$0xff] }
 0x3cf   : > { %11446 = vmatprep.subr.mxu1 %v18056_v36  ;;  %11412 = vmatpush3.msra.mxu0 %v15796_v22 }
 0x3d0   : > { %11447 = vmatpush3.msra.mxu1 %v8364_v30  ;;  %11413 = vmatprep.subr.mxu0 %v18056_v36  ;;  %v12426_v30 = vld [vmem:[%s17776_s5 + $0x28] sm:$0xff] }
 0x3d1   : > { %11448 = vmatprep.subr.mxu1 %v18056_v36  ;;  %11414 = vmatpush3.msra.mxu0 %v15807_v37 }
 0x3d2   : > { %11449 = vmatpush3.msra.mxu1 %v8363_v42  ;;  %11415 = vmatprep.subr.mxu0 %v18056_v36  ;;  %v15984_v42 = vld [vmem:[%s17776_s5 + $0x98] sm:$0xff] }
 0x3d3   : > { %11450 = vmatprep.subr.mxu1 %v18056_v36  ;;  %11416 = vmatpush3.msra.mxu0 %v15818_v34 }
 0x3d4   : > { %11451 = vmatpush3.msra.mxu1 %v8362_v54  ;;  %11417 = vmatprep.subr.mxu0 %v18056_v36  ;;  %v12427_v54 = vld [vmem:[%s17776_s5 + $0x20] sm:$0xff] }
 0x3d5   : > { %11452 = vmatprep.subr.mxu1 %v18056_v36  ;;  %11418 = vmatpush3.msra.mxu0 %v15829_v28 }
 0x3d6   : > { %11453 = vmatpush3.msra.mxu1 %v8361_v26  ;;  %11419 = vmatprep.subr.mxu0 %v18056_v36  ;;  %v15995_v26 = vld [vmem:[%s17776_s5 + $0x90] sm:$0xff] }
 0x3d7   : > { %11454 = vmatprep.subr.mxu1 %v18056_v36  ;;  %11420 = vmatpush3.msra.mxu0 %v15840_v57 }
 0x3d8   : > { %11421 = vmatprep.mubr.msk.f32.mxu0 %vm12467_vm0, %v18056_v36  ;;  %11455 = vmatpush3.msra.mxu1 %v8360_v14  ;;  %v12428_v14 = vld [vmem:[%s17776_s5 + $0x18] sm:$0xff] }
 0x3d9   : > { %11456 = vmatprep.mubr.msk.f32.mxu1 %vm12467_vm0, %v18056_v36  ;;  %11422 = vmatmul.mubr.f32.vlgmr.msra.gmra.mxu0 %v5339_v58  ;;  %v16006_v58 = vld [vmem:[%s17776_s5 + $0x88] sm:$0xff] }
 0x3da   : > { %11457 = vmatmul.mubr.f32.vlgmr.msra.gmra.mxu1 %v5428_v33  ;;  %11459 = vmatprep.subr.mxu0 %v18056_v36  ;;  %v12429_v33 = vld [vmem:[%s17776_s5 + $0x10] sm:$0xff] }
 0x3db   : > { %11494 = vmatprep.subr.mxu1 %v18056_v36  ;;  %11460 = vmatpush3.msra.mxu0 %v15854_v2 }
 0x3dc   : > { %11495 = vmatpush3.msra.mxu1 %v5542_v63  ;;  %11461 = vmatprep.subr.mxu0 %v18056_v36  ;;  %v16017_v63 = vld [vmem:[%s17776_s5 + $0x80] sm:$0xff] }
 0x3dd   : > { %11496 = vmatprep.subr.mxu1 %v18056_v36  ;;  %11462 = vmatpush3.msra.mxu0 %v15866_v60 }
 0x3de   : > { %11497 = vmatpush3.msra.mxu1 %v5541_v46  ;;  %11463 = vmatprep.subr.mxu0 %v18056_v36  ;;  %v12430_v46 = vld [vmem:[%s17776_s5 + $0x8] sm:$0xff] }
 0x3df   : > { %11498 = vmatprep.subr.mxu1 %v18056_v36  ;;  %11464 = vmatpush3.msra.mxu0 %v15877_v53 }
 0x3e0   : > { %11499 = vmatpush3.msra.mxu1 %v5540_v11  ;;  %11465 = vmatprep.subr.mxu0 %v18056_v36  ;;  %v12431_v11 = vld [vmem:[%s17776_s5] sm:$0xff] }
 0x3e1   : > { %11500 = vmatprep.subr.mxu1 %v18056_v36  ;;  %11466 = vmatpush3.msra.mxu0 %v15888_v20 }
 0x3e2   : > { %11501 = vmatpush3.msra.mxu1 %v12419_v61  ;;  %11467 = vmatprep.subr.mxu0 %v18056_v36  ;;  %v5543_v61 = vld [vmem:[#allocation2 + $0x19] sm:$0xf] }
 0x3e3   : > { %11502 = vmatprep.subr.mxu1 %v18056_v36  ;;  %11468 = vmatpush3.msra.mxu0 %v15896_v18 }
 0x3e4   : > { %11503 = vmatpush3.msra.mxu1 %v12420_v38  ;;  %11469 = vmatprep.subr.mxu0 %v18056_v36  ;;  %v5526_v38 = vld [vmem:[#allocation2 + $0x18] sm:$0xf] }
 0x3e5   : > { %11504 = vmatprep.subr.mxu1 %v18056_v36  ;;  %11470 = vmatpush3.msra.mxu0 %v15907_v5 }
 0x3e6   : > { %11505 = vmatpush3.msra.mxu1 %v12421_v9  ;;  %11471 = vmatprep.subr.mxu0 %v18056_v36  ;;  %v16036_v9 = vld [vmem:[%s17776_s5 + $0x178] sm:$0xff] }
 0x3e7   : > { %11506 = vmatprep.subr.mxu1 %v18056_v36  ;;  %11472 = vmatpush3.msra.mxu0 %v15918_v44 }
 0x3e8   : > { %11507 = vmatpush3.msra.mxu1 %v12422_v23  ;;  %11473 = vmatprep.subr.mxu0 %v18056_v36  ;;  %v16043_v23 = vld [vmem:[%s17776_s5 + $0x170] sm:$0xff] }
 0x3e9   : > { %11508 = vmatprep.subr.mxu1 %v18056_v36  ;;  %11474 = vmatpush3.msra.mxu0 %v15929_v39 }
 0x3ea   : > { %11509 = vmatpush3.msra.mxu1 %v12423_v35  ;;  %11475 = vmatprep.subr.mxu0 %v18056_v36  ;;  %v12432_v35 = vld [vmem:[%s17776_s5 + $0x1f8] sm:$0xff] }
 0x3eb   : > { %11510 = vmatprep.subr.mxu1 %v18056_v36  ;;  %11476 = vmatpush3.msra.mxu0 %v15940_v6 }
 0x3ec   : > { %11511 = vmatpush3.msra.mxu1 %v12424_v29  ;;  %11477 = vmatprep.subr.mxu0 %v18056_v36  ;;  %v16054_v29 = vld [vmem:[%s17776_s5 + $0x168] sm:$0xff] }
 0x3ed   : > { %11512 = vmatprep.subr.mxu1 %v18056_v36  ;;  %11478 = vmatpush3.msra.mxu0 %v15951_v45 }
 0x3ee   : > { %11513 = vmatpush3.msra.mxu1 %v12425_v21  ;;  %11479 = vmatprep.subr.mxu0 %v18056_v36  ;;  %v12433_v21 = vld [vmem:[%s17776_s5 + $0x1f0] sm:$0xff] }
 0x3ef   : > { %11514 = vmatprep.subr.mxu1 %v18056_v36  ;;  %11480 = vmatpush3.msra.mxu0 %v15962_v47 }
 0x3f0   : > { %11515 = vmatpush3.msra.mxu1 %v12426_v30  ;;  %11481 = vmatprep.subr.mxu0 %v18056_v36  ;;  %v16065_v30 = vld [vmem:[%s17776_s5 + $0x160] sm:$0xff] }
 0x3f1   : > { %11516 = vmatprep.subr.mxu1 %v18056_v36  ;;  %11482 = vmatpush3.msra.mxu0 %v15973_v43 }
 0x3f2   : > { %11517 = vmatpush3.msra.mxu1 %v12427_v54  ;;  %11483 = vmatprep.subr.mxu0 %v18056_v36  ;;  %v12434_v54 = vld [vmem:[%s17776_s5 + $0x1e8] sm:$0xff] }
 0x3f3   : > { %11518 = vmatprep.subr.mxu1 %v18056_v36  ;;  %11484 = vmatpush3.msra.mxu0 %v15984_v42 }
 0x3f4   : > { %11519 = vmatpush3.msra.mxu1 %v12428_v14  ;;  %11485 = vmatprep.subr.mxu0 %v18056_v36  ;;  %v16076_v14 = vld [vmem:[%s17776_s5 + $0x158] sm:$0xff] }
 0x3f5   : > { %11520 = vmatprep.subr.mxu1 %v18056_v36  ;;  %11486 = vmatpush3.msra.mxu0 %v15995_v26 }
 0x3f6   : > { %11521 = vmatpush3.msra.mxu1 %v12429_v33  ;;  %11487 = vmatprep.subr.mxu0 %v18056_v36  ;;  %v12435_v33 = vld [vmem:[%s17776_s5 + $0x1e0] sm:$0xff] }
 0x3f7   : > { %11522 = vmatprep.subr.mxu1 %v18056_v36  ;;  %11488 = vmatpush3.msra.mxu0 %v16006_v58 }
 0x3f8   : > { %11523 = vmatpush3.msra.mxu1 %v12430_v46  ;;  %11489 = vmatprep.subr.mxu0 %v18056_v36  ;;  %v16087_v46 = vld [vmem:[%s17776_s5 + $0x150] sm:$0xff] }
 0x3f9   : > { %11524 = vmatprep.subr.mxu1 %v18056_v36  ;;  %11490 = vmatpush3.msra.mxu0 %v16017_v63 }
 0x3fa   : > { %11491 = vmatprep.mubr.msk.f32.mxu0 %vm12467_vm0, %v18056_v36  ;;  %11525 = vmatpush3.msra.mxu1 %v12431_v11  ;;  %v12436_v11 = vld [vmem:[%s17776_s5 + $0x1d8] sm:$0xff] }
 0x3fb   : > { %11526 = vmatprep.mubr.msk.f32.mxu1 %vm12467_vm0, %v18056_v36  ;;  %11492 = vmatmul.mubr.f32.vlgmr.msra.gmra.mxu0 %v5543_v61  ;;  %v16098_v61 = vld [vmem:[%s17776_s5 + $0x148] sm:$0xff] }
 0x3fc   : > { %11527 = vmatmul.mubr.f32.vlgmr.msra.gmra.mxu1 %v5526_v38  ;;  %11529 = vmatprep.subr.mxu0 %v18056_v36  ;;  %v12437_v38 = vld [vmem:[%s17776_s5 + $0x1d0] sm:$0xff] }
 0x3fd   : > { %11564 = vmatprep.subr.mxu1 %v18056_v36  ;;  %11530 = vmatpush3.msra.mxu0 %v16036_v9 }
 0x3fe   : > { %11565 = vmatpush3.msra.mxu1 %v12432_v35  ;;  %11531 = vmatprep.subr.mxu0 %v18056_v36  ;;  %v16109_v35 = vld [vmem:[%s17776_s5 + $0x140] sm:$0xff] }
 0x3ff   : > { %11566 = vmatprep.subr.mxu1 %v18056_v36  ;;  %11532 = vmatpush3.msra.mxu0 %v16043_v23 }
 0x400   : > { %11567 = vmatpush3.msra.mxu1 %v12433_v21  ;;  %11533 = vmatprep.subr.mxu0 %v18056_v36  ;;  %v12438_v21 = vld [vmem:[%s17776_s5 + $0x1c8] sm:$0xff] }
 0x401   : > { %11568 = vmatprep.subr.mxu1 %v18056_v36  ;;  %11534 = vmatpush3.msra.mxu0 %v16054_v29 }
 0x402   : > { %11569 = vmatpush3.msra.mxu1 %v12434_v54  ;;  %11535 = vmatprep.subr.mxu0 %v18056_v36  ;;  %v16120_v54 = vld [vmem:[%s17776_s5 + $0x138] sm:$0xff] }
 0x403   : > { %11570 = vmatprep.subr.mxu1 %v18056_v36  ;;  %11536 = vmatpush3.msra.mxu0 %v16065_v30  ;;  %18057 = vst [vmem:[#allocation11_spill] sm:$0xff] %v16120_v54 }
 0x404   : > { %11571 = vmatpush3.msra.mxu1 %v12435_v33  ;;  %11537 = vmatprep.subr.mxu0 %v18056_v36  ;;  %v12439_v33 = vld [vmem:[%s17776_s5 + $0x1c0] sm:$0xff] }
 0x405   : > { %11572 = vmatprep.subr.mxu1 %v18056_v36  ;;  %11538 = vmatpush3.msra.mxu0 %v16076_v14 }
 0x406   : > { %11573 = vmatpush3.msra.mxu1 %v12436_v11  ;;  %11539 = vmatprep.subr.mxu0 %v18056_v36  ;;  %v16131_v11 = vld [vmem:[%s17776_s5 + $0x130] sm:$0xff] }
 0x407   : > { %11574 = vmatprep.subr.mxu1 %v18056_v36  ;;  %11540 = vmatpush3.msra.mxu0 %v16087_v46  ;;  %18058 = vst [vmem:[#allocation9_spill] sm:$0xff] %v16131_v11 }
 0x408   : > { %11575 = vmatpush3.msra.mxu1 %v12437_v38  ;;  %11541 = vmatprep.subr.mxu0 %v18056_v36  ;;  %v12440_v38 = vld [vmem:[%s17776_s5 + $0x1b8] sm:$0xff] }
 0x409   : > { %11576 = vmatprep.subr.mxu1 %v18056_v36  ;;  %11542 = vmatpush3.msra.mxu0 %v16098_v61 }
 0x40a   : > { %11577 = vmatpush3.msra.mxu1 %v12438_v21  ;;  %11543 = vmatprep.subr.mxu0 %v18056_v36  ;;  %v16142_v21 = vld [vmem:[%s17776_s5 + $0x128] sm:$0xff] }
 0x40b   : > { %11578 = vmatprep.subr.mxu1 %v18056_v36  ;;  %11544 = vmatpush3.msra.mxu0 %v16109_v35  ;;  %18059 = vst [vmem:[#allocation60_spill] sm:$0xff] %v16142_v21 }
 0x40c   : > { %11579 = vmatpush3.msra.mxu1 %v12439_v33  ;;  %11545 = vmatprep.subr.mxu0 %v18056_v36  ;;  %v12441_v33 = vld [vmem:[%s17776_s5 + $0x1b0] sm:$0xff] }
 0x40d   : > { %11580 = vmatprep.subr.mxu1 %v18056_v36  ;;  %11546 = vmatpush3.msra.mxu0 %v16120_v54  ;;  %v5788_v54 = vld [vmem:[#allocation2 + $0x30] sm:$0xf] }
 0x40e   : > { %11581 = vmatpush3.msra.mxu1 %v12440_v38  ;;  %11547 = vmatprep.subr.mxu0 %v18056_v36  ;;  %v16153_v38 = vld [vmem:[%s17776_s5 + $0x120] sm:$0xff] }
 0x40f   : > { %11582 = vmatprep.subr.mxu1 %v18056_v36  ;;  %11548 = vmatpush3.msra.mxu0 %v16131_v11  ;;  %18060 = vst [vmem:[#allocation13_spill] sm:$0xff] %v16153_v38  ;;  %v12442_v11 = vld [vmem:[%s17776_s5 + $0x1a8] sm:$0xff] }
 0x410   : > { %11583 = vmatpush3.msra.mxu1 %v12441_v33  ;;  %11549 = vmatprep.subr.mxu0 %v18056_v36  ;;  %v16164_v33 = vld [vmem:[%s17776_s5 + $0x118] sm:$0xff] }
 0x411   : > { %11584 = vmatprep.subr.mxu1 %v18056_v36  ;;  %11550 = vmatpush3.msra.mxu0 %v16142_v21  ;;  %18061 = vst [vmem:[#allocation14_spill] sm:$0xff] %v16164_v33  ;;  %v12443_v21 = vld [vmem:[%s17776_s5 + $0x1a0] sm:$0xff] }
 0x412   : > { %11585 = vmatpush3.msra.mxu1 %v12442_v11  ;;  %11551 = vmatprep.subr.mxu0 %v18056_v36  ;;  %v16175_v11 = vld [vmem:[%s17776_s5 + $0x110] sm:$0xff] }
 0x413   : > { %11586 = vmatprep.subr.mxu1 %v18056_v36  ;;  %11552 = vmatpush3.msra.mxu0 %v16153_v38  ;;  %18062 = vst [vmem:[#allocation15_spill] sm:$0xff] %v16175_v11  ;;  %v12444_v38 = vld [vmem:[%s17776_s5 + $0x198] sm:$0xff] }
 0x414   : > { %11587 = vmatpush3.msra.mxu1 %v12443_v21  ;;  %11553 = vmatprep.subr.mxu0 %v18056_v36  ;;  %v16186_v21 = vld [vmem:[%s17776_s5 + $0x108] sm:$0xff] }
 0x415   : > { %11588 = vmatprep.subr.mxu1 %v18056_v36  ;;  %11554 = vmatpush3.msra.mxu0 %v16164_v33  ;;  %18063 = vst [vmem:[#allocation25_spill] sm:$0xff] %v16186_v21  ;;  %v12445_v33 = vld [vmem:[%s17776_s5 + $0x190] sm:$0xff] }
 0x416   : > { %11589 = vmatpush3.msra.mxu1 %v12444_v38  ;;  %11555 = vmatprep.subr.mxu0 %v18056_v36  ;;  %v16197_v38 = vld [vmem:[%s17776_s5 + $0x100] sm:$0xff] }
 0x417   : > { %11590 = vmatprep.subr.mxu1 %v18056_v36  ;;  %11556 = vmatpush3.msra.mxu0 %v16175_v11  ;;  %v12446_v11 = vld [vmem:[%s17776_s5 + $0x188] sm:$0xff] }
 0x418   : > { %11591 = vmatpush3.msra.mxu1 %v12445_v33  ;;  %11557 = vmatprep.subr.mxu0 %v18056_v36  ;;  %v12447_v33 = vld [vmem:[%s17776_s5 + $0x180] sm:$0xff] }
 0x419   : > { %11592 = vmatprep.subr.mxu1 %v18056_v36  ;;  %11558 = vmatpush3.msra.mxu0 %v16186_v21  ;;  %v5700_v21 = vld [vmem:[#allocation2 + $0x1a] sm:$0xf] }
 0x41a   : > { %11593 = vmatpush3.msra.mxu1 %v12446_v11  ;;  %11559 = vmatprep.subr.mxu0 %v18056_v36  ;;  %v16216_v11 = vld [vmem:[%s17776_s5 + $0x278] sm:$0xff] }
 0x41b   : > { %11594 = vmatprep.subr.mxu1 %v18056_v36  ;;  %11560 = vmatpush3.msra.mxu0 %v16197_v38 }
 0x41c   : > { %11561 = vmatprep.mubr.msk.f32.mxu0 %vm12467_vm0, %v18056_v36  ;;  %11595 = vmatpush3.msra.mxu1 %v12447_v33  ;;  %v16223_v33 = vld [vmem:[%s17776_s5 + $0x270] sm:$0xff] }
 0x41d   : > { %11596 = vmatprep.mubr.msk.f32.mxu1 %vm12467_vm0, %v18056_v36  ;;  %11562 = vmatmul.mubr.f32.vlgmr.msra.gmra.mxu0 %v5700_v21  ;;  %v5964_v21 = vld [vmem:[#allocation2 + $0x32] sm:$0xf] }
 0x41e   : > { %11597 = vmatmul.mubr.f32.vlgmr.msra.gmra.mxu1 %v5788_v54  ;;  %11599 = vmatprep.subr.mxu0 %v18056_v36  ;;  %v16232_v54 = vld [vmem:[%s17776_s5 + $0x268] sm:$0xff] }
 0x41f   : > { %11634 = vmatprep.subr.mxu1 %v18056_v36  ;;  %11600 = vmatpush3.msra.mxu0 %v16216_v11 }
 0x420   : > { %11635 = vmatpush3.msra.mxu1 %v15493_v16  ;;  %11601 = vmatprep.subr.mxu0 %v18056_v36  ;;  %v16241_v16 = vld [vmem:[%s17776_s5 + $0x260] sm:$0xff] }
 0x421   : > { %11636 = vmatprep.subr.mxu1 %v18056_v36  ;;  %11602 = vmatpush3.msra.mxu0 %v16223_v33 }
 0x422   : > { %11637 = vmatpush3.msra.mxu1 %v15503_v52  ;;  %11603 = vmatprep.subr.mxu0 %v18056_v36  ;;  %v16250_v52 = vld [vmem:[%s17776_s5 + $0x258] sm:$0xff] }
 0x423   : > { %11638 = vmatprep.subr.mxu1 %v18056_v36  ;;  %11604 = vmatpush3.msra.mxu0 %v16232_v54 }
 0x424   : > { %11639 = vmatpush3.msra.mxu1 %v15515_v19  ;;  %11605 = vmatprep.subr.mxu0 %v18056_v36  ;;  %v16259_v19 = vld [vmem:[%s17776_s5 + $0x250] sm:$0xff] }
 0x425   : > { %11640 = vmatprep.subr.mxu1 %v18056_v36  ;;  %11606 = vmatpush3.msra.mxu0 %v16241_v16 }
 0x426   : > { %11641 = vmatpush3.msra.mxu1 %v15526_v27  ;;  %11607 = vmatprep.subr.mxu0 %v18056_v36  ;;  %v16268_v27 = vld [vmem:[%s17776_s5 + $0x248] sm:$0xff] }
 0x427   : > { %11642 = vmatprep.subr.mxu1 %v18056_v36  ;;  %11608 = vmatpush3.msra.mxu0 %v16250_v52 }
 0x428   : > { %11643 = vmatpush3.msra.mxu1 %v15537_v31  ;;  %11609 = vmatprep.subr.mxu0 %v18056_v36  ;;  %v16277_v31 = vld [vmem:[%s17776_s5 + $0x240] sm:$0xff] }
 0x429   : > { %11644 = vmatprep.subr.mxu1 %v18056_v36  ;;  %11610 = vmatpush3.msra.mxu0 %v16259_v19 }
 0x42a   : > { %11645 = vmatpush3.msra.mxu1 %v15548_v55  ;;  %11611 = vmatprep.subr.mxu0 %v18056_v36  ;;  %v12448_v55 = vld [vmem:[%s17776_s5 + $0x238] sm:$0xff] }
 0x42b   : > { %11646 = vmatprep.subr.mxu1 %v18056_v36  ;;  %11612 = vmatpush3.msra.mxu0 %v16268_v27 }
 0x42c   : > { %11647 = vmatpush3.msra.mxu1 %v15559_v62  ;;  %11613 = vmatprep.subr.mxu0 %v18056_v36  ;;  %v12449_v62 = vld [vmem:[%s17776_s5 + $0x230] sm:$0xff] }
 0x42d   : > { %11648 = vmatprep.subr.mxu1 %v18056_v36  ;;  %11614 = vmatpush3.msra.mxu0 %v16277_v31 }
 0x42e   : > { %11649 = vmatpush3.msra.mxu1 %v15570_v59  ;;  %11615 = vmatprep.subr.mxu0 %v18056_v36  ;;  %v12450_v59 = vld [vmem:[%s17776_s5 + $0x228] sm:$0xff] }
 0x42f   : > { %11650 = vmatprep.subr.mxu1 %v18056_v36  ;;  %11616 = vmatpush3.msra.mxu0 %v12448_v55 }
 0x430   : > { %11651 = vmatpush3.msra.mxu1 %v15581_v12  ;;  %11617 = vmatprep.subr.mxu0 %v18056_v36  ;;  %v12451_v12 = vld [vmem:[%s17776_s5 + $0x220] sm:$0xff] }
 0x431   : > { %11652 = vmatprep.subr.mxu1 %v18056_v36  ;;  %11618 = vmatpush3.msra.mxu0 %v12449_v62 }
 0x432   : > { %11653 = vmatpush3.msra.mxu1 %v15592_v4  ;;  %11619 = vmatprep.subr.mxu0 %v18056_v36  ;;  %v12452_v4 = vld [vmem:[%s17776_s5 + $0x218] sm:$0xff] }
 0x433   : > { %11654 = vmatprep.subr.mxu1 %v18056_v36  ;;  %11620 = vmatpush3.msra.mxu0 %v12450_v59 }
 0x434   : > { %11655 = vmatpush3.msra.mxu1 %v15603_v3  ;;  %11621 = vmatprep.subr.mxu0 %v18056_v36  ;;  %v12453_v3 = vld [vmem:[%s17776_s5 + $0x210] sm:$0xff] }
 0x435   : > { %11656 = vmatprep.subr.mxu1 %v18056_v36  ;;  %11622 = vmatpush3.msra.mxu0 %v12451_v12  ;;  %v6141_v12 = vld [vmem:[#allocation2 + $0x49] sm:$0xf] }
 0x436   : > { %11657 = vmatpush3.msra.mxu1 %v15614_v24  ;;  %11623 = vmatprep.subr.mxu0 %v18056_v36  ;;  %v12454_v24 = vld [vmem:[%s17776_s5 + $0x208] sm:$0xff] }
 0x437   : > { %11658 = vmatprep.subr.mxu1 %v18056_v36  ;;  %11624 = vmatpush3.msra.mxu0 %v12452_v4  ;;  %v16503_v4 = vld [vmem:[%s17776_s5 + $0x468] sm:$0xff] }
 0x438   : > { %11659 = vmatpush3.msra.mxu1 %v15625_v41  ;;  %11625 = vmatprep.subr.mxu0 %v18056_v36  ;;  %v12455_v41 = vld [vmem:[%s17776_s5 + $0x200] sm:$0xff] }
 0x439   : > { %11660 = vmatprep.subr.mxu1 %v18056_v36  ;;  %11626 = vmatpush3.msra.mxu0 %v12453_v3 }
 0x43a   : > { %11661 = vmatpush3.msra.mxu1 %v15636_v50  ;;  %11627 = vmatprep.subr.mxu0 %v18056_v36  ;;  %v5876_v50 = vld [vmem:[#allocation2 + $0x31] sm:$0xf] }
 0x43b   : > { %11662 = vmatprep.subr.mxu1 %v18056_v36  ;;  %11628 = vmatpush3.msra.mxu0 %v12454_v24 }
 0x43c   : > { %11663 = vmatpush3.msra.mxu1 %v15647_v7  ;;  %11629 = vmatprep.subr.mxu0 %v18056_v36  ;;  %v16342_v7 = vld [vmem:[%s17776_s5 + $0x370] sm:$0xff] }
 0x43d   : > { %11664 = vmatprep.subr.mxu1 %v18056_v36  ;;  %11630 = vmatpush3.msra.mxu0 %v12455_v41 }
 0x43e   : > { %11631 = vmatprep.mubr.msk.f32.mxu0 %vm12467_vm0, %v18056_v36  ;;  %11665 = vmatpush3.msra.mxu1 %v15658_v15  ;;  %v16351_v15 = vld [vmem:[%s17776_s5 + $0x368] sm:$0xff] }
 0x43f   : > { %11666 = vmatprep.mubr.msk.f32.mxu1 %vm12467_vm0, %v18056_v36  ;;  %11632 = vmatmul.mubr.f32.vlgmr.msra.gmra.mxu0 %v5876_v50 }
 0x440   : > { %11667 = vmatmul.mubr.f32.vlgmr.msra.gmra.mxu1 %v5964_v21  ;;  %11669 = vmatprep.subr.mxu0 %v18056_v36  ;;  %v6343_v21 = vld [vmem:[#allocation2 + $0x31] sm:$0xf] }
 0x441   : > { %11704 = vmatprep.subr.mxu1 %v18056_v36  ;;  %11670 = vmatpush3.msra.mxu0 %v15498_v48  ;;  %v16360_v48 = vld [vmem:[%s17776_s5 + $0x360] sm:$0xff] }
 0x442   : > { %11705 = vmatpush3.msra.mxu1 %v15672_v0  ;;  %11671 = vmatprep.subr.mxu0 %v18056_v36  ;;  %v16369_v0 = vld [vmem:[%s17776_s5 + $0x358] sm:$0xff] }
 0x443   : > { %11706 = vmatprep.subr.mxu1 %v18056_v36  ;;  %11672 = vmatpush3.msra.mxu0 %v16342_v7 }
 0x444   : > { %11707 = vmatpush3.msra.mxu1 %v15684_v13  ;;  %11673 = vmatprep.subr.mxu0 %v18056_v36  ;;  %v16378_v13 = vld [vmem:[%s17776_s5 + $0x350] sm:$0xff] }
 0x445   : > { %11708 = vmatprep.subr.mxu1 %v18056_v36  ;;  %11674 = vmatpush3.msra.mxu0 %v16351_v15 }
 0x446   : > { %11709 = vmatpush3.msra.mxu1 %v15695_v8  ;;  %11675 = vmatprep.subr.mxu0 %v18056_v36  ;;  %v16387_v8 = vld [vmem:[%s17776_s5 + $0x348] sm:$0xff] }
 0x447   : > { %11710 = vmatprep.subr.mxu1 %v18056_v36  ;;  %11676 = vmatpush3.msra.mxu0 %v16360_v48 }
 0x448   : > { %11711 = vmatpush3.msra.mxu1 %v15706_v10  ;;  %11677 = vmatprep.subr.mxu0 %v18056_v36  ;;  %v16396_v10 = vld [vmem:[%s17776_s5 + $0x340] sm:$0xff] }
 0x449   : > { %11712 = vmatprep.subr.mxu1 %v18056_v36  ;;  %11678 = vmatpush3.msra.mxu0 %v16369_v0 }
 0x44a   : > { %11713 = vmatpush3.msra.mxu1 %v15717_v56  ;;  %11679 = vmatprep.subr.mxu0 %v18056_v36  ;;  %v16405_v56 = vld [vmem:[%s17776_s5 + $0x338] sm:$0xff] }
 0x44b   : > { %11714 = vmatprep.subr.mxu1 %v18056_v36  ;;  %11680 = vmatpush3.msra.mxu0 %v16378_v13 }
 0x44c   : > { %11715 = vmatpush3.msra.mxu1 %v15728_v17  ;;  %11681 = vmatprep.subr.mxu0 %v18056_v36  ;;  %v16414_v17 = vld [vmem:[%s17776_s5 + $0x330] sm:$0xff] }
 0x44d   : > { %11716 = vmatprep.subr.mxu1 %v18056_v36  ;;  %11682 = vmatpush3.msra.mxu0 %v16387_v8 }
 0x44e   : > { %11717 = vmatpush3.msra.mxu1 %v15739_v25  ;;  %11683 = vmatprep.subr.mxu0 %v18056_v36  ;;  %v16423_v25 = vld [vmem:[%s17776_s5 + $0x328] sm:$0xff] }
 0x44f   : > { %11718 = vmatprep.subr.mxu1 %v18056_v36  ;;  %11684 = vmatpush3.msra.mxu0 %v16396_v10 }
 0x450   : > { %11719 = vmatpush3.msra.mxu1 %v15752_v1  ;;  %11685 = vmatprep.subr.mxu0 %v18056_v36  ;;  %v16432_v1 = vld [vmem:[%s17776_s5 + $0x320] sm:$0xff] }
 0x451   : > { %11720 = vmatprep.subr.mxu1 %v18056_v36  ;;  %11686 = vmatpush3.msra.mxu0 %v16405_v56 }
 0x452   : > { %11721 = vmatpush3.msra.mxu1 %v15763_v40  ;;  %11687 = vmatprep.subr.mxu0 %v18056_v36  ;;  %v16441_v40 = vld [vmem:[%s17776_s5 + $0x318] sm:$0xff] }
 0x453   : > { %11722 = vmatprep.subr.mxu1 %v18056_v36  ;;  %11688 = vmatpush3.msra.mxu0 %v16414_v17 }
 0x454   : > { %11723 = vmatpush3.msra.mxu1 %v15774_v49  ;;  %11689 = vmatprep.subr.mxu0 %v18056_v36 }
 0x455   : > { %11724 = vmatprep.subr.mxu1 %v18056_v36  ;;  %11690 = vmatpush3.msra.mxu0 %v16423_v25 }
 0x456   : > { %11725 = vmatpush3.msra.mxu1 %v15785_v51  ;;  %11691 = vmatprep.subr.mxu0 %v18056_v36  ;;  %v16443_v49 = vpop.f32.mrf.mxu0  ;;  %v16454_v51 = vld [vmem:[%s17776_s5 + $0x310] sm:$0xff] }
 0x457   : > { %11726 = vmatprep.subr.mxu1 %v18056_v36  ;;  %v16445_v55 = vpop.f32.mrf.mxu1  ;;  %11692 = vmatpush3.msra.mxu0 %v16432_v1 }
 0x458   : > { %11727 = vmatpush3.msra.mxu1 %v15796_v22  ;;  %11693 = vmatprep.subr.mxu0 %v18056_v36  ;;  %v11283_v62 = vpop.f32.mrf.mxu0  ;;  %v16463_v22 = vld [vmem:[%s17776_s5 + $0x308] sm:$0xff] }
 0x459   : > { %11728 = vmatprep.subr.mxu1 %v18056_v36  ;;  %v11318_v59 = vpop.f32.mrf.mxu1  ;;  %11694 = vmatpush3.msra.mxu0 %v16441_v40  ;;  %v16655_v62 = vld [vmem:[%s17776_s5 + $0x68] sm:$0xff] }
 0x45a   : > { %11729 = vmatpush3.msra.mxu1 %v15807_v37  ;;  %11695 = vmatprep.subr.mxu0 %v18056_v36  ;;  %v16472_v37 = vld [vmem:[%s17776_s5 + $0x300] sm:$0xff]  ;;  %v5071_v59 = vadd.f32 %v16443_v49, %v15744_v32 }
 0x45b   : > { %11730 = vmatprep.subr.mxu1 %v18056_v36  ;;  %11696 = vmatpush3.msra.mxu0 %v16454_v51  ;;  %v16702_v32 = vld [vmem:[%s17776_s5 + $0x40] sm:$0xff] }
 0x45c   : > { %11731 = vmatpush3.msra.mxu1 %v15818_v34  ;;  %11697 = vmatprep.subr.mxu0 %v18056_v36  ;;  %v6053_v34 = vld [vmem:[#allocation2 + $0x48] sm:$0xf] }
 0x45d   : > { %11732 = vmatprep.subr.mxu1 %v18056_v36  ;;  %11698 = vmatpush3.msra.mxu0 %v16463_v22 }
 0x45e   : > { %11733 = vmatpush3.msra.mxu1 %v15829_v28  ;;  %11699 = vmatprep.subr.mxu0 %v18056_v36  ;;  %v16487_v28 = vld [vmem:[%s17776_s5 + $0x478] sm:$0xff] }
 0x45f   : > { %11734 = vmatprep.subr.mxu1 %v18056_v36  ;;  %11700 = vmatpush3.msra.mxu0 %v16472_v37 }
 0x460   : > { %11701 = vmatprep.mubr.msk.f32.mxu0 %vm12467_vm0, %v18056_v36  ;;  %11735 = vmatpush3.msra.mxu1 %v15840_v57  ;;  %v16494_v57 = vld [vmem:[%s17776_s5 + $0x470] sm:$0xff] }
 0x461   : > { %11736 = vmatprep.mubr.msk.f32.mxu1 %vm12467_vm0, %v18056_v36  ;;  %11702 = vmatmul.mubr.f32.vlgmr.msra.gmra.mxu0 %v6053_v34  ;;  %v18065_v34 = vld [vmem:[#allocation9_spill] sm:$0xff] }
 0x462   : > { %11737 = vmatmul.mubr.f32.vlgmr.msra.gmra.mxu1 %v6141_v12  ;;  %11739 = vmatprep.subr.mxu0 %v18056_v36 }
 0x463   : > { %11774 = vmatprep.subr.mxu1 %v18056_v36  ;;  %11740 = vmatpush3.msra.mxu0 %v16487_v28 }
 0x464   : > { %11775 = vmatpush3.msra.mxu1 %v15854_v2  ;;  %11741 = vmatprep.subr.mxu0 %v18056_v36  ;;  %v16512_v2 = vld [vmem:[%s17776_s5 + $0x460] sm:$0xff] }
 0x465   : > { %11776 = vmatprep.subr.mxu1 %v18056_v36  ;;  %11742 = vmatpush3.msra.mxu0 %v16494_v57 }
 0x466   : > { %11777 = vmatpush3.msra.mxu1 %v15866_v60  ;;  %11743 = vmatprep.subr.mxu0 %v18056_v36  ;;  %v16521_v60 = vld [vmem:[%s17776_s5 + $0x458] sm:$0xff] }
 0x467   : > { %11778 = vmatprep.subr.mxu1 %v18056_v36  ;;  %11744 = vmatpush3.msra.mxu0 %v16503_v4 }
 0x468   : > { %11779 = vmatpush3.msra.mxu1 %v15877_v53  ;;  %11745 = vmatprep.subr.mxu0 %v18056_v36  ;;  %v16530_v53 = vld [vmem:[%s17776_s5 + $0x450] sm:$0xff] }
 0x469   : > { %11780 = vmatprep.subr.mxu1 %v18056_v36  ;;  %11746 = vmatpush3.msra.mxu0 %v16512_v2 }
 0x46a   : > { %11781 = vmatpush3.msra.mxu1 %v15888_v20  ;;  %11747 = vmatprep.subr.mxu0 %v18056_v36  ;;  %v16539_v20 = vld [vmem:[%s17776_s5 + $0x448] sm:$0xff] }
 0x46b   : > { %11782 = vmatprep.subr.mxu1 %v18056_v36  ;;  %11748 = vmatpush3.msra.mxu0 %v16521_v60 }
 0x46c   : > { %11783 = vmatpush3.msra.mxu1 %v15896_v18  ;;  %11749 = vmatprep.subr.mxu0 %v18056_v36  ;;  %v16548_v18 = vld [vmem:[%s17776_s5 + $0x440] sm:$0xff] }
 0x46d   : > { %11784 = vmatprep.subr.mxu1 %v18056_v36  ;;  %11750 = vmatpush3.msra.mxu0 %v16530_v53 }
 0x46e   : > { %11785 = vmatpush3.msra.mxu1 %v15907_v5  ;;  %11751 = vmatprep.subr.mxu0 %v18056_v36  ;;  %v16557_v5 = vld [vmem:[%s17776_s5 + $0x438] sm:$0xff] }
 0x46f   : > { %11786 = vmatprep.subr.mxu1 %v18056_v36  ;;  %11752 = vmatpush3.msra.mxu0 %v16539_v20 }
 0x470   : > { %11787 = vmatpush3.msra.mxu1 %v15918_v44  ;;  %11753 = vmatprep.subr.mxu0 %v18056_v36  ;;  %v16566_v44 = vld [vmem:[%s17776_s5 + $0x430] sm:$0xff] }
 0x471   : > { %11788 = vmatprep.subr.mxu1 %v18056_v36  ;;  %11754 = vmatpush3.msra.mxu0 %v16548_v18 }
 0x472   : > { %11789 = vmatpush3.msra.mxu1 %v15929_v39  ;;  %11755 = vmatprep.subr.mxu0 %v18056_v36  ;;  %v16575_v39 = vld [vmem:[%s17776_s5 + $0x428] sm:$0xff] }
 0x473   : > { %11790 = vmatprep.subr.mxu1 %v18056_v36  ;;  %11756 = vmatpush3.msra.mxu0 %v16557_v5 }
 0x474   : > { %11791 = vmatpush3.msra.mxu1 %v15940_v6  ;;  %11757 = vmatprep.subr.mxu0 %v18056_v36  ;;  %v16584_v6 = vld [vmem:[%s17776_s5 + $0x420] sm:$0xff] }
 0x475   : > { %11792 = vmatprep.subr.mxu1 %v18056_v36  ;;  %11758 = vmatpush3.msra.mxu0 %v16566_v44 }
 0x476   : > { %11793 = vmatpush3.msra.mxu1 %v15951_v45  ;;  %11759 = vmatprep.subr.mxu0 %v18056_v36  ;;  %v16597_v45 = vld [vmem:[%s17776_s5 + $0x418] sm:$0xff] }
 0x477   : > { %11794 = vmatprep.subr.mxu1 %v18056_v36  ;;  %11760 = vmatpush3.msra.mxu0 %v16575_v39  ;;  %v16588_v3 = vpop.f32.mrf.mxu0 }
 0x478   : > { %11795 = vmatpush3.msra.mxu1 %v15962_v47  ;;  %v16590_v24 = vpop.f32.mrf.mxu1  ;;  %11761 = vmatprep.subr.mxu0 %v18056_v36  ;;  %v16606_v47 = vld [vmem:[%s17776_s5 + $0x410] sm:$0xff] }
 0x479   : > { %11796 = vmatprep.subr.mxu1 %v18056_v36  ;;  %11762 = vmatpush3.msra.mxu0 %v16584_v6  ;;  %v11353_v41 = vpop.f32.mrf.mxu0 }
 0x47a   : > { %11797 = vmatpush3.msra.mxu1 %v15973_v43  ;;  %v11388_v50 = vpop.f32.mrf.mxu1  ;;  %11763 = vmatprep.subr.mxu0 %v18056_v36  ;;  %v16615_v43 = vld [vmem:[%s17776_s5 + $0x408] sm:$0xff]  ;;  %v18066_v41 = vld [vmem:[#allocation60_spill] sm:$0xff] }
 0x47b   : > { %11798 = vmatprep.subr.mxu1 %v18056_v36  ;;  %11764 = vmatpush3.msra.mxu0 %v16597_v45 }
 0x47c   : > { %11799 = vmatpush3.msra.mxu1 %v15984_v42  ;;  %11765 = vmatprep.subr.mxu0 %v18056_v36  ;;  %v16624_v42 = vld [vmem:[%s17776_s5 + $0x400] sm:$0xff] }
 0x47d   : > { %11800 = vmatprep.subr.mxu1 %v18056_v36  ;;  %11766 = vmatpush3.msra.mxu0 %v16606_v47 }
 0x47e   : > { %11801 = vmatpush3.msra.mxu1 %v15995_v26  ;;  %11767 = vmatprep.subr.mxu0 %v18056_v36  ;;  %v6229_v26 = vld [vmem:[#allocation2 + $0x4a] sm:$0xf] }
 0x47f   : > { %11802 = vmatprep.subr.mxu1 %v18056_v36  ;;  %11768 = vmatpush3.msra.mxu0 %v16615_v43 }
 0x480   : > { %11803 = vmatpush3.msra.mxu1 %v16006_v58  ;;  %11769 = vmatprep.subr.mxu0 %v18056_v36  ;;  %v16639_v58 = vld [vmem:[%s17776_s5 + $0x78] sm:$0xff] }
 0x481   : > { %11804 = vmatprep.subr.mxu1 %v18056_v36  ;;  %11770 = vmatpush3.msra.mxu0 %v16624_v42 }
 0x482   : > { %11771 = vmatprep.mubr.msk.f32.mxu0 %vm12467_vm0, %v18056_v36  ;;  %11805 = vmatpush3.msra.mxu1 %v16017_v63  ;;  %v16646_v63 = vld [vmem:[%s17776_s5 + $0x70] sm:$0xff] }
 0x483   : > { %11806 = vmatprep.mubr.msk.f32.mxu1 %vm12467_vm0, %v18056_v36  ;;  %11772 = vmatmul.mubr.f32.vlgmr.msra.gmra.mxu0 %v6229_v26 }
 0x484   : > { %11807 = vmatmul.mubr.f32.vlgmr.msra.gmra.mxu1 %v6343_v21  ;;  %11809 = vmatprep.subr.mxu0 %v18056_v36 }
 0x485   : > { %11844 = vmatprep.subr.mxu1 %v18056_v36  ;;  %11810 = vmatpush3.msra.mxu0 %v16639_v58 }
 0x486   : > { %11845 = vmatpush3.msra.mxu1 %v16036_v9  ;;  %11811 = vmatprep.subr.mxu0 %v18056_v36  ;;  %v16664_v9 = vld [vmem:[%s17776_s5 + $0x60] sm:$0xff] }
 0x487   : > { %11846 = vmatprep.subr.mxu1 %v18056_v36  ;;  %11812 = vmatpush3.msra.mxu0 %v16646_v63 }
 0x488   : > { %11847 = vmatpush3.msra.mxu1 %v16043_v23  ;;  %11813 = vmatprep.subr.mxu0 %v18056_v36  ;;  %v16673_v23 = vld [vmem:[%s17776_s5 + $0x58] sm:$0xff] }
 0x489   : > { %11848 = vmatprep.subr.mxu1 %v18056_v36  ;;  %11814 = vmatpush3.msra.mxu0 %v16655_v62 }
 0x48a   : > { %11849 = vmatpush3.msra.mxu1 %v16054_v29  ;;  %11815 = vmatprep.subr.mxu0 %v18056_v36  ;;  %v16682_v29 = vld [vmem:[%s17776_s5 + $0x50] sm:$0xff] }
 0x48b   : > { %11850 = vmatprep.subr.mxu1 %v18056_v36  ;;  %11816 = vmatpush3.msra.mxu0 %v16664_v9 }
 0x48c   : > { %11851 = vmatpush3.msra.mxu1 %v16065_v30  ;;  %11817 = vmatprep.subr.mxu0 %v18056_v36  ;;  %v16693_v30 = vld [vmem:[%s17776_s5 + $0x48] sm:$0xff] }
 0x48d   : > { %11852 = vmatprep.subr.mxu1 %v18056_v36  ;;  %11818 = vmatpush3.msra.mxu0 %v16673_v23 }
 0x48e   : > { %11853 = vmatpush3.msra.mxu1 %v16076_v14  ;;  %11819 = vmatprep.subr.mxu0 %v18056_v36  ;;  %v5160_v14 = vadd.f32 %v16445_v55, %v5071_v59  ;;  %v18064_v55 = vld [vmem:[#allocation11_spill] sm:$0xff]  ;;  %v18067_v59 = vld [vmem:[#allocation13_spill] sm:$0xff] }
 0x48f   : > { %11854 = vmatprep.subr.mxu1 %v18056_v36  ;;  %11820 = vmatpush3.msra.mxu0 %v16682_v29 }
 0x490   : > { %11855 = vmatpush3.msra.mxu1 %v16087_v46  ;;  %11821 = vmatprep.subr.mxu0 %v18056_v36  ;;  %v16712_v46 = vld [vmem:[%s17776_s5 + $0x38] sm:$0xff]  ;;  %v5249_v49 = vadd.f32 %v16588_v3, %v5160_v14  ;;  %v16741_v3 = vld [vmem:[%s17776_s5 + $0x20] sm:$0xff] }
 0x491   : > { %11856 = vmatprep.subr.mxu1 %v18056_v36  ;;  %11822 = vmatpush3.msra.mxu0 %v16693_v30  ;;  %v8376_v14 = vld [vmem:[%s17777_s6] ss:$0 sm:$0xff] }
 0x492   : > { %11857 = vmatpush3.msra.mxu1 %v16098_v61  ;;  %11823 = vmatprep.subr.mxu0 %v18056_v36  ;;  %v16722_v61 = vld [vmem:[%s17776_s5 + $0x30] sm:$0xff]  ;;  %v5338_v12 = vadd.f32 %v16590_v24, %v5249_v49  ;;  %v16750_v24 = vld [vmem:[%s17776_s5 + $0x18] sm:$0xff] }
 0x493   : > { %11858 = vmatprep.subr.mxu1 %v18056_v36  ;;  %11824 = vmatpush3.msra.mxu0 %v16702_v32 }
 0x494   : > { %11859 = vmatpush3.msra.mxu1 %v16109_v35  ;;  %11825 = vmatprep.subr.mxu0 %v18056_v36  ;;  %v16731_v35 = vld [vmem:[%s17776_s5 + $0x28] sm:$0xff] }
 0x495   : > { %11860 = vmatprep.subr.mxu1 %v18056_v36  ;;  %11826 = vmatpush3.msra.mxu0 %v16712_v46 }
 0x496   : > { %11861 = vmatpush3.msra.mxu1 %v18064_v55  ;;  %11827 = vmatprep.subr.mxu0 %v18056_v36 }
 0x497   : > { %11862 = vmatprep.subr.mxu1 %v18056_v36  ;;  %11828 = vmatpush3.msra.mxu0 %v16722_v61 }
 0x498   : > { %11863 = vmatpush3.msra.mxu1 %v18065_v34  ;;  %11829 = vmatprep.subr.mxu0 %v18056_v36  ;;  %v16763_v34 = vld [vmem:[%s17776_s5 + $0x10] sm:$0xff] }
 0x499   : > { %11864 = vmatprep.subr.mxu1 %v18056_v36  ;;  %11830 = vmatpush3.msra.mxu0 %v16731_v35  ;;  %v5423_v50 = vpop.f32.mrf.mxu0 }
 0x49a   : > { %11865 = vmatpush3.msra.mxu1 %v18066_v41  ;;  %v5512_v26 = vpop.f32.mrf.mxu1  ;;  %11831 = vmatprep.subr.mxu0 %v18056_v36  ;;  %v5427_v21 = vadd.f32 %v5423_v50, %v5338_v12  ;;  %v18068_v41 = vld [vmem:[#allocation14_spill] sm:$0xff]  ;;  %v16777_v50 = vld [vmem:[%s17776_s5 + $0x8] sm:$0xff] }
 0x49b   : > { %11866 = vmatprep.subr.mxu1 %v18056_v36  ;;  %11832 = vmatpush3.msra.mxu0 %v16741_v3  ;;  %v11423_v49 = vpop.f32.mrf.mxu0 }
 0x49c   : > { %11867 = vmatpush3.msra.mxu1 %v18067_v59  ;;  %v11458_v55 = vpop.f32.mrf.mxu1  ;;  %11833 = vmatprep.subr.mxu0 %v18056_v36  ;;  %v5516_v12 = vadd.f32 %v5512_v26, %v5427_v21  ;;  %v18069_v21 = vld [vmem:[#allocation15_spill] sm:$0xff]  ;;  %v16786_v59 = vld [vmem:[%s17776_s5] sm:$0xff]  ;;  %v18070_v49 = vld [vmem:[#allocation25_spill] sm:$0xff] }
 0x49d   : > { %11868 = vmatprep.subr.mxu1 %v18056_v36  ;;  %11834 = vmatpush3.msra.mxu0 %v16750_v24  ;;  %v6500_v55 = vld [vmem:[#allocation2 + $0x32] sm:$0xf] }
 0x49e   : > { %11869 = vmatpush3.msra.mxu1 %v18068_v41  ;;  %11835 = vmatprep.subr.mxu0 %v18056_v36  ;;  %v5524_v26 = vadd.f32 %v8376_v14, %v5516_v12  ;;  %v6326_v14 = vld [vmem:[#allocation2 + $0x30] sm:$0xf]  ;;  %v16802_v12 = vld [vmem:[%s17776_s5 + $0x1f8] sm:$0xff]  ;;  %v16818_v41 = vld [vmem:[%s17776_s5 + $0x1e8] sm:$0xff] }
 0x49f   : > { %11870 = vmatprep.subr.mxu1 %v18056_v36  ;;  %11836 = vmatpush3.msra.mxu0 %v16763_v34 }
 0x4a0   : > { %11871 = vmatpush3.msra.mxu1 %v18069_v21  ;;  %11837 = vmatprep.subr.mxu0 %v18056_v36  ;;  %5525 = vst [vmem:[%s16770_s20] sm:$0xf] %v5524_v26  ;;  %v8561_v26 = vld [vmem:[%s17776_s5 + $0x238] sm:$0xff]  ;;  %v8560_v21 = vld [vmem:[%s17776_s5 + $0x230] sm:$0xff] }
 0x4a1   : > { %11872 = vmatprep.subr.mxu1 %v18056_v36  ;;  %11838 = vmatpush3.msra.mxu0 %v16777_v50 }
 0x4a2   : > { %11873 = vmatpush3.msra.mxu1 %v18070_v49  ;;  %11839 = vmatprep.subr.mxu0 %v18056_v36  ;;  %v8559_v49 = vld [vmem:[%s17776_s5 + $0x228] sm:$0xff] }
 0x4a3   : > { %11874 = vmatprep.subr.mxu1 %v18056_v36  ;;  %11840 = vmatpush3.msra.mxu0 %v16786_v59 }
 0x4a4   : > { %11841 = vmatprep.mubr.msk.f32.mxu0 %vm12467_vm0, %v18056_v36  ;;  %11875 = vmatpush3.msra.mxu1 %v16197_v38  ;;  %v16809_v38 = vld [vmem:[%s17776_s5 + $0x1f0] sm:$0xff] }
 0x4a5   : > { %11876 = vmatprep.mubr.msk.f32.mxu1 %vm12467_vm0, %v18056_v36  ;;  %11842 = vmatmul.mubr.f32.vlgmr.msra.gmra.mxu0 %v6326_v14  ;;  %v16906_v14 = vld [vmem:[%s17776_s5 + $0x1a0] sm:$0xff] }
 0x4a6   : > { %11877 = vmatmul.mubr.f32.vlgmr.msra.gmra.mxu1 %v6500_v55  ;;  %11879 = vmatprep.subr.mxu0 %v18056_v36  ;;  %v8558_v55 = vld [vmem:[%s17776_s5 + $0x220] sm:$0xff] }
 0x4a7   : > { %11914 = vmatprep.subr.mxu1 %v18056_v36  ;;  %11880 = vmatpush3.msra.mxu0 %v16802_v12 }
 0x4a8   : > { %11915 = vmatpush3.msra.mxu1 %v16216_v11  ;;  %11881 = vmatprep.subr.mxu0 %v18056_v36  ;;  %v16827_v11 = vld [vmem:[%s17776_s5 + $0x1e0] sm:$0xff] }
 0x4a9   : > { %11916 = vmatprep.subr.mxu1 %v18056_v36  ;;  %11882 = vmatpush3.msra.mxu0 %v16809_v38 }
 0x4aa   : > { %11917 = vmatpush3.msra.mxu1 %v16223_v33  ;;  %11883 = vmatprep.subr.mxu0 %v18056_v36  ;;  %v16836_v33 = vld [vmem:[%s17776_s5 + $0x1d8] sm:$0xff] }
 0x4ab   : > { %11918 = vmatprep.subr.mxu1 %v18056_v36  ;;  %11884 = vmatpush3.msra.mxu0 %v16818_v41 }
 0x4ac   : > { %11919 = vmatpush3.msra.mxu1 %v16232_v54  ;;  %11885 = vmatprep.subr.mxu0 %v18056_v36  ;;  %v16845_v54 = vld [vmem:[%s17776_s5 + $0x1d0] sm:$0xff] }
 0x4ad   : > { %11920 = vmatprep.subr.mxu1 %v18056_v36  ;;  %11886 = vmatpush3.msra.mxu0 %v16827_v11  ;;  %18071 = vst [vmem:[#allocation26_spill] sm:$0xff] %v16845_v54 }
 0x4ae   : > { %11921 = vmatpush3.msra.mxu1 %v16241_v16  ;;  %11887 = vmatprep.subr.mxu0 %v18056_v36  ;;  %v16854_v16 = vld [vmem:[%s17776_s5 + $0x1c8] sm:$0xff] }
 0x4af   : > { %11922 = vmatprep.subr.mxu1 %v18056_v36  ;;  %11888 = vmatpush3.msra.mxu0 %v16836_v33  ;;  %18072 = vst [vmem:[#allocation28_spill] sm:$0xff] %v16854_v16 }
 0x4b0   : > { %11923 = vmatpush3.msra.mxu1 %v16250_v52  ;;  %11889 = vmatprep.subr.mxu0 %v18056_v36  ;;  %v16863_v52 = vld [vmem:[%s17776_s5 + $0x1c0] sm:$0xff] }
 0x4b1   : > { %11924 = vmatprep.subr.mxu1 %v18056_v36  ;;  %11890 = vmatpush3.msra.mxu0 %v16845_v54  ;;  %18073 = vst [vmem:[#allocation27_spill] sm:$0xff] %v16863_v52  ;;  %v8556_v54 = vld [vmem:[%s17776_s5 + $0x210] sm:$0xff] }
 0x4b2   : > { %11925 = vmatpush3.msra.mxu1 %v16259_v19  ;;  %11891 = vmatprep.subr.mxu0 %v18056_v36  ;;  %v16872_v19 = vld [vmem:[%s17776_s5 + $0x1b8] sm:$0xff] }
 0x4b3   : > { %11926 = vmatprep.subr.mxu1 %v18056_v36  ;;  %11892 = vmatpush3.msra.mxu0 %v16854_v16  ;;  %18074 = vst [vmem:[#allocation32_spill] sm:$0xff] %v16872_v19  ;;  %v16930_v16 = vld [vmem:[%s17776_s5 + $0x190] sm:$0xff] }
 0x4b4   : > { %11927 = vmatpush3.msra.mxu1 %v16268_v27  ;;  %11893 = vmatprep.subr.mxu0 %v18056_v36  ;;  %v16884_v27 = vld [vmem:[%s17776_s5 + $0x1b0] sm:$0xff] }
 0x4b5   : > { %11928 = vmatprep.subr.mxu1 %v18056_v36  ;;  %11894 = vmatpush3.msra.mxu0 %v16863_v52  ;;  %18075 = vst [vmem:[#allocation59_spill] sm:$0xff] %v16884_v27 }
 0x4b6   : > { %11929 = vmatpush3.msra.mxu1 %v16277_v31  ;;  %11895 = vmatprep.subr.mxu0 %v18056_v36  ;;  %v16895_v31 = vld [vmem:[%s17776_s5 + $0x1a8] sm:$0xff] }
 0x4b7   : > { %11930 = vmatprep.subr.mxu1 %v18056_v36  ;;  %11896 = vmatpush3.msra.mxu0 %v16872_v19  ;;  %18076 = vst [vmem:[#allocation62_spill] sm:$0xff] %v16895_v31 }
 0x4b8   : > { %11931 = vmatpush3.msra.mxu1 %v8561_v26  ;;  %11897 = vmatprep.subr.mxu0 %v18056_v36 }
 0x4b9   : > { %11932 = vmatprep.subr.mxu1 %v18056_v36  ;;  %11898 = vmatpush3.msra.mxu0 %v16884_v27  ;;  %v8557_v27 = vld [vmem:[%s17776_s5 + $0x218] sm:$0xff] }
 0x4ba   : > { %11933 = vmatpush3.msra.mxu1 %v8560_v21  ;;  %11899 = vmatprep.subr.mxu0 %v18056_v36  ;;  %v16917_v21 = vld [vmem:[%s17776_s5 + $0x198] sm:$0xff] }
 0x4bb   : > { %11934 = vmatprep.subr.mxu1 %v18056_v36  ;;  %11900 = vmatpush3.msra.mxu0 %v16895_v31  ;;  %v5626_v26 = vpop.f32.mrf.mxu0 }
 0x4bc   : > { %11935 = vmatpush3.msra.mxu1 %v8559_v49  ;;  %v5696_v19 = vpop.f32.mrf.mxu1  ;;  %11901 = vmatprep.subr.mxu0 %v18056_v36 }
 0x4bd   : > { %11936 = vmatprep.subr.mxu1 %v18056_v36  ;;  %v16922_v52 = vadd.f32 %v5696_v19, %v5626_v26  ;;  %11902 = vmatpush3.msra.mxu0 %v16906_v14  ;;  %v11493_v49 = vpop.f32.mrf.mxu0  ;;  %v16941_v19 = vld [vmem:[%s17776_s5 + $0x188] sm:$0xff] }
 0x4be   : > { %11937 = vmatpush3.msra.mxu1 %v8558_v55  ;;  %v11528_v31 = vpop.f32.mrf.mxu1  ;;  %11903 = vmatprep.subr.mxu0 %v18056_v36  ;;  %v8554_v55 = vld [vmem:[%s17776_s5 + $0x200] sm:$0xff]  ;;  %v6676_v26 = vld [vmem:[#allocation2 + $0x49] sm:$0xf]  ;;  %v16968_v49 = vld [vmem:[%s17776_s5 + $0x2f8] sm:$0xff] }
 0x4bf   : > { %11938 = vmatprep.subr.mxu1 %v18056_v36  ;;  %11904 = vmatpush3.msra.mxu0 %v16917_v21  ;;  %v8555_v31 = vld [vmem:[%s17776_s5 + $0x208] sm:$0xff] }
 0x4c0   : > { %11939 = vmatpush3.msra.mxu1 %v8557_v27  ;;  %11905 = vmatprep.subr.mxu0 %v18056_v36  ;;  %v16952_v27 = vld [vmem:[%s17776_s5 + $0x180] sm:$0xff] }
 0x4c1   : > { %11940 = vmatprep.subr.mxu1 %v18056_v36  ;;  %11906 = vmatpush3.msra.mxu0 %v16930_v16 }
 0x4c2   : > { %11941 = vmatpush3.msra.mxu1 %v8556_v54  ;;  %11907 = vmatprep.subr.mxu0 %v18056_v36  ;;  %v6588_v54 = vld [vmem:[#allocation2 + $0x48] sm:$0xf] }
 0x4c3   : > { %11942 = vmatprep.subr.mxu1 %v18056_v36  ;;  %11908 = vmatpush3.msra.mxu0 %v16941_v19 }
 0x4c4   : > { %11943 = vmatpush3.msra.mxu1 %v8555_v31  ;;  %11909 = vmatprep.subr.mxu0 %v18056_v36  ;;  %v8601_v31 = vld [vmem:[%s17776_s5 + $0x378] sm:$0xff] }
 0x4c5   : > { %11944 = vmatprep.subr.mxu1 %v18056_v36  ;;  %11910 = vmatpush3.msra.mxu0 %v16952_v27 }
 0x4c6   : > { %11911 = vmatprep.mubr.msk.f32.mxu0 %vm12467_vm0, %v18056_v36  ;;  %11945 = vmatpush3.msra.mxu1 %v8554_v55  ;;  %v16978_v55 = vld [vmem:[%s17776_s5 + $0x2f0] sm:$0xff] }
 0x4c7   : > { %11946 = vmatprep.mubr.msk.f32.mxu1 %vm12467_vm0, %v18056_v36  ;;  %11912 = vmatmul.mubr.f32.vlgmr.msra.gmra.mxu0 %v6588_v54  ;;  %v16986_v54 = vld [vmem:[%s17776_s5 + $0x2e8] sm:$0xff] }
 0x4c8   : > { %11947 = vmatmul.mubr.f32.vlgmr.msra.gmra.mxu1 %v6676_v26  ;;  %11949 = vmatprep.subr.mxu0 %v18056_v36  ;;  %v16995_v26 = vld [vmem:[%s17776_s5 + $0x2e0] sm:$0xff] }
 0x4c9   : > { %11984 = vmatprep.subr.mxu1 %v18056_v36  ;;  %11950 = vmatpush3.msra.mxu0 %v16968_v49 }
 0x4ca   : > { %11985 = vmatpush3.msra.mxu1 %v8601_v31  ;;  %11951 = vmatprep.subr.mxu0 %v18056_v36 }
 0x4cb   : > { %11986 = vmatprep.subr.mxu1 %v18056_v36  ;;  %11952 = vmatpush3.msra.mxu0 %v16978_v55 }
 0x4cc   : > { %11987 = vmatpush3.msra.mxu1 %v16342_v7  ;;  %11953 = vmatprep.subr.mxu0 %v18056_v36  ;;  %v17004_v7 = vld [vmem:[%s17776_s5 + $0x2d8] sm:$0xff] }
 0x4cd   : > { %11988 = vmatprep.subr.mxu1 %v18056_v36  ;;  %11954 = vmatpush3.msra.mxu0 %v16986_v54 }
 0x4ce   : > { %11989 = vmatpush3.msra.mxu1 %v16351_v15  ;;  %11955 = vmatprep.subr.mxu0 %v18056_v36  ;;  %v17013_v15 = vld [vmem:[%s17776_s5 + $0x2d0] sm:$0xff] }
 0x4cf   : > { %11990 = vmatprep.subr.mxu1 %v18056_v36  ;;  %11956 = vmatpush3.msra.mxu0 %v16995_v26 }
 0x4d0   : > { %11991 = vmatpush3.msra.mxu1 %v16360_v48  ;;  %11957 = vmatprep.subr.mxu0 %v18056_v36  ;;  %v17022_v48 = vld [vmem:[%s17776_s5 + $0x2c8] sm:$0xff] }
 0x4d1   : > { %11992 = vmatprep.subr.mxu1 %v18056_v36  ;;  %11958 = vmatpush3.msra.mxu0 %v17004_v7  ;;  %18077 = vst [vmem:[#allocation61_spill] sm:$0xff] %v17022_v48 }
 0x4d2   : > { %11993 = vmatpush3.msra.mxu1 %v16369_v0  ;;  %11959 = vmatprep.subr.mxu0 %v18056_v36  ;;  %v17031_v0 = vld [vmem:[%s17776_s5 + $0x2c0] sm:$0xff] }
 0x4d3   : > { %11994 = vmatprep.subr.mxu1 %v18056_v36  ;;  %11960 = vmatpush3.msra.mxu0 %v17013_v15  ;;  %18078 = vst [vmem:[#allocation63_spill] sm:$0xff] %v17031_v0 }
 0x4d4   : > { %11995 = vmatpush3.msra.mxu1 %v16378_v13  ;;  %11961 = vmatprep.subr.mxu0 %v18056_v36  ;;  %v17040_v13 = vld [vmem:[%s17776_s5 + $0x2b8] sm:$0xff] }
 0x4d5   : > { %11996 = vmatprep.subr.mxu1 %v18056_v36  ;;  %11962 = vmatpush3.msra.mxu0 %v17022_v48  ;;  %18079 = vst [vmem:[#allocation16_spill] sm:$0xff] %v17040_v13 }
 0x4d6   : > { %11997 = vmatpush3.msra.mxu1 %v16387_v8  ;;  %11963 = vmatprep.subr.mxu0 %v18056_v36  ;;  %v17049_v8 = vld [vmem:[%s17776_s5 + $0x2b0] sm:$0xff] }
 0x4d7   : > { %11998 = vmatprep.subr.mxu1 %v18056_v36  ;;  %11964 = vmatpush3.msra.mxu0 %v17031_v0  ;;  %18080 = vst [vmem:[#allocation17_spill] sm:$0xff] %v17049_v8 }
 0x4d8   : > { %11999 = vmatpush3.msra.mxu1 %v16396_v10  ;;  %11965 = vmatprep.subr.mxu0 %v18056_v36  ;;  %v17058_v10 = vld [vmem:[%s17776_s5 + $0x2a8] sm:$0xff] }
 0x4d9   : > { %12000 = vmatprep.subr.mxu1 %v18056_v36  ;;  %11966 = vmatpush3.msra.mxu0 %v17040_v13  ;;  %18081 = vst [vmem:[#allocation29_spill] sm:$0xff] %v17058_v10 }
 0x4da   : > { %12001 = vmatpush3.msra.mxu1 %v16405_v56  ;;  %11967 = vmatprep.subr.mxu0 %v18056_v36  ;;  %v17067_v56 = vld [vmem:[%s17776_s5 + $0x2a0] sm:$0xff] }
 0x4db   : > { %12002 = vmatprep.subr.mxu1 %v18056_v36  ;;  %11968 = vmatpush3.msra.mxu0 %v17049_v8 }
 0x4dc   : > { %12003 = vmatpush3.msra.mxu1 %v16414_v17  ;;  %11969 = vmatprep.subr.mxu0 %v18056_v36  ;;  %v17076_v17 = vld [vmem:[%s17776_s5 + $0x298] sm:$0xff] }
 0x4dd   : > { %12004 = vmatprep.subr.mxu1 %v18056_v36  ;;  %11970 = vmatpush3.msra.mxu0 %v17058_v10  ;;  %v5783_v31 = vpop.f32.mrf.mxu0 }
 0x4de   : > { %12005 = vmatpush3.msra.mxu1 %v16423_v25  ;;  %v5871_v13 = vpop.f32.mrf.mxu1  ;;  %11971 = vmatprep.subr.mxu0 %v18056_v36  ;;  %v5787_v8 = vadd.f32 %v5783_v31, %v16922_v52  ;;  %v17086_v25 = vld [vmem:[%s17776_s5 + $0x290] sm:$0xff]  ;;  %v6853_v52 = vld [vmem:[#allocation2 + $0x60] sm:$0xf] }
 0x4df   : > { %12006 = vmatprep.subr.mxu1 %v18056_v36  ;;  %11972 = vmatpush3.msra.mxu0 %v17067_v56  ;;  %v11563_v10 = vpop.f32.mrf.mxu0 }
 0x4e0   : > { %12007 = vmatpush3.msra.mxu1 %v16432_v1  ;;  %v11598_v0 = vpop.f32.mrf.mxu1  ;;  %11973 = vmatprep.subr.mxu0 %v18056_v36  ;;  %v17088_v48 = vadd.f32 %v5871_v13, %v5787_v8  ;;  %v17097_v1 = vld [vmem:[%s17776_s5 + $0x288] sm:$0xff] }
 0x4e1   : > { %12008 = vmatprep.subr.mxu1 %v18056_v36  ;;  %11974 = vmatpush3.msra.mxu0 %v17076_v17  ;;  %v17137_v0 = vld [vmem:[%s17776_s5 + $0x3e8] sm:$0xff] }
 0x4e2   : > { %12009 = vmatpush3.msra.mxu1 %v16441_v40  ;;  %11975 = vmatprep.subr.mxu0 %v18056_v36  ;;  %v17106_v40 = vld [vmem:[%s17776_s5 + $0x280] sm:$0xff] }
 0x4e3   : > { %12010 = vmatprep.subr.mxu1 %v18056_v36  ;;  %11976 = vmatpush3.msra.mxu0 %v17086_v25 }
 0x4e4   : > { %12011 = vmatpush3.msra.mxu1 %v16454_v51  ;;  %11977 = vmatprep.subr.mxu0 %v18056_v36  ;;  %v6764_v51 = vld [vmem:[#allocation2 + $0x4a] sm:$0xf] }
 0x4e5   : > { %12012 = vmatprep.subr.mxu1 %v18056_v36  ;;  %11978 = vmatpush3.msra.mxu0 %v17097_v1 }
 0x4e6   : > { %12013 = vmatpush3.msra.mxu1 %v16463_v22  ;;  %11979 = vmatprep.subr.mxu0 %v18056_v36  ;;  %v17121_v22 = vld [vmem:[%s17776_s5 + $0x3f8] sm:$0xff] }
 0x4e7   : > { %12014 = vmatprep.subr.mxu1 %v18056_v36  ;;  %11980 = vmatpush3.msra.mxu0 %v17106_v40 }
 0x4e8   : > { %11981 = vmatprep.mubr.msk.f32.mxu0 %vm12467_vm0, %v18056_v36  ;;  %12015 = vmatpush3.msra.mxu1 %v16472_v37  ;;  %v17128_v37 = vld [vmem:[%s17776_s5 + $0x3f0] sm:$0xff] }
 0x4e9   : > { %12016 = vmatprep.mubr.msk.f32.mxu1 %vm12467_vm0, %v18056_v36  ;;  %11982 = vmatmul.mubr.f32.vlgmr.msra.gmra.mxu0 %v6764_v51  ;;  %v7029_v51 = vld [vmem:[#allocation2 + $0x62] sm:$0xf] }
 0x4ea   : > { %12017 = vmatmul.mubr.f32.vlgmr.msra.gmra.mxu1 %v6853_v52  ;;  %12019 = vmatprep.subr.mxu0 %v18056_v36  ;;  %v8649_v52 = vld [vmem:[%s17776_s5 + $0xf0] sm:$0xff] }
 0x4eb   : > { %12054 = vmatprep.subr.mxu1 %v18056_v36  ;;  %12020 = vmatpush3.msra.mxu0 %v17121_v22 }
 0x4ec   : > { %12055 = vmatpush3.msra.mxu1 %v16487_v28  ;;  %12021 = vmatprep.subr.mxu0 %v18056_v36  ;;  %v17146_v28 = vld [vmem:[%s17776_s5 + $0x3e0] sm:$0xff] }
 0x4ed   : > { %12056 = vmatprep.subr.mxu1 %v18056_v36  ;;  %12022 = vmatpush3.msra.mxu0 %v17128_v37 }
 0x4ee   : > { %12057 = vmatpush3.msra.mxu1 %v16494_v57  ;;  %12023 = vmatprep.subr.mxu0 %v18056_v36  ;;  %v17155_v57 = vld [vmem:[%s17776_s5 + $0x3d8] sm:$0xff] }
 0x4ef   : > { %12058 = vmatprep.subr.mxu1 %v18056_v36  ;;  %12024 = vmatpush3.msra.mxu0 %v17137_v0 }
 0x4f0   : > { %12059 = vmatpush3.msra.mxu1 %v16503_v4  ;;  %12025 = vmatprep.subr.mxu0 %v18056_v36  ;;  %v17164_v4 = vld [vmem:[%s17776_s5 + $0x3d0] sm:$0xff] }
 0x4f1   : > { %12060 = vmatprep.subr.mxu1 %v18056_v36  ;;  %12026 = vmatpush3.msra.mxu0 %v17146_v28 }
 0x4f2   : > { %12061 = vmatpush3.msra.mxu1 %v16512_v2  ;;  %12027 = vmatprep.subr.mxu0 %v18056_v36  ;;  %v17173_v2 = vld [vmem:[%s17776_s5 + $0x3c8] sm:$0xff] }
 0x4f3   : > { %12062 = vmatprep.subr.mxu1 %v18056_v36  ;;  %12028 = vmatpush3.msra.mxu0 %v17155_v57 }
 0x4f4   : > { %12063 = vmatpush3.msra.mxu1 %v16521_v60  ;;  %12029 = vmatprep.subr.mxu0 %v18056_v36  ;;  %v17182_v60 = vld [vmem:[%s17776_s5 + $0x3c0] sm:$0xff] }
 0x4f5   : > { %12064 = vmatprep.subr.mxu1 %v18056_v36  ;;  %12030 = vmatpush3.msra.mxu0 %v17164_v4 }
 0x4f6   : > { %12065 = vmatpush3.msra.mxu1 %v16530_v53  ;;  %12031 = vmatprep.subr.mxu0 %v18056_v36  ;;  %v17191_v53 = vld [vmem:[%s17776_s5 + $0x3b8] sm:$0xff] }
 0x4f7   : > { %12066 = vmatprep.subr.mxu1 %v18056_v36  ;;  %12032 = vmatpush3.msra.mxu0 %v17173_v2 }
 0x4f8   : > { %12067 = vmatpush3.msra.mxu1 %v16539_v20  ;;  %12033 = vmatprep.subr.mxu0 %v18056_v36  ;;  %v17200_v20 = vld [vmem:[%s17776_s5 + $0x3b0] sm:$0xff] }
 0x4f9   : > { %12068 = vmatprep.subr.mxu1 %v18056_v36  ;;  %12034 = vmatpush3.msra.mxu0 %v17182_v60 }
 0x4fa   : > { %12069 = vmatpush3.msra.mxu1 %v16548_v18  ;;  %12035 = vmatprep.subr.mxu0 %v18056_v36  ;;  %v17209_v18 = vld [vmem:[%s17776_s5 + $0x3a8] sm:$0xff] }
 0x4fb   : > { %12070 = vmatprep.subr.mxu1 %v18056_v36  ;;  %12036 = vmatpush3.msra.mxu0 %v17191_v53 }
 0x4fc   : > { %12071 = vmatpush3.msra.mxu1 %v16557_v5  ;;  %12037 = vmatprep.subr.mxu0 %v18056_v36  ;;  %v17218_v5 = vld [vmem:[%s17776_s5 + $0x3a0] sm:$0xff] }
 0x4fd   : > { %12072 = vmatprep.subr.mxu1 %v18056_v36  ;;  %12038 = vmatpush3.msra.mxu0 %v17200_v20 }
 0x4fe   : > { %12073 = vmatpush3.msra.mxu1 %v16566_v44  ;;  %12039 = vmatprep.subr.mxu0 %v18056_v36  ;;  %v17231_v44 = vld [vmem:[%s17776_s5 + $0x398] sm:$0xff] }
 0x4ff   : > { %12074 = vmatprep.subr.mxu1 %v18056_v36  ;;  %12040 = vmatpush3.msra.mxu0 %v17209_v18  ;;  %v17222_v13 = vpop.f32.mrf.mxu0 }
 0x500   : > { %12075 = vmatpush3.msra.mxu1 %v16575_v39  ;;  %v17224_v8 = vpop.f32.mrf.mxu1  ;;  %12041 = vmatprep.subr.mxu0 %v18056_v36  ;;  %v17240_v39 = vld [vmem:[%s17776_s5 + $0x390] sm:$0xff] }
 0x501   : > { %12076 = vmatprep.subr.mxu1 %v18056_v36  ;;  %12042 = vmatpush3.msra.mxu0 %v17218_v5  ;;  %v11633_v10 = vpop.f32.mrf.mxu0 }
 0x502   : > { %12077 = vmatpush3.msra.mxu1 %v16584_v6  ;;  %v11668_v31 = vpop.f32.mrf.mxu1  ;;  %12043 = vmatprep.subr.mxu0 %v18056_v36  ;;  %v17249_v6 = vld [vmem:[%s17776_s5 + $0x388] sm:$0xff]  ;;  %v8647_v10 = vld [vmem:[%s17776_s5 + $0xe0] sm:$0xff] }
 0x503   : > { %12078 = vmatprep.subr.mxu1 %v18056_v36  ;;  %12044 = vmatpush3.msra.mxu0 %v17231_v44 }
 0x504   : > { %12079 = vmatpush3.msra.mxu1 %v16597_v45  ;;  %12045 = vmatprep.subr.mxu0 %v18056_v36  ;;  %v17258_v45 = vld [vmem:[%s17776_s5 + $0x380] sm:$0xff] }
 0x505   : > { %12080 = vmatprep.subr.mxu1 %v18056_v36  ;;  %12046 = vmatpush3.msra.mxu0 %v17240_v39 }
 0x506   : > { %12081 = vmatpush3.msra.mxu1 %v16606_v47  ;;  %12047 = vmatprep.subr.mxu0 %v18056_v36  ;;  %v6941_v47 = vld [vmem:[#allocation2 + $0x61] sm:$0xf] }
 0x507   : > { %12082 = vmatprep.subr.mxu1 %v18056_v36  ;;  %12048 = vmatpush3.msra.mxu0 %v17249_v6 }
 0x508   : > { %12083 = vmatpush3.msra.mxu1 %v16615_v43  ;;  %12049 = vmatprep.subr.mxu0 %v18056_v36  ;;  %v8650_v43 = vld [vmem:[%s17776_s5 + $0xf8] sm:$0xff] }
 0x509   : > { %12084 = vmatprep.subr.mxu1 %v18056_v36  ;;  %12050 = vmatpush3.msra.mxu0 %v17258_v45 }
 0x50a   : > { %12051 = vmatprep.mubr.msk.f32.mxu0 %vm12467_vm0, %v18056_v36  ;;  %12085 = vmatpush3.msra.mxu1 %v16624_v42  ;;  %v8648_v42 = vld [vmem:[%s17776_s5 + $0xe8] sm:$0xff] }
 0x50b   : > { %12086 = vmatprep.mubr.msk.f32.mxu1 %vm12467_vm0, %v18056_v36  ;;  %12052 = vmatmul.mubr.f32.vlgmr.msra.gmra.mxu0 %v6941_v47 }
 0x50c   : > { %12087 = vmatmul.mubr.f32.vlgmr.msra.gmra.mxu1 %v7029_v51  ;;  %12089 = vmatprep.subr.mxu0 %v18056_v36 }
 0x50d   : > { %12124 = vmatprep.subr.mxu1 %v18056_v36  ;;  %12090 = vmatpush3.msra.mxu0 %v8650_v43  ;;  %v8635_v43 = vld [vmem:[%s17776_s5 + $0x80] sm:$0xff] }
 0x50e   : > { %12125 = vmatpush3.msra.mxu1 %v16639_v58  ;;  %12091 = vmatprep.subr.mxu0 %v18056_v36  ;;  %v8646_v58 = vld [vmem:[%s17776_s5 + $0xd8] sm:$0xff] }
 0x50f   : > { %12126 = vmatprep.subr.mxu1 %v18056_v36  ;;  %12092 = vmatpush3.msra.mxu0 %v8649_v52  ;;  %v8666_v52 = vld [vmem:[%s17776_s5 + $0x178] sm:$0xff] }
 0x510   : > { %12127 = vmatpush3.msra.mxu1 %v16646_v63  ;;  %12093 = vmatprep.subr.mxu0 %v18056_v36  ;;  %v8645_v63 = vld [vmem:[%s17776_s5 + $0xd0] sm:$0xff] }
 0x511   : > { %12128 = vmatprep.subr.mxu1 %v18056_v36  ;;  %12094 = vmatpush3.msra.mxu0 %v8648_v42  ;;  %v8663_v42 = vld [vmem:[%s17776_s5 + $0x160] sm:$0xff] }
 0x512   : > { %12129 = vmatpush3.msra.mxu1 %v16655_v62  ;;  %12095 = vmatprep.subr.mxu0 %v18056_v36  ;;  %v8644_v62 = vld [vmem:[%s17776_s5 + $0xc8] sm:$0xff] }
 0x513   : > { %12130 = vmatprep.subr.mxu1 %v18056_v36  ;;  %12096 = vmatpush3.msra.mxu0 %v8647_v10  ;;  %v18082_v10 = vld [vmem:[#allocation26_spill] sm:$0xff] }
 0x514   : > { %12131 = vmatpush3.msra.mxu1 %v16664_v9  ;;  %12097 = vmatprep.subr.mxu0 %v18056_v36  ;;  %v8643_v9 = vld [vmem:[%s17776_s5 + $0xc0] sm:$0xff] }
 0x515   : > { %12132 = vmatprep.subr.mxu1 %v18056_v36  ;;  %12098 = vmatpush3.msra.mxu0 %v8646_v58  ;;  %v8658_v58 = vld [vmem:[%s17776_s5 + $0x138] sm:$0xff] }
 0x516   : > { %12133 = vmatpush3.msra.mxu1 %v16673_v23  ;;  %12099 = vmatprep.subr.mxu0 %v18056_v36  ;;  %v8642_v23 = vld [vmem:[%s17776_s5 + $0xb8] sm:$0xff] }
 0x517   : > { %12134 = vmatprep.subr.mxu1 %v18056_v36  ;;  %12100 = vmatpush3.msra.mxu0 %v8645_v63  ;;  %v18084_v63 = vld [vmem:[#allocation27_spill] sm:$0xff] }
 0x518   : > { %12135 = vmatpush3.msra.mxu1 %v16682_v29  ;;  %12101 = vmatprep.subr.mxu0 %v18056_v36  ;;  %v8641_v29 = vld [vmem:[%s17776_s5 + $0xb0] sm:$0xff] }
 0x519   : > { %12136 = vmatprep.subr.mxu1 %v18056_v36  ;;  %12102 = vmatpush3.msra.mxu0 %v8644_v62 }
 0x51a   : > { %12137 = vmatpush3.msra.mxu1 %v16693_v30  ;;  %12103 = vmatprep.subr.mxu0 %v18056_v36  ;;  %v8640_v30 = vld [vmem:[%s17776_s5 + $0xa8] sm:$0xff] }
 0x51b   : > { %12138 = vmatprep.subr.mxu1 %v18056_v36  ;;  %12104 = vmatpush3.msra.mxu0 %v8643_v9  ;;  %v18085_v9 = vld [vmem:[#allocation32_spill] sm:$0xff] }
 0x51c   : > { %12139 = vmatpush3.msra.mxu1 %v16702_v32  ;;  %12105 = vmatprep.subr.mxu0 %v18056_v36  ;;  %v8639_v32 = vld [vmem:[%s17776_s5 + $0xa0] sm:$0xff] }
 0x51d   : > { %12140 = vmatprep.subr.mxu1 %v18056_v36  ;;  %12106 = vmatpush3.msra.mxu0 %v8642_v23  ;;  %v8656_v23 = vld [vmem:[%s17776_s5 + $0x128] sm:$0xff] }
 0x51e   : > { %12141 = vmatpush3.msra.mxu1 %v16712_v46  ;;  %12107 = vmatprep.subr.mxu0 %v18056_v36 }
 0x51f   : > { %12142 = vmatprep.subr.mxu1 %v18056_v36  ;;  %12108 = vmatpush3.msra.mxu0 %v8641_v29  ;;  %v18086_v29 = vld [vmem:[#allocation59_spill] sm:$0xff] }
 0x520   : > { %12143 = vmatpush3.msra.mxu1 %v16722_v61  ;;  %12109 = vmatprep.subr.mxu0 %v18056_v36  ;;  %v8638_v61 = vld [vmem:[%s17776_s5 + $0x98] sm:$0xff] }
 0x521   : > { %12144 = vmatprep.subr.mxu1 %v18056_v36  ;;  %12110 = vmatpush3.msra.mxu0 %v8640_v30  ;;  %v17339_v46 = vpop.f32.mrf.mxu0 }
 0x522   : > { %12145 = vmatpush3.msra.mxu1 %v16731_v35  ;;  %v17341_v31 = vpop.f32.mrf.mxu1  ;;  %12111 = vmatprep.subr.mxu0 %v18056_v36  ;;  %v8637_v35 = vld [vmem:[%s17776_s5 + $0x90] sm:$0xff] }
 0x523   : > { %12146 = vmatprep.subr.mxu1 %v18056_v36  ;;  %12112 = vmatpush3.msra.mxu0 %v8639_v32  ;;  %v11703_v47 = vpop.f32.mrf.mxu0  ;;  %v8655_v32 = vld [vmem:[%s17776_s5 + $0x120] sm:$0xff] }
 0x524   : > { %12147 = vmatpush3.msra.mxu1 %v16741_v3  ;;  %v11738_v51 = vpop.f32.mrf.mxu1  ;;  %12113 = vmatprep.subr.mxu0 %v18056_v36  ;;  %v8636_v3 = vld [vmem:[%s17776_s5 + $0x88] sm:$0xff]  ;;  %v17451_v47 = vld [vmem:[%s17777_s6] ss:$0 sm:$0xff] }
 0x525   : > { %12148 = vmatprep.subr.mxu1 %v18056_v36  ;;  %12114 = vmatpush3.msra.mxu0 %v8638_v61 }
 0x526   : > { %12149 = vmatpush3.msra.mxu1 %v16750_v24  ;;  %12115 = vmatprep.subr.mxu0 %v18056_v36  ;;  %v7143_v24 = vld [vmem:[#allocation2 + $0x49] sm:$0xf] }
 0x527   : > { %12150 = vmatprep.subr.mxu1 %v18056_v36  ;;  %12116 = vmatpush3.msra.mxu0 %v8637_v35 }
 0x528   : > { %12151 = vmatpush3.msra.mxu1 %v16763_v34  ;;  %12117 = vmatprep.subr.mxu0 %v18056_v36  ;;  %v7126_v34 = vld [vmem:[#allocation2 + $0x48] sm:$0xf] }
 0x529   : > { %12152 = vmatprep.subr.mxu1 %v18056_v36  ;;  %12118 = vmatpush3.msra.mxu0 %v8636_v3 }
 0x52a   : > { %12153 = vmatpush3.msra.mxu1 %v16777_v50  ;;  %12119 = vmatprep.subr.mxu0 %v18056_v36  ;;  %v8665_v50 = vld [vmem:[%s17776_s5 + $0x170] sm:$0xff] }
 0x52b   : > { %12154 = vmatprep.subr.mxu1 %v18056_v36  ;;  %12120 = vmatpush3.msra.mxu0 %v8635_v43 }
 0x52c   : > { %12121 = vmatprep.mubr.msk.f32.mxu0 %vm12467_vm0, %v18056_v36  ;;  %12155 = vmatpush3.msra.mxu1 %v16786_v59  ;;  %v8664_v59 = vld [vmem:[%s17776_s5 + $0x168] sm:$0xff] }
 0x52d   : > { %12156 = vmatprep.mubr.msk.f32.mxu1 %vm12467_vm0, %v18056_v36  ;;  %12122 = vmatmul.mubr.f32.vlgmr.msra.gmra.mxu0 %v7143_v24  ;;  %v8653_v24 = vld [vmem:[%s17776_s5 + $0x110] sm:$0xff] }
 0x52e   : > { %12157 = vmatmul.mubr.f32.vlgmr.msra.gmra.mxu1 %v7126_v34  ;;  %12159 = vmatprep.subr.mxu0 %v18056_v36 }
 0x52f   : > { %12194 = vmatprep.subr.mxu1 %v18056_v36  ;;  %12160 = vmatpush3.msra.mxu0 %v8666_v52  ;;  %v7388_v52 = vld [vmem:[#allocation2 + $0x60] sm:$0xf] }
 0x530   : > { %12195 = vmatpush3.msra.mxu1 %v16802_v12  ;;  %12161 = vmatprep.subr.mxu0 %v18056_v36  ;;  %v8662_v12 = vld [vmem:[%s17776_s5 + $0x158] sm:$0xff] }
 0x531   : > { %12196 = vmatprep.subr.mxu1 %v18056_v36  ;;  %12162 = vmatpush3.msra.mxu0 %v8665_v50  ;;  %v8698_v50 = vld [vmem:[%s17776_s5 + $0x278] sm:$0xff] }
 0x532   : > { %12197 = vmatpush3.msra.mxu1 %v16809_v38  ;;  %12163 = vmatprep.subr.mxu0 %v18056_v36  ;;  %v8661_v38 = vld [vmem:[%s17776_s5 + $0x150] sm:$0xff] }
 0x533   : > { %12198 = vmatprep.subr.mxu1 %v18056_v36  ;;  %12164 = vmatpush3.msra.mxu0 %v8664_v59  ;;  %v8695_v59 = vld [vmem:[%s17776_s5 + $0x260] sm:$0xff] }
 0x534   : > { %12199 = vmatpush3.msra.mxu1 %v16818_v41  ;;  %12165 = vmatprep.subr.mxu0 %v18056_v36  ;;  %v5963_v41 = vadd.f32 %v17222_v13, %v17088_v48  ;;  %v18083_v48 = vld [vmem:[#allocation28_spill] sm:$0xff] }
 0x535   : > { %12200 = vmatprep.subr.mxu1 %v18056_v36  ;;  %12166 = vmatpush3.msra.mxu0 %v8663_v42  ;;  %v8690_v42 = vld [vmem:[%s17776_s5 + $0x238] sm:$0xff] }
 0x536   : > { %12201 = vmatpush3.msra.mxu1 %v16827_v11  ;;  %12167 = vmatprep.subr.mxu0 %v18056_v36  ;;  %v8660_v11 = vld [vmem:[%s17776_s5 + $0x148] sm:$0xff]  ;;  %v6051_v13 = vadd.f32 %v17224_v8, %v5963_v41  ;;  %v8657_v8 = vld [vmem:[%s17776_s5 + $0x130] sm:$0xff] }
 0x537   : > { %12202 = vmatprep.subr.mxu1 %v18056_v36  ;;  %12168 = vmatpush3.msra.mxu0 %v8662_v12  ;;  %v8689_v12 = vld [vmem:[%s17776_s5 + $0x230] sm:$0xff]  ;;  %v8688_v41 = vld [vmem:[%s17776_s5 + $0x228] sm:$0xff] }
 0x538   : > { %12203 = vmatpush3.msra.mxu1 %v16836_v33  ;;  %12169 = vmatprep.subr.mxu0 %v18056_v36  ;;  %v8659_v33 = vld [vmem:[%s17776_s5 + $0x140] sm:$0xff]  ;;  %v6140_v62 = vadd.f32 %v17339_v46, %v6051_v13 }
 0x539   : > { %12204 = vmatprep.subr.mxu1 %v18056_v36  ;;  %12170 = vmatpush3.msra.mxu0 %v8661_v38  ;;  %v18087_v46 = vld [vmem:[#allocation62_spill] sm:$0xff]  ;;  %v18090_v38 = vld [vmem:[#allocation16_spill] sm:$0xff] }
 0x53a   : > { %12205 = vmatpush3.msra.mxu1 %v18082_v10  ;;  %12171 = vmatprep.subr.mxu0 %v18056_v36  ;;  %v6228_v30 = vadd.f32 %v17341_v31, %v6140_v62  ;;  %v8654_v31 = vld [vmem:[%s17776_s5 + $0x118] sm:$0xff]  ;;  %v8687_v10 = vld [vmem:[%s17776_s5 + $0x220] sm:$0xff] }
 0x53b   : > { %12206 = vmatprep.subr.mxu1 %v18056_v36  ;;  %12172 = vmatpush3.msra.mxu0 %v8660_v11  ;;  %v18091_v11 = vld [vmem:[#allocation17_spill] sm:$0xff] }
 0x53c   : > { %12207 = vmatpush3.msra.mxu1 %v18083_v48  ;;  %12173 = vmatprep.subr.mxu0 %v18056_v36 }
 0x53d   : > { %12208 = vmatprep.subr.mxu1 %v18056_v36  ;;  %12174 = vmatpush3.msra.mxu0 %v8659_v33  ;;  %v18092_v33 = vld [vmem:[#allocation29_spill] sm:$0xff] }
 0x53e   : > { %12209 = vmatpush3.msra.mxu1 %v18084_v63  ;;  %12175 = vmatprep.subr.mxu0 %v18056_v36 }
 0x53f   : > { %12210 = vmatprep.subr.mxu1 %v18056_v36  ;;  %12176 = vmatpush3.msra.mxu0 %v8658_v58  ;;  %v8686_v58 = vld [vmem:[%s17776_s5 + $0x218] sm:$0xff] }
 0x540   : > { %12211 = vmatpush3.msra.mxu1 %v18085_v9  ;;  %12177 = vmatprep.subr.mxu0 %v18056_v36  ;;  %v8685_v9 = vld [vmem:[%s17776_s5 + $0x210] sm:$0xff] }
 0x541   : > { %12212 = vmatprep.subr.mxu1 %v18056_v36  ;;  %12178 = vmatpush3.msra.mxu0 %v8657_v8 }
 0x542   : > { %12213 = vmatpush3.msra.mxu1 %v18086_v29  ;;  %12179 = vmatprep.subr.mxu0 %v18056_v36  ;;  %v8683_v29 = vld [vmem:[%s17776_s5 + $0x200] sm:$0xff] }
 0x543   : > { %12214 = vmatprep.subr.mxu1 %v18056_v36  ;;  %12180 = vmatpush3.msra.mxu0 %v8656_v23  ;;  %v6312_v61 = vpop.f32.mrf.mxu0 }
 0x544   : > { %12215 = vmatpush3.msra.mxu1 %v18087_v46  ;;  %v17453_v51 = vpop.f32.mrf.mxu1  ;;  %12181 = vmatprep.subr.mxu0 %v18056_v36  ;;  %v6316_v35 = vadd.f32 %v6312_v61, %v6228_v30  ;;  %v8730_v30 = vld [vmem:[%s17776_s5 + $0x378] sm:$0xff] }
 0x545   : > { %12216 = vmatprep.subr.mxu1 %v18056_v36  ;;  %12182 = vmatpush3.msra.mxu0 %v8655_v32  ;;  %v11773_v3 = vpop.f32.mrf.mxu0  ;;  %v8727_v32 = vld [vmem:[%s17776_s5 + $0x360] sm:$0xff] }
 0x546   : > { %12217 = vmatpush3.msra.mxu1 %v16906_v14  ;;  %v11808_v43 = vpop.f32.mrf.mxu1  ;;  %12183 = vmatprep.subr.mxu0 %v18056_v36  ;;  %v6324_v34 = vadd.f32 %v17451_v47, %v6316_v35  ;;  %v8652_v14 = vld [vmem:[%s17776_s5 + $0x108] sm:$0xff]  ;;  %v7741_v35 = vld [vmem:[#allocation2 + $0x79] sm:$0xf] }
 0x547   : > { %12218 = vmatprep.subr.mxu1 %v18056_v36  ;;  %12184 = vmatpush3.msra.mxu0 %v8654_v31  ;;  %v8715_v31 = vld [vmem:[%s17776_s5 + $0x300] sm:$0xff]  ;;  %v8760_v3 = vld [vmem:[%s17776_s5 + $0x468] sm:$0xff]  ;;  %v8758_v43 = vld [vmem:[%s17776_s5 + $0x458] sm:$0xff] }
 0x548   : > { %12219 = vmatpush3.msra.mxu1 %v16917_v21  ;;  %12185 = vmatprep.subr.mxu0 %v18056_v36  ;;  %6325 = vst [vmem:[%s16770_s20 + $0x4] sm:$0xf] %v6324_v34  ;;  %v8651_v21 = vld [vmem:[%s17776_s5 + $0x100] sm:$0xff]  ;;  %v8756_v34 = vld [vmem:[%s17776_s5 + $0x448] sm:$0xff] }
 0x549   : > { %12220 = vmatprep.subr.mxu1 %v18056_v36  ;;  %12186 = vmatpush3.msra.mxu0 %v8653_v24  ;;  %v8757_v24 = vld [vmem:[%s17776_s5 + $0x450] sm:$0xff] }
 0x54a   : > { %12221 = vmatpush3.msra.mxu1 %v16930_v16  ;;  %12187 = vmatprep.subr.mxu0 %v18056_v36  ;;  %v7300_v16 = vld [vmem:[#allocation2 + $0x4a] sm:$0xf] }
 0x54b   : > { %12222 = vmatprep.subr.mxu1 %v18056_v36  ;;  %12188 = vmatpush3.msra.mxu0 %v8652_v14  ;;  %v8755_v14 = vld [vmem:[%s17776_s5 + $0x440] sm:$0xff] }
 0x54c   : > { %12223 = vmatpush3.msra.mxu1 %v16941_v19  ;;  %12189 = vmatprep.subr.mxu0 %v18056_v36  ;;  %v8697_v19 = vld [vmem:[%s17776_s5 + $0x270] sm:$0xff] }
 0x54d   : > { %12224 = vmatprep.subr.mxu1 %v18056_v36  ;;  %12190 = vmatpush3.msra.mxu0 %v8651_v21  ;;  %v8754_v21 = vld [vmem:[%s17776_s5 + $0x438] sm:$0xff] }
 0x54e   : > { %12191 = vmatprep.mubr.msk.f32.mxu0 %vm12467_vm0, %v18056_v36  ;;  %12225 = vmatpush3.msra.mxu1 %v16952_v27  ;;  %v8696_v27 = vld [vmem:[%s17776_s5 + $0x268] sm:$0xff] }
 0x54f   : > { %12226 = vmatprep.mubr.msk.f32.mxu1 %vm12467_vm0, %v18056_v36  ;;  %12192 = vmatmul.mubr.f32.vlgmr.msra.gmra.mxu0 %v7300_v16  ;;  %v8753_v16 = vld [vmem:[%s17776_s5 + $0x430] sm:$0xff] }
 0x550   : > { %12227 = vmatmul.mubr.f32.vlgmr.msra.gmra.mxu1 %v7388_v52  ;;  %12229 = vmatprep.subr.mxu0 %v18056_v36  ;;  %v8752_v52 = vld [vmem:[%s17776_s5 + $0x428] sm:$0xff] }
 0x551   : > { %12264 = vmatprep.subr.mxu1 %v18056_v36  ;;  %12230 = vmatpush3.msra.mxu0 %v8698_v50  ;;  %v8751_v50 = vld [vmem:[%s17776_s5 + $0x420] sm:$0xff] }
 0x552   : > { %12265 = vmatpush3.msra.mxu1 %v16968_v49  ;;  %12231 = vmatprep.subr.mxu0 %v18056_v36  ;;  %v8694_v49 = vld [vmem:[%s17776_s5 + $0x258] sm:$0xff] }
 0x553   : > { %12266 = vmatprep.subr.mxu1 %v18056_v36  ;;  %12232 = vmatpush3.msra.mxu0 %v8697_v19  ;;  %v8750_v19 = vld [vmem:[%s17776_s5 + $0x418] sm:$0xff] }
 0x554   : > { %12267 = vmatpush3.msra.mxu1 %v16978_v55  ;;  %12233 = vmatprep.subr.mxu0 %v18056_v36  ;;  %v8693_v55 = vld [vmem:[%s17776_s5 + $0x250] sm:$0xff] }
 0x555   : > { %12268 = vmatprep.subr.mxu1 %v18056_v36  ;;  %12234 = vmatpush3.msra.mxu0 %v8696_v27 }
 0x556   : > { %12269 = vmatpush3.msra.mxu1 %v16986_v54  ;;  %12235 = vmatprep.subr.mxu0 %v18056_v36  ;;  %v8692_v54 = vld [vmem:[%s17776_s5 + $0x248] sm:$0xff] }
 0x557   : > { %12270 = vmatprep.subr.mxu1 %v18056_v36  ;;  %12236 = vmatpush3.msra.mxu0 %v8695_v59 }
 0x558   : > { %12271 = vmatpush3.msra.mxu1 %v16995_v26  ;;  %12237 = vmatprep.subr.mxu0 %v18056_v36  ;;  %v8691_v26 = vld [vmem:[%s17776_s5 + $0x240] sm:$0xff] }
 0x559   : > { %12272 = vmatprep.subr.mxu1 %v18056_v36  ;;  %12238 = vmatpush3.msra.mxu0 %v8694_v49  ;;  %v8749_v49 = vld [vmem:[%s17776_s5 + $0x410] sm:$0xff] }
 0x55a   : > { %12273 = vmatpush3.msra.mxu1 %v17004_v7  ;;  %12239 = vmatprep.subr.mxu0 %v18056_v36  ;;  %v18088_v7 = vld [vmem:[#allocation61_spill] sm:$0xff] }
 0x55b   : > { %12274 = vmatprep.subr.mxu1 %v18056_v36  ;;  %12240 = vmatpush3.msra.mxu0 %v8693_v55 }
 0x55c   : > { %12275 = vmatpush3.msra.mxu1 %v17013_v15  ;;  %12241 = vmatprep.subr.mxu0 %v18056_v36  ;;  %v18089_v15 = vld [vmem:[#allocation63_spill] sm:$0xff] }
 0x55d   : > { %12276 = vmatprep.subr.mxu1 %v18056_v36  ;;  %12242 = vmatpush3.msra.mxu0 %v8692_v54 }
 0x55e   : > { %12277 = vmatpush3.msra.mxu1 %v18088_v7  ;;  %12243 = vmatprep.subr.mxu0 %v18056_v36  ;;  %v8747_v7 = vld [vmem:[%s17776_s5 + $0x400] sm:$0xff] }
 0x55f   : > { %12278 = vmatprep.subr.mxu1 %v18056_v36  ;;  %12244 = vmatpush3.msra.mxu0 %v8691_v26  ;;  %v8748_v26 = vld [vmem:[%s17776_s5 + $0x408] sm:$0xff] }
 0x560   : > { %12279 = vmatpush3.msra.mxu1 %v18089_v15  ;;  %12245 = vmatprep.subr.mxu0 %v18056_v36 }
 0x561   : > { %12280 = vmatprep.subr.mxu1 %v18056_v36  ;;  %12246 = vmatpush3.msra.mxu0 %v8690_v42  ;;  %v7829_v42 = vld [vmem:[#allocation2 + $0x7a] sm:$0xf] }
 0x562   : > { %12281 = vmatpush3.msra.mxu1 %v18090_v38  ;;  %12247 = vmatprep.subr.mxu0 %v18056_v36 }
 0x563   : > { %12282 = vmatprep.subr.mxu1 %v18056_v36  ;;  %12248 = vmatpush3.msra.mxu0 %v8689_v12 }
 0x564   : > { %12283 = vmatpush3.msra.mxu1 %v18091_v11  ;;  %12249 = vmatprep.subr.mxu0 %v18056_v36 }
 0x565   : > { %12284 = vmatprep.subr.mxu1 %v18056_v36  ;;  %12250 = vmatpush3.msra.mxu0 %v8688_v41  ;;  %v6496_v48 = vpop.f32.mrf.mxu0 }
 0x566   : > { %12285 = vmatpush3.msra.mxu1 %v18092_v33  ;;  %v6583_v13 = vpop.f32.mrf.mxu1  ;;  %12251 = vmatprep.subr.mxu0 %v18056_v36  ;;  %v6497_v63 = vadd.f32 %v6496_v48, %v17453_v51 }
 0x567   : > { %12286 = vmatprep.subr.mxu1 %v18056_v36  ;;  %12252 = vmatpush3.msra.mxu0 %v8687_v10  ;;  %v11843_v62 = vpop.f32.mrf.mxu0 }
 0x568   : > { %12287 = vmatpush3.msra.mxu1 %v17067_v56  ;;  %v11878_v8 = vpop.f32.mrf.mxu1  ;;  %12253 = vmatprep.subr.mxu0 %v18056_v36  ;;  %v17569_v23 = vadd.f32 %v6583_v13, %v6497_v63  ;;  %v8684_v56 = vld [vmem:[%s17776_s5 + $0x208] sm:$0xff] }
 0x569   : > { %12288 = vmatprep.subr.mxu1 %v18056_v36  ;;  %12254 = vmatpush3.msra.mxu0 %v8686_v58 }
 0x56a   : > { %12289 = vmatpush3.msra.mxu1 %v17076_v17  ;;  %12255 = vmatprep.subr.mxu0 %v18056_v36  ;;  %v7476_v17 = vld [vmem:[#allocation2 + $0x61] sm:$0xf] }
 0x56b   : > { %12290 = vmatprep.subr.mxu1 %v18056_v36  ;;  %12256 = vmatpush3.msra.mxu0 %v8685_v9 }
 0x56c   : > { %12291 = vmatpush3.msra.mxu1 %v17086_v25  ;;  %12257 = vmatprep.subr.mxu0 %v18056_v36  ;;  %v7564_v25 = vld [vmem:[#allocation2 + $0x62] sm:$0xf] }
 0x56d   : > { %12292 = vmatprep.subr.mxu1 %v18056_v36  ;;  %12258 = vmatpush3.msra.mxu0 %v8684_v56 }
 0x56e   : > { %12293 = vmatpush3.msra.mxu1 %v17097_v1  ;;  %12259 = vmatprep.subr.mxu0 %v18056_v36  ;;  %v8729_v1 = vld [vmem:[%s17776_s5 + $0x370] sm:$0xff] }
 0x56f   : > { %12294 = vmatprep.subr.mxu1 %v18056_v36  ;;  %12260 = vmatpush3.msra.mxu0 %v8683_v29 }
 0x570   : > { %12261 = vmatprep.mubr.msk.f32.mxu0 %vm12467_vm0, %v18056_v36  ;;  %12295 = vmatpush3.msra.mxu1 %v17106_v40  ;;  %v8728_v40 = vld [vmem:[%s17776_s5 + $0x368] sm:$0xff] }
 0x571   : > { %12296 = vmatprep.mubr.msk.f32.mxu1 %vm12467_vm0, %v18056_v36  ;;  %12262 = vmatmul.mubr.f32.vlgmr.msra.gmra.mxu0 %v7476_v17 }
 0x572   : > { %12297 = vmatmul.mubr.f32.vlgmr.msra.gmra.mxu1 %v7564_v25  ;;  %12299 = vmatprep.subr.mxu0 %v18056_v36 }
 0x573   : > { %12334 = vmatprep.subr.mxu1 %v18056_v36  ;;  %12300 = vmatpush3.msra.mxu0 %v8730_v30 }
 0x574   : > { %12335 = vmatpush3.msra.mxu1 %v17121_v22  ;;  %12301 = vmatprep.subr.mxu0 %v18056_v36  ;;  %v8726_v22 = vld [vmem:[%s17776_s5 + $0x358] sm:$0xff] }
 0x575   : > { %12336 = vmatprep.subr.mxu1 %v18056_v36  ;;  %12302 = vmatpush3.msra.mxu0 %v8729_v1 }
 0x576   : > { %12337 = vmatpush3.msra.mxu1 %v17128_v37  ;;  %12303 = vmatprep.subr.mxu0 %v18056_v36  ;;  %v8725_v37 = vld [vmem:[%s17776_s5 + $0x350] sm:$0xff] }
 0x577   : > { %12338 = vmatprep.subr.mxu1 %v18056_v36  ;;  %12304 = vmatpush3.msra.mxu0 %v8728_v40 }
 0x578   : > { %12339 = vmatpush3.msra.mxu1 %v17137_v0  ;;  %12305 = vmatprep.subr.mxu0 %v18056_v36  ;;  %v8724_v0 = vld [vmem:[%s17776_s5 + $0x348] sm:$0xff] }
 0x579   : > { %12340 = vmatprep.subr.mxu1 %v18056_v36  ;;  %12306 = vmatpush3.msra.mxu0 %v8727_v32 }
 0x57a   : > { %12341 = vmatpush3.msra.mxu1 %v17146_v28  ;;  %12307 = vmatprep.subr.mxu0 %v18056_v36  ;;  %v8723_v28 = vld [vmem:[%s17776_s5 + $0x340] sm:$0xff] }
 0x57b   : > { %12342 = vmatprep.subr.mxu1 %v18056_v36  ;;  %12308 = vmatpush3.msra.mxu0 %v8726_v22 }
 0x57c   : > { %12343 = vmatpush3.msra.mxu1 %v17155_v57  ;;  %12309 = vmatprep.subr.mxu0 %v18056_v36  ;;  %v8722_v57 = vld [vmem:[%s17776_s5 + $0x338] sm:$0xff] }
 0x57d   : > { %12344 = vmatprep.subr.mxu1 %v18056_v36  ;;  %12310 = vmatpush3.msra.mxu0 %v8725_v37 }
 0x57e   : > { %12345 = vmatpush3.msra.mxu1 %v17164_v4  ;;  %12311 = vmatprep.subr.mxu0 %v18056_v36  ;;  %v8721_v4 = vld [vmem:[%s17776_s5 + $0x330] sm:$0xff] }
 0x57f   : > { %12346 = vmatprep.subr.mxu1 %v18056_v36  ;;  %12312 = vmatpush3.msra.mxu0 %v8724_v0 }
 0x580   : > { %12347 = vmatpush3.msra.mxu1 %v17173_v2  ;;  %12313 = vmatprep.subr.mxu0 %v18056_v36  ;;  %v8720_v2 = vld [vmem:[%s17776_s5 + $0x328] sm:$0xff] }
 0x581   : > { %12348 = vmatprep.subr.mxu1 %v18056_v36  ;;  %12314 = vmatpush3.msra.mxu0 %v8723_v28 }
 0x582   : > { %12349 = vmatpush3.msra.mxu1 %v17182_v60  ;;  %12315 = vmatprep.subr.mxu0 %v18056_v36  ;;  %v8719_v60 = vld [vmem:[%s17776_s5 + $0x320] sm:$0xff] }
 0x583   : > { %12350 = vmatprep.subr.mxu1 %v18056_v36  ;;  %12316 = vmatpush3.msra.mxu0 %v8722_v57 }
 0x584   : > { %12351 = vmatpush3.msra.mxu1 %v17191_v53  ;;  %12317 = vmatprep.subr.mxu0 %v18056_v36 }
 0x585   : > { %12352 = vmatprep.subr.mxu1 %v18056_v36  ;;  %12318 = vmatpush3.msra.mxu0 %v8721_v4 }
 0x586   : > { %12353 = vmatpush3.msra.mxu1 %v17200_v20  ;;  %12319 = vmatprep.subr.mxu0 %v18056_v36  ;;  %v8718_v20 = vld [vmem:[%s17776_s5 + $0x318] sm:$0xff] }
 0x587   : > { %12354 = vmatprep.subr.mxu1 %v18056_v36  ;;  %12320 = vmatpush3.msra.mxu0 %v8720_v2  ;;  %v17660_v53 = vpop.f32.mrf.mxu0 }
 0x588   : > { %12355 = vmatpush3.msra.mxu1 %v17209_v18  ;;  %v17662_v46 = vpop.f32.mrf.mxu1  ;;  %12321 = vmatprep.subr.mxu0 %v18056_v36  ;;  %v8717_v18 = vld [vmem:[%s17776_s5 + $0x310] sm:$0xff]  ;;  %v6675_v15 = vadd.f32 %v17660_v53, %v17569_v23 }
 0x589   : > { %12356 = vmatprep.subr.mxu1 %v18056_v36  ;;  %12322 = vmatpush3.msra.mxu0 %v8719_v60  ;;  %v11913_v61 = vpop.f32.mrf.mxu0 }
 0x58a   : > { %12357 = vmatpush3.msra.mxu1 %v17218_v5  ;;  %v11948_v51 = vpop.f32.mrf.mxu1  ;;  %12323 = vmatprep.subr.mxu0 %v18056_v36  ;;  %v8716_v5 = vld [vmem:[%s17776_s5 + $0x308] sm:$0xff]  ;;  %v6763_v12 = vadd.f32 %v17662_v46, %v6675_v15 }
 0x58b   : > { %12358 = vmatprep.subr.mxu1 %v18056_v36  ;;  %12324 = vmatpush3.msra.mxu0 %v8718_v20 }
 0x58c   : > { %12359 = vmatpush3.msra.mxu1 %v17231_v44  ;;  %12325 = vmatprep.subr.mxu0 %v18056_v36  ;;  %v7653_v44 = vld [vmem:[#allocation2 + $0x78] sm:$0xf] }
 0x58d   : > { %12360 = vmatprep.subr.mxu1 %v18056_v36  ;;  %12326 = vmatpush3.msra.mxu0 %v8717_v18 }
 0x58e   : > { %12361 = vmatpush3.msra.mxu1 %v17240_v39  ;;  %12327 = vmatprep.subr.mxu0 %v18056_v36  ;;  %v8762_v39 = vld [vmem:[%s17776_s5 + $0x478] sm:$0xff] }
 0x58f   : > { %12362 = vmatprep.subr.mxu1 %v18056_v36  ;;  %12328 = vmatpush3.msra.mxu0 %v8716_v5 }
 0x590   : > { %12331 = vmatprep.mubr.msk.f32.mxu0 %vm12467_vm0, %v18056_v36  ;;  %12329 = vmatprep.subr.mxu0 %v18056_v36 }
 0x591   : > { %12363 = vmatpush3.msra.mxu1 %v17249_v6  ;;  %12330 = vmatpush3.msra.mxu0 %v8715_v31  ;;  %v8761_v6 = vld [vmem:[%s17776_s5 + $0x470] sm:$0xff] }
 0x592   : > { %12364 = vmatprep.subr.mxu1 %v18056_v36  ;;  %12332 = vmatmul.mubr.f32.vlgmr.msra.gmra.mxu0 %v7653_v44 }
 0x593   : > { %12369 = vmatprep.subr.mxu0 %v18056_v36  ;;  %12365 = vmatpush3.msra.mxu1 %v17258_v45  ;;  %v8759_v45 = vld [vmem:[%s17776_s5 + $0x460] sm:$0xff] }
 0x594   : > { %12366 = vmatprep.mubr.msk.f32.mxu1 %vm12467_vm0, %v18056_v36  ;;  %12370 = vmatpush3.msra.mxu0 %v8762_v39 }
 0x595   : > { %12367 = vmatmul.mubr.f32.vlgmr.msra.gmra.mxu1 %v7741_v35  ;;  %12371 = vmatprep.subr.mxu0 %v18056_v36 }
 0x596   : > { %12401 = vmatprep.mubr.msk.f32.mxu0 %vm12467_vm0, %v18056_v36  ;;  %12372 = vmatpush3.msra.mxu0 %v8761_v6 }
 0x597   : > { %12373 = vmatprep.subr.mxu0 %v18056_v36 }
 0x598   : > { %12374 = vmatpush3.msra.mxu0 %v8760_v3 }
 0x599   : > { %12375 = vmatprep.subr.mxu0 %v18056_v36 }
 0x59a   : > { %12376 = vmatpush3.msra.mxu0 %v8759_v45 }
 0x59b   : > { %12377 = vmatprep.subr.mxu0 %v18056_v36 }
 0x59c   : > { %12378 = vmatpush3.msra.mxu0 %v8758_v43 }
 0x59d   : > { %12379 = vmatprep.subr.mxu0 %v18056_v36 }
 0x59e   : > { %12380 = vmatpush3.msra.mxu0 %v8757_v24 }
 0x59f   : > { %12381 = vmatprep.subr.mxu0 %v18056_v36 }
 0x5a0   : > { %12382 = vmatpush3.msra.mxu0 %v8756_v34 }
 0x5a1   : > { %12383 = vmatprep.subr.mxu0 %v18056_v36 }
 0x5a2   : > { %12384 = vmatpush3.msra.mxu0 %v8755_v14 }
 0x5a3   : > { %12385 = vmatprep.subr.mxu0 %v18056_v36 }
 0x5a4   : > { %12386 = vmatpush3.msra.mxu0 %v8754_v21 }
 0x5a5   : > { %12387 = vmatprep.subr.mxu0 %v18056_v36 }
 0x5a6   : > { %12388 = vmatpush3.msra.mxu0 %v8753_v16 }
 0x5a7   : > { %12389 = vmatprep.subr.mxu0 %v18056_v36 }
 0x5a8   : > { %12390 = vmatpush3.msra.mxu0 %v8752_v52 }
 0x5a9   : > { %12391 = vmatprep.subr.mxu0 %v18056_v36  ;;  %v6847_v27 = vpop.f32.mrf.mxu0 }
 0x5aa   : > { %v6936_v59 = vpop.f32.mrf.mxu1  ;;  %12392 = vmatpush3.msra.mxu0 %v8751_v50  ;;  %v6851_v38 = vadd.f32 %v6847_v27, %v6763_v12 }
 0x5ab   : > { %12393 = vmatprep.subr.mxu0 %v18056_v36  ;;  %v11983_v55 = vpop.f32.mrf.mxu0 }
 0x5ac   : > { %v12018_v54 = vpop.f32.mrf.mxu1  ;;  %12394 = vmatpush3.msra.mxu0 %v8750_v19  ;;  %v6940_v41 = vadd.f32 %v6936_v59, %v6851_v38 }
 0x5ad   : > { %12395 = vmatprep.subr.mxu0 %v18056_v36 }
 0x5ae   : > { %12396 = vmatpush3.msra.mxu0 %v8749_v49 }
 0x5af   : > { %12397 = vmatprep.subr.mxu0 %v18056_v36 }
 0x5b0   : > { %12398 = vmatpush3.msra.mxu0 %v8748_v26 }
 0x5b1   : > { %12399 = vmatprep.subr.mxu0 %v18056_v36 }
 0x5b2   : > { %12400 = vmatpush3.msra.mxu0 %v8747_v7 }
 0x5b3   : > { %12402 = vmatmul.mubr.f32.vlgmr.msra.gmra.mxu0 %v7829_v42 }
 0x5cb   : > { %v7024_v11 = vpop.f32.mrf.mxu0 }
 0x5cc   : > { %v7112_v10 = vpop.f32.mrf.mxu1  ;;  %v7028_v33 = vadd.f32 %v7024_v11, %v6940_v41 }
 0x5cd   : > { %v12053_v48 = vpop.f32.mrf.mxu0 }
 0x5ce   : > { %v12088_v13 = vpop.f32.mrf.mxu1  ;;  %v7116_v58 = vadd.f32 %v7112_v10, %v7028_v33 }
 0x5d0   : > { %v7124_v63 = vadd.f32 %v17451_v47, %v7116_v58 }
 0x5d2   : > { %7125 = vst [vmem:[%s16770_s20 + $0x8] sm:$0xf] %v7124_v63 }
 0x5ed   : > { %v7226_v62 = vpop.f32.mrf.mxu0 }
 0x5ee   : > { %v7296_v36 = vpop.f32.mrf.mxu1 }
 0x5ef   : > { %v7297_v8 = vadd.f32 %v7296_v36, %v7226_v62  ;;  %v12123_v9 = vpop.f32.mrf.mxu0 }
 0x5f0   : > { %v12158_v56 = vpop.f32.mrf.mxu1 }
 0x60f   : > { %v7383_v29 = vpop.f32.mrf.mxu0 }
 0x610   : > { %v7471_v23 = vpop.f32.mrf.mxu1  ;;  %v7387_v17 = vadd.f32 %v7383_v29, %v7297_v8 }
 0x611   : > { %v12193_v25 = vpop.f32.mrf.mxu0 }
 0x612   : > { %v12228_v30 = vpop.f32.mrf.mxu1  ;;  %v7475_v1 = vadd.f32 %v7471_v23, %v7387_v17 }
 0x631   : > { %v7559_v40 = vpop.f32.mrf.mxu0 }
 0x632   : > { %v7647_v32 = vpop.f32.mrf.mxu1  ;;  %v7563_v2 = vadd.f32 %v7559_v40, %v7475_v1 }
 0x633   : > { %v12263_v22 = vpop.f32.mrf.mxu0 }
 0x634   : > { %v12298_v37 = vpop.f32.mrf.mxu1  ;;  %v7651_v60 = vadd.f32 %v7647_v32, %v7563_v2 }
 0x652   : > { %v7736_v0 = vpop.f32.mrf.mxu0 }
 0x653   : > { %v7740_v53 = vadd.f32 %v7736_v0, %v7651_v60 }
 0x654   : > { %v12333_v28 = vpop.f32.mrf.mxu0 }
 0x655   : > { %v7824_v57 = vpop.f32.mrf.mxu1 }
 0x656   : > { %v7828_v46 = vadd.f32 %v7824_v57, %v7740_v53 }
 0x657   : > { %v12368_v4 = vpop.f32.mrf.mxu1 }
 0x673   : > { %v7912_v20 = vpop.f32.mrf.mxu0 }
 0x674   : > { %v7916_v61 = vadd.f32 %v7912_v20, %v7828_v46 }
 0x675   : > { %v12403_v51 = vpop.f32.mrf.mxu0 }
 0x676   : > { %v7924_v18 = vadd.f32 %v17451_v47, %v7916_v61 }
 0x678   : > { %7925 = vst [vmem:[%s16770_s20 + $0xc] sm:$0xf] %v7924_v18 }
 0x679 PF: > { %s17_s24 = sadd.s32 1, %s12464_s24  }
 0x67a   : > { %p14_p4 = scmp.ge.s32.totalorder %s17_s24, 4  }
 0x67c   :  { %16 = sbr.rel (!%p14_p4) target bundleno = 1 (0x1), region = 107 }

</bundles_post_ra>
